<compile_context>
chip_gen: v5e
topology: v5e:2x2
jax: 0.10.0
libtpu: 0.0.40
codegen_flags: <defaults>
</compile_context>

<pallas_src>
import functools
import math

import jax
import jax.numpy as jnp
from jax.experimental import pallas as pl
from jax.experimental.pallas import tpu as pltpu

NEG_INF = -1e30


def _layer_norm(h, g, b, eps=1e-6):
    # matches torch.nn.LayerNorm(model_dim, eps=1e-06)
    mu = jnp.mean(h, axis=-1, keepdims=True)
    d = h - mu
    var = jnp.mean(d * d, axis=-1, keepdims=True)
    return d * jax.lax.rsqrt(var + eps) * g + b


def _encoder_kernel(
    # resident (per batch-shard) inputs
    x0_ref, keep_ref, bias_ref,
    # per-layer (streamed, mostly bf16) weights
    wqkv_ref, bqkv_ref, wo_ref, bo_ref, wkr_blk_ref, wvr_blk_ref,
    ln1g_ref, ln1b_ref, w1_ref, b1_ref, w2_ref, b2_ref,
    ln2g_ref, ln2b_ref,
    # output: doubles as the VMEM-resident running activation buffer
    out_ref,
    *, num_head, k_rel):
    layer = pl.program_id(1)
    B, S, D = out_ref.shape              # B here = per-shard batch
    H = num_head
    d = D // H
    C = 2 * k_rel + 1
    BS = B * S
    inv_sqrt_d = 1.0 / math.sqrt(d)

    @pl.when(layer == 0)
    def _():
        out_ref[...] = x0_ref[...]       # initialize the resident activations

    x = out_ref[...]                     # (B, S, D) f32 running activations
    keep = keep_ref[...]                 # (B, S, 1): 1.0 at real tokens
    # additive -1e30 pad bias, broadcast hoisted out of the head loop
    bias_b = jnp.broadcast_to(bias_ref[...], (B, S, S))

    # Toeplitz relative-position one-hot, generated in-kernel (bf16, no resident input):
    #   e_ohT[q, c, k] = 1  iff  clip(k - q, -k_rel, k_rel) + k_rel == c
    qi = jax.lax.broadcasted_iota(jnp.int32, (S, C, S), 0)
    ci = jax.lax.broadcasted_iota(jnp.int32, (S, C, S), 1)
    ki = jax.lax.broadcasted_iota(jnp.int32, (S, C, S), 2)
    pos = jnp.clip(ki - qi, -k_rel, k_rel) + k_rel
    e_ohT = (pos == ci).astype(jnp.bfloat16)                       # (S, C, S)

    x16 = x.reshape(BS, D).astype(jnp.bfloat16)

    # ---- fused QKV projection: one (BS,D)@(D,3D) MXU matmul ----
    qkv2 = jnp.dot(x16, wqkv_ref[...],
                   preferred_element_type=jnp.float32) + bqkv_ref[...]   # (BS, 3D)
    q16_2d = qkv2[:, :D].astype(jnp.bfloat16)                            # (BS, D)
    k16 = qkv2[:, D:2 * D].astype(jnp.bfloat16).reshape(B, S, D)
    v16 = qkv2[:, 2 * D:].astype(jnp.bfloat16).reshape(B, S, D)
    q16 = q16_2d.reshape(B, S, D)

    # ---- fused block-diagonal relative-key projection: (BS,D)@(D,H*C), K = D ----
    r_all = jnp.dot(q16_2d, wkr_blk_ref[...],
                    preferred_element_type=jnp.float32).reshape(B, S, H * C)

    ctx_heads = []
    bucket_heads = []
    for h in range(H):
        sl = slice(h * d, (h + 1) * d)
        qh = q16[:, :, sl]
        kh = k16[:, :, sl]
        vh = v16[:, :, sl]

        # content scores (MXU, batched over B)
        s_qk = jnp.einsum('bqd,bkd->bqk', qh, kh,
                          preferred_element_type=jnp.float32)
        # relative-key scores: bucket values expanded to kv on the MXU
        r_h = r_all[:, :, h * C:(h + 1) * C].astype(jnp.bfloat16)
        s_rel = jnp.einsum('bqc,qck->bqk', r_h, e_ohT,
                           preferred_element_type=jnp.float32)

        scores = (s_qk + s_rel) * inv_sqrt_d + bias_b

        # softmax in f32; EUP reciprocal for the denominator
        m = jnp.max(scores, axis=-1, keepdims=True)
        ex = jnp.exp(scores - m)
        attn = ex * pl.reciprocal(jnp.sum(ex, axis=-1, keepdims=True), approx=True)
        attn16 = attn.astype(jnp.bfloat16)

        # content context (MXU) + attention-weight bucketing (MXU)
        ctx_heads.append(jnp.einsum('bqk,bkd->bqd', attn16, vh,
                                    preferred_element_type=jnp.float32))
        bucket_heads.append(jnp.einsum('bqk,qck->bqc', attn16, e_ohT,
                                       preferred_element_type=jnp.float32))

    # lane-concat once (no masked partial stores into a scratch slab)
    ctx_cat = jnp.concatenate(ctx_heads, axis=-1).reshape(BS, D)
    bkt_cat = jnp.concatenate(bucket_heads, axis=-1).reshape(BS, H * C)
    # fused block-diagonal value-side relative contribution: (BS,H*C)@(H*C,D)
    ctx_all = ctx_cat + jnp.dot(bkt_cat.astype(jnp.bfloat16), wvr_blk_ref[...],
                                preferred_element_type=jnp.float32)

    # ---- output projection: (BS,D)@(D,D) ----
    attn_out = jnp.dot(ctx_all.astype(jnp.bfloat16), wo_ref[...],
                       preferred_element_type=jnp.float32) + bo_ref[...]
    attn_out = attn_out.reshape(B, S, D) * keep             # masked_fill(pad, 0)

    # residual + LayerNorm 1 (dropout = identity in eval mode)
    h1 = _layer_norm(attn_out + x, ln1g_ref[...], ln1b_ref[...])

    # TODO(synk): transformer.PositionwiseFeedForward source not provided; the
    # standard Linear -> ReLU -> (dropout) -> Linear form is assumed here.
    ff = jnp.maximum(
        jnp.dot(h1.reshape(BS, D).astype(jnp.bfloat16), w1_ref[...],
                preferred_element_type=jnp.float32) + b1_ref[...], 0.0)
    ff = jnp.dot(ff.astype(jnp.bfloat16), w2_ref[...],
                 preferred_element_type=jnp.float32) + b2_ref[...]
    ff = ff.reshape(B, S, D) * keep                          # masked_fill(pad, 0)

    # residual + LayerNorm 2 -> back into the resident activation buffer
    out_ref[...] = _layer_norm(ff + h1, ln2g_ref[...], ln2b_ref[...])


def _encoder_stack_call(x0, keep, bias, stacks, num_head, k_rel,
                        num_layers, num_batch_shards):
    B, S, D = x0.shape
    Bs = B // num_batch_shards

    def resident_batched(arr):
        return pl.BlockSpec((Bs,) + arr.shape[1:], lambda b, l: (b, 0, 0))

    def per_layer(arr):
        tail = arr.shape[1:]
        nd = len(tail)
        return pl.BlockSpec((None,) + tail, lambda b, l, nd=nd: (l,) + (0,) * nd)

    kernel = functools.partial(_encoder_kernel, num_head=num_head, k_rel=k_rel)
    grid_spec = pltpu.PrefetchScalarGridSpec(
        num_scalar_prefetch=0,
        grid=(num_batch_shards, num_layers),
        in_specs=[
            resident_batched(x0), resident_batched(keep), resident_batched(bias),
            per_layer(stacks['wqkv']), per_layer(stacks['bqkv']),
            per_layer(stacks['wo']), per_layer(stacks['bo']),
            per_layer(stacks['wkr_blk']), per_layer(stacks['wvr_blk']),
            per_layer(stacks['ln1_g']), per_layer(stacks['ln1_b']),
            per_layer(stacks['w1']), per_layer(stacks['b1']),
            per_layer(stacks['w2']), per_layer(stacks['b2']),
            per_layer(stacks['ln2_g']), per_layer(stacks['ln2_b']),
        ],
        out_specs=pl.BlockSpec((Bs, S, D), lambda b, l: (b, 0, 0)),
    )
    return pl.pallas_call(
        kernel,
        out_shape=jax.ShapeDtypeStruct((B, S, D), jnp.float32),
        grid_spec=grid_spec,
        compiler_params=pltpu.CompilerParams(
            dimension_semantics=("parallel", "arbitrary"),   # shards ||, layers seq
            vmem_limit_bytes=64 * 1024 * 1024),
    )(x0, keep, bias,
      stacks['wqkv'], stacks['bqkv'], stacks['wo'], stacks['bo'],
      stacks['wkr_blk'], stacks['wvr_blk'],
      stacks['ln1_g'], stacks['ln1_b'],
      stacks['w1'], stacks['b1'], stacks['w2'], stacks['b2'],
      stacks['ln2_g'], stacks['ln2_b'])


def rel_transformer_encoder_forward(tokens, params):
    """tokens: (B, S) int32.  Returns (B, S, model_dim) float32."""
    num_head = params['num_head']
    k_rel = params['k']
    emb = params['embedding']                        # (V, D), row 0 == padding == 0
    x = jnp.take(emb, tokens, axis=0).astype(jnp.float32)   # (B,S,D); dropout = id
    B, S = tokens.shape

    pad = (tokens == 0)
    keep = (~pad).astype(jnp.float32)[:, :, None]                        # (B, S, 1)
    bias = jnp.where(pad, NEG_INF, 0.0).astype(jnp.float32)[:, None, :]  # (B, 1, S)

    layers = params['layers']
    H = num_head
    eye = jnp.eye(H, dtype=jnp.float32)

    def stack(fn):
        return jnp.stack([fn(lp) for lp in layers], axis=0)

    stacks = dict(
        # fused QKV weights / biases, bf16 weight streaming
        wqkv=stack(lambda lp: jnp.concatenate(
            [lp['wq'], lp['wk'], lp['wv']], axis=1)).astype(jnp.bfloat16),
        bqkv=stack(lambda lp: jnp.concatenate(
            [lp['bq'], lp['bk'], lp['bv']], axis=1)),
        wo=stack(lambda lp: lp['wo']).astype(jnp.bfloat16),
        bo=stack(lambda lp: lp['bo']),
        # block-diagonal (shared across heads) relative-position projections:
        #   wkr_blk: (D, H*C) so r_all = q @ wkr_blk has K = D = model_dim
        #   wvr_blk: (H*C, D) so ctx_rel = buckets @ wvr_blk lands head-major in D
        wkr_blk=stack(lambda lp: jnp.kron(eye, lp['wk_rel'].T)).astype(jnp.bfloat16),
        wvr_blk=stack(lambda lp: jnp.kron(eye, lp['wv_rel'])).astype(jnp.bfloat16),
        ln1_g=stack(lambda lp: lp['ln1_g']), ln1_b=stack(lambda lp: lp['ln1_b']),
        w1=stack(lambda lp: lp['w1']).astype(jnp.bfloat16),
        b1=stack(lambda lp: lp['b1']),
        w2=stack(lambda lp: lp['w2']).astype(jnp.bfloat16),
        b2=stack(lambda lp: lp['b2']),
        ln2_g=stack(lambda lp: lp['ln2_g']), ln2_b=stack(lambda lp: lp['ln2_b']),
    )

    # split the batch across a "parallel" grid axis (2 TensorCores on v7x)
    num_batch_shards = 2 if (B >= 2 and B % 2 == 0) else 1
    return _encoder_stack_call(x, keep, bias, stacks, num_head, k_rel,
                               len(layers), num_batch_shards)


def init_params(key, vocab_size, emb_dim, model_dim, ff_dim, num_layers, num_head,
                k=16):
    assert emb_dim == model_dim and model_dim % num_head == 0
    d_head = model_dim // num_head
    keys = jax.random.split(key, 1 + num_layers)

    emb = 0.1 * jax.random.normal(keys[0], (vocab_size, emb_dim), jnp.float32)
    emb = emb.at[0].set(0.0)                         # padding_idx = 0

    def lin_w(kk, fan_in, fan_out):
        return (jax.random.normal(kk, (fan_in, fan_out), jnp.float32)
                / jnp.sqrt(jnp.float32(fan_in)))

    layers = []
    for li in range(num_layers):
        lk = jax.random.split(keys[1 + li], 8)
        layers.append(dict(
            wq=lin_w(lk[0], model_dim, model_dim), bq=jnp.zeros((1, model_dim), jnp.float32),
            wk=lin_w(lk[1], model_dim, model_dim), bk=jnp.zeros((1, model_dim), jnp.float32),
            wv=lin_w(lk[2], model_dim, model_dim), bv=jnp.zeros((1, model_dim), jnp.float32),
            wo=lin_w(lk[3], model_dim, model_dim), bo=jnp.zeros((1, model_dim), jnp.float32),
            wk_rel=0.1 * jax.random.normal(lk[4], (2 * k + 1, d_head), jnp.float32),
            wv_rel=0.1 * jax.random.normal(lk[5], (2 * k + 1, d_head), jnp.float32),
            ln1_g=jnp.ones((1, model_dim), jnp.float32),
            ln1_b=jnp.zeros((1, model_dim), jnp.float32),
            w1=lin_w(lk[6], model_dim, ff_dim), b1=jnp.zeros((1, ff_dim), jnp.float32),
            w2=lin_w(lk[7], ff_dim, model_dim), b2=jnp.zeros((1, model_dim), jnp.float32),
            ln2_g=jnp.ones((1, model_dim), jnp.float32),
            ln2_b=jnp.zeros((1, model_dim), jnp.float32),
        ))
    return dict(embedding=emb, layers=layers, num_head=num_head, k=k)


if __name__ == "__main__":
    # lane-dense demo dims (model_dim, ff_dim multiples of 128)
    vocab_size, emb_dim, model_dim, ff_dim = 32, 128, 128, 256
    num_layers, num_head = 2, 4
    B, S = 2, 8

    key = jax.random.PRNGKey(0)
    kp, kt = jax.random.split(key)
    params = init_params(kp, vocab_size, emb_dim, model_dim, ff_dim,
                         num_layers, num_head, k=16)

    tokens = jax.random.randint(kt, (B, S), 1, vocab_size, dtype=jnp.int32)
    tokens = tokens.at[0, -2:].set(0)   # padding tail in sequence 0
    tokens = tokens.at[1, -1:].set(0)   # padding tail in sequence 1

    out = rel_transformer_encoder_forward(tokens, params)
    out = jax.block_until_ready(out)
    assert out.shape == (B, S, model_dim)
    assert bool(jnp.all(jnp.isfinite(out)))
    print("KERNEL_OK")
</pallas_src>

<mosaic_0001>
module attributes {stable_mosaic.version = 11 : i64} {
  func.func @_encoder_kernel(%arg0: i32, %arg1: i32, %arg2: memref<1x8x128xf32, #tpu.memory_space<vmem>>, %arg3: memref<1x8x1xf32, #tpu.memory_space<vmem>>, %arg4: memref<1x1x8xf32, #tpu.memory_space<vmem>>, %arg5: memref<1x128x384xbf16, #tpu.memory_space<vmem>>, %arg6: memref<1x1x384xf32, #tpu.memory_space<vmem>>, %arg7: memref<1x128x128xbf16, #tpu.memory_space<vmem>>, %arg8: memref<1x1x128xf32, #tpu.memory_space<vmem>>, %arg9: memref<1x128x132xbf16, #tpu.memory_space<vmem>>, %arg10: memref<1x132x128xbf16, #tpu.memory_space<vmem>>, %arg11: memref<1x1x128xf32, #tpu.memory_space<vmem>>, %arg12: memref<1x1x128xf32, #tpu.memory_space<vmem>>, %arg13: memref<1x128x256xbf16, #tpu.memory_space<vmem>>, %arg14: memref<1x1x256xf32, #tpu.memory_space<vmem>>, %arg15: memref<1x256x128xbf16, #tpu.memory_space<vmem>>, %arg16: memref<1x1x128xf32, #tpu.memory_space<vmem>>, %arg17: memref<1x1x128xf32, #tpu.memory_space<vmem>>, %arg18: memref<1x1x128xf32, #tpu.memory_space<vmem>>, %arg19: memref<1x8x128xf32, #tpu.memory_space<vmem>>) attributes {dimension_semantics = [#tpu.dimension_semantics<parallel>, #tpu.dimension_semantics<arbitrary>], iteration_bounds = array<i64: 2, 2>, scalar_prefetch = 0 : i64, scratch_operands = 0 : i64, tpu.core_type = #tpu.core_type<tc>, window_params = [{transform_indices = @transform_0, window_bounds = array<i64: 1, 8, 128>}, {transform_indices = @transform_1, window_bounds = array<i64: 1, 8, 1>}, {transform_indices = @transform_2, window_bounds = array<i64: 1, 1, 8>}, {transform_indices = @transform_3, window_bounds = array<i64: 1, 128, 384>}, {transform_indices = @transform_4, window_bounds = array<i64: 1, 1, 384>}, {transform_indices = @transform_5, window_bounds = array<i64: 1, 128, 128>}, {transform_indices = @transform_6, window_bounds = array<i64: 1, 1, 128>}, {transform_indices = @transform_7, window_bounds = array<i64: 1, 128, 132>}, {transform_indices = @transform_8, window_bounds = array<i64: 1, 132, 128>}, {transform_indices = @transform_9, window_bounds = array<i64: 1, 1, 128>}, {transform_indices = @transform_10, window_bounds = array<i64: 1, 1, 128>}, {transform_indices = @transform_11, window_bounds = array<i64: 1, 128, 256>}, {transform_indices = @transform_12, window_bounds = array<i64: 1, 1, 256>}, {transform_indices = @transform_13, window_bounds = array<i64: 1, 256, 128>}, {transform_indices = @transform_14, window_bounds = array<i64: 1, 1, 128>}, {transform_indices = @transform_15, window_bounds = array<i64: 1, 1, 128>}, {transform_indices = @transform_16, window_bounds = array<i64: 1, 1, 128>}, {transform_indices = @transform_17, window_bounds = array<i64: 1, 8, 128>}]} {
    %c0_i32 = arith.constant 0 : i32
    %0 = arith.cmpi eq, %arg1, %c0_i32 : i32
    %1 = arith.extui %0 : i1 to i32
    %c0_i32_0 = arith.constant 0 : i32
    %2 = arith.cmpi ne, %1, %c0_i32_0 : i32
    scf.if %2 {
      %c0_99 = arith.constant 0 : index
      %c0_100 = arith.constant 0 : index
      %c0_101 = arith.constant 0 : index
      %245 = vector.load %arg2[%c0_99, %c0_100, %c0_101] : memref<1x8x128xf32, #tpu.memory_space<vmem>>, vector<1x8x128xf32>
      %c0_102 = arith.constant 0 : index
      %c0_103 = arith.constant 0 : index
      %c0_104 = arith.constant 0 : index
      %246 = vector.load %arg19[%c0_102, %c0_103, %c0_104] : memref<1x8x128xf32, #tpu.memory_space<vmem>>, vector<1x8x128xf32>
      tpu.vector_store %arg19[%c0_102, %c0_103, %c0_104], %245 {strides = array<i32>} : memref<1x8x128xf32, #tpu.memory_space<vmem>>, vector<1x8x128xf32>,
    } else {
    }
    %c0 = arith.constant 0 : index
    %c0_1 = arith.constant 0 : index
    %c0_2 = arith.constant 0 : index
    %3 = vector.load %arg19[%c0, %c0_1, %c0_2] : memref<1x8x128xf32, #tpu.memory_space<vmem>>, vector<1x8x128xf32>
    %c0_3 = arith.constant 0 : index
    %c0_4 = arith.constant 0 : index
    %c0_5 = arith.constant 0 : index
    %4 = vector.load %arg3[%c0_3, %c0_4, %c0_5] : memref<1x8x1xf32, #tpu.memory_space<vmem>>, vector<1x8x1xf32>
    %c0_6 = arith.constant 0 : index
    %c0_7 = arith.constant 0 : index
    %c0_8 = arith.constant 0 : index
    %5 = vector.load %arg4[%c0_6, %c0_7, %c0_8] : memref<1x1x8xf32, #tpu.memory_space<vmem>>, vector<1x1x8xf32>
    %6 = vector.shape_cast %5 : vector<1x1x8xf32> to vector<1x1x8xf32>
    %7 = vector.broadcast %6 : vector<1x1x8xf32> to vector<1x8x8xf32>
    %8 = tpu.iota {dimensions = array<i32: 0>} : vector<8x33x8xi32>
    %9 = tpu.iota {dimensions = array<i32: 1>} : vector<8x33x8xi32>
    %10 = tpu.iota {dimensions = array<i32: 2>} : vector<8x33x8xi32>
    %11 = arith.subi %10, %8 : vector<8x33x8xi32>
    %c-16_i32 = arith.constant -16 : i32
    %c16_i32 = arith.constant 16 : i32
    %12 = vector.broadcast %c-16_i32 : i32 to vector<8x33x8xi32>
    %13 = arith.maxsi %12, %11 : vector<8x33x8xi32>
    %14 = vector.broadcast %c16_i32 : i32 to vector<8x33x8xi32>
    %15 = arith.minsi %14, %13 : vector<8x33x8xi32>
    %c16_i32_9 = arith.constant 16 : i32
    %16 = vector.broadcast %c16_i32_9 : i32 to vector<8x33x8xi32>
    %17 = arith.addi %15, %16 : vector<8x33x8xi32>
    %18 = arith.cmpi eq, %17, %9 : vector<8x33x8xi32>
    %19 = arith.extui %18 : vector<8x33x8xi1> to vector<8x33x8xi32>
    %20 = arith.sitofp %19 : vector<8x33x8xi32> to vector<8x33x8xf32>
    %21 = arith.truncf %20 : vector<8x33x8xf32> to vector<8x33x8xbf16>
    %22 = vector.shape_cast %3 : vector<1x8x128xf32> to vector<8x128xf32>
    %23 = arith.truncf %22 : vector<8x128xf32> to vector<8x128xbf16>
    %c0_10 = arith.constant 0 : index
    %c0_11 = arith.constant 0 : index
    %c0_12 = arith.constant 0 : index
    %24 = vector.load %arg5[%c0_10, %c0_11, %c0_12] : memref<1x128x384xbf16, #tpu.memory_space<vmem>>, vector<1x128x384xbf16>
    %25 = vector.shape_cast %24 : vector<1x128x384xbf16> to vector<128x384xbf16>
    %cst = arith.constant dense<0.000000e+00> : vector<8x384xf32>
    %26 = tpu.matmul %23, %25, %cst {dimension_numbers = #tpu.dot_dimension_numbers<[1], [0], [0], [1], [0, 0, 1, 1], [], []>} : vector<8x128xbf16>, vector<128x384xbf16>, vector<8x384xf32> -> vector<8x384xf32>
    %c0_13 = arith.constant 0 : index
    %c0_14 = arith.constant 0 : index
    %c0_15 = arith.constant 0 : index
    %27 = vector.load %arg6[%c0_13, %c0_14, %c0_15] : memref<1x1x384xf32, #tpu.memory_space<vmem>>, vector<1x1x384xf32>
    %28 = vector.shape_cast %27 : vector<1x1x384xf32> to vector<1x384xf32>
    %29 = vector.broadcast %28 : vector<1x384xf32> to vector<8x384xf32>
    %30 = arith.addf %26, %29 : vector<8x384xf32>
    %31 = vector.extract_strided_slice %30 {offsets = [0, 0], sizes = [8, 128], strides = [1, 1]} : vector<8x384xf32> to vector<8x128xf32>
    %32 = arith.truncf %31 : vector<8x128xf32> to vector<8x128xbf16>
    %33 = vector.extract_strided_slice %30 {offsets = [0, 128], sizes = [8, 128], strides = [1, 1]} : vector<8x384xf32> to vector<8x128xf32>
    %34 = arith.truncf %33 : vector<8x128xf32> to vector<8x128xbf16>
    %35 = vector.shape_cast %34 : vector<8x128xbf16> to vector<1x8x128xbf16>
    %36 = vector.extract_strided_slice %30 {offsets = [0, 256], sizes = [8, 128], strides = [1, 1]} : vector<8x384xf32> to vector<8x128xf32>
    %37 = arith.truncf %36 : vector<8x128xf32> to vector<8x128xbf16>
    %38 = vector.shape_cast %37 : vector<8x128xbf16> to vector<1x8x128xbf16>
    %39 = vector.shape_cast %32 : vector<8x128xbf16> to vector<1x8x128xbf16>
    %c0_16 = arith.constant 0 : index
    %c0_17 = arith.constant 0 : index
    %c0_18 = arith.constant 0 : index
    %40 = vector.load %arg9[%c0_16, %c0_17, %c0_18] : memref<1x128x132xbf16, #tpu.memory_space<vmem>>, vector<1x128x132xbf16>
    %41 = vector.shape_cast %40 : vector<1x128x132xbf16> to vector<128x132xbf16>
    %cst_19 = arith.constant dense<0.000000e+00> : vector<8x132xf32>
    %42 = tpu.matmul %32, %41, %cst_19 {dimension_numbers = #tpu.dot_dimension_numbers<[1], [0], [0], [1], [0, 0, 1, 1], [], []>} : vector<8x128xbf16>, vector<128x132xbf16>, vector<8x132xf32> -> vector<8x132xf32>
    %43 = vector.shape_cast %42 : vector<8x132xf32> to vector<1x8x132xf32>
    %44 = vector.extract_strided_slice %39 {offsets = [0, 0, 0], sizes = [1, 8, 32], strides = [1, 1, 1]} : vector<1x8x128xbf16> to vector<1x8x32xbf16>
    %45 = vector.extract_strided_slice %35 {offsets = [0, 0, 0], sizes = [1, 8, 32], strides = [1, 1, 1]} : vector<1x8x128xbf16> to vector<1x8x32xbf16>
    %46 = vector.extract_strided_slice %38 {offsets = [0, 0, 0], sizes = [1, 8, 32], strides = [1, 1, 1]} : vector<1x8x128xbf16> to vector<1x8x32xbf16>
    "tpu.trace_start"() <{level = 10 : i32, message = "bqd,bkd->bqk"}> : () -> ()
    %cst_20 = arith.constant dense<0.000000e+00> : vector<1x8x8xf32>
    %47 = tpu.matmul %44, %45, %cst_20 {dimension_numbers = #tpu.dot_dimension_numbers<[2], [2], [1], [1], [0, 0, 0, 1, 1, 1], [0], [0]>} : vector<1x8x32xbf16>, vector<1x8x32xbf16>, vector<1x8x8xf32> -> vector<1x8x8xf32>
    "tpu.trace_stop"() : () -> ()
    %48 = vector.extract_strided_slice %43 {offsets = [0, 0, 0], sizes = [1, 8, 33], strides = [1, 1, 1]} : vector<1x8x132xf32> to vector<1x8x33xf32>
    %49 = arith.truncf %48 : vector<1x8x33xf32> to vector<1x8x33xbf16>
    "tpu.trace_start"() <{level = 10 : i32, message = "bqc,qck->bqk"}> : () -> ()
    %cst_21 = arith.constant dense<0.000000e+00> : vector<8x8x1xf32>
    %50 = tpu.matmul %21, %49, %cst_21 {dimension_numbers = #tpu.dot_dimension_numbers<[1], [2], [2], [0], [0, 0, 0, 2, 1, 0], [0], [1]>} : vector<8x33x8xbf16>, vector<1x8x33xbf16>, vector<8x8x1xf32> -> vector<8x8x1xf32>
    %51 = tpu.transpose %50, [2, 0, 1] : vector<8x8x1xf32> -> vector<1x8x8xf32>
    "tpu.trace_stop"() : () -> ()
    %52 = arith.addf %47, %51 : vector<1x8x8xf32>
    %cst_22 = arith.constant 0.176776692 : f32
    %53 = vector.broadcast %cst_22 : f32 to vector<1x8x8xf32>
    %54 = arith.mulf %52, %53 : vector<1x8x8xf32>
    %55 = arith.addf %54, %7 : vector<1x8x8xf32>
    %cst_23 = arith.constant dense<0xFF800000> : vector<1x8xf32>
    %56 = vector.multi_reduction <maximumf>, %55, %cst_23 [2] : vector<1x8x8xf32> to vector<1x8xf32>
    %57 = vector.shape_cast %56 : vector<1x8xf32> to vector<1x8x1xf32>
    %58 = vector.broadcast %57 : vector<1x8x1xf32> to vector<1x8x8xf32>
    %59 = arith.subf %55, %58 : vector<1x8x8xf32>
    %60 = math.exp %59 : vector<1x8x8xf32>
    %cst_24 = arith.constant dense<0.000000e+00> : vector<1x8xf32>
    %61 = vector.multi_reduction <add>, %60, %cst_24 [2] : vector<1x8x8xf32> to vector<1x8xf32>
    %62 = vector.shape_cast %61 : vector<1x8xf32> to vector<1x8x1xf32>
    %63 = tpu.reciprocal %62 {approx = true} : vector<1x8x1xf32> -> vector<1x8x1xf32>
    %64 = vector.broadcast %63 : vector<1x8x1xf32> to vector<1x8x8xf32>
    %65 = arith.mulf %60, %64 : vector<1x8x8xf32>
    %66 = arith.truncf %65 : vector<1x8x8xf32> to vector<1x8x8xbf16>
    "tpu.trace_start"() <{level = 10 : i32, message = "bqk,bkd->bqd"}> : () -> ()
    %cst_25 = arith.constant dense<0.000000e+00> : vector<1x8x32xf32>
    %67 = tpu.matmul %66, %46, %cst_25 {dimension_numbers = #tpu.dot_dimension_numbers<[2], [1], [1], [2], [0, 0, 0, 1, 1, 2], [0], [0]>} : vector<1x8x8xbf16>, vector<1x8x32xbf16>, vector<1x8x32xf32> -> vector<1x8x32xf32>
    "tpu.trace_stop"() : () -> ()
    "tpu.trace_start"() <{level = 10 : i32, message = "bqk,qck->bqc"}> : () -> ()
    %cst_26 = arith.constant dense<0.000000e+00> : vector<8x33x1xf32>
    %68 = tpu.matmul %21, %66, %cst_26 {dimension_numbers = #tpu.dot_dimension_numbers<[2], [2], [1], [0], [0, 0, 0, 1, 1, 0], [0], [1]>} : vector<8x33x8xbf16>, vector<1x8x8xbf16>, vector<8x33x1xf32> -> vector<8x33x1xf32>
    %69 = tpu.transpose %68, [2, 0, 1] : vector<8x33x1xf32> -> vector<1x8x33xf32>
    "tpu.trace_stop"() : () -> ()
    %70 = vector.extract_strided_slice %39 {offsets = [0, 0, 32], sizes = [1, 8, 32], strides = [1, 1, 1]} : vector<1x8x128xbf16> to vector<1x8x32xbf16>
    %71 = vector.extract_strided_slice %35 {offsets = [0, 0, 32], sizes = [1, 8, 32], strides = [1, 1, 1]} : vector<1x8x128xbf16> to vector<1x8x32xbf16>
    %72 = vector.extract_strided_slice %38 {offsets = [0, 0, 32], sizes = [1, 8, 32], strides = [1, 1, 1]} : vector<1x8x128xbf16> to vector<1x8x32xbf16>
    "tpu.trace_start"() <{level = 10 : i32, message = "bqd,bkd->bqk"}> : () -> ()
    %cst_27 = arith.constant dense<0.000000e+00> : vector<1x8x8xf32>
    %73 = tpu.matmul %70, %71, %cst_27 {dimension_numbers = #tpu.dot_dimension_numbers<[2], [2], [1], [1], [0, 0, 0, 1, 1, 1], [0], [0]>} : vector<1x8x32xbf16>, vector<1x8x32xbf16>, vector<1x8x8xf32> -> vector<1x8x8xf32>
    "tpu.trace_stop"() : () -> ()
    %74 = vector.extract_strided_slice %43 {offsets = [0, 0, 33], sizes = [1, 8, 33], strides = [1, 1, 1]} : vector<1x8x132xf32> to vector<1x8x33xf32>
    %75 = arith.truncf %74 : vector<1x8x33xf32> to vector<1x8x33xbf16>
    "tpu.trace_start"() <{level = 10 : i32, message = "bqc,qck->bqk"}> : () -> ()
    %cst_28 = arith.constant dense<0.000000e+00> : vector<8x8x1xf32>
    %76 = tpu.matmul %21, %75, %cst_28 {dimension_numbers = #tpu.dot_dimension_numbers<[1], [2], [2], [0], [0, 0, 0, 2, 1, 0], [0], [1]>} : vector<8x33x8xbf16>, vector<1x8x33xbf16>, vector<8x8x1xf32> -> vector<8x8x1xf32>
    %77 = tpu.transpose %76, [2, 0, 1] : vector<8x8x1xf32> -> vector<1x8x8xf32>
    "tpu.trace_stop"() : () -> ()
    %78 = arith.addf %73, %77 : vector<1x8x8xf32>
    %cst_29 = arith.constant 0.176776692 : f32
    %79 = vector.broadcast %cst_29 : f32 to vector<1x8x8xf32>
    %80 = arith.mulf %78, %79 : vector<1x8x8xf32>
    %81 = arith.addf %80, %7 : vector<1x8x8xf32>
    %cst_30 = arith.constant dense<0xFF800000> : vector<1x8xf32>
    %82 = vector.multi_reduction <maximumf>, %81, %cst_30 [2] : vector<1x8x8xf32> to vector<1x8xf32>
    %83 = vector.shape_cast %82 : vector<1x8xf32> to vector<1x8x1xf32>
    %84 = vector.broadcast %83 : vector<1x8x1xf32> to vector<1x8x8xf32>
    %85 = arith.subf %81, %84 : vector<1x8x8xf32>
    %86 = math.exp %85 : vector<1x8x8xf32>
    %cst_31 = arith.constant dense<0.000000e+00> : vector<1x8xf32>
    %87 = vector.multi_reduction <add>, %86, %cst_31 [2] : vector<1x8x8xf32> to vector<1x8xf32>
    %88 = vector.shape_cast %87 : vector<1x8xf32> to vector<1x8x1xf32>
    %89 = tpu.reciprocal %88 {approx = true} : vector<1x8x1xf32> -> vector<1x8x1xf32>
    %90 = vector.broadcast %89 : vector<1x8x1xf32> to vector<1x8x8xf32>
    %91 = arith.mulf %86, %90 : vector<1x8x8xf32>
    %92 = arith.truncf %91 : vector<1x8x8xf32> to vector<1x8x8xbf16>
    "tpu.trace_start"() <{level = 10 : i32, message = "bqk,bkd->bqd"}> : () -> ()
    %cst_32 = arith.constant dense<0.000000e+00> : vector<1x8x32xf32>
    %93 = tpu.matmul %92, %72, %cst_32 {dimension_numbers = #tpu.dot_dimension_numbers<[2], [1], [1], [2], [0, 0, 0, 1, 1, 2], [0], [0]>} : vector<1x8x8xbf16>, vector<1x8x32xbf16>, vector<1x8x32xf32> -> vector<1x8x32xf32>
    "tpu.trace_stop"() : () -> ()
    "tpu.trace_start"() <{level = 10 : i32, message = "bqk,qck->bqc"}> : () -> ()
    %cst_33 = arith.constant dense<0.000000e+00> : vector<8x33x1xf32>
    %94 = tpu.matmul %21, %92, %cst_33 {dimension_numbers = #tpu.dot_dimension_numbers<[2], [2], [1], [0], [0, 0, 0, 1, 1, 0], [0], [1]>} : vector<8x33x8xbf16>, vector<1x8x8xbf16>, vector<8x33x1xf32> -> vector<8x33x1xf32>
    %95 = tpu.transpose %94, [2, 0, 1] : vector<8x33x1xf32> -> vector<1x8x33xf32>
    "tpu.trace_stop"() : () -> ()
    %96 = vector.extract_strided_slice %39 {offsets = [0, 0, 64], sizes = [1, 8, 32], strides = [1, 1, 1]} : vector<1x8x128xbf16> to vector<1x8x32xbf16>
    %97 = vector.extract_strided_slice %35 {offsets = [0, 0, 64], sizes = [1, 8, 32], strides = [1, 1, 1]} : vector<1x8x128xbf16> to vector<1x8x32xbf16>
    %98 = vector.extract_strided_slice %38 {offsets = [0, 0, 64], sizes = [1, 8, 32], strides = [1, 1, 1]} : vector<1x8x128xbf16> to vector<1x8x32xbf16>
    "tpu.trace_start"() <{level = 10 : i32, message = "bqd,bkd->bqk"}> : () -> ()
    %cst_34 = arith.constant dense<0.000000e+00> : vector<1x8x8xf32>
    %99 = tpu.matmul %96, %97, %cst_34 {dimension_numbers = #tpu.dot_dimension_numbers<[2], [2], [1], [1], [0, 0, 0, 1, 1, 1], [0], [0]>} : vector<1x8x32xbf16>, vector<1x8x32xbf16>, vector<1x8x8xf32> -> vector<1x8x8xf32>
    "tpu.trace_stop"() : () -> ()
    %100 = vector.extract_strided_slice %43 {offsets = [0, 0, 66], sizes = [1, 8, 33], strides = [1, 1, 1]} : vector<1x8x132xf32> to vector<1x8x33xf32>
    %101 = arith.truncf %100 : vector<1x8x33xf32> to vector<1x8x33xbf16>
    "tpu.trace_start"() <{level = 10 : i32, message = "bqc,qck->bqk"}> : () -> ()
    %cst_35 = arith.constant dense<0.000000e+00> : vector<8x8x1xf32>
    %102 = tpu.matmul %21, %101, %cst_35 {dimension_numbers = #tpu.dot_dimension_numbers<[1], [2], [2], [0], [0, 0, 0, 2, 1, 0], [0], [1]>} : vector<8x33x8xbf16>, vector<1x8x33xbf16>, vector<8x8x1xf32> -> vector<8x8x1xf32>
    %103 = tpu.transpose %102, [2, 0, 1] : vector<8x8x1xf32> -> vector<1x8x8xf32>
    "tpu.trace_stop"() : () -> ()
    %104 = arith.addf %99, %103 : vector<1x8x8xf32>
    %cst_36 = arith.constant 0.176776692 : f32
    %105 = vector.broadcast %cst_36 : f32 to vector<1x8x8xf32>
    %106 = arith.mulf %104, %105 : vector<1x8x8xf32>
    %107 = arith.addf %106, %7 : vector<1x8x8xf32>
    %cst_37 = arith.constant dense<0xFF800000> : vector<1x8xf32>
    %108 = vector.multi_reduction <maximumf>, %107, %cst_37 [2] : vector<1x8x8xf32> to vector<1x8xf32>
    %109 = vector.shape_cast %108 : vector<1x8xf32> to vector<1x8x1xf32>
    %110 = vector.broadcast %109 : vector<1x8x1xf32> to vector<1x8x8xf32>
    %111 = arith.subf %107, %110 : vector<1x8x8xf32>
    %112 = math.exp %111 : vector<1x8x8xf32>
    %cst_38 = arith.constant dense<0.000000e+00> : vector<1x8xf32>
    %113 = vector.multi_reduction <add>, %112, %cst_38 [2] : vector<1x8x8xf32> to vector<1x8xf32>
    %114 = vector.shape_cast %113 : vector<1x8xf32> to vector<1x8x1xf32>
    %115 = tpu.reciprocal %114 {approx = true} : vector<1x8x1xf32> -> vector<1x8x1xf32>
    %116 = vector.broadcast %115 : vector<1x8x1xf32> to vector<1x8x8xf32>
    %117 = arith.mulf %112, %116 : vector<1x8x8xf32>
    %118 = arith.truncf %117 : vector<1x8x8xf32> to vector<1x8x8xbf16>
    "tpu.trace_start"() <{level = 10 : i32, message = "bqk,bkd->bqd"}> : () -> ()
    %cst_39 = arith.constant dense<0.000000e+00> : vector<1x8x32xf32>
    %119 = tpu.matmul %118, %98, %cst_39 {dimension_numbers = #tpu.dot_dimension_numbers<[2], [1], [1], [2], [0, 0, 0, 1, 1, 2], [0], [0]>} : vector<1x8x8xbf16>, vector<1x8x32xbf16>, vector<1x8x32xf32> -> vector<1x8x32xf32>
    "tpu.trace_stop"() : () -> ()
    "tpu.trace_start"() <{level = 10 : i32, message = "bqk,qck->bqc"}> : () -> ()
    %cst_40 = arith.constant dense<0.000000e+00> : vector<8x33x1xf32>
    %120 = tpu.matmul %21, %118, %cst_40 {dimension_numbers = #tpu.dot_dimension_numbers<[2], [2], [1], [0], [0, 0, 0, 1, 1, 0], [0], [1]>} : vector<8x33x8xbf16>, vector<1x8x8xbf16>, vector<8x33x1xf32> -> vector<8x33x1xf32>
    %121 = tpu.transpose %120, [2, 0, 1] : vector<8x33x1xf32> -> vector<1x8x33xf32>
    "tpu.trace_stop"() : () -> ()
    %122 = vector.extract_strided_slice %39 {offsets = [0, 0, 96], sizes = [1, 8, 32], strides = [1, 1, 1]} : vector<1x8x128xbf16> to vector<1x8x32xbf16>
    %123 = vector.extract_strided_slice %35 {offsets = [0, 0, 96], sizes = [1, 8, 32], strides = [1, 1, 1]} : vector<1x8x128xbf16> to vector<1x8x32xbf16>
    %124 = vector.extract_strided_slice %38 {offsets = [0, 0, 96], sizes = [1, 8, 32], strides = [1, 1, 1]} : vector<1x8x128xbf16> to vector<1x8x32xbf16>
    "tpu.trace_start"() <{level = 10 : i32, message = "bqd,bkd->bqk"}> : () -> ()
    %cst_41 = arith.constant dense<0.000000e+00> : vector<1x8x8xf32>
    %125 = tpu.matmul %122, %123, %cst_41 {dimension_numbers = #tpu.dot_dimension_numbers<[2], [2], [1], [1], [0, 0, 0, 1, 1, 1], [0], [0]>} : vector<1x8x32xbf16>, vector<1x8x32xbf16>, vector<1x8x8xf32> -> vector<1x8x8xf32>
    "tpu.trace_stop"() : () -> ()
    %126 = vector.extract_strided_slice %43 {offsets = [0, 0, 99], sizes = [1, 8, 33], strides = [1, 1, 1]} : vector<1x8x132xf32> to vector<1x8x33xf32>
    %127 = arith.truncf %126 : vector<1x8x33xf32> to vector<1x8x33xbf16>
    "tpu.trace_start"() <{level = 10 : i32, message = "bqc,qck->bqk"}> : () -> ()
    %cst_42 = arith.constant dense<0.000000e+00> : vector<8x8x1xf32>
    %128 = tpu.matmul %21, %127, %cst_42 {dimension_numbers = #tpu.dot_dimension_numbers<[1], [2], [2], [0], [0, 0, 0, 2, 1, 0], [0], [1]>} : vector<8x33x8xbf16>, vector<1x8x33xbf16>, vector<8x8x1xf32> -> vector<8x8x1xf32>
    %129 = tpu.transpose %128, [2, 0, 1] : vector<8x8x1xf32> -> vector<1x8x8xf32>
    "tpu.trace_stop"() : () -> ()
    %130 = arith.addf %125, %129 : vector<1x8x8xf32>
    %cst_43 = arith.constant 0.176776692 : f32
    %131 = vector.broadcast %cst_43 : f32 to vector<1x8x8xf32>
    %132 = arith.mulf %130, %131 : vector<1x8x8xf32>
    %133 = arith.addf %132, %7 : vector<1x8x8xf32>
    %cst_44 = arith.constant dense<0xFF800000> : vector<1x8xf32>
    %134 = vector.multi_reduction <maximumf>, %133, %cst_44 [2] : vector<1x8x8xf32> to vector<1x8xf32>
    %135 = vector.shape_cast %134 : vector<1x8xf32> to vector<1x8x1xf32>
    %136 = vector.broadcast %135 : vector<1x8x1xf32> to vector<1x8x8xf32>
    %137 = arith.subf %133, %136 : vector<1x8x8xf32>
    %138 = math.exp %137 : vector<1x8x8xf32>
    %cst_45 = arith.constant dense<0.000000e+00> : vector<1x8xf32>
    %139 = vector.multi_reduction <add>, %138, %cst_45 [2] : vector<1x8x8xf32> to vector<1x8xf32>
    %140 = vector.shape_cast %139 : vector<1x8xf32> to vector<1x8x1xf32>
    %141 = tpu.reciprocal %140 {approx = true} : vector<1x8x1xf32> -> vector<1x8x1xf32>
    %142 = vector.broadcast %141 : vector<1x8x1xf32> to vector<1x8x8xf32>
    %143 = arith.mulf %138, %142 : vector<1x8x8xf32>
    %144 = arith.truncf %143 : vector<1x8x8xf32> to vector<1x8x8xbf16>
    "tpu.trace_start"() <{level = 10 : i32, message = "bqk,bkd->bqd"}> : () -> ()
    %cst_46 = arith.constant dense<0.000000e+00> : vector<1x8x32xf32>
    %145 = tpu.matmul %144, %124, %cst_46 {dimension_numbers = #tpu.dot_dimension_numbers<[2], [1], [1], [2], [0, 0, 0, 1, 1, 2], [0], [0]>} : vector<1x8x8xbf16>, vector<1x8x32xbf16>, vector<1x8x32xf32> -> vector<1x8x32xf32>
    "tpu.trace_stop"() : () -> ()
    "tpu.trace_start"() <{level = 10 : i32, message = "bqk,qck->bqc"}> : () -> ()
    %cst_47 = arith.constant dense<0.000000e+00> : vector<8x33x1xf32>
    %146 = tpu.matmul %21, %144, %cst_47 {dimension_numbers = #tpu.dot_dimension_numbers<[2], [2], [1], [0], [0, 0, 0, 1, 1, 0], [0], [1]>} : vector<8x33x8xbf16>, vector<1x8x8xbf16>, vector<8x33x1xf32> -> vector<8x33x1xf32>
    %147 = tpu.transpose %146, [2, 0, 1] : vector<8x33x1xf32> -> vector<1x8x33xf32>
    "tpu.trace_stop"() : () -> ()
    %148 = tpu.concatenate %67, %93, %119, %145 in 2 : vector<1x8x32xf32>, vector<1x8x32xf32>, vector<1x8x32xf32>, vector<1x8x32xf32> -> vector<1x8x128xf32>
    %149 = vector.shape_cast %148 : vector<1x8x128xf32> to vector<8x128xf32>
    %150 = tpu.concatenate %69, %95, %121, %147 in 2 : vector<1x8x33xf32>, vector<1x8x33xf32>, vector<1x8x33xf32>, vector<1x8x33xf32> -> vector<1x8x132xf32>
    %151 = vector.shape_cast %150 : vector<1x8x132xf32> to vector<8x132xf32>
    %152 = arith.truncf %151 : vector<8x132xf32> to vector<8x132xbf16>
    %c0_48 = arith.constant 0 : index
    %c0_49 = arith.constant 0 : index
    %c0_50 = arith.constant 0 : index
    %153 = vector.load %arg10[%c0_48, %c0_49, %c0_50] : memref<1x132x128xbf16, #tpu.memory_space<vmem>>, vector<1x132x128xbf16>
    %154 = vector.shape_cast %153 : vector<1x132x128xbf16> to vector<132x128xbf16>
    %cst_51 = arith.constant dense<0.000000e+00> : vector<8x128xf32>
    %155 = tpu.matmul %152, %154, %cst_51 {dimension_numbers = #tpu.dot_dimension_numbers<[1], [0], [0], [1], [0, 0, 1, 1], [], []>} : vector<8x132xbf16>, vector<132x128xbf16>, vector<8x128xf32> -> vector<8x128xf32>
    %156 = arith.addf %149, %155 : vector<8x128xf32>
    %157 = arith.truncf %156 : vector<8x128xf32> to vector<8x128xbf16>
    %c0_52 = arith.constant 0 : index
    %c0_53 = arith.constant 0 : index
    %c0_54 = arith.constant 0 : index
    %158 = vector.load %arg7[%c0_52, %c0_53, %c0_54] : memref<1x128x128xbf16, #tpu.memory_space<vmem>>, vector<1x128x128xbf16>
    %159 = vector.shape_cast %158 : vector<1x128x128xbf16> to vector<128x128xbf16>
    %cst_55 = arith.constant dense<0.000000e+00> : vector<8x128xf32>
    %160 = tpu.matmul %157, %159, %cst_55 {dimension_numbers = #tpu.dot_dimension_numbers<[1], [0], [0], [1], [0, 0, 1, 1], [], []>} : vector<8x128xbf16>, vector<128x128xbf16>, vector<8x128xf32> -> vector<8x128xf32>
    %c0_56 = arith.constant 0 : index
    %c0_57 = arith.constant 0 : index
    %c0_58 = arith.constant 0 : index
    %161 = vector.load %arg8[%c0_56, %c0_57, %c0_58] : memref<1x1x128xf32, #tpu.memory_space<vmem>>, vector<1x1x128xf32>
    %162 = vector.shape_cast %161 : vector<1x1x128xf32> to vector<1x128xf32>
    %163 = vector.broadcast %162 : vector<1x128xf32> to vector<8x128xf32>
    %164 = arith.addf %160, %163 : vector<8x128xf32>
    %165 = vector.shape_cast %164 : vector<8x128xf32> to vector<1x8x128xf32>
    %166 = vector.broadcast %4 : vector<1x8x1xf32> to vector<1x8x128xf32>
    %167 = arith.mulf %165, %166 : vector<1x8x128xf32>
    %168 = arith.addf %167, %3 : vector<1x8x128xf32>
    %c0_59 = arith.constant 0 : index
    %c0_60 = arith.constant 0 : index
    %c0_61 = arith.constant 0 : index
    %169 = vector.load %arg11[%c0_59, %c0_60, %c0_61] : memref<1x1x128xf32, #tpu.memory_space<vmem>>, vector<1x1x128xf32>
    %170 = vector.shape_cast %169 : vector<1x1x128xf32> to vector<1x128xf32>
    %c0_62 = arith.constant 0 : index
    %c0_63 = arith.constant 0 : index
    %c0_64 = arith.constant 0 : index
    %171 = vector.load %arg12[%c0_62, %c0_63, %c0_64] : memref<1x1x128xf32, #tpu.memory_space<vmem>>, vector<1x1x128xf32>
    %172 = vector.shape_cast %171 : vector<1x1x128xf32> to vector<1x128xf32>
    %cst_65 = arith.constant dense<0.000000e+00> : vector<1x8xf32>
    %173 = vector.multi_reduction <add>, %168, %cst_65 [2] : vector<1x8x128xf32> to vector<1x8xf32>
    %174 = vector.shape_cast %173 : vector<1x8xf32> to vector<1x8x1xf32>
    %cst_66 = arith.constant 1.280000e+02 : f32
    %175 = vector.broadcast %cst_66 : f32 to vector<1x8x1xf32>
    %176 = arith.divf %174, %175 : vector<1x8x1xf32>
    %177 = vector.broadcast %176 : vector<1x8x1xf32> to vector<1x8x128xf32>
    %178 = arith.subf %168, %177 : vector<1x8x128xf32>
    %179 = arith.mulf %178, %178 : vector<1x8x128xf32>
    %cst_67 = arith.constant dense<0.000000e+00> : vector<1x8xf32>
    %180 = vector.multi_reduction <add>, %179, %cst_67 [2] : vector<1x8x128xf32> to vector<1x8xf32>
    %181 = vector.shape_cast %180 : vector<1x8xf32> to vector<1x8x1xf32>
    %cst_68 = arith.constant 1.280000e+02 : f32
    %182 = vector.broadcast %cst_68 : f32 to vector<1x8x1xf32>
    %183 = arith.divf %181, %182 : vector<1x8x1xf32>
    %cst_69 = arith.constant 9.99999997E-7 : f32
    %184 = vector.broadcast %cst_69 : f32 to vector<1x8x1xf32>
    %185 = arith.addf %183, %184 : vector<1x8x1xf32>
    %186 = math.rsqrt %185 : vector<1x8x1xf32>
    %187 = vector.broadcast %186 : vector<1x8x1xf32> to vector<1x8x128xf32>
    %188 = arith.mulf %178, %187 : vector<1x8x128xf32>
    %189 = vector.shape_cast %170 : vector<1x128xf32> to vector<1x1x128xf32>
    %190 = vector.broadcast %189 : vector<1x1x128xf32> to vector<1x8x128xf32>
    %191 = arith.mulf %188, %190 : vector<1x8x128xf32>
    %192 = vector.shape_cast %172 : vector<1x128xf32> to vector<1x1x128xf32>
    %193 = vector.broadcast %192 : vector<1x1x128xf32> to vector<1x8x128xf32>
    %194 = arith.addf %191, %193 : vector<1x8x128xf32>
    %195 = vector.shape_cast %194 : vector<1x8x128xf32> to vector<8x128xf32>
    %196 = arith.truncf %195 : vector<8x128xf32> to vector<8x128xbf16>
    %c0_70 = arith.constant 0 : index
    %c0_71 = arith.constant 0 : index
    %c0_72 = arith.constant 0 : index
    %197 = vector.load %arg13[%c0_70, %c0_71, %c0_72] : memref<1x128x256xbf16, #tpu.memory_space<vmem>>, vector<1x128x256xbf16>
    %198 = vector.shape_cast %197 : vector<1x128x256xbf16> to vector<128x256xbf16>
    %cst_73 = arith.constant dense<0.000000e+00> : vector<8x256xf32>
    %199 = tpu.matmul %196, %198, %cst_73 {dimension_numbers = #tpu.dot_dimension_numbers<[1], [0], [0], [1], [0, 0, 1, 1], [], []>} : vector<8x128xbf16>, vector<128x256xbf16>, vector<8x256xf32> -> vector<8x256xf32>
    %c0_74 = arith.constant 0 : index
    %c0_75 = arith.constant 0 : index
    %c0_76 = arith.constant 0 : index
    %200 = vector.load %arg14[%c0_74, %c0_75, %c0_76] : memref<1x1x256xf32, #tpu.memory_space<vmem>>, vector<1x1x256xf32>
    %201 = vector.shape_cast %200 : vector<1x1x256xf32> to vector<1x256xf32>
    %202 = vector.broadcast %201 : vector<1x256xf32> to vector<8x256xf32>
    %203 = arith.addf %199, %202 : vector<8x256xf32>
    %cst_77 = arith.constant 0.000000e+00 : f32
    %204 = vector.broadcast %cst_77 : f32 to vector<8x256xf32>
    %205 = arith.maximumf %203, %204 : vector<8x256xf32>
    %206 = arith.truncf %205 : vector<8x256xf32> to vector<8x256xbf16>
    %c0_78 = arith.constant 0 : index
    %c0_79 = arith.constant 0 : index
    %c0_80 = arith.constant 0 : index
    %207 = vector.load %arg15[%c0_78, %c0_79, %c0_80] : memref<1x256x128xbf16, #tpu.memory_space<vmem>>, vector<1x256x128xbf16>
    %208 = vector.shape_cast %207 : vector<1x256x128xbf16> to vector<256x128xbf16>
    %cst_81 = arith.constant dense<0.000000e+00> : vector<8x128xf32>
    %209 = tpu.matmul %206, %208, %cst_81 {dimension_numbers = #tpu.dot_dimension_numbers<[1], [0], [0], [1], [0, 0, 1, 1], [], []>} : vector<8x256xbf16>, vector<256x128xbf16>, vector<8x128xf32> -> vector<8x128xf32>
    %c0_82 = arith.constant 0 : index
    %c0_83 = arith.constant 0 : index
    %c0_84 = arith.constant 0 : index
    %210 = vector.load %arg16[%c0_82, %c0_83, %c0_84] : memref<1x1x128xf32, #tpu.memory_space<vmem>>, vector<1x1x128xf32>
    %211 = vector.shape_cast %210 : vector<1x1x128xf32> to vector<1x128xf32>
    %212 = vector.broadcast %211 : vector<1x128xf32> to vector<8x128xf32>
    %213 = arith.addf %209, %212 : vector<8x128xf32>
    %214 = vector.shape_cast %213 : vector<8x128xf32> to vector<1x8x128xf32>
    %215 = vector.broadcast %4 : vector<1x8x1xf32> to vector<1x8x128xf32>
    %216 = arith.mulf %214, %215 : vector<1x8x128xf32>
    %217 = arith.addf %216, %194 : vector<1x8x128xf32>
    %c0_85 = arith.constant 0 : index
    %c0_86 = arith.constant 0 : index
    %c0_87 = arith.constant 0 : index
    %218 = vector.load %arg17[%c0_85, %c0_86, %c0_87] : memref<1x1x128xf32, #tpu.memory_space<vmem>>, vector<1x1x128xf32>
    %219 = vector.shape_cast %218 : vector<1x1x128xf32> to vector<1x128xf32>
    %c0_88 = arith.constant 0 : index
    %c0_89 = arith.constant 0 : index
    %c0_90 = arith.constant 0 : index
    %220 = vector.load %arg18[%c0_88, %c0_89, %c0_90] : memref<1x1x128xf32, #tpu.memory_space<vmem>>, vector<1x1x128xf32>
    %221 = vector.shape_cast %220 : vector<1x1x128xf32> to vector<1x128xf32>
    %cst_91 = arith.constant dense<0.000000e+00> : vector<1x8xf32>
    %222 = vector.multi_reduction <add>, %217, %cst_91 [2] : vector<1x8x128xf32> to vector<1x8xf32>
    %223 = vector.shape_cast %222 : vector<1x8xf32> to vector<1x8x1xf32>
    %cst_92 = arith.constant 1.280000e+02 : f32
    %224 = vector.broadcast %cst_92 : f32 to vector<1x8x1xf32>
    %225 = arith.divf %223, %224 : vector<1x8x1xf32>
    %226 = vector.broadcast %225 : vector<1x8x1xf32> to vector<1x8x128xf32>
    %227 = arith.subf %217, %226 : vector<1x8x128xf32>
    %228 = arith.mulf %227, %227 : vector<1x8x128xf32>
    %cst_93 = arith.constant dense<0.000000e+00> : vector<1x8xf32>
    %229 = vector.multi_reduction <add>, %228, %cst_93 [2] : vector<1x8x128xf32> to vector<1x8xf32>
    %230 = vector.shape_cast %229 : vector<1x8xf32> to vector<1x8x1xf32>
    %cst_94 = arith.constant 1.280000e+02 : f32
    %231 = vector.broadcast %cst_94 : f32 to vector<1x8x1xf32>
    %232 = arith.divf %230, %231 : vector<1x8x1xf32>
    %cst_95 = arith.constant 9.99999997E-7 : f32
    %233 = vector.broadcast %cst_95 : f32 to vector<1x8x1xf32>
    %234 = arith.addf %232, %233 : vector<1x8x1xf32>
    %235 = math.rsqrt %234 : vector<1x8x1xf32>
    %236 = vector.broadcast %235 : vector<1x8x1xf32> to vector<1x8x128xf32>
    %237 = arith.mulf %227, %236 : vector<1x8x128xf32>
    %238 = vector.shape_cast %219 : vector<1x128xf32> to vector<1x1x128xf32>
    %239 = vector.broadcast %238 : vector<1x1x128xf32> to vector<1x8x128xf32>
    %240 = arith.mulf %237, %239 : vector<1x8x128xf32>
    %241 = vector.shape_cast %221 : vector<1x128xf32> to vector<1x1x128xf32>
    %242 = vector.broadcast %241 : vector<1x1x128xf32> to vector<1x8x128xf32>
    %243 = arith.addf %240, %242 : vector<1x8x128xf32>
    %c0_96 = arith.constant 0 : index
    %c0_97 = arith.constant 0 : index
    %c0_98 = arith.constant 0 : index
    %244 = vector.load %arg19[%c0_96, %c0_97, %c0_98] : memref<1x8x128xf32, #tpu.memory_space<vmem>>, vector<1x8x128xf32>
    tpu.vector_store %arg19[%c0_96, %c0_97, %c0_98], %243 {strides = array<i32>} : memref<1x8x128xf32, #tpu.memory_space<vmem>>, vector<1x8x128xf32>,
    return
  }
  func.func @transform_0(%arg0: i32, %arg1: i32) -> (i32, i32, i32) {
    %c0_i32 = arith.constant 0 : i32
    %c0_i32_0 = arith.constant 0 : i32
    %c0_i32_1 = arith.constant 0 : i32
    return %arg0, %c0_i32, %c0_i32_0 : i32, i32, i32
  }
  func.func @transform_1(%arg0: i32, %arg1: i32) -> (i32, i32, i32) {
    %c0_i32 = arith.constant 0 : i32
    %c0_i32_0 = arith.constant 0 : i32
    %c0_i32_1 = arith.constant 0 : i32
    return %arg0, %c0_i32, %c0_i32_0 : i32, i32, i32
  }
  func.func @transform_2(%arg0: i32, %arg1: i32) -> (i32, i32, i32) {
    %c0_i32 = arith.constant 0 : i32
    %c0_i32_0 = arith.constant 0 : i32
    %c0_i32_1 = arith.constant 0 : i32
    return %arg0, %c0_i32, %c0_i32_0 : i32, i32, i32
  }
  func.func @transform_3(%arg0: i32, %arg1: i32) -> (i32, i32, i32) {
    %c0_i32 = arith.constant 0 : i32
    %c0_i32_0 = arith.constant 0 : i32
    %c0_i32_1 = arith.constant 0 : i32
    return %arg1, %c0_i32, %c0_i32_0 : i32, i32, i32
  }
  func.func @transform_4(%arg0: i32, %arg1: i32) -> (i32, i32, i32) {
    %c0_i32 = arith.constant 0 : i32
    %c0_i32_0 = arith.constant 0 : i32
    %c0_i32_1 = arith.constant 0 : i32
    return %arg1, %c0_i32, %c0_i32_0 : i32, i32, i32
  }
  func.func @transform_5(%arg0: i32, %arg1: i32) -> (i32, i32, i32) {
    %c0_i32 = arith.constant 0 : i32
    %c0_i32_0 = arith.constant 0 : i32
    %c0_i32_1 = arith.constant 0 : i32
    return %arg1, %c0_i32, %c0_i32_0 : i32, i32, i32
  }
  func.func @transform_6(%arg0: i32, %arg1: i32) -> (i32, i32, i32) {
    %c0_i32 = arith.constant 0 : i32
    %c0_i32_0 = arith.constant 0 : i32
    %c0_i32_1 = arith.constant 0 : i32
    return %arg1, %c0_i32, %c0_i32_0 : i32, i32, i32
  }
  func.func @transform_7(%arg0: i32, %arg1: i32) -> (i32, i32, i32) {
    %c0_i32 = arith.constant 0 : i32
    %c0_i32_0 = arith.constant 0 : i32
    %c0_i32_1 = arith.constant 0 : i32
    return %arg1, %c0_i32, %c0_i32_0 : i32, i32, i32
  }
  func.func @transform_8(%arg0: i32, %arg1: i32) -> (i32, i32, i32) {
    %c0_i32 = arith.constant 0 : i32
    %c0_i32_0 = arith.constant 0 : i32
    %c0_i32_1 = arith.constant 0 : i32
    return %arg1, %c0_i32, %c0_i32_0 : i32, i32, i32
  }
  func.func @transform_9(%arg0: i32, %arg1: i32) -> (i32, i32, i32) {
    %c0_i32 = arith.constant 0 : i32
    %c0_i32_0 = arith.constant 0 : i32
    %c0_i32_1 = arith.constant 0 : i32
    return %arg1, %c0_i32, %c0_i32_0 : i32, i32, i32
  }
  func.func @transform_10(%arg0: i32, %arg1: i32) -> (i32, i32, i32) {
    %c0_i32 = arith.constant 0 : i32
    %c0_i32_0 = arith.constant 0 : i32
    %c0_i32_1 = arith.constant 0 : i32
    return %arg1, %c0_i32, %c0_i32_0 : i32, i32, i32
  }
  func.func @transform_11(%arg0: i32, %arg1: i32) -> (i32, i32, i32) {
    %c0_i32 = arith.constant 0 : i32
    %c0_i32_0 = arith.constant 0 : i32
    %c0_i32_1 = arith.constant 0 : i32
    return %arg1, %c0_i32, %c0_i32_0 : i32, i32, i32
  }
  func.func @transform_12(%arg0: i32, %arg1: i32) -> (i32, i32, i32) {
    %c0_i32 = arith.constant 0 : i32
    %c0_i32_0 = arith.constant 0 : i32
    %c0_i32_1 = arith.constant 0 : i32
    return %arg1, %c0_i32, %c0_i32_0 : i32, i32, i32
  }
  func.func @transform_13(%arg0: i32, %arg1: i32) -> (i32, i32, i32) {
    %c0_i32 = arith.constant 0 : i32
    %c0_i32_0 = arith.constant 0 : i32
    %c0_i32_1 = arith.constant 0 : i32
    return %arg1, %c0_i32, %c0_i32_0 : i32, i32, i32
  }
  func.func @transform_14(%arg0: i32, %arg1: i32) -> (i32, i32, i32) {
    %c0_i32 = arith.constant 0 : i32
    %c0_i32_0 = arith.constant 0 : i32
    %c0_i32_1 = arith.constant 0 : i32
    return %arg1, %c0_i32, %c0_i32_0 : i32, i32, i32
  }
  func.func @transform_15(%arg0: i32, %arg1: i32) -> (i32, i32, i32) {
    %c0_i32 = arith.constant 0 : i32
    %c0_i32_0 = arith.constant 0 : i32
    %c0_i32_1 = arith.constant 0 : i32
    return %arg1, %c0_i32, %c0_i32_0 : i32, i32, i32
  }
  func.func @transform_16(%arg0: i32, %arg1: i32) -> (i32, i32, i32) {
    %c0_i32 = arith.constant 0 : i32
    %c0_i32_0 = arith.constant 0 : i32
    %c0_i32_1 = arith.constant 0 : i32
    return %arg1, %c0_i32, %c0_i32_0 : i32, i32, i32
  }
  func.func @transform_17(%arg0: i32, %arg1: i32) -> (i32, i32, i32) {
    %c0_i32 = arith.constant 0 : i32
    %c0_i32_0 = arith.constant 0 : i32
    %c0_i32_1 = arith.constant 0 : i32
    return %arg0, %c0_i32, %c0_i32_0 : i32, i32, i32
  }
}

</mosaic_0001>

<bundles_post_ra>
// kernel: tpu_custom_call.1
= control target key start
LH: loop header
LB: loop body
LE: loop exit
PB: predicated region body
PF: predicated region fallthrough
CT: control target
= control target key end

     0   :  { %s16487_s0 = inlined_call_operand.vmem [shape: f32[2,8,128], index: 0, kind: input, shape index: {}]   ;;  %s16488_s1 = inlined_call_operand.vmem [shape: f32[2,8,1], index: 1, kind: input, shape index: {}]   ;;  %s16489_s2 = inlined_call_operand.vmem [shape: f32[2,1,8], index: 2, kind: input, shape index: {}]   ;;  %s16490_s3 = inlined_call_operand.vmem [shape: bf16[2,128,384], index: 3, kind: input, shape index: {}]   ;;  %s16491_s4 = inlined_call_operand.vmem [shape: f32[2,1,384], index: 4, kind: input, shape index: {}]   ;;  %s16492_s5 = inlined_call_operand.vmem [shape: bf16[2,128,128], index: 5, kind: input, shape index: {}]   ;;  %s16493_s6 = inlined_call_operand.vmem [shape: f32[2,1,128], index: 6, kind: input, shape index: {}]   ;;  %s16494_s7 = inlined_call_operand.vmem [shape: bf16[2,128,132], index: 7, kind: input, shape index: {}]   ;;  %s16495_s8 = inlined_call_operand.vmem [shape: bf16[2,132,128], index: 8, kind: input, shape index: {}]   ;;  %s16496_s9 = inlined_call_operand.vmem [shape: f32[2,1,128], index: 9, kind: input, shape index: {}]   ;;  %s16497_s10 = inlined_call_operand.vmem [shape: f32[2,1,128], index: 10, kind: input, shape index: {}]   ;;  %s16498_s11 = inlined_call_operand.hbm [shape: bf16[2,128,256], index: 11, kind: input, shape index: {}]   ;;  %s16499_s12 = inlined_call_operand.vmem [shape: f32[2,1,256], index: 12, kind: input, shape index: {}]   ;;  %s16500_s13 = inlined_call_operand.hbm [shape: bf16[2,256,128], index: 13, kind: input, shape index: {}]   ;;  %s16501_s14 = inlined_call_operand.vmem [shape: f32[2,1,128], index: 14, kind: input, shape index: {}]   ;;  %s16502_s15 = inlined_call_operand.hbm [shape: f32[2,1,128], index: 15, kind: input, shape index: {}]   ;;  %s16503_s16 = inlined_call_operand.vmem [shape: f32[2,1,128], index: 16, kind: input, shape index: {}]   ;;  %s16504_s17 = inlined_call_operand.hbm [shape: f32[2,8,128], index: 17, kind: output, shape index: {}]  }
   0x1   :  { %16627 = sst [smem:[#allocation140_spill]] %s16487_s0 }
   0x2   :  { %16628 = sst [smem:[#allocation141_spill]] %s16488_s1 }
   0x3   :  { %16629 = sst [smem:[#allocation142_spill]] %s16489_s2 }
   0x4   :  { %16630 = sst [smem:[#allocation143_spill]] %s16490_s3 }
   0x5   :  { %16631 = sst [smem:[#allocation144_spill]] %s16491_s4 }
   0x6   :  { %16632 = sst [smem:[#allocation145_spill]] %s16492_s5 }
   0x7   :  { %16633 = sst [smem:[#allocation146_spill]] %s16493_s6 }
   0x8   :  { %16634 = sst [smem:[#allocation147_spill]] %s16494_s7 }
   0x9   :  { %16635 = sst [smem:[#allocation148_spill]] %s16495_s8 }
   0xa   :  { %16636 = sst [smem:[#allocation149_spill]] %s16496_s9 }
   0xb   :  { %16637 = sst [smem:[#allocation150_spill]] %s16497_s10 }
   0xc   :  { %16638 = sst [smem:[#allocation151_spill]] %s16498_s11 }
   0xd   :  { %16639 = sst [smem:[#allocation152_spill]] %s16499_s12 }
   0xe   :  { %16640 = sst [smem:[#allocation153_spill]] %s16500_s13 }
   0xf   :  { %16641 = sst [smem:[#allocation154_spill]] %s16501_s14 }
  0x10   :  { %16642 = sst [smem:[#allocation155_spill]] %s16502_s15 }
  0x11   :  { %16643 = sst [smem:[#allocation156_spill]] %s16503_s16 }
  0x12   :  { %16644 = sst [smem:[#allocation157_spill]] %s16504_s17 }
  0x13   :  { %22 = vsyncpa [#allocation3], 0 }
  0x14   :  { %24 = vsyncpa [#allocation3 + $0x1], 0 }
  0x15   :  { %25 = vsyncpa [#allocation6], 0 }
  0x16   :  { %27 = vsyncpa [#allocation6 + $0x1], 0 }
  0x17   :  { %28 = vsyncpa [#allocation4], 0 }
  0x18   :  { %30 = vsyncpa [#allocation4 + $0x1], 0  ;;  %s13513_s24 = smov 0   ;;  %s13515_s25 = smov 0  }
  0x19   :  { %s13517_s26 = smov 0   ;;  %s13519_s27 = smov 0  }
  0x1a   :  { %s13521_s28 = smov 0   ;;  %s13523_s29 = smov 0  }
  0x1b   :  { %s13525_s0 = smov 0   ;;  %s13527_s30 = smov 0  }
  0x1c   :  { %s13529_s18 = smov 0   ;;  %s13531_s19 = smov 0  }
  0x1d   :  { %s13533_s1 = smov 0  }
  0x1e LB: > { %16645 = sst [smem:[#allocation12_spill]] %s13362_s24  ;;  %s13567_s20 = sadd.s32 4294967295, %s13402_s1   ;;  %s13402_s1 = sphi %s13533_s1, %s36_s1   ;;  %s13398_s19 = sphi %s13531_s19, %s17011_s19   ;;  %s13394_s18 = sphi %s13529_s18, %s17010_s18   ;;  %s13390_s30 = sphi %s13527_s30, %s17009_s30   ;;  %s13386_s0 = sphi %s13525_s0, %s17008_s0   ;;  %s13382_s29 = sphi %s13523_s29, %s17007_s29   ;;  %s13378_s28 = sphi %s13521_s28, %s17006_s28   ;;  %s13374_s27 = sphi %s13519_s27, %s17005_s27   ;;  %s13370_s26 = sphi %s13517_s26, %s17004_s26   ;;  %s13366_s25 = sphi %s13515_s25, %s17003_s25   ;;  %s13362_s24 = sphi %s13513_s24, %s17002_s24  }
  0x1f   : > { %16646 = sst [smem:[#allocation13_spill]] %s13366_s25  ;;  %s11863_s21 = sadd.s32 4294967294, %s13402_s1  }
  0x20   : > { %16647 = sst [smem:[#allocation14_spill]] %s13370_s26  ;;  %s45_s22 = sadd.s32 1, %s13394_s18 }
  0x21   : > { %16648 = sst [smem:[#allocation15_spill]] %s13378_s28  ;;  %s48_s23 = sadd.s32 1, %s13398_s19 }
  0x22   : > { %16649 = sst [smem:[#allocation16_spill]] %s13382_s29  ;;  %p46_p0 = scmp.ge.s32.totalorder %s45_s22, 2 }
  0x23   : > { %16650 = sst [smem:[#allocation17_spill]] %s13390_s30  ;;  %s341_s17 = sadd.s32 1, %s13382_s29 }
  0x24   : > { %16651 = sst [smem:[#allocation18_spill]] %s13394_s18  ;;  %p348_p1 = scmp.ne.s32.totalorder %s13382_s29, %s13378_s28 }
  0x25   : > { %16652 = sst [smem:[#allocation19_spill]] %s13398_s19  ;;  %p349_p2 = scmp.eq.s32.totalorder %s13402_s1, 0 }
  0x26   : > { %16653 = sst [smem:[#allocation20_spill]] %s13402_s1  ;;  %s17013_s22 = smov (%p46_p0, %s45_s22), 0 }
  0x27   : > { %16654 = sst [smem:[#allocation21_spill]] %s17013_s22  ;;  %s17015_s23 = smov (!%p46_p0, %s48_s23), %s13398_s19 }
  0x28   : > { %s338_s16 = ssub.s32 %s13394_s18, %s17013_s22  ;;  %p13581_p3 = por %p349_p2, %p348_p1 }
  0x29   : > { %p50_p4 = scmp.ge.s32.totalorder %s17015_s23, 2  ;;  %p339_p5 = scmp.eq.s32.totalorder %s338_s16, 0 }
  0x2a   : > { %p354_p6 = scmp.ne.s32.totalorder %s13378_s28, %s13374_s27  ;;  %p355_p7 = scmp.eq.s32.totalorder %s13567_s20, 0 }
  0x2b   : > { %s17017_s23 = smov (%p50_p4, %s17015_s23), 0  ;;  %s497_s10 = sadd.s32 1, %s13370_s26 }
  0x2c   : > { %16656 = sst [smem:[#allocation22_spill]] %s17017_s23  ;;  %p13592_p8 = por %p355_p7, %p354_p6 }
  0x2d   : > { %s13590_s12 = scalar_select %p339_p5, %s13382_s29, %s341_s17  }
  0x2e   : > { %s494_s8 = ssub.s32 %s13398_s19, %s17017_s23  ;;  %p507_p10 = scmp.ne.s32.totalorder %s13370_s26, %s13366_s25 }
  0x2f   : > { %16657 = sst [smem:[#allocation23_spill]] %s13590_s12  ;;  %p495_p9 = scmp.eq.s32.totalorder %s494_s8, 0 }
  0x30   : > { %p508_p11 = scmp.eq.s32.totalorder %s13567_s20, 3  ;;  %p513_p13 = scmp.ne.s32.totalorder %s13366_s25, %s13362_s24 }
  0x31   : > { %s13603_s16 = scalar_select %p495_p9, %s13370_s26, %s497_s10  }
  0x32   : > { %p13605_p12 = por %p508_p11, %p507_p10  ;;  %p514_p0 = scmp.eq.s32.totalorder %s11863_s21, 3 }
  0x33   : > { %16659 = sst [smem:[#allocation24_spill]] %s13603_s16  ;;  %p12541_p1 = scmp.lt.s32.totalorder %s13402_s1, 4 }
  0x34   : > { %s16660_s27 = scalar_select %p13605_p12, 1, 0 }
  0x35   : > { %s13613_s17 = sand.u32 1, %s13382_s29   ;;  %p13615_p2 = por %p514_p0, %p513_p13 }
  0x36   : > { %16661 = sst [smem:[#allocation25_spill]] %s16660_s27  ;;  %s11866_s8 = sshll.u32 %s13613_s17, 7 }
  0x37   : > { %s16662_s12 = scalar_select %p13615_p2, 1, 0 }
  0x38   : > { %s12424_s23 = sshll.u32 %s13394_s18, 7  ;;  %p13623_p4 = pnand %p12541_p1, %p13581_p3 }
  0x39   : > { %16663 = sst [smem:[#allocation26_spill]] %s16662_s12  ;;  %s640_s19 = sand.u32 1, %s13402_s1  }
  0x3a   : > { %s16665_s13 = sld [smem:[#allocation153_spill]]  ;;  %s644_s26 = scalar_lea.vmem [#allocation5], %s11866_s8 }
  0x3b   : > { %s652_s24 = sshll.u32 %s644_s26, 4  ;;  %p11872_p5 = scmp.ge.s32.totalorder %s13402_s1, 1  ;;  %s653_s24 = int_to_ptr.vmem [resolvable:$true] %s652_s24 }
  0x3c   : > { %s641_s12 = scalar_lea.sflag [#allocation6], %s640_s19  ;;  %s13404_s14 = smov 64  }
  0x3d   : > { %s13405_s9 = smov 4   ;;  %p689_p3 = scmp.lt.s32.totalorder %s13402_s1, 5 }
  0x3e   : > { %s16667_s11 = sld [smem:[#allocation151_spill]]  ;;  %s615_s21 = scalar_lea.vmem [#allocation2], %s11866_s8 }
  0x3f   : > { %p13635_p6 = pnand %p11872_p5, %p689_p3  ;;  %s612_s19 = scalar_lea.sflag [#allocation3], %s13613_s17 }
  0x40   : > { %s649_s29 = scalar_lea.hbm %s16665_s13, %s12424_s23  ;;  %s623_s13 = sshll.u32 %s615_s21, 4  ;;  %s624_s13 = int_to_ptr.vmem [resolvable:$true] %s623_s13 }
  0x41   : > { %s650_s27 = sshll.u32 %s649_s29, 4  ;;  %s13406_s6 = smov 128   ;;  %s651_s27 = int_to_ptr.hbm [resolvable:$true] %s650_s27 }
  0x42   : > { %12533 = dma.hbm_to_vmem [thread:$0]  (!%p13623_p4), %s651_s27, 2048, %s653_s24, %s641_s12, %s13404_s14, %s13404_s14, %s13405_s9  }
  0x43   : > { %s13407_s3 = smov 8   ;;  %s16668_s15 = sld [smem:[#allocation155_spill]] }
  0x44   : > { %s620_s29 = scalar_lea.hbm %s16667_s11, %s12424_s23  ;;  %s671_s14 = scalar_lea.vmem [#allocation7], %s13613_s17 }
  0x45   : > { %s621_s4 = sshll.u32 %s620_s29, 4  ;;  %s678_s1 = sshll.u32 %s671_s14, 4  ;;  %s622_s4 = int_to_ptr.hbm [resolvable:$true] %s621_s4  ;;  %s679_s1 = int_to_ptr.vmem [resolvable:$true] %s678_s1 }
  0x46   : > { %12530 = dma.hbm_to_vmem [thread:$0]  (!%p13623_p4), %s622_s4, 2048, %s624_s13, %s612_s19, %s13406_s6, %s13406_s6, %s13407_s3  }
  0x47   : > { %693 = sbr.rel (%p13635_p6) target bundleno = 7924 (0x1ef4), region = 88 }
  0x49   : > { %s674_s27 = scalar_lea.hbm %s16668_s15, %s13394_s18 }
  0x4a   : > { %s676_s5 = sshll.u32 %s674_s27, 4  ;;  %s677_s5 = int_to_ptr.hbm [resolvable:$true] %s676_s5 }
  0x4b   : > { %12536 = dma.hbm_to_vmem [thread:$0]  (!%p13623_p4), %s677_s5, 16, %s679_s1, %s641_s12  }
  0x4c   : > { %s13655_s23 = sand.u32 1, %s13378_s28  }
  0x4d   : > { %s11873_s3 = sshll.u32 %s13655_s23, 7  ;;  %s696_s4 = scalar_lea.sflag [#allocation3], %s13655_s23 }
  0x4e   : > { %s13659_s6 = scalar_lea.vmem [#allocation2], %s11873_s3 }
  0x4f   : > { %16669 = sst [smem:[#allocation27_spill]] %s13659_s6 }
  0x50   : > { %13349 = dma.done.wait (%p13592_p8), %s696_s4, 2048  }
  0x51   : > { %13351 = vsyncadd (%p13592_p8), %s696_s4, 4294965248  ;;  %s705_s5 = sand.u32 1, %s13567_s20   ;;  %s13666_s12 = scalar_lea.vmem [#allocation5], %s11873_s3 }
  0x52   : > { %s706_s7 = scalar_lea.sflag [#allocation6], %s705_s5  ;;  %16670 = sst [smem:[#allocation28_spill]] %s13666_s12 }
  0x53   : > { %13353 = dma.done.wait (%p13592_p8), %s706_s7, 2064  }
  0x54   : > { %13355 = vsyncadd (%p13592_p8), %s706_s7, 4294965232  ;;  %s16517_s13 = sand.u32 1, %s13366_s25   ;;  %p833_p7 = scmp.lt.s32.totalorder %s13390_s30, 1 }
  0x55   : > { %s11875_s1 = sshll.u32 %s16517_s13, 3  ;;  %p844_p9 = scmp.lt.s32.totalorder %s13386_s0, 1 }
  0x56   : > { %s834_s20 = scalar_select %p833_p7, %s13390_s30, 1 }
  0x57   : > { %s13679_s17 = scalar_select %p844_p9, %s13386_s0, 1 }
  0x58   : > { %s11876_s22 = sshll.u32 %s834_s20, 3  ;;  %s16671_s2 = sld [smem:[#allocation142_spill]] }
  0x59   : > { %s16672_s21 = sld [smem:[#allocation140_spill]]  ;;  %s12516_s3 = smul.u32 192, %s13679_s17 }
  0x5a   : > { %s16673_s27 = sld [smem:[#allocation141_spill]]  ;;  %s12426_s4 = sshll.u32 %s13679_s17, 6 }
  0x5b   : > { %s12517_s5 = smul.u32 3, %s13679_s17  ;;  %s16676_s29 = sld [smem:[#allocation143_spill]] }
  0x5c   : > { %s16678_s15 = sld [smem:[#allocation144_spill]]  ;;  %s12427_s28 = sshll.u32 %s13679_s17, 7 }
  0x5d   : > { %s16679_s7 = sld [smem:[#allocation147_spill]]  ;;  %s12518_s8 = smul.u32 68, %s13679_s17 }
  0x5e   : > { %s13684_s16 = scalar_lea.vmem %s16671_s2, %s834_s20  ;;  %s16675_s20 = sld [smem:[#allocation145_spill]] }
  0x5f   : > { %s836_s19 = scalar_lea.vmem %s16672_s21, %s11876_s22  ;;  %s16681_s2 = sld [smem:[#allocation150_spill]] }
  0x60   : > { %s13692_s14 = scalar_lea.vmem %s16673_s27, %s11876_s22  ;;  %s16682_s11 = sld [smem:[#allocation148_spill]] }
  0x61   : > { %16674 = sst [smem:[#allocation29_spill]] %s13692_s14  ;;  %s13705_s21 = scalar_lea.vmem %s16676_s29, %s12516_s3 }
  0x62   : > { %s13714_s18 = scalar_lea.vmem %s16678_s15, %s12517_s5  ;;  %s11884_s5 = sshll.u32 %s13679_s17, 1 }
  0x63   : > { %s16683_s25 = sld [smem:[#allocation152_spill]]  ;;  %s718_s29 = scalar_lea.vmem [#allocation7], %s13655_s23 }
  0x64   : > { %s13700_s10 = scalar_lea.vmem %s16675_s20, %s12426_s4  ;;  %s13720_s4 = scalar_lea.vmem %s16679_s7, %s12427_s28 }
  0x65   : > { %s876_s9 = scalar_lea.vmem %s16681_s2, %s13679_s17  ;;  %s16684_s14 = sld [smem:[#allocation154_spill]] }
  0x66   : > { %s13734_s15 = scalar_lea.vmem %s16682_s11, %s12518_s8  ;;  %s16685_s26 = sld [smem:[#allocation156_spill]] }
  0x67   : > { %s13751_s2 = scalar_lea.vmem [#allocation8], %s11875_s1  ;;  %p11885_p8 = scmp.ne.s32.totalorder %s13386_s0, 0 }
  0x69   : > { %s13740_s28 = scalar_lea.vmem %s16683_s25, %s11884_s5  ;;  %891 = sbr.rel (%p11885_p8) target bundleno = 112 (0x70), region = 104 }
  0x6b   : > { %s883_s20 = scalar_lea.vmem %s16684_s14, %s13679_s17 }
  0x6c   : > { %s886_s12 = scalar_lea.vmem %s16685_s26, %s13679_s17 }
  0x6e   : > { %v892_v0 = vld [vmem:[%s836_s19] sm:$0xff] }
  0x6f   : > { %893 = vst [vmem:[%s13751_s2] sm:$0xff] %v892_v0 }
  0x70 PF: > { %v12017_v1 = vld [vmem:[%s13705_s21 + $0xa8] sm:$0xf]  ;;  %v12450_v2 = vld [vmem:[%s13705_s21 + $0xb0] sm:$0xf0]  ;;  %v12005_v3 = vld [vmem:[%s13705_s21 + $0x90] sm:$0xf] }
  0x71   : > { %v12018_v4 = vor.u32 %v12450_v2, %v12017_v1  ;;  %v12447_v5 = vld [vmem:[%s13705_s21 + $0x98] sm:$0xf0]  ;;  %v11993_v7 = vld [vmem:[%s13705_s21 + $0x78] sm:$0xf]  ;;  %v12444_v8 = vld [vmem:[%s13705_s21 + $0x80] sm:$0xf0] }
  0x72   : > { %v12006_v6 = vor.u32 %v12447_v5, %v12005_v3  ;;  %v12085_v9 = vld [vmem:[%s13720_s4 + $0x70] sm:$0xf]  ;;  %v12467_v10 = vld [vmem:[%s13720_s4 + $0x74] sm:$0xf0]  ;;  %v11994_v11 = vor.u32 %v12444_v8, %v11993_v7  ;;  %v12077_v13 = vld [vmem:[%s13720_s4 + $0x60] sm:$0xf] }
  0x73   : > { %1284 = vmatpush.bf16.msra.mxu0 %v12018_v4  ;;  %v12086_v12 = vor.u32 %v12467_v10, %v12085_v9  ;;  %v12465_v14 = vld [vmem:[%s13720_s4 + $0x64] sm:$0xf0]  ;;  %v11981_v15 = vld [vmem:[%s13705_s21 + $0x60] sm:$0xf]  ;;  %v12441_v16 = vld [vmem:[%s13705_s21 + $0x68] sm:$0xf0] }
  0x74   : > { %v12078_v17 = vor.u32 %v12465_v14, %v12077_v13  ;;  %v12069_v18 = vld [vmem:[%s13720_s4 + $0x50] sm:$0xf]  ;;  %v12463_v19 = vld [vmem:[%s13720_s4 + $0x54] sm:$0xf0]  ;;  %v11982_v20 = vor.u32 %v12441_v16, %v11981_v15  ;;  %v11969_v21 = vld [vmem:[%s13705_s21 + $0x48] sm:$0xf] }
  0x75   : > { %1422 = vmatpush.bf16.msra.mxu3 %v12086_v12  ;;  %v12438_v22 = vld [vmem:[%s13705_s21 + $0x50] sm:$0xf0]  ;;  %v12070_v23 = vor.u32 %v12463_v19, %v12069_v18  ;;  %v12061_v24 = vld [vmem:[%s13720_s4 + $0x40] sm:$0xf]  ;;  %v12461_v25 = vld [vmem:[%s13720_s4 + $0x44] sm:$0xf0] }
  0x76   : > { %v11970_v26 = vor.u32 %v12438_v22, %v11969_v21  ;;  %v11957_v27 = vld [vmem:[%s13705_s21 + $0x30] sm:$0xf]  ;;  %v12435_v28 = vld [vmem:[%s13705_s21 + $0x38] sm:$0xf0]  ;;  %v12062_v29 = vor.u32 %v12461_v25, %v12061_v24  ;;  %v12459_v31 = vld [vmem:[%s13720_s4 + $0x34] sm:$0xf0] }
  0x77   : > { %1285 = vmatpush.bf16.msra.mxu0 %v12006_v6  ;;  %v12053_v30 = vld [vmem:[%s13720_s4 + $0x30] sm:$0xf]  ;;  %v11958_v32 = vor.u32 %v12435_v28, %v11957_v27  ;;  %v11945_v33 = vld [vmem:[%s13705_s21 + $0x18] sm:$0xf]  ;;  %v12432_v34 = vld [vmem:[%s13705_s21 + $0x20] sm:$0xf0] }
  0x78   : > { %v12054_v35 = vor.u32 %v12459_v31, %v12053_v30  ;;  %v12045_v36 = vld [vmem:[%s13720_s4 + $0x20] sm:$0xf]  ;;  %v12457_v37 = vld [vmem:[%s13720_s4 + $0x24] sm:$0xf0]  ;;  %v11946_v38 = vor.u32 %v12432_v34, %v11945_v33  ;;  %v12429_v40 = vld [vmem:[%s13705_s21 + $0x8] sm:$0xf0] }
  0x79   : > { %1423 = vmatpush.bf16.msra.mxu3 %v12078_v17  ;;  %v11933_v39 = vld [vmem:[%s13705_s21] sm:$0xf]  ;;  %v12466_v41 = vld [vmem:[%s13720_s4 + $0x74] sm:$0xf]  ;;  %v12087_v42 = vld [vmem:[%s13720_s4 + $0x78] sm:$0xf0]  ;;  %v12046_v43 = vor.u32 %v12457_v37, %v12045_v36 }
  0x7a   : > { %v12037_v44 = vld [vmem:[%s13720_s4 + $0x10] sm:$0xf]  ;;  %v12455_v45 = vld [vmem:[%s13720_s4 + $0x14] sm:$0xf0]  ;;  %v11934_v46 = vor.u32 %v12429_v40, %v11933_v39  ;;  %v12090_v48 = vor.u32 %v12466_v41, %v12087_v42  ;;  %v12464_v49 = vld [vmem:[%s13720_s4 + $0x64] sm:$0xf] }
  0x7b   : > { %1286 = vmatpush.bf16.msra.mxu0 %v11994_v11  ;;  %v894_v47 = vld [vmem:[%s13751_s2] sm:$0xff]  ;;  %v12038_v51 = vor.u32 %v12455_v45, %v12037_v44  ;;  %v12462_v54 = vld [vmem:[%s13720_s4 + $0x54] sm:$0xf]  ;;  %v12071_v55 = vld [vmem:[%s13720_s4 + $0x58] sm:$0xf0]  ;;  %vm1466_vm0 = vcmask 1047556  }
  0x7c   : > { %v12079_v50 = vld [vmem:[%s13720_s4 + $0x68] sm:$0xf0]  ;;  %v13790_v52 = vpack.c.bf16 %v894_v47, %v894_v47  ;;  %v12074_v56 = vor.u32 %v12462_v54, %v12071_v55  ;;  %v12460_v57 = vld [vmem:[%s13720_s4 + $0x44] sm:$0xf]  ;;  %v12458_v60 = vld [vmem:[%s13720_s4 + $0x34] sm:$0xf] }
  0x7d   : > { %1424 = vmatpush.bf16.msra.mxu3 %v12070_v23  ;;  %v12082_v53 = vor.u32 %v12464_v49, %v12079_v50  ;;  %v12063_v58 = vld [vmem:[%s13720_s4 + $0x48] sm:$0xf0]  ;;  %v12055_v61 = vld [vmem:[%s13720_s4 + $0x38] sm:$0xf0]  ;;  %v12456_v63 = vld [vmem:[%s13720_s4 + $0x24] sm:$0xf] }
  0x7e   : > { %v12066_v59 = vor.u32 %v12460_v57, %v12063_v58  ;;  %v12058_v62 = vor.u32 %v12458_v60, %v12055_v61  ;;  %v12047_v0 = vld [vmem:[%s13720_s4 + $0x28] sm:$0xf0]  ;;  %v12454_v2 = vld [vmem:[%s13720_s4 + $0x14] sm:$0xf]  ;;  %v12039_v3 = vld [vmem:[%s13720_s4 + $0x18] sm:$0xf0] }
  0x7f   : > { %1287 = vmatpush.bf16.msra.mxu0 %v11982_v20  ;;  %v12050_v1 = vor.u32 %v12456_v63, %v12047_v0  ;;  %v12042_v4 = vor.u32 %v12454_v2, %v12039_v3  ;;  %v12029_v5 = vld [vmem:[%s13720_s4] sm:$0xf]  ;;  %v12453_v6 = vld [vmem:[%s13720_s4 + $0x4] sm:$0xf0]  ;;  %v12452_v7 = vld [vmem:[%s13720_s4 + $0x4] sm:$0xf] }
  0x80   : > { %v12030_v8 = vor.u32 %v12453_v6, %v12029_v5  ;;  %v12031_v9 = vld [vmem:[%s13720_s4 + $0x8] sm:$0xf0]  ;;  %v1148_v11 = vld [vmem:[%s13714_s18] sm:$0x7]  ;;  %v13408_v22 = vmov 1983009808  }
  0x81   : > { %1425 = vmatpush.bf16.msra.mxu3 %v12062_v29  ;;  %v12034_v10 = vor.u32 %v12452_v7, %v12031_v9  ;;  %v1150_v12 = vperm.slane %v1148_v11, 0  ;;  %v1469_v23 = vunpack.c.l.s4 %v13408_v22  ;;  %v13409_v24 = vmov 1934713408   ;;  %s13413_s0 = smov 95   ;;  %s13415_s6 = smov 62  }
  0x82   : > { %v1479_v25 = vunpack.c.l.s4 %v13409_v24  ;;  %s13416_s1 = smov 64   ;;  %s13417_s19 = smov 29  }
  0x83   : > { %1288 = vmatpush.bf16.msra.mxu0 %v11970_v26  ;;  %v13817_v26 = vunpack.c.0.s8 %v1469_v23  ;;  %s13418_s14 = smov 32   ;;  %s13421_s24 = smov 99  }
  0x84   : > { %v13819_v27 = vunpack.c.0.s8 %v1479_v25  ;;  %s16983_s4 = sld [smem:[#allocation29_spill]] }
  0x85   : > { %1426 = vmatpush.bf16.msra.mxu3 %v12054_v35  ;;  %s16985_s8 = sld [smem:[#allocation27_spill]] }
  0x86   : > { %s16986_s22 = sld [smem:[#allocation146_spill]] }
  0x87   : > { %1289 = vmatpush.bf16.msra.mxu0 %v11958_v32  ;;  %s16989_s25 = sld [smem:[#allocation149_spill]] }
  0x89   : > { %1427 = vmatpush.bf16.msra.mxu3 %v12046_v43 }
  0x8b   : > { %1290 = vmatpush.bf16.msra.mxu0 %v11946_v38 }
  0x8c   : > { %s16987_s11 = scalar_lea.vmem %s16986_s22, %s13679_s17 }
  0x8d   : > { %1428 = vmatpush.bf16.msra.mxu3 %v12038_v51  ;;  %s16990_s30 = scalar_lea.vmem %s16989_s25, %s13679_s17 }
  0x8f   : > { %1291 = vmatpush.bf16.msra.mxu0 %v11934_v46 }
  0x91   : > { %1429 = vmatpush.bf16.msra.mxu3 %v12030_v8 }
  0x92   : > { %1292 = vmatmul.bf16.vlgmr.msra.gmra.mxu0 %v13790_v52 }
  0x93   : > { %1435 = vmatpush.bf16.msrb.mxu0 %v12090_v48 }
  0x97   : > { %1436 = vmatpush.bf16.msrb.mxu0 %v12082_v53 }
  0x9b   : > { %1437 = vmatpush.bf16.msrb.mxu0 %v12074_v56 }
  0x9f   : > { %1438 = vmatpush.bf16.msrb.mxu0 %v12066_v59 }
  0xa3   : > { %1439 = vmatpush.bf16.msrb.mxu0 %v12058_v62 }
  0xa7   : > { %1440 = vmatpush.bf16.msrb.mxu0 %v12050_v1 }
  0xab   : > { %1441 = vmatpush.bf16.msrb.mxu0 %v12042_v4 }
  0xaf   : > { %1442 = vmatpush.bf16.msrb.mxu0 %v12034_v10 }
 0x10f   : > { %v1293_v13 = vpop.f32.mrf.mxu0 }
 0x110   : > { %v1294_v14 = vadd.f32 %v1293_v13, %v1150_v12 }
 0x112   : > { %v13808_v15 = vpack.c.bf16 %v1294_v14, %v1294_v14 }
 0x114   : > { %1430 = vmatmul.bf16.vlgmr.msra.gmra.mxu3 %v13808_v15  ;;  %1443 = vmatmul.bf16.vlgmr.msrb.gmra.mxu0 %v13808_v15 }
 0x117   : > { %v1295_v16 = vpop.f32.mrf.mxu0 }
 0x191   : > { %v13812_v17 = vpop.f32.mrf.mxu0 }
 0x192   : > { %16686 = vst [vmem:[#allocation30_spill] sm:$0xff] %v13812_v17 }
 0x197   : > { %v1431_v18 = vpop.f32.mrf.mxu3 }
 0x198   : > { %v13814_v19 = vpack.c.bf16 %v1431_v18, %v1431_v18 }
 0x199   : > { %v1446_v20 = vpop.f32.mrf.mxu0 }
 0x19a   : > { %16687 = vst [vmem:[#allocation31_spill] sm:$0xff] %v13814_v19  ;;  %1449 = vxpose.xlu0.c.b16.start.end [1/1] (short) (narrow) %v13814_v19, 48 }
 0x19f   : > { %v1433_v21 = vpop.f32.mrf.mxu3 }
 0x246   : > { %v1457_v28 = vpop.trf.xlu0 }
 0x247   : > { %v1465_v29 = vrot.slane %v1457_v28, 4  ;;  %v1471_v30 = vperm.slane %v1457_v28, %v13817_v26 }
 0x249   : > { %v1467_v31 = vsel %vm1466_vm0, 0, %v1465_v29  ;;  %v1476_v32 = vrot.slane %v1471_v30, 4  ;;  %v13824_v33 = vperm.slane %v1471_v30, %v13819_v27 }
 0x24a   : > { %v1475_v34 = vperm.slane %v1467_v31, %v13817_v26 }
 0x24b   : > { %v1477_v35 = vsel %vm1466_vm0, 0, %v1476_v32  ;;  %v1496_v36 = vrot.slane %v13824_v33, 4 }
 0x24c   : > { %v1485_v37 = vperm.slane %v1477_v35, %v13819_v27  ;;  %v13831_v38 = vperm.slane %v1475_v34, %v13819_v27  ;;  %v1486_v50 = vrot.slane %v1475_v34, 4 }
 0x24d   : > { %v1497_v39 = vsel %vm1466_vm0, 0, %v1496_v36 }
 0x24e   : > { %v1553_v40 = vshrl.u32 %v1497_v39, 16  ;;  %v1559_v41 = vshrl.u32 %v1485_v37, 16  ;;  %v1498_v42 = vrot.slane %v1485_v37, 4  ;;  %v1500_v43 = vrot.slane %v13831_v38, 4 }
 0x24f   : > { %v1557_v45 = vpack.i.b16 0, %v1485_v37  ;;  %v1569_v47 = vpack.i.b16 0, %v13831_v38  ;;  %v1487_v55 = vsel %vm1466_vm0, 0, %v1486_v50  ;;  %v1551_v10 = vpack.i.b16 0, %v1497_v39 }
 0x250   : > { %v1554_v44 = vpack.i.b16 0, %v1553_v40  ;;  %v1560_v46 = vpack.i.b16 0, %v1559_v41  ;;  %v13837_v48 = vsel %vm1466_vm0, 0, %v1498_v42  ;;  %v1501_v49 = vsel %vm1466_vm0, 0, %v1500_v43 }
 0x251   : > { %v1565_v51 = vshrl.u32 %v13837_v48, 16  ;;  %v1575_v54 = vpack.i.b16 0, %v1501_v49  ;;  %v1495_v60 = vperm.slane %v1487_v55, %v13819_v27  ;;  %v1577_v0 = vshrl.u32 %v1501_v49, 16 }
 0x252   : > { %12650 = vxpose.binary.xlu1.c.b16.start.end [1/2] (short) (narrow) %v1557_v45, %v1554_v44, 16  ;;  %v1571_v41 = vshrl.u32 %v13831_v38, 16  ;;  %v1563_v42 = vpack.i.b16 0, %v13837_v48  ;;  %v900_v44 = vlaneseq  ;;  %v1544_v45 = vpack.i.b16 0, %v13824_v33 }
 0x253   : > { %12653 = vxpose.binary.xlu2.c.b16.start.end [1/2] (short) (narrow) %v1569_v47, %v1560_v46, 16  ;;  %v1566_v53 = vpack.i.b16 0, %v1565_v51  ;;  %v1583_v1 = vshrl.u32 %v1495_v60, 16  ;;  %v1578_v5 = vpack.i.b16 0, %v1577_v0  ;;  %v1581_v6 = vpack.i.b16 0, %v1495_v60 }
 0x254   : > { %v1502_v11 = vrot.slane %v1495_v60, 4  ;;  %v1572_v46 = vpack.i.b16 0, %v1571_v41  ;;  %v13861_v49 = vand.u32 127, %v900_v44 }
 0x255   : > { %12656 = vxpose.binary.xlu0.c.b16.start.end [1/2] (short) (narrow) %v1575_v54, %v1566_v53, 16  ;;  %v1584_v7 = vpack.i.b16 0, %v1583_v1 }
 0x256   : > { %v1458_v56 = vpop.trf.xlu0  ;;  %v13850_v16 = vsel %vm1466_vm0, 0, %v1502_v11  ;;  %v11888_v51 = vadd.s32 4294967293, %v13861_v49  ;;  %v11887_v60 = vadd.s32 4294967294, %v13861_v49  ;;  %vm931_vm10 = vcmp.lt.s32.totalorder %v13861_v49, 16 }
 0x257   : > { %v1504_v57 = vrot.slane %v1458_v56, 4  ;;  %v1509_v58 = vperm.slane %v1458_v56, %v13817_v26  ;;  %v1589_v22 = vshrl.u32 %v13850_v16, 16  ;;  %v932_v41 = vsel %vm931_vm10, %v13861_v49, 16 }
 0x258   : > { %vm937_vm1 = vcmp.lt.s32.totalorder %v11888_v51, 16  ;;  %vm935_vm3 = vcmp.lt.s32.totalorder %v11887_v60, 16 }
 0x259   : > { %v1505_v59 = vsel %vm1466_vm0, 0, %v1504_v57  ;;  %v1519_v62 = vperm.slane %v1509_v58, %v13819_v27  ;;  %v1514_v12 = vrot.slane %v1509_v58, 4  ;;  %v1590_v28 = vpack.i.b16 0, %v1589_v22 }
 0x25a   : > { %v1513_v61 = vperm.slane %v1505_v59, %v13817_v26  ;;  %v938_v57 = vsel %vm937_vm1, %v11888_v51, 16  ;;  %v13865_v58 = vshrl.u32 %v900_v44, 7  ;;  %v11886_v59 = vadd.s32 4294967295, %v13861_v49 }
 0x25b   : > { %v1595_v2 = vshrl.u32 %v1519_v62, 16  ;;  %v1593_v3 = vpack.i.b16 0, %v1519_v62  ;;  %v1534_v13 = vrot.slane %v1519_v62, 4  ;;  %v1515_v18 = vsel %vm1466_vm0, 0, %v1514_v12 }
 0x25c   : > { %v1524_v63 = vrot.slane %v1513_v61, 4  ;;  %v1523_v23 = vperm.slane %v1515_v18, %v13819_v27  ;;  %v1529_v35 = vperm.slane %v1513_v61, %v13819_v27  ;;  %v13869_v62 = vadd.s32 16, %v938_v57 }
 0x25d   : > { %v1596_v8 = vpack.i.b16 0, %v1595_v2  ;;  %v1535_v20 = vsel %vm1466_vm0, 0, %v1534_v13  ;;  %vm933_vm2 = vcmp.lt.s32.totalorder %v11886_v59, 16  ;;  %v936_v0 = vsel %vm935_vm3, %v11887_v60, 16 }
 0x25e   : > { %v1525_v4 = vsel %vm1466_vm0, 0, %v1524_v63  ;;  %v1601_v24 = vshrl.u32 %v1535_v20, 16  ;;  %v1599_v29 = vpack.i.b16 0, %v1535_v20  ;;  %v1605_v31 = vpack.i.b16 0, %v1523_v23 }
 0x25f   : > { %v1533_v9 = vperm.slane %v1525_v4, %v13819_v27  ;;  %v1607_v36 = vshrl.u32 %v1523_v23, 16  ;;  %v1619_v37 = vshrl.u32 %v1529_v35, 16  ;;  %v1617_v40 = vpack.i.b16 0, %v1529_v35 }
 0x260   : > { %v1602_v30 = vpack.i.b16 0, %v1601_v24  ;;  %v1536_v47 = vrot.slane %v1523_v23, 4  ;;  %v1538_v61 = vrot.slane %v1529_v35, 4  ;;  %v934_v63 = vsel %vm933_vm2, %v11886_v59, 16 }
 0x261   : > { %v1540_v14 = vrot.slane %v1533_v9, 4  ;;  %v1608_v39 = vpack.i.b16 0, %v1607_v36  ;;  %v1620_v43 = vpack.i.b16 0, %v1619_v37  ;;  %v1631_v54 = vshrl.u32 %v1533_v9, 16 }
 0x262   : > { %12659 = vxpose.binary.xlu1.c.b16.start.end [1/2] (short) (narrow) %v1581_v6, %v1578_v5, 16  ;;  %v1537_v50 = vsel %vm1466_vm0, 0, %v1536_v47  ;;  %v1629_v55 = vpack.i.b16 0, %v1533_v9  ;;  %v13872_v1 = vadd.s32 8, %v13865_v58  ;;  %v13874_v2 = vadd.s32 16, %v934_v63 }
 0x263   : > { %12662 = vxpose.binary.xlu2.c.b16.start.end [1/2] (short) (narrow) %v1593_v3, %v1584_v7, 16  ;;  %v1541_v21 = vsel %vm1466_vm0, 0, %v1540_v14  ;;  %v1613_v53 = vshrl.u32 %v1537_v50, 16  ;;  %v1611_v38 = vpack.i.b16 0, %v1537_v50  ;;  %v1632_v56 = vpack.i.b16 0, %v1631_v54 }
 0x264   : > { %v1637_v25 = vshrl.u32 %v1541_v21, 16  ;;  %v1635_v32 = vpack.i.b16 0, %v1541_v21  ;;  %v13876_v3 = vadd.s32 16, %v936_v0  ;;  %v1539_v4 = vsel %vm1466_vm0, 0, %v1538_v61 }
 0x265   : > { %12665 = vxpose.binary.xlu0.c.b16.start.end [1/2] (short) (narrow) %v1551_v10, %v1596_v8, 16  ;;  %v1614_v48 = vpack.i.b16 0, %v1613_v53  ;;  %vm970_vm4 = vcmp.eq.s32.totalorder %v13869_v62, %v13865_v58  ;;  %vm960_vm5 = vcmp.eq.s32.totalorder %v13874_v2, %v13865_v58  ;;  %vm961_vm6 = vcmp.eq.s32.totalorder %v13874_v2, %v13872_v1 }
 0x266   : > { %v1638_v34 = vpack.i.b16 0, %v1637_v25  ;;  %vm965_vm7 = vcmp.eq.s32.totalorder %v13876_v3, %v13865_v58  ;;  %vm966_vm8 = vcmp.eq.s32.totalorder %v13876_v3, %v13872_v1  ;;  %v13410_v5 = vmov 0.0   ;;  %v1459_v10 = vpop.trf.xlu0 }
 0x267   : > { %v11896_v6 = vsel %vm960_vm5, 1.0, %v13410_v5  ;;  %v11897_v7 = vsel %vm961_vm6, 1.0, %v13410_v5  ;;  %v11901_v8 = vsel %vm965_vm7, 1.0, %v13410_v5  ;;  %v11902_v9 = vsel %vm966_vm8, 1.0, %v13410_v5 }
 0x268   : > { %v1080_v11 = vpack.c.bf16 %v11896_v6, %v11896_v6  ;;  %v1081_v12 = vpack.c.bf16 %v11897_v7, %v11897_v7  ;;  %v1085_v13 = vpack.c.bf16 %v11901_v8, %v11901_v8  ;;  %v1086_v14 = vpack.c.bf16 %v11902_v9, %v11902_v9 }
 0x269   : > { %v1625_v18 = vshrl.u32 %v1539_v4, 16  ;;  %vm971_vm9 = vcmp.eq.s32.totalorder %v13869_v62, %v13872_v1  ;;  %v1641_v24 = vpack.i.b16 0, %v1459_v10  ;;  %v11906_v25 = vsel %vm970_vm4, 1.0, %v13410_v5 }
 0x26a   : > { %v2553_v20 = vunpack.c.l.b16 %v1080_v11  ;;  %v2554_v21 = vunpack.c.l.b16 %v1081_v12  ;;  %v2604_v22 = vunpack.c.l.b16 %v1085_v13  ;;  %v2605_v23 = vunpack.c.l.b16 %v1086_v14 }
 0x26b   : > { %v11907_v35 = vsel %vm971_vm9, 1.0, %v13410_v5  ;;  %v1587_v36 = vpack.i.b16 0, %v13850_v16  ;;  %v13911_v37 = vadd.s32 16, %v13865_v58  ;;  %v13923_v44 = vadd.s32 16, %v932_v41 }
 0x26c   : > { %v13411_v47 = vmov 0.0|0.0  }
 0x26d   : > { %vm962_vm13 = vcmp.eq.s32.totalorder %v13874_v2, %v13911_v37  ;;  %vm967_vm15 = vcmp.eq.s32.totalorder %v13876_v3, %v13911_v37  ;;  %vm972_vm1 = vcmp.eq.s32.totalorder %v13869_v62, %v13911_v37  ;;  %v2498_v50 = vunpack.c.l.b16 %v13411_v47 }
 0x26e   : > { %vm957_vm4 = vcmp.eq.s32.totalorder %v13923_v44, %v13911_v37 }
 0x26f   : > { %v11893_v6 = vsel %vm957_vm4, 1.0, %v13410_v5  ;;  %v13959_v10 = vpack.c.b16 %v2498_v50, %v2498_v50 }
 0x271   : > { %16690 = vst [vmem:[#allocation34_spill] sm:$0xff] %v13959_v10 }
 0x272   : > { %12668 = vxpose.binary.xlu1.c.b16.start.end [1/2] (short) (narrow) %v1599_v29, %v1590_v28, 16  ;;  %v11890_v28 = vadd.s32 4294967291, %v13861_v49  ;;  %v13900_v29 = vpack.c.b16 %v2554_v21, %v2553_v20 }
 0x273   : > { %12671 = vxpose.binary.xlu2.c.b16.start.end [1/2] (short) (narrow) %v1605_v31, %v1602_v30, 16  ;;  %v13902_v30 = vpack.c.b16 %v2605_v23, %v2604_v22  ;;  %v11891_v31 = vadd.s32 4294967290, %v13861_v49  ;;  %v1077_v22 = vpack.c.bf16 %v11893_v6, %v11893_v6 }
 0x274   : > { %16688 = vst [vmem:[#allocation32_spill] sm:$0xff] %v13900_v29  ;;  %vm941_vm11 = vcmp.lt.s32.totalorder %v11890_v28, 16 }
 0x275   : > { %12689 = vxpose.binary.xlu0.c.b16.start.end [1/2] (short) (narrow) %v1638_v34, %v1635_v32, 16  ;;  %16689 = vst [vmem:[#allocation33_spill] sm:$0xff] %v13902_v30  ;;  %v1623_v32 = vpack.i.b16 0, %v1539_v4  ;;  %v1626_v34 = vpack.i.b16 0, %v1625_v18  ;;  %vm943_vm12 = vcmp.lt.s32.totalorder %v11891_v31, 16 }
 0x276   : > { %v944_v16 = vsel %vm943_vm12, %v11891_v31, 16 }
 0x282   : > { %12674 = vxpose.binary.xlu1.c.b16.start.end [1/2] (short) (narrow) %v1617_v40, %v1608_v39, 16  ;;  %v1090_v39 = vpack.c.bf16 %v11906_v25, %v11906_v25  ;;  %v13914_v40 = vadd.s32 24, %v13865_v58 }
 0x283   : > { %12677 = vxpose.binary.xlu2.c.b16.start.end [1/2] (short) (narrow) %v1563_v42, %v1620_v43, 16  ;;  %v1091_v42 = vpack.c.bf16 %v11907_v35, %v11907_v35  ;;  %v942_v43 = vsel %vm941_vm11, %v11890_v28, 16 }
 0x284   : > { %vm963_vm14 = vcmp.eq.s32.totalorder %v13874_v2, %v13914_v40  ;;  %vm968_vm2 = vcmp.eq.s32.totalorder %v13876_v3, %v13914_v40  ;;  %v2655_v51 = vunpack.c.l.b16 %v1090_v39  ;;  %v13931_v53 = vadd.s32 16, %v942_v43 }
 0x285   : > { %12692 = vxpose.binary.xlu0.c.b16.start.end [1/2] (short) (narrow) %v1544_v45, %v1572_v46, 16  ;;  %v11898_v45 = vsel %vm962_vm13, 1.0, %v13410_v5  ;;  %v1546_v46 = vshrl.u32 %v13824_v33, 16  ;;  %v2656_v54 = vunpack.c.l.b16 %v1091_v42  ;;  %vm973_vm3 = vcmp.eq.s32.totalorder %v13869_v62, %v13914_v40 }
 0x286   : > { %v11904_v57 = vsel %vm968_vm2, 1.0, %v13410_v5  ;;  %v1082_v33 = vpack.c.bf16 %v11898_v45, %v11898_v45  ;;  %vm958_vm5 = vcmp.eq.s32.totalorder %v13923_v44, %v13914_v40  ;;  %vm980_vm6 = vcmp.eq.s32.totalorder %v13931_v53, %v13865_v58 }
 0x287   : > { %vm981_vm7 = vcmp.eq.s32.totalorder %v13931_v53, %v13872_v1  ;;  %v1088_v61 = vpack.c.bf16 %v11904_v57, %v11904_v57  ;;  %v11894_v7 = vsel %vm958_vm5, 1.0, %v13410_v5  ;;  %v11909_v8 = vsel %vm973_vm3, 1.0, %v13410_v5 }
 0x288   : > { %v2555_v63 = vunpack.c.l.b16 %v1082_v33  ;;  %v11916_v11 = vsel %vm980_vm6, 1.0, %v13410_v5  ;;  %v11917_v12 = vsel %vm981_vm7, 1.0, %v13410_v5  ;;  %v13965_v14 = vpack.c.b16 %v2656_v54, %v2655_v51 }
 0x289   : > { %v2607_v9 = vunpack.c.l.b16 %v1088_v61  ;;  %v1078_v23 = vpack.c.bf16 %v11894_v7, %v11894_v7  ;;  %v1093_v25 = vpack.c.bf16 %v11909_v8, %v11909_v8  ;;  %v1548_v28 = vpack.i.b16 0, %v1546_v46 }
 0x28a   : > { %16692 = vst [vmem:[#allocation36_spill] sm:$0xff] %v13965_v14  ;;  %v1100_v31 = vpack.c.bf16 %v11916_v11, %v11916_v11  ;;  %v13976_v45 = vadd.s32 32, %v13865_v58  ;;  %v11889_v46 = vadd.s32 4294967292, %v13861_v49  ;;  %v11892_v51 = vadd.s32 4294967289, %v13861_v49 }
 0x28b   : > { %v2501_v39 = vunpack.c.l.b16 %v1078_v23  ;;  %v2658_v42 = vunpack.c.l.b16 %v1093_v25 }
 0x28c   : > { %v2757_v43 = vunpack.c.l.b16 %v1100_v31  ;;  %vm964_vm10 = vcmp.eq.s32.totalorder %v13874_v2, %v13976_v45  ;;  %vm969_vm11 = vcmp.eq.s32.totalorder %v13876_v3, %v13976_v45  ;;  %vm939_vm12 = vcmp.lt.s32.totalorder %v11889_v46, 16 }
 0x28d   : > { %v11905_v57 = vsel %vm969_vm11, 1.0, %v13410_v5  ;;  %vm945_vm13 = vcmp.lt.s32.totalorder %v11892_v51, 16 }
 0x28e   : > { %v1089_v2 = vpack.c.bf16 %v11905_v57, %v11905_v57  ;;  %v946_v3 = vsel %vm945_vm13, %v11892_v51, 16  ;;  %vm984_vm13 = vcmp.eq.s32.totalorder %v13931_v53, %v13976_v45 }
 0x292   : > { %12680 = vxpose.binary.xlu1.c.b16.start.end [1/2] (short) (narrow) %v1614_v48, %v1611_v38, 16  ;;  %v13933_v38 = vadd.s32 16, %v944_v16  ;;  %v11899_v48 = vsel %vm963_vm14, 1.0, %v13410_v5  ;;  %vm959_vm14 = vcmp.eq.s32.totalorder %v13923_v44, %v13976_v45 }
 0x293   : > { %12686 = vxpose.binary.xlu2.c.b16.start.end [1/2] (short) (narrow) %v1632_v56, %v1629_v55, 16  ;;  %v11903_v55 = vsel %vm967_vm15, 1.0, %v13410_v5  ;;  %v11908_v56 = vsel %vm972_vm1, 1.0, %v13410_v5  ;;  %v1083_v59 = vpack.c.bf16 %v11899_v48, %v11899_v48  ;;  %vm982_vm15 = vcmp.eq.s32.totalorder %v13931_v53, %v13911_v37 }
 0x294   : > { %v1087_v60 = vpack.c.bf16 %v11903_v55, %v11903_v55  ;;  %vm985_vm8 = vcmp.eq.s32.totalorder %v13933_v38, %v13865_v58  ;;  %vm986_vm9 = vcmp.eq.s32.totalorder %v13933_v38, %v13872_v1  ;;  %v11900_v55 = vsel %vm964_vm10, 1.0, %v13410_v5 }
 0x295   : > { %12703 = vxpose.binary.xlu0.c.b16.start [1/6] (short) (narrow) %v13900_v29, %v13902_v30, 16  ;;  %v2556_v0 = vunpack.c.l.b16 %v1083_v59  ;;  %v11921_v18 = vsel %vm985_vm8, 1.0, %v13410_v5  ;;  %v11922_v20 = vsel %vm986_vm9, 1.0, %v13410_v5  ;;  %v1084_v33 = vpack.c.bf16 %v11900_v55, %v11900_v55 }
 0x296   : > { %v2606_v4 = vunpack.c.l.b16 %v1087_v60  ;;  %v1106_v35 = vpack.c.bf16 %v11922_v20, %v11922_v20  ;;  %v940_v60 = vsel %vm939_vm12, %v11889_v46, 16  ;;  %vm983_vm1 = vcmp.eq.s32.totalorder %v13931_v53, %v13914_v40  ;;  %v12007_v46 = vld [vmem:[%s13705_s21 + $0x9c] sm:$0xf0] }
 0x297   : > { %v13963_v13 = vpack.c.b16 %v2556_v0, %v2555_v63  ;;  %v2557_v49 = vunpack.c.l.b16 %v1084_v33  ;;  %v13996_v61 = vadd.s32 16, %v940_v60  ;;  %v2608_v63 = vunpack.c.l.b16 %v1089_v2 }
 0x298   : > { %v13969_v21 = vpack.c.b16 %v2607_v9, %v2606_v4  ;;  %v2809_v50 = vunpack.c.l.b16 %v1106_v35  ;;  %v14002_v0 = vadd.s32 16, %v946_v3  ;;  %vm987_vm2 = vcmp.eq.s32.totalorder %v13933_v38, %v13911_v37 }
 0x299   : > { %16691 = vst [vmem:[#allocation35_spill] sm:$0xff] %v13963_v13  ;;  %v14006_v4 = vpack.c.b16 %v2557_v49, %v2557_v49  ;;  %vm975_vm3 = vcmp.eq.s32.totalorder %v13996_v61, %v13865_v58  ;;  %vm976_vm4 = vcmp.eq.s32.totalorder %v13996_v61, %v13872_v1  ;;  %v14012_v6 = vpack.c.b16 %v2608_v63, %v2608_v63 }
 0x29a   : > { %16693 = vst [vmem:[#allocation37_spill] sm:$0xff] %v13969_v21  ;;  %vm990_vm5 = vcmp.eq.s32.totalorder %v14002_v0, %v13865_v58  ;;  %vm991_vm6 = vcmp.eq.s32.totalorder %v14002_v0, %v13872_v1  ;;  %v11911_v7 = vsel %vm975_vm3, 1.0, %v13410_v5  ;;  %v11912_v8 = vsel %vm976_vm4, 1.0, %v13410_v5 }
 0x29b   : > { %16698 = vst [vmem:[#allocation42_spill] sm:$0xff] %v14006_v4  ;;  %v11926_v9 = vsel %vm990_vm5, 1.0, %v13410_v5  ;;  %v11927_v11 = vsel %vm991_vm6, 1.0, %v13410_v5  ;;  %vm988_vm7 = vcmp.eq.s32.totalorder %v13933_v38, %v13914_v40  ;;  %vm974_vm8 = vcmp.eq.s32.totalorder %v13869_v62, %v13976_v45 }
 0x29c   : > { %16699 = vst [vmem:[#allocation43_spill] sm:$0xff] %v14012_v6  ;;  %v1110_v20 = vpack.c.bf16 %v11926_v9, %v11926_v9  ;;  %v11895_v58 = vsel %vm959_vm14, 1.0, %v13410_v5  ;;  %v11918_v23 = vsel %vm982_vm15, 1.0, %v13410_v5  ;;  %v11919_v44 = vsel %vm983_vm1, 1.0, %v13410_v5 }
 0x29d   : > { %v11924_v31 = vsel %vm988_vm7, 1.0, %v13410_v5  ;;  %vm977_vm9 = vcmp.eq.s32.totalorder %v13996_v61, %v13911_v37  ;;  %vm978_vm10 = vcmp.eq.s32.totalorder %v13996_v61, %v13914_v40  ;;  %vm992_vm11 = vcmp.eq.s32.totalorder %v14002_v0, %v13911_v37 }
 0x29e   : > { %v2859_v25 = vunpack.c.l.b16 %v1110_v20  ;;  %v1108_v51 = vpack.c.bf16 %v11924_v31, %v11924_v31  ;;  %vm993_vm12 = vcmp.eq.s32.totalorder %v14002_v0, %v13914_v40  ;;  %v11913_v57 = vsel %vm977_vm9, 1.0, %v13410_v5 }
 0x29f   : > { %v11914_v2 = vsel %vm978_vm10, 1.0, %v13410_v5  ;;  %v11928_v60 = vsel %vm992_vm11, 1.0, %v13410_v5  ;;  %v11929_v49 = vsel %vm993_vm12, 1.0, %v13410_v5  ;;  %v1097_v3 = vpack.c.bf16 %v11913_v57, %v11913_v57 }
 0x2a0   : > { %v1098_v63 = vpack.c.bf16 %v11914_v2, %v11914_v2  ;;  %v2811_v37 = vunpack.c.l.b16 %v1108_v51  ;;  %vm989_vm14 = vcmp.eq.s32.totalorder %v13933_v38, %v13976_v45  ;;  %v11920_v31 = vsel %vm984_vm13, 1.0, %v13410_v5  ;;  %v12434_v2 = vld [vmem:[%s13705_s21 + $0x34] sm:$0xf] }
 0x2a1   : > { %v1104_v53 = vpack.c.bf16 %v11920_v31, %v11920_v31  ;;  %vm979_vm15 = vcmp.eq.s32.totalorder %v13996_v61, %v13976_v45  ;;  %vm994_vm1 = vcmp.eq.s32.totalorder %v14002_v0, %v13976_v45  ;;  %vm2525_vm3 = vcmask 269312  }
 0x2a2   : > { %12683 = vxpose.binary.xlu1.c.b16.start.end [1/2] (short) (narrow) %v1626_v34, %v1623_v32, 16  ;;  %v1101_v32 = vpack.c.bf16 %v11917_v12, %v11917_v12  ;;  %v1105_v34 = vpack.c.bf16 %v11921_v18, %v11921_v18  ;;  %v1095_v12 = vpack.c.bf16 %v11911_v7, %v11911_v7  ;;  %v2709_v40 = vunpack.c.l.b16 %v1098_v63  ;;  %v11947_v63 = vld [vmem:[%s13705_s21 + $0x24] sm:$0xf0] }
 0x2a3   : > { %12695 = vxpose.binary.xlu2.c.b16.start.end [1/2] (short) (narrow) %v1587_v36, %v1641_v24, 16  ;;  %v1092_v24 = vpack.c.bf16 %v11908_v56, %v11908_v56  ;;  %v2500_v36 = vunpack.c.l.b16 %v1077_v22  ;;  %v1096_v18 = vpack.c.bf16 %v11912_v8, %v11912_v8  ;;  %v1111_v22 = vpack.c.bf16 %v11927_v11, %v11927_v11 }
 0x2a4   : > { %v2758_v16 = vunpack.c.l.b16 %v1101_v32  ;;  %v2808_v47 = vunpack.c.l.b16 %v1105_v34  ;;  %v2706_v1 = vunpack.c.l.b16 %v1095_v12  ;;  %v11910_v32 = vsel %vm974_vm8, 1.0, %v13410_v5 }
 0x2a5   : > { %12704 = vxpose.binary.xlu0.c.b16.cont [2/6] (short) (narrow) %v13963_v13, %v13969_v21, 16  ;;  %v2657_v41 = vunpack.c.l.b16 %v1092_v24  ;;  %v13984_v54 = vpack.c.b16 %v2501_v39, %v2500_v36  ;;  %v2707_v24 = vunpack.c.l.b16 %v1096_v18  ;;  %v2860_v62 = vunpack.c.l.b16 %v1111_v22  ;;  %v12449_v36 = vld [vmem:[%s13705_s21 + $0xac] sm:$0xf]  ;;  %v12019_v39 = vld [vmem:[%s13705_s21 + $0xb4] sm:$0xf0] }
 0x2a6   : > { %v13989_v56 = vpack.c.b16 %v2758_v16, %v2757_v43  ;;  %v13992_v59 = vpack.c.b16 %v2809_v50, %v2808_v47  ;;  %v12022_v43 = vor.u32 %v12449_v36, %v12019_v39  ;;  %v12446_v16 = vld [vmem:[%s13705_s21 + $0x94] sm:$0xf]  ;;  %v1103_v47 = vpack.c.bf16 %v11919_v44, %v11919_v44  ;;  %v12443_v36 = vld [vmem:[%s13705_s21 + $0x7c] sm:$0xf]  ;;  %v11995_v39 = vld [vmem:[%s13705_s21 + $0x84] sm:$0xf0] }
 0x2a7   : > { %16694 = vst [vmem:[#allocation38_spill] sm:$0xff] %v13984_v54  ;;  %v13986_v48 = vpack.c.b16 %v2658_v42, %v2657_v41  ;;  %v14050_v34 = vpack.c.b16 %v2707_v24, %v2706_v1  ;;  %v14052_v35 = vpack.c.b16 %v2860_v62, %v2859_v25  ;;  %v1079_v41 = vpack.c.bf16 %v11895_v58, %v11895_v58 }
 0x2a8   : > { %16696 = vst [vmem:[#allocation40_spill] sm:$0xff] %v13989_v56  ;;  %v1102_v42 = vpack.c.bf16 %v11918_v23, %v11918_v23  ;;  %1297 = vmatpush.bf16.msra.mxu1 %v12022_v43  ;;  %v12010_v55 = vor.u32 %v12446_v16, %v12007_v46  ;;  %v1094_v33 = vpack.c.bf16 %v11910_v32, %v11910_v32  ;;  %v2760_v9 = vunpack.c.l.b16 %v1103_v47  ;;  %v11983_v43 = vld [vmem:[%s13705_s21 + $0x6c] sm:$0xf0]  ;;  %v12437_v46 = vld [vmem:[%s13705_s21 + $0x4c] sm:$0xf] }
 0x2a9   : > { %16695 = vst [vmem:[#allocation39_spill] sm:$0xff] %v13986_v48  ;;  %v1112_v7 = vpack.c.bf16 %v11928_v60, %v11928_v60  ;;  %v1113_v12 = vpack.c.bf16 %v11929_v49, %v11929_v49  ;;  %v2708_v18 = vunpack.c.l.b16 %v1097_v3  ;;  %v2502_v22 = vunpack.c.l.b16 %v1079_v41  ;;  %v11971_v47 = vld [vmem:[%s13705_s21 + $0x54] sm:$0xf0]  ;;  %v11959_v60 = vld [vmem:[%s13705_s21 + $0x3c] sm:$0xf0] }
 0x2aa   : > { %16697 = vst [vmem:[#allocation41_spill] sm:$0xff] %v13992_v59  ;;  %v2759_v8 = vunpack.c.l.b16 %v1102_v42  ;;  %v2659_v58 = vunpack.c.l.b16 %v1094_v33  ;;  %v11925_v32 = vsel %vm989_vm14, 1.0, %v13410_v5  ;;  %v11998_v41 = vor.u32 %v12443_v36, %v11995_v39  ;;  %v12440_v42 = vld [vmem:[%s13705_s21 + $0x64] sm:$0xf]  ;;  %v12431_v3 = vld [vmem:[%s13705_s21 + $0x1c] sm:$0xf] }
 0x2ab   : > { %16700 = vst [vmem:[#allocation44_spill] sm:$0xff] %v14050_v34  ;;  %v2861_v20 = vunpack.c.l.b16 %v1112_v7  ;;  %v2862_v1 = vunpack.c.l.b16 %v1113_v12  ;;  %v14070_v23 = vpack.c.b16 %v2709_v40, %v2708_v18  ;;  %v14078_v44 = vpack.c.b16 %v2502_v22, %v2502_v22 }
 0x2ac   : > { %16701 = vst [vmem:[#allocation45_spill] sm:$0xff] %v14052_v35  ;;  %1298 = vmatpush.bf16.msra.mxu1 %v12010_v55  ;;  %v14074_v25 = vpack.c.b16 %v2760_v9, %v2759_v8  ;;  %v1109_v16 = vpack.c.bf16 %v11925_v32, %v11925_v32  ;;  %v11986_v38 = vor.u32 %v12440_v42, %v11983_v43  ;;  %v12428_v8 = vld [vmem:[%s13705_s21 + $0x4] sm:$0xf]  ;;  %v11935_v9 = vld [vmem:[%s13705_s21 + $0xc] sm:$0xf0]  ;;  %v11930_v18 = vsel %vm994_vm1, 1.0, %v13410_v5 }
 0x2ad   : > { %16702 = vst [vmem:[#allocation46_spill] sm:$0xff] %v14070_v23  ;;  %v14072_v24 = vpack.c.b16 %v2862_v1, %v2861_v20  ;;  %v11974_v55 = vor.u32 %v12437_v46, %v11971_v47  ;;  %v11962_v49 = vor.u32 %v12434_v2, %v11959_v60  ;;  %v11950_v7 = vor.u32 %v12431_v3, %v11947_v63  ;;  %v12025_v47 = vld [vmem:[%s13705_s21 + $0xb0] sm:$0xf]  ;;  %v12013_v2 = vld [vmem:[%s13705_s21 + $0x98] sm:$0xf] }
 0x2ae   : > { %16704 = vst [vmem:[#allocation48_spill] sm:$0xff] %v14074_v25  ;;  %v2812_v51 = vunpack.c.l.b16 %v1109_v16  ;;  %v1114_v20 = vpack.c.bf16 %v11930_v18, %v11930_v18  ;;  %v12448_v60 = vld [vmem:[%s13705_s21 + $0xa0] sm:$0xf0]  ;;  %v12442_v18 = vld [vmem:[%s13705_s21 + $0x70] sm:$0xf0]  ;;  %vm3200_vm4 = vcmask 261120  }
 0x2af   : > { %16703 = vst [vmem:[#allocation47_spill] sm:$0xff] %v14072_v24  ;;  %vm3238_vm5 = vcmask 1043456   ;;  %vm3222_vm6 = vcmask 64512   ;;  %vm8695_vm7 = vcmask 236544   ;;  %vm11095_vm8 = vcmask 1041408  }
 0x2b0   : > { %16706 = vst [vmem:[#allocation50_spill] sm:$0xff] %v14078_v44  ;;  %1299 = vmatpush.bf16.msra.mxu1 %v11998_v41  ;;  %v14104_v33 = vpack.c.b16 %v2812_v51, %v2812_v51  ;;  %vm11091_vm9 = vcmask 31744   ;;  %vm11017_vm10 = vcmask 539648   ;;  %vm11019_vm11 = vcmask 809984  }
 0x2b1   : > { %vm11002_vm12 = vcmask 785408  }
 0x2b2   : > { %1659 = vxpose.xlu1.c.b16.start.end [1/1] (short) (narrow) %v1548_v28, 16  ;;  %v11923_v28 = vsel %vm987_vm2, 1.0, %v13410_v5  ;;  %16709 = vst [vmem:[#allocation53_spill] sm:$0xff] %v14104_v33  ;;  %vm2529_vm2 = vcmask 1040384  }
 0x2b3   : > { %12698 = vxpose.binary.xlu2.c.b16.start [1/6] (short) (narrow) %v13965_v14, %v13959_v10, 16  ;;  %v1107_v50 = vpack.c.bf16 %v11923_v28, %v11923_v28  ;;  %v14080_v28 = vpack.c.b16 %v2659_v58, %v2659_v58  ;;  %v2863_v58 = vunpack.c.l.b16 %v1114_v20 }
 0x2b4   : > { %1300 = vmatpush.bf16.msra.mxu1 %v11986_v38 }
 0x2b5   : > { %12705 = vxpose.binary.xlu0.c.b16.end [3/6] (short) (narrow) %v14006_v4, %v14012_v6, 16  ;;  %v2810_v11 = vunpack.c.l.b16 %v1107_v50  ;;  %16707 = vst [vmem:[#allocation51_spill] sm:$0xff] %v14080_v28  ;;  %v2761_v50 = vunpack.c.l.b16 %v1104_v53  ;;  %v14133_v36 = vpack.c.b16 %v2863_v58, %v2863_v58  ;;  %v11977_v58 = vld [vmem:[%s13705_s21 + $0x50] sm:$0xf] }
 0x2b7   : > { %v14076_v62 = vpack.c.b16 %v2811_v37, %v2810_v11  ;;  %v14102_v57 = vpack.c.b16 %v2761_v50, %v2761_v50  ;;  %v11938_v11 = vor.u32 %v12428_v8, %v11935_v9  ;;  %v11915_v37 = vsel %vm979_vm15, 1.0, %v13410_v5  ;;  %16711 = vst [vmem:[#allocation55_spill] sm:$0xff] %v14133_v36  ;;  %v12451_v50 = vld [vmem:[%s13705_s21 + $0xb8] sm:$0xf0]  ;;  %v12445_v8 = vld [vmem:[%s13705_s21 + $0x88] sm:$0xf0] }
 0x2b8   : > { %1301 = vmatpush.bf16.msra.mxu1 %v11974_v55  ;;  %v1099_v40 = vpack.c.bf16 %v11915_v37, %v11915_v37  ;;  %v12026_v51 = vor.u32 %v12451_v50, %v12025_v47  ;;  %v11989_v37 = vld [vmem:[%s13705_s21 + $0x68] sm:$0xf]  ;;  %v12439_v47 = vld [vmem:[%s13705_s21 + $0x58] sm:$0xf0] }
 0x2b9   : > { %16705 = vst [vmem:[#allocation49_spill] sm:$0xff] %v14076_v62  ;;  %v11978_v50 = vor.u32 %v12439_v47, %v11977_v58 }
 0x2ba   : > { %16708 = vst [vmem:[#allocation52_spill] sm:$0xff] %v14102_v57  ;;  %v2710_v22 = vunpack.c.l.b16 %v1099_v40  ;;  %1310 = vmatpush.bf16.msra.mxu2 %v12026_v51  ;;  %v11990_v40 = vor.u32 %v12442_v18, %v11989_v37  ;;  %v11965_v51 = vld [vmem:[%s13705_s21 + $0x38] sm:$0xf] }
 0x2bc   : > { %1302 = vmatpush.bf16.msra.mxu1 %v11962_v49  ;;  %v14131_v32 = vpack.c.b16 %v2710_v22, %v2710_v22  ;;  %v12014_v49 = vor.u32 %v12448_v60, %v12013_v2  ;;  %v12436_v2 = vld [vmem:[%s13705_s21 + $0x40] sm:$0xf0] }
 0x2bd   : > { %v11966_v60 = vor.u32 %v12436_v2, %v11965_v51 }
 0x2be   : > { %16710 = vst [vmem:[#allocation54_spill] sm:$0xff] %v14131_v32  ;;  %1311 = vmatpush.bf16.msra.mxu2 %v12014_v49  ;;  %v11953_v49 = vld [vmem:[%s13705_s21 + $0x20] sm:$0xf] }
 0x2c0   : > { %1303 = vmatpush.bf16.msra.mxu1 %v11950_v7  ;;  %v12001_v7 = vld [vmem:[%s13705_s21 + $0x80] sm:$0xf] }
 0x2c1   : > { %v12002_v9 = vor.u32 %v12445_v8, %v12001_v7  ;;  %v12433_v7 = vld [vmem:[%s13705_s21 + $0x28] sm:$0xf0] }
 0x2c2   : > { %12708 = vxpose.binary.xlu1.c.b16.start [1/6] (short) (narrow) %v13989_v56, %v13992_v59, 16  ;;  %v11954_v17 = vor.u32 %v12433_v7, %v11953_v49 }
 0x2c3   : > { %12699 = vxpose.binary.xlu2.c.b16.cont [2/6] (short) (narrow) %v13986_v48, %v13984_v54, 16 }
 0x2c4   : > { %1304 = vmatpush.bf16.msra.mxu1 %v11938_v11  ;;  %1312 = vmatpush.bf16.msra.mxu2 %v12002_v9 }
 0x2c7   : > { %1305 = vmatmul.bf16.vlgmr.msra.gmra.mxu1 %v13790_v52 }
 0x2c8   : > { %1313 = vmatpush.bf16.msra.mxu2 %v11990_v40  ;;  %v11941_v40 = vld [vmem:[%s13705_s21 + $0x8] sm:$0xf] }
 0x2cc   : > { %1314 = vmatpush.bf16.msra.mxu2 %v11978_v50 }
 0x2d0   : > { %1315 = vmatpush.bf16.msra.mxu2 %v11966_v60 }
 0x2d2   : > { %12709 = vxpose.binary.xlu1.c.b16.cont [2/6] (short) (narrow) %v14074_v25, %v14076_v62, 16 }
 0x2d3   : > { %12700 = vxpose.binary.xlu2.c.b16.end [3/6] (short) (narrow) %v14080_v28, %v14078_v44, 16 }
 0x2d4   : > { %1316 = vmatpush.bf16.msra.mxu2 %v11954_v17 }
 0x2e2   : > { %12710 = vxpose.binary.xlu1.c.b16.end [3/6] (short) (narrow) %v14102_v57, %v14104_v33, 16 }
 0x2e3   : > { %12713 = vxpose.binary.xlu2.c.b16.start [1/6] (short) (narrow) %v14052_v35, %v14050_v34, 16 }
 0x2f3   : > { %12714 = vxpose.binary.xlu2.c.b16.cont [2/6] (short) (narrow) %v14072_v24, %v14070_v23, 16 }
 0x2f4   : > { %v14119_v12 = vpop.trf.xlu2 }
 0x2fc   : > { %v14129_v1 = vpop.trf.xlu2 }
 0x2fe   : > { %v12651_v31 = vpop.trf.xlu1 }
 0x301   : > { %v12657_v61 = vpop.trf.xlu0 }
 0x302   : > { %v2233_v18 = vrot.slane %v12657_v61, 4 }
 0x303   : > { %12715 = vxpose.binary.xlu2.c.b16.end [3/6] (short) (narrow) %v14133_v36, %v14131_v32, 16  ;;  %v12430_v36 = vld [vmem:[%s13705_s21 + $0x10] sm:$0xf0]  ;;  %s13420_s21 = smov 33  }
 0x304   : > { %v14137_v39 = vpop.trf.xlu2  ;;  %v11942_v58 = vor.u32 %v12430_v36, %v11941_v40  ;;  %v2234_v50 = vsel %vm1466_vm0, %v2233_v18, %v12651_v31 }
 0x306   : > { %v14139_v5 = vpop.trf.xlu1  ;;  %1317 = vmatpush.bf16.msra.mxu2 %v11942_v58 }
 0x307   : > { %v2171_v60 = vrot.slane %v14139_v5, 4 }
 0x309   : > { %v14141_v45 = vpop.trf.xlu0  ;;  %1318 = vmatmul.bf16.vlgmr.msra.gmra.mxu2 %v13790_v52 }
 0x30c   : > { %v12664_v0 = vpop.trf.xlu2 }
 0x30e   : > { %v14143_v41 = vpop.trf.xlu1 }
 0x311   : > { %v14145_v42 = vpop.trf.xlu0 }
 0x314   : > { %v14147_v43 = vpop.trf.xlu2 }
 0x316   : > { %v12661_v53 = vpop.trf.xlu1 }
 0x317   : > { %v2183_v33 = vrot.slane %v12661_v53, 4  ;;  %v14187_v53 = vperm.slane %v2234_v50, %v13817_v26 }
 0x319   : > { %v14149_v16 = vpop.trf.xlu0  ;;  %v2184_v49 = vsel %vm1466_vm0, %v2183_v33, %v14129_v1 }
 0x31a   : > { %v14195_v5 = vperm.slane %v2184_v49, %v13817_v26 }
 0x31c   : > { %v12673_v38 = vpop.trf.xlu2  ;;  %v2209_v40 = vrot.slane %v14195_v5, 4 }
 0x31d   : > { %v2283_v57 = vrot.slane %v12673_v38, 4  ;;  %v2239_v38 = vrot.slane %v14137_v39, 4 }
 0x31e   : > { %v12669_v46 = vpop.trf.xlu1 }
 0x31f   : > { %v2245_v51 = vrot.slane %v12669_v46, 4  ;;  %v2284_v17 = vsel %vm1466_vm0, %v2283_v57, %v12664_v0 }
 0x320   : > { %v14198_v33 = vperm.slane %v2284_v17, %v13817_v26 }
 0x321   : > { %v14153_v55 = vpop.trf.xlu0  ;;  %v2246_v31 = vsel %vm1466_vm0, %v2245_v51, %v14143_v41 }
 0x322   : > { %v2250_v41 = vperm.slane %v2246_v31, %v13817_v26 }
 0x324   : > { %v14157_v3 = vpop.trf.xlu2 }
 0x326   : > { %v14159_v63 = vpop.trf.xlu1 }
 0x329   : > { %v14163_v11 = vpop.trf.xlu0 }
 0x32c   : > { %v12679_v20 = vpop.trf.xlu2 }
 0x32d   : > { %v2177_v61 = vrot.slane %v12679_v20, 4 }
 0x32e   : > { %v12675_v22 = vpop.trf.xlu1 }
 0x32f   : > { %v2178_v1 = vsel %vm1466_vm0, %v2177_v61, %v14149_v16  ;;  %v2339_v0 = vrot.slane %v12675_v22, 4  ;;  %v2301_v16 = vrot.slane %v14153_v55, 4  ;;  %v16532_v61 = vmov 0  }
 0x330   : > { %v2182_v22 = vperm.slane %v2178_v1, %v13817_v26  ;;  %v14218_v31 = vsel %vm2529_vm2, 65535, %v16532_v61 }
 0x331   : > { %v12693_v8 = vpop.trf.xlu0  ;;  %v2340_v51 = vsel %vm1466_vm0, %v2339_v0, %v14145_v42 }
 0x332   : > { %v2240_v46 = vsel %vm1466_vm0, %v2239_v38, %v12693_v8  ;;  %v2195_v1 = vrot.slane %v2182_v22, 4  ;;  %v14224_v0 = vperm.slane %v2340_v51, %v13817_v26 }
 0x333   : > { %v2244_v8 = vperm.slane %v2240_v46, %v13817_v26 }
 0x334   : > { %v14173_v9 = vpop.trf.xlu2 }
 0x335   : > { %v2295_v49 = vrot.slane %v14173_v9, 4  ;;  %v2265_v9 = vrot.slane %v2244_v8, 4 }
 0x336   : > { %v14175_v37 = vpop.trf.xlu1 }
 0x337   : > { %v2296_v57 = vsel %vm1466_vm0, %v2295_v49, %v14175_v37 }
 0x339   : > { %v12694_v2 = vpop.trf.xlu0 }
 0x33a   : > { %v2172_v36 = vsel %vm1466_vm0, %v2171_v60, %v12694_v2  ;;  %v2263_v60 = vrot.slane %v2250_v41, 4 }
 0x33b   : > { %v2176_v39 = vperm.slane %v2172_v36, %v13817_v26 }
 0x33c   : > { %v14179_v47 = vpop.trf.xlu2 }
 0x33d   : > { %v2197_v17 = vrot.slane %v2176_v39, 4  ;;  %v2351_v46 = vrot.slane %v14179_v47, 4 }
 0x33e   : > { %v12681_v32 = vpop.trf.xlu1 }
 0x33f   : > { %v2289_v7 = vrot.slane %v12681_v32, 4  ;;  %v2352_v37 = vsel %vm1466_vm0, %v2351_v46, %v14157_v3 }
 0x341   : > { %v2290_v36 = vsel %vm1466_vm0, %v2289_v7, %v14159_v63  ;;  %v2198_v63 = vsel %vm1466_vm0, %v2182_v22, %v2197_v17  ;;  %v2300_v17 = vperm.slane %v2296_v57, %v13817_v26 }
 0x342   : > { %v2294_v7 = vperm.slane %v2290_v36, %v13817_v26 }
 0x344   : > { %v12696_v20 = vpop.trf.xlu2  ;;  %v2307_v36 = vrot.slane %v2294_v7, 4 }
 0x345   : > { %v2398_v18 = vperm.slane %v12696_v20, %v13817_v26 }
 0x346   : > { %v12682_v50 = vpop.trf.xlu1 }
 0x347   : > { %v2404_v2 = vperm.slane %v2398_v18, %v13819_v27  ;;  %v2345_v32 = vrot.slane %v12682_v50, 4  ;;  %v2399_v47 = vrot.slane %v2398_v18, 4 }
 0x349   : > { %v2478_v38 = vpack.i.b16 0, %v2404_v2  ;;  %v2479_v42 = vshrl.u32 %v2404_v2, 16  ;;  %v2409_v20 = vrot.slane %v2404_v2, 4  ;;  %v2346_v50 = vsel %vm1466_vm0, %v2345_v32, %v14147_v43 }
 0x34a   : > { %v2264_v32 = vsel %vm1466_vm0, %v2263_v60, %v2244_v8  ;;  %v14244_v22 = vperm.slane %v2346_v50, %v13817_v26  ;;  %v2266_v8 = vsel %vm1466_vm0, %v2250_v41, %v2265_v9  ;;  %v2206_v60 = vperm.slane %v2198_v63, %v13819_v27 }
 0x34b   : > { %v2533_v61 = vand.u32 %v14218_v31, %v2478_v38  ;;  %v2480_v52 = vpack.i.b16 0, %v2479_v42  ;;  %v14235_v51 = vsel %vm1466_vm0, 0, %v2409_v20  ;;  %v2196_v38 = vsel %vm1466_vm0, %v2195_v1, %v2176_v39 }
 0x34c   : > { %v12697_v58 = vpop.trf.xlu2  ;;  %v2482_v43 = vpack.i.b16 0, %v14235_v51  ;;  %v2400_v57 = vsel %vm1466_vm0, 0, %v2399_v47  ;;  %v2365_v1 = vrot.slane %v14224_v0, 4  ;;  %v14262_v46 = vperm.slane %v2264_v32, %v13819_v27 }
 0x34d   : > { %v2189_v2 = vrot.slane %v12697_v58, 4  ;;  %2540 = vmatpush.bf16.msrb.mxu1 %v2533_v61  ;;  %v2584_v55 = vand.u32 %v14218_v31, %v2480_v52  ;;  %v2356_v61 = vperm.slane %v2352_v37, %v13817_v26  ;;  %v14265_v20 = vperm.slane %v2266_v8, %v13819_v27 }
 0x34e   : > { %v12684_v49 = vpop.trf.xlu1  ;;  %v2635_v58 = vand.u32 %v14218_v31, %v2482_v43  ;;  %v2321_v9 = vrot.slane %v2300_v17, 4  ;;  %v2308_v43 = vsel %vm1466_vm0, %v2307_v36, %v14198_v33 }
 0x34f   : > { %v2190_v18 = vsel %vm1466_vm0, %v2189_v2, %v14141_v45  ;;  %v2302_v52 = vsel %vm1466_vm0, %v2301_v16, %v12684_v49  ;;  %2591 = vmatpush.bf16.msrb.mxu2 %v2584_v55  ;;  %v2202_v45 = vperm.slane %v2196_v38, %v13819_v27  ;;  %v2363_v16 = vrot.slane %v14244_v22, 4 }
 0x350   : > { %v2194_v39 = vperm.slane %v2190_v18, %v13817_v26  ;;  %v2306_v3 = vperm.slane %v2302_v52, %v13817_v26  ;;  %2642 = vmatpush.bf16.msrb.mxu3 %v2635_v58  ;;  %v2225_v2 = vrot.slane %v2206_v60, 4  ;;  %v2377_v37 = vrot.slane %v2356_v61, 4 }
 0x351   : > { %v2221_v38 = vrot.slane %v2202_v45, 4  ;;  %v16712_v52 = vrot.slane %v14163_v11, 4 }
 0x352   : > { %v2207_v55 = vrot.slane %v2194_v39, 4  ;;  %v2210_v42 = vsel %vm1466_vm0, %v2194_v39, %v2209_v40  ;;  %v2319_v41 = vrot.slane %v2306_v3, 4  ;;  %v14272_v40 = vperm.slane %v2400_v57, %v13819_v27 }
 0x353   : > { %v2218_v47 = vperm.slane %v2210_v42, %v13819_v27  ;;  %v16713_v39 = vrot.slane %v14198_v33, 4  ;;  %v2483_v42 = vshrl.u32 %v14235_v51, 16 }
 0x354   : > { %v2320_v50 = vsel %vm1466_vm0, %v2319_v41, %v2300_v17  ;;  %v2208_v63 = vsel %vm1466_vm0, %v2207_v55, %v14195_v5  ;;  %v2364_v17 = vsel %vm1466_vm0, %v2363_v16, %v14224_v0  ;;  %v2314_v41 = vperm.slane %v2308_v43, %v13819_v27 }
 0x355   : > { %v2214_v32 = vperm.slane %v2208_v63, %v13819_v27  ;;  %v2326_v18 = vperm.slane %v2320_v50, %v13819_v27  ;;  %v14281_v5 = vsel %vm1466_vm0, %v2218_v47, %v2225_v2  ;;  %v2310_v36 = vsel %vm1466_vm0, %v2294_v7, %v16713_v39 }
 0x356   : > { %v12685_v49 = vpop.trf.xlu1  ;;  %v2223_v57 = vrot.slane %v2218_v47, 4  ;;  %v2322_v16 = vsel %vm1466_vm0, %v2306_v3, %v2321_v9  ;;  %v2370_v11 = vperm.slane %v2364_v17, %v13819_v27  ;;  %v2486_v33 = vpack.i.b16 0, %v14272_v40 }
 0x357   : > { %v2358_v58 = vsel %vm1466_vm0, %v16712_v52, %v12685_v49  ;;  %v2219_v8 = vrot.slane %v2214_v32, 4  ;;  %v14293_v0 = vsel %vm1466_vm0, %v2214_v32, %v2221_v38  ;;  %v2331_v47 = vrot.slane %v2326_v18, 4 }
 0x358   : > { %v2362_v55 = vperm.slane %v2358_v58, %v13817_v26  ;;  %v2487_v51 = vshrl.u32 %v14272_v40, 16  ;;  %v2275_v2 = vrot.slane %v14262_v46, 4  ;;  %v14305_v43 = vperm.slane %v2310_v36, %v13819_v27 }
 0x359   : > { %v14298_v50 = vsel %vm1466_vm0, %v2219_v8, %v2202_v45  ;;  %v14308_v3 = vsel %vm1466_vm0, %v2223_v57, %v2206_v60  ;;  %v2279_v9 = vrot.slane %v14265_v20, 4  ;;  %v14312_v45 = vperm.slane %v2322_v16, %v13819_v27 }
 0x35a   : > { %v2375_v7 = vrot.slane %v2362_v55, 4  ;;  %v2378_v63 = vsel %vm1466_vm0, %v2362_v55, %v2377_v37  ;;  %v2484_v32 = vpack.i.b16 0, %v2483_v42  ;;  %v2333_v38 = vrot.slane %v2314_v41, 4 }
 0x35b   : > { %v2411_v49 = vrot.slane %v14272_v40, 4  ;;  %v14317_v17 = vperm.slane %v2378_v63, %v13819_v27  ;;  %v2389_v58 = vrot.slane %v2370_v11, 4  ;;  %v2332_v60 = vsel %vm1466_vm0, %v2331_v47, %v2314_v41 }
 0x35c   : > { %v2376_v37 = vsel %vm1466_vm0, %v2375_v7, %v2356_v61  ;;  %v14322_v39 = vand.u32 %v14218_v31, %v2486_v33  ;;  %v14324_v36 = vpack.i.b16 0, %v2487_v51  ;;  %v2366_v57 = vsel %vm1466_vm0, %v14244_v22, %v2365_v1  ;;  %v14337_v1 = vpop.trf.xlu0 }
 0x35d   : > { %v2382_v52 = vperm.slane %v2376_v37, %v13819_v27  ;;  %v16714_v61 = vrot.slane %v14119_v12, 4  ;;  %v2334_v55 = vsel %vm1466_vm0, %v2326_v18, %v2333_v38  ;;  %v2686_v33 = vand.u32 %v14218_v31, %v2484_v32  ;;  %16715 = vst [vmem:[#allocation56_spill] sm:$0xff] %v14337_v1 }
 0x35e   : > { %v1667_v8 = vpop.trf.xlu1  ;;  %v2335_v63 = vrot.slane %v14312_v45, 4  ;;  %v2449_v22 = vshrl.u32 %v2332_v60, 16  ;;  %v14340_v12 = vperm.slane %v2366_v57, %v13819_v27  ;;  %v2391_v18 = vrot.slane %v14317_v17, 4 }
 0x35f   : > { %v2228_v40 = vsel %vm1466_vm0, %v16714_v61, %v1667_v8  ;;  %v2390_v42 = vsel %vm1466_vm0, %v2382_v52, %v2389_v58  ;;  %v2387_v16 = vrot.slane %v2382_v52, 4  ;;  %v16716_v51 = vrot.slane %v14187_v53, 4 }
 0x360   : > { %v2232_v7 = vperm.slane %v2228_v40, %v13817_v26  ;;  %v2455_v41 = vpack.i.b16 %v2390_v42, %v2334_v55  ;;  %v2457_v58 = vshrl.u32 %v2334_v55, 16  ;;  %v14350_v61 = vsel %vm1466_vm0, 0, %v2411_v49 }
 0x361   : > { %v2388_v47 = vsel %vm1466_vm0, %v2387_v16, %v2370_v11  ;;  %v2788_v11 = vand.u32 %v14218_v31, %v14324_v36  ;;  %v2425_v16 = vshrl.u32 %v14293_v0, 16 }
 0x362   : > { %v2252_v38 = vsel %vm1466_vm0, %v16716_v51, %v2232_v7  ;;  %v2253_v37 = vrot.slane %v2232_v7, 4  ;;  %2643 = vmatpush.bf16.msrb.mxu3 %v2455_v41  ;;  %v2447_v32 = vpack.i.b16 %v2388_v47, %v2332_v60  ;;  %v2450_v52 = vshrl.u32 %v2388_v47, 16 }
 0x363   : > { %v2258_v8 = vperm.slane %v2252_v38, %v13819_v27  ;;  %v2336_v60 = vsel %vm1466_vm0, %v2335_v63, %v14305_v43  ;;  %v2417_v7 = vshrl.u32 %v14298_v50, 16  ;;  %v2458_v51 = vshrl.u32 %v2390_v42, 16 }
 0x364   : > { %v2254_v57 = vsel %vm1466_vm0, %v14187_v53, %v2253_v37  ;;  %2541 = vmatpush.bf16.msrb.mxu1 %v2447_v32  ;;  %v2451_v40 = vpack.i.b16 %v2450_v52, %v2449_v22  ;;  %v2392_v53 = vsel %vm1466_vm0, %v2391_v18, %v14340_v12  ;;  %v2433_v22 = vshrl.u32 %v14308_v3, 16  ;;  %v14367_v37 = vpop.trf.xlu2 }
 0x365   : > { %v2276_v55 = vsel %vm1466_vm0, %v2275_v2, %v2258_v8  ;;  %v2277_v41 = vrot.slane %v2258_v8, 4  ;;  %v2262_v36 = vperm.slane %v2254_v57, %v13819_v27  ;;  %16717 = vst [vmem:[#allocation57_spill] sm:$0xff] %v14367_v37  ;;  %v2441_v57 = vshrl.u32 %v14281_v5, 16 }
 0x366   : > { %2592 = vmatpush.bf16.msrb.mxu2 %v2451_v40  ;;  %v2415_v49 = vpack.i.b16 %v2276_v55, %v14298_v50  ;;  %v2418_v47 = vshrl.u32 %v2276_v55, 16  ;;  %v2466_v40 = vshrl.u32 %v2392_v53, 16 }
 0x367   : > { %v2278_v63 = vsel %vm1466_vm0, %v14262_v46, %v2277_v41  ;;  %v2280_v2 = vsel %vm1466_vm0, %v2279_v9, %v2262_v36  ;;  %v2281_v38 = vrot.slane %v2262_v36, 4  ;;  %v14375_v46 = vld [vmem:[%s13714_s18] sm:$0x7]  ;;  %v2465_v41 = vshrl.u32 %v2336_v60, 16  ;;  %s13414_s18 = smov 96  }
 0x368   : > { %2542 = vmatpush.bf16.msrb.mxu1 %v2415_v49  ;;  %v2419_v32 = vpack.i.b16 %v2418_v47, %v2417_v7  ;;  %v2423_v50 = vpack.i.b16 %v2278_v63, %v14293_v0  ;;  %v2426_v52 = vshrl.u32 %v2278_v63, 16  ;;  %v2431_v8 = vpack.i.b16 %v2280_v2, %v14308_v3  ;;  %v1306_v47 = vpop.f32.mrf.mxu1 }
 0x369   : > { %v2434_v18 = vshrl.u32 %v2280_v2, 16  ;;  %v2282_v42 = vsel %vm1466_vm0, %v14265_v20, %v2281_v38  ;;  %v1151_v9 = vperm.slane %v14375_v46, 1  ;;  %v2459_v3 = vpack.i.b16 %v2458_v51, %v2457_v58 }
 0x36a   : > { %2593 = vmatpush.bf16.msrb.mxu2 %v2419_v32  ;;  %2644 = vmatpush.bf16.msrb.mxu3 %v2423_v50  ;;  %v2427_v55 = vpack.i.b16 %v2426_v52, %v2425_v16  ;;  %v2439_v0 = vpack.i.b16 %v2282_v42, %v14281_v5  ;;  %v2442_v7 = vshrl.u32 %v2282_v42, 16  ;;  %v2490_v36 = vpack.i.b16 0, %v14350_v61 }
 0x36b   : > { %12091 = vmatmul.msk.bf16.vlgmr.msrb.gmra.mxu1 %vm2525_vm3, %v14367_v37  ;;  %v2435_v20 = vpack.i.b16 %v2434_v18, %v2433_v22  ;;  %v2463_v5 = vpack.i.b16 %v2392_v53, %v2336_v60  ;;  %v1307_v16 = vadd.f32 %v1306_v47, %v1151_v9  ;;  %v2467_v63 = vpack.i.b16 %v2466_v40, %v2465_v41 }
 0x36c   : > { %2693 = vmatpush.bf16.msra.mxu1 %v2686_v33  ;;  %v14382_v33 = vpop.trf.xlu0  ;;  %v2443_v49 = vpack.i.b16 %v2442_v7, %v2441_v57  ;;  %v2337_v51 = vrot.slane %v14305_v43, 4  ;;  %v2491_v2 = vshrl.u32 %v14350_v61, 16  ;;  %v14403_v43 = vpop.trf.xlu2  ;;  %v1152_v57 = vperm.slane %v14375_v46, 2 }
 0x36d   : > { %16718 = vst [vmem:[#allocation58_spill] sm:$0xff] %v14382_v33  ;;  %12093 = vmatmul.msk.bf16.vlgmr.msrb.gmra.mxu3 %vm2525_vm3, %v14337_v1  ;;  %12092 = vmatmul.msk.bf16.vlgmr.msrb.gmra.mxu2 %vm2525_vm3, %v14382_v33  ;;  %v14390_v58 = vpack.c.bf16 %v1307_v16, %v1307_v16 }
 0x36e   : > { %2744 = vmatpush.bf16.msra.mxu2 %v14322_v39  ;;  %2795 = vmatpush.bf16.msra.mxu3 %v2788_v11  ;;  %v2393_v39 = vrot.slane %v14340_v12, 4  ;;  %v2839_v11 = vand.u32 %v14218_v31, %v2490_v36  ;;  %v14393_v22 = vpop.trf.xlu1  ;;  %v2338_v12 = vsel %vm1466_vm0, %v14312_v45, %v2337_v51  ;;  %v2492_v50 = vpack.i.b16 0, %v2491_v2  ;;  %16720 = vst [vmem:[#allocation60_spill] sm:$0xff] %v14403_v43 }
 0x36f   : > { %16719 = vst [vmem:[#allocation59_spill] sm:$0xff] %v14393_v22  ;;  %v3205_v53 = vsel %vm3200_vm4, %v14390_v58, 0  ;;  %v2473_v61 = vshrl.u32 %v2338_v12, 16 }
 0x370   : > { %2694 = vmatpush.bf16.msra.mxu1 %v2459_v3  ;;  %v2394_v60 = vsel %vm1466_vm0, %v14317_v17, %v2393_v39  ;;  %v1308_v32 = vpop.f32.mrf.mxu1  ;;  %v2890_v17 = vand.u32 %v14218_v31, %v2492_v50 }
 0x371   : > { %v2471_v38 = vpack.i.b16 %v2394_v60, %v2338_v12  ;;  %v2474_v18 = vshrl.u32 %v2394_v60, 16 }
 0x372   : > { %2745 = vmatpush.bf16.msra.mxu2 %v2463_v5  ;;  %2796 = vmatpush.bf16.msra.mxu3 %v2467_v63 }
 0x373   : > { %v2475_v45 = vpack.i.b16 %v2474_v18, %v2473_v61 }
 0x374   : > { %2695 = vmatpush.bf16.msra.mxu1 %v2427_v55 }
 0x376   : > { %2746 = vmatpush.bf16.msra.mxu2 %v2431_v8  ;;  %2797 = vmatpush.bf16.msra.mxu3 %v2435_v20  ;;  %v14406_v52 = vpop.trf.xlu1 }
 0x377   : > { %16721 = vst [vmem:[#allocation61_spill] sm:$0xff] %v14406_v52 }
 0x378   : > { %2846 = vmatpush.bf16.msrb.mxu1 %v2839_v11 }
 0x37a   : > { %3214 = vmatpush.bf16.xpose.msrb.mxu2 %v3205_v53 }
 0x37b   : > { %12094 = vmatmul.msk.bf16.vlgmr.msra.gmra.mxu1 %vm2525_vm3, %v14403_v43 }
 0x37c   : > { %2847 = vmatpush.bf16.msrb.mxu1 %v2471_v38 }
 0x37d   : > { %12096 = vmatmul.msk.bf16.vlgmr.msra.gmra.mxu3 %vm2525_vm3, %v14406_v52 }
 0x380   : > { %2848 = vmatpush.bf16.msrb.mxu1 %v2439_v0 }
 0x384   : > { %2897 = vmatpush.bf16.msra.mxu1 %v2890_v17  ;;  %v14412_v8 = vpop.trf.xlu2 }
 0x385   : > { %16722 = vst [vmem:[#allocation62_spill] sm:$0xff] %v14412_v8  ;;  %12095 = vmatmul.msk.bf16.vlgmr.msra.gmra.mxu2 %vm2525_vm3, %v14412_v8 }
 0x388   : > { %2898 = vmatpush.bf16.msra.mxu1 %v2475_v45 }
 0x38b   : > { %12097 = vmatmul.msk.bf16.vlgmr.msrb.gmra.mxu1 %vm2525_vm3, %v14393_v22 }
 0x38c   : > { %2899 = vmatpush.bf16.msra.mxu1 %v2443_v49  ;;  %v14420_v42 = vpop.trf.xlu2  ;;  %v1319_v9 = vpop.f32.mrf.mxu2 }
 0x38d   : > { %16723 = vst [vmem:[#allocation63_spill] sm:$0xff] %v14420_v42  ;;  %v1320_v40 = vadd.f32 %v1319_v9, %v1152_v57 }
 0x38f   : > { %v14425_v55 = vpack.c.bf16 %v1320_v40, %v1320_v40 }
 0x391   : > { %16724 = vst [vmem:[#allocation64_spill] sm:$0xff] %v14425_v55  ;;  %v3240_v0 = vsel %vm3238_vm5, %v14425_v55, 0 }
 0x392   : > { %3249 = vmatpush.bf16.msrb.mxu3 %v3240_v0 }
 0x394   : > { %v1321_v7 = vpop.f32.mrf.mxu2 }
 0x395   : > { %12099 = vmatmul.msk.bf16.vlgmr.msrb.gmra.mxu2 %vm3200_vm4, %v13808_v15 }
 0x39b   : > { %12098 = vmatmul.msk.bf16.vlgmr.msra.gmra.mxu1 %vm2525_vm3, %v14420_v42 }
 0x3e8   : > { %v2544_v3 = vpop.f32.mrf.mxu1 }
 0x3e9   : > { %2905 = vxpose.xlu1.b32.start.end [1/1] (short) (narrow) %v2544_v3, 8 }
 0x3f0   : > { %v2546_v20 = vpop.f32.mrf.mxu1  ;;  %v2646_v41 = vpop.f32.mrf.mxu3 }
 0x3f1   : > { %2969 = vxpose.xlu1.b32.start.end [1/1] (short) (narrow) %v2646_v41, 8  ;;  %v2595_v36 = vpop.f32.mrf.mxu2 }
 0x3f2   : > { %2937 = vxpose.xlu0.b32.start.end [1/1] (short) (narrow) %v2595_v36, 8 }
 0x3f8   : > { %v2648_v49 = vpop.f32.mrf.mxu3  ;;  %v2697_v47 = vpop.f32.mrf.mxu1 }
 0x3f9   : > { %3001 = vxpose.xlu1.b32.start.end [1/1] (short) (narrow) %v2697_v47, 8  ;;  %v2597_v46 = vpop.f32.mrf.mxu2 }
 0x400   : > { %v2699_v5 = vpop.f32.mrf.mxu1  ;;  %v2799_v16 = vpop.f32.mrf.mxu3 }
 0x401   : > { %3065 = vxpose.xlu0.b32.start.end [1/1] (short) (narrow) %v2799_v16, 8 }
 0x408   : > { %v2748_v63 = vpop.f32.mrf.mxu2  ;;  %v2801_v39 = vpop.f32.mrf.mxu3 }
 0x409   : > { %v2850_v11 = vpop.f32.mrf.mxu1  ;;  %3033 = vxpose.xlu0.b32.start.end [1/1] (short) (narrow) %v2748_v63, 8 }
 0x40a   : > { %3097 = vxpose.xlu1.b32.start.end [1/1] (short) (narrow) %v2850_v11, 8 }
 0x410   : > { %v2750_v51 = vpop.f32.mrf.mxu2 }
 0x411   : > { %v2852_v60 = vpop.f32.mrf.mxu1 }
 0x418   : > { %v3216_v53 = vpop.f32.mrf.mxu2 }
 0x419   : > { %v2901_v2 = vpop.f32.mrf.mxu1 }
 0x41a   : > { %3129 = vxpose.xlu0.b32.start.end [1/1] (short) (narrow) %v2901_v2, 8 }
 0x420   : > { %v3218_v12 = vpop.f32.mrf.mxu2 }
 0x421   : > { %v2903_v38 = vpop.f32.mrf.mxu1 }
 0x464   : > { %4096 = vrot.lane.b32.xlu1 %v13814_v19, %s13413_s0 }
 0x48d   : > { %v2921_v32 = vpop.trf.xlu1 }
 0x495   : > { %v2985_v17 = vpop.trf.xlu1 }
 0x496   : > { %v2953_v50 = vpop.trf.xlu0  ;;  %v3161_v40 = vrot.slane %v2985_v17, 4 }
 0x498   : > { %v3163_v41 = vsel %vm1466_vm0, %v3161_v40, %v2921_v32  ;;  %v13152_v32 = vld [vmem:[%s13684_s16] ss:$0 sm:$0xff] }
 0x499   : > { %v3167_v46 = vperm.slane %v3163_v41, %v13817_v26 }
 0x49d   : > { %v3017_v61 = vpop.trf.xlu1 }
 0x49e   : > { %v3168_v57 = vrot.slane %v3017_v61, 4 }
 0x4a0   : > { %v3169_v0 = vsel %vm1466_vm0, %v3168_v57, %v2953_v50 }
 0x4a1   : > { %v3173_v3 = vperm.slane %v3169_v0, %v13817_v26 }
 0x4a3   : > { %v3186_v5 = vrot.slane %v3173_v3, 4 }
 0x4a5   : > { %v3081_v18 = vpop.trf.xlu0  ;;  %v3187_v11 = vsel %vm1466_vm0, %v3186_v5, %v3167_v46 }
 0x4a6   : > { %v3191_v2 = vperm.slane %v3187_v11, %v13819_v27 }
 0x4ad   : > { %v3049_v45 = vpop.trf.xlu0 }
 0x4ae   : > { %v3113_v9 = vpop.trf.xlu1 }
 0x4af   : > { %v3174_v7 = vrot.slane %v3113_v9, 4 }
 0x4b1   : > { %v3175_v49 = vsel %vm1466_vm0, %v3174_v7, %v3049_v45 }
 0x4b2   : > { %v3179_v63 = vperm.slane %v3175_v49, %v13817_v26 }
 0x4be   : > { %v3145_v20 = vpop.trf.xlu0 }
 0x4bf   : > { %v3180_v36 = vrot.slane %v3145_v20, 4 }
 0x4c1   : > { %v3181_v47 = vsel %vm1466_vm0, %v3180_v36, %v3081_v18 }
 0x4c2   : > { %v3185_v16 = vperm.slane %v3181_v47, %v13817_v26 }
 0x4c4   : > { %v3192_v39 = vrot.slane %v3185_v16, 4 }
 0x4c6   : > { %v3193_v51 = vsel %vm1466_vm0, %v3192_v39, %v3179_v63 }
 0x4c7   : > { %v3197_v60 = vperm.slane %v3193_v51, %v13819_v27 }
 0x4c9   : > { %v3198_v12 = vrot.slane %v3197_v60, 4 }
 0x4cb   : > { %v3199_v38 = vsel %vm1466_vm0, %v3198_v12, %v3191_v2 }
 0x4cc   : > { %v3217_v50 = vadd.f32 %v3216_v53, %v3199_v38 }
 0x4ce   : > { %v3220_v17 = vmul.f32 0.17677669, %v3217_v50 }
 0x4d0   : > { %v3221_v18 = vadd.f32 %v13152_v32, %v3220_v17 }
 0x4d2   : > { %v3223_v61 = vsel %vm3222_vm6, %v3221_v18, -inf }
 0x4d3   : > { %3224 = vmax.xlane.f32.xlu2 %v3223_v61 }
 0x4d6   : > { %v4097_v45 = vpop.permute.xlu1 %4096 }
 0x4fc   : > { %4099 = vxpose.xlu2.c.b16.start.end [1/1] (short) (narrow) %v4097_v45, 48 }
 0x546   : > { %v3225_v57 = vpop.xlane.xlu2 %3224 }
 0x547   : > { %v3226_v9 = vsub.f32 %v3221_v18, %v3225_v57 }
 0x549   : > { %v3227_v40 = vmul.f32 1.442695, %v3226_v9 }
 0x54b   : > { %13159 = vpow2.f32 %v3227_v40 }
 0x551   : > { %v13160_v0 = vpop.eup %13159 }
 0x552   : > { %v3229_v7 = vsel %vm3222_vm6, %v13160_v0, 0.0 }
 0x553   : > { %3230 = vadd.xlane.f32.xlu0 %v3229_v7 }
 0x59d   : > { %v4107_v3 = vpop.trf.xlu2 }
 0x59e   : > { %v4115_v38 = vrot.slane %v4107_v3, 4  ;;  %v4120_v18 = vperm.slane %v4107_v3, %v13817_v26 }
 0x5a0   : > { %v4116_v57 = vsel %vm1466_vm0, 0, %v4115_v38  ;;  %v14466_v40 = vperm.slane %v4120_v18, %v13819_v27 }
 0x5a2   : > { %v4145_v3 = vrot.slane %v14466_v40, 4 }
 0x5ad   : > { %v4108_v20 = vpop.trf.xlu2 }
 0x5ae   : > { %v4158_v53 = vperm.slane %v4108_v20, %v13817_v26  ;;  %v4153_v49 = vrot.slane %v4108_v20, 4  ;;  %v4124_v20 = vperm.slane %v4116_v57, %v13817_v26 }
 0x5b0   : > { %v14448_v41 = vperm.slane %v4158_v53, %v13819_v27  ;;  %v4154_v46 = vsel %vm1466_vm0, 0, %v4153_v49  ;;  %v4163_v49 = vrot.slane %v4158_v53, 4 }
 0x5b1   : > { %v4162_v16 = vperm.slane %v4154_v46, %v13817_v26 }
 0x5b2   : > { %v4183_v36 = vrot.slane %v14448_v41, 4  ;;  %v4242_v2 = vshrl.u32 %v14448_v41, 16 }
 0x5b3   : > { %v14455_v11 = vperm.slane %v4162_v16, %v13819_v27  ;;  %v4173_v61 = vrot.slane %v4162_v16, 4  ;;  %v14475_v16 = vsel %vm1466_vm0, 0, %v4145_v3 }
 0x5b4   : > { %v4184_v47 = vsel %vm1466_vm0, 0, %v4183_v36  ;;  %v4243_v32 = vpack.i.b16 0, %v4242_v2 }
 0x5b5   : > { %v4246_v5 = vpack.i.b16 0, %v4184_v47  ;;  %v4187_v51 = vrot.slane %v14455_v11, 4  ;;  %v4174_v7 = vsel %vm1466_vm0, 0, %v4173_v61  ;;  %v4248_v3 = vshrl.u32 %v4184_v47, 16 }
 0x5b6   : > { %v4182_v36 = vperm.slane %v4174_v7, %v13819_v27  ;;  %v4264_v7 = vpack.i.b16 0, %v14455_v11 }
 0x5b7   : > { %v14460_v12 = vsel %vm1466_vm0, 0, %v4187_v51  ;;  %v4198_v51 = vpack.i.b16 0, %v14475_v16 }
 0x5b8   : > { %v4270_v50 = vpack.i.b16 0, %v14460_v12  ;;  %v4278_v46 = vshrl.u32 %v4182_v36, 16 }
 0x5bd   : > { %v4109_v63 = vpop.trf.xlu2 }
 0x5be   : > { %v4288_v39 = vpack.i.b16 0, %v4109_v63 }
 0x5c0   : > { %12721 = vxpose.binary.xlu2.c.b16.start.end [1/2] (short) (narrow) %v4246_v5, %v4288_v39, 16  ;;  %v4164_v5 = vsel %vm1466_vm0, 0, %v4163_v49  ;;  %v14491_v49 = vperm.slane %v4124_v20, %v13819_v27 }
 0x5c1   : > { %v14479_v39 = vperm.slane %v4164_v5, %v13819_v27 }
 0x5c3   : > { %v4185_v53 = vrot.slane %v14479_v39, 4  ;;  %v4252_v5 = vpack.i.b16 0, %v14479_v39 }
 0x5c6   : > { %v3231_v60 = vpop.xlane.xlu0 %3230 }
 0x5c7   : > { %13161 = vrcp.f32 %v3231_v60  ;;  %v4279_v60 = vpack.i.b16 0, %v4278_v46  ;;  %v4249_v46 = vpack.i.b16 0, %v4248_v3 }
 0x5cd   : > { %v13162_v17 = vpop.eup %13161 }
 0x5ce   : > { %v3233_v45 = vmul.f32 %v13162_v17, %v13160_v0  ;;  %v4135_v0 = vrot.slane %v4124_v20, 4 }
 0x5d0   : > { %12748 = vxpose.binary.xlu2.c.b16.start.end [1/2] (short) (narrow) %v4270_v50, %v4243_v32, 16  ;;  %v3234_v9 = vpack.c.bf16 %v3233_v45, %v3233_v45  ;;  %v4136_v63 = vsel %vm1466_vm0, 0, %v4135_v0  ;;  %v4186_v32 = vsel %vm1466_vm0, 0, %v4185_v53  ;;  %v4149_v0 = vrot.slane %v14491_v49, 4 }
 0x5d1   : > { %v14483_v2 = vperm.slane %v4136_v63, %v13819_v27  ;;  %v4258_v50 = vpack.i.b16 0, %v4186_v32  ;;  %v4260_v17 = vshrl.u32 %v4186_v32, 16 }
 0x5d2   : > { %3255 = vxpose.xlu1.c.b16.start.end [1/1] (short) (narrow) %v3234_v9, 16  ;;  %12100 = vmatmul.msk.bf16.vlgmr.msrb.gmra.mxu3 %vm3222_vm6, %v3234_v9  ;;  %v4150_v63 = vsel %vm1466_vm0, 0, %v4149_v0 }
 0x5d3   : > { %v4151_v38 = vrot.slane %v14483_v2, 4  ;;  %v4261_v45 = vpack.i.b16 0, %v4260_v17  ;;  %v4228_v53 = vpack.i.b16 0, %v14483_v2 }
 0x5d5   : > { %v4152_v61 = vsel %vm1466_vm0, 0, %v4151_v38  ;;  %12718 = vxpose.binary.xlu0.c.b16.start.end [1/2] (short) (narrow) %v4261_v45, %v4258_v50, 16  ;;  %v4125_v38 = vrot.slane %v4120_v18, 4  ;;  %v4189_v50 = vrot.slane %v4182_v36, 4  ;;  %v4240_v18 = vpack.i.b16 0, %v14448_v41 }
 0x5d6   : > { %v4236_v57 = vshrl.u32 %v4152_v61, 16  ;;  %v4194_v41 = vshrl.u32 %v14466_v40, 16 }
 0x5d7   : > { %v4126_v32 = vsel %vm1466_vm0, 0, %v4125_v38  ;;  %v4190_v45 = vsel %vm1466_vm0, 0, %v4189_v50  ;;  %v5568_v38 = vunpack.c.l.b16 %v14390_v58 }
 0x5d8   : > { %v4237_v9 = vpack.i.b16 0, %v4236_v57  ;;  %v14499_v20 = vperm.slane %v4126_v32, %v13819_v27 }
 0x5da   : > { %v4147_v47 = vrot.slane %v14499_v20, 4  ;;  %v4206_v32 = vshrl.u32 %v14499_v20, 16 }
 0x5dc   : > { %v4148_v17 = vsel %vm1466_vm0, 0, %v4147_v47  ;;  %v14510_v47 = vpack.c.b16 %v5568_v38, %v5568_v38  ;;  %v4207_v50 = vpack.i.b16 0, %v4206_v32 }
 0x5dd   : > { %v4210_v57 = vpack.i.b16 0, %v4148_v17  ;;  %v4212_v3 = vshrl.u32 %v4148_v17, 16  ;;  %v4234_v17 = vpack.i.b16 0, %v4152_v61  ;;  %v4218_v61 = vshrl.u32 %v14491_v49, 16 }
 0x5de   : > { %16726 = vst [vmem:[#allocation66_spill] sm:$0xff] %v14510_v47 }
 0x5df   : > { %v4213_v0 = vpack.i.b16 0, %v4212_v3 }
 0x5e0   : > { %12754 = vxpose.binary.xlu2.c.b16.start.end [1/2] (short) (narrow) %v4198_v51, %v4279_v60, 16  ;;  %v4224_v51 = vshrl.u32 %v4150_v63, 16 }
 0x5e2   : > { %v4225_v60 = vpack.i.b16 0, %v4224_v51 }
 0x5e5   : > { %12724 = vxpose.binary.xlu0.c.b16.start.end [1/2] (short) (narrow) %v4252_v5, %v4249_v46, 16  ;;  %v4272_v46 = vshrl.u32 %v14460_v12, 16  ;;  %v4195_v12 = vpack.i.b16 0, %v4194_v41 }
 0x5e7   : > { %v4273_v51 = vpack.i.b16 0, %v4272_v46 }
 0x5f0   : > { %12763 = vxpose.binary.xlu2.c.b16.start.end [1/2] (short) (narrow) %v4264_v7, %v4237_v9, 16  ;;  %v4284_v9 = vshrl.u32 %v4190_v45, 16 }
 0x5f2   : > { %v4285_v7 = vpack.i.b16 0, %v4284_v9 }
 0x5f5   : > { %12742 = vxpose.binary.xlu0.c.b16.start.end [1/2] (short) (narrow) %v4210_v57, %v4285_v7, 16 }
 0x600   : > { %12772 = vxpose.binary.xlu2.c.b16.start.end [1/2] (short) (narrow) %v4228_v53, %v4225_v60, 16  ;;  %v4276_v60 = vpack.i.b16 0, %v4182_v36  ;;  %v4222_v36 = vpack.i.b16 0, %v4150_v63 }
 0x605   : > { %12745 = vxpose.binary.xlu0.c.b16.start.end [1/2] (short) (narrow) %v4240_v18, %v4213_v0, 16  ;;  %v4219_v18 = vpack.i.b16 0, %v4218_v61 }
 0x615   : > { %12751 = vxpose.binary.xlu0.c.b16.start.end [1/2] (short) (narrow) %v4276_v60, %v4273_v51, 16 }
 0x625   : > { %12760 = vxpose.binary.xlu0.c.b16.start.end [1/2] (short) (narrow) %v4234_v17, %v4207_v50, 16 }
 0x635   : > { %12769 = vxpose.binary.xlu0.c.b16.start.end [1/2] (short) (narrow) %v4222_v36, %v4195_v12, 16 }
 0x645   : > { %4434 = vxpose.xlu0.c.b16.start.end [1/1] (short) (narrow) %v4219_v18, 16  ;;  %v4200_v18 = vshrl.u32 %v14475_v16, 16 }
 0x655   : > { %v14506_v5 = vpop.f32.mrf.mxu3 }
 0x656   : > { %16725 = vst [vmem:[#allocation65_spill] sm:$0xff] %v14506_v5 }
 0x65d   : > { %v3253_v53 = vpop.f32.mrf.mxu3 }
 0x669   : > { %5570 = vrot.lane.b32.xlu2 %v14510_v47, %s13414_s18 }
 0x671   : > { %6397 = vrot.lane.b32.xlu2 %v13814_v19, %s13415_s6  ;;  %s16994_s6 = sld [smem:[#allocation13_spill]] }
 0x677   : > { %s16998_s23 = sand.u32 1, %s16994_s6  }
 0x67e   : > { %v3263_v58 = vpop.trf.xlu1 }
 0x67f   : > { %v3274_v57 = vperm.slane %v3263_v58, %v13817_v26 }
 0x681   : > { %v3280_v9 = vperm.slane %v3274_v57, %v13819_v27  ;;  %v3275_v38 = vrot.slane %v3274_v57, 4  ;;  %v4282_v57 = vpack.i.b16 0, %v4190_v45  ;;  %v14530_v45 = vpop.trf.xlu0 }
 0x683   : > { %v3292_v7 = vshrl.u32 %v3280_v9, 16  ;;  %v3290_v3 = vpack.i.b16 0, %v3280_v9  ;;  %v3285_v46 = vrot.slane %v3280_v9, 4  ;;  %v3276_v32 = vsel %vm1466_vm0, 0, %v3275_v38 }
 0x684   : > { %v3284_v50 = vperm.slane %v3276_v32, %v13819_v27  ;;  %v4230_v38 = vshrl.u32 %v14483_v2, 16  ;;  %v4216_v32 = vpack.i.b16 0, %v14491_v49  ;;  %v5563_v49 = vunpack.c.l.b16 %v13808_v15 }
 0x685   : > { %v3293_v0 = vpack.i.b16 0, %v3292_v7  ;;  %v3286_v51 = vsel %vm1466_vm0, 0, %v3285_v46  ;;  %v4201_v46 = vpack.i.b16 0, %v4200_v18 }
 0x686   : > { %v3298_v60 = vshrl.u32 %v3286_v51, 16  ;;  %v3296_v53 = vpack.i.b16 0, %v3286_v51  ;;  %v3304_v17 = vshrl.u32 %v3284_v50, 16  ;;  %v3302_v41 = vpack.i.b16 0, %v3284_v50 }
 0x687   : > { %12727 = vxpose.binary.xlu1.c.b16.start.end [1/2] (short) (narrow) %v3293_v0, %v3290_v3, 16  ;;  %v3287_v36 = vrot.slane %v3284_v50, 4  ;;  %v4254_v3 = vshrl.u32 %v14479_v39, 16  ;;  %v4204_v51 = vpack.i.b16 0, %v14499_v20  ;;  %v4231_v39 = vpack.i.b16 0, %v4230_v38 }
 0x688   : > { %v3299_v63 = vpack.i.b16 0, %v3298_v60  ;;  %v3305_v12 = vpack.i.b16 0, %v3304_v17  ;;  %v4266_v60 = vshrl.u32 %v14455_v11, 16 }
 0x689   : > { %v3288_v58 = vsel %vm1466_vm0, 0, %v3287_v36  ;;  %v4255_v0 = vpack.i.b16 0, %v4254_v3  ;;  %v14532_v50 = vpop.trf.xlu0 }
 0x68a   : > { %v3310_v9 = vshrl.u32 %v3288_v58, 16  ;;  %v3308_v7 = vpack.i.b16 0, %v3288_v58 }
 0x68c   : > { %v3311_v61 = vpack.i.b16 0, %v3310_v9  ;;  %v14545_v9 = vpack.c.b16 %v5563_v49, %v5563_v49 }
 0x68e   : > { %16727 = vst [vmem:[#allocation67_spill] sm:$0xff] %v14545_v9 }
 0x691   : > { %v14534_v16 = vpop.trf.xlu0 }
 0x697   : > { %12730 = vxpose.binary.xlu1.c.b16.start.end [1/2] (short) (narrow) %v3299_v63, %v3296_v53, 16  ;;  %v4192_v53 = vpack.i.b16 0, %v14466_v40  ;;  %v4267_v63 = vpack.i.b16 0, %v4266_v60 }
 0x699   : > { %v14536_v17 = vpop.trf.xlu0 }
 0x6a7   : > { %12733 = vxpose.binary.xlu1.c.b16.start.end [1/2] (short) (narrow) %v3305_v12, %v3302_v41, 16  ;;  %v12722_v41 = vpop.trf.xlu2  ;;  %v14538_v12 = vpop.trf.xlu0 }
 0x6af   : > { %v14540_v36 = vpop.trf.xlu2  ;;  %v14543_v58 = vpop.trf.xlu0 }
 0x6b7   : > { %12736 = vxpose.binary.xlu1.c.b16.start.end [1/2] (short) (narrow) %v3311_v61, %v3308_v7, 16  ;;  %v14549_v7 = vpop.trf.xlu2  ;;  %v14551_v3 = vpop.trf.xlu0 }
 0x6c7   : > { %12739 = vxpose.binary.xlu1.c.b16.start.end [1/2] (short) (narrow) %v4282_v57, %v4255_v0, 16  ;;  %v14553_v57 = vpop.trf.xlu2 }
 0x6d7   : > { %12757 = vxpose.binary.xlu1.c.b16.start.end [1/2] (short) (narrow) %v4204_v51, %v4201_v46, 16  ;;  %v14556_v51 = vpop.trf.xlu0 }
 0x6e7   : > { %12766 = vxpose.binary.xlu1.c.b16.start.end [1/2] (short) (narrow) %v4192_v53, %v4267_v63, 16 }
 0x6f7   : > { %12775 = vxpose.binary.xlu1.c.b16.start.end [1/2] (short) (narrow) %v4216_v32, %v4231_v39, 16  ;;  %v14561_v32 = vperm.slane %v12722_v41, %v13817_v26  ;;  %v14563_v39 = vpop.trf.xlu2 }
 0x6ff   : > { %v14578_v55 = vpop.trf.xlu2 }
 0x733   : > { %v12728_v20 = vpop.trf.xlu1 }
 0x73b   : > { %v12729_v11 = vpop.trf.xlu1 }
 0x743   : > { %v12731_v40 = vpop.trf.xlu1 }
 0x74b   : > { %v12732_v2 = vpop.trf.xlu1 }
 0x751   : > { %5565 = vrot.lane.b32.xlu1 %v14545_v9, %s13414_s18 }
 0x753   : > { %v12734_v61 = vpop.trf.xlu1 }
 0x754   : > { %v3441_v18 = vrot.slane %v12734_v61, 4 }
 0x756   : > { %v3442_v46 = vsel %vm1466_vm0, %v3441_v18, %v12728_v20  ;;  %v14567_v18 = vpop.trf.xlu0 }
 0x757   : > { %v3446_v60 = vperm.slane %v3442_v46, %v13817_v26 }
 0x759   : > { %v3455_v5 = vrot.slane %v3446_v60, 4 }
 0x75b   : > { %v12735_v0 = vpop.trf.xlu1 }
 0x75c   : > { %v3469_v53 = vrot.slane %v12735_v0, 4  ;;  %v5051_v0 = vperm.slane %v14561_v32, %v13819_v27 }
 0x75e   : > { %v3470_v61 = vsel %vm1466_vm0, %v3469_v53, %v12729_v11  ;;  %v5056_v53 = vrot.slane %v5051_v0, 4 }
 0x763   : > { %v12737_v15 = vpop.trf.xlu1 }
 0x764   : > { %v3447_v63 = vrot.slane %v12737_v15, 4 }
 0x766   : > { %v3448_v38 = vsel %vm1466_vm0, %v3447_v63, %v12731_v40  ;;  %v3474_v40 = vperm.slane %v3470_v61, %v13817_v26 }
 0x767   : > { %v3452_v49 = vperm.slane %v3448_v38, %v13817_v26 }
 0x768   : > { %v3483_v47 = vrot.slane %v3474_v40, 4 }
 0x769   : > { %v3453_v20 = vrot.slane %v3452_v49, 4  ;;  %v3456_v19 = vsel %vm1466_vm0, %v3452_v49, %v3455_v5  ;;  %v5126_v5 = vshrl.u32 %v5051_v0, 16  ;;  %v5125_v49 = vpack.i.b16 0, %v5051_v0 }
 0x76a   : > { %v3464_v63 = vperm.slane %v3456_v19, %v13819_v27  ;;  %v5057_v19 = vsel %vm1466_vm0, 0, %v5056_v53 }
 0x76b   : > { %v12738_v46 = vpop.trf.xlu1  ;;  %v3454_v41 = vsel %vm1466_vm0, %v3453_v20, %v3446_v60 }
 0x76c   : > { %v3475_v15 = vrot.slane %v12738_v46, 4  ;;  %v3460_v11 = vperm.slane %v3454_v41, %v13819_v27  ;;  %v3467_v22 = vrot.slane %v3464_v63, 4  ;;  %v14585_v46 = vpop.trf.xlu0 }
 0x76e   : > { %v3476_v38 = vsel %vm1466_vm0, %v3475_v15, %v12732_v2  ;;  %v3465_v20 = vrot.slane %v3460_v11, 4  ;;  %v5127_v15 = vpack.i.b16 0, %v5126_v5  ;;  %v3500_v1 = vshrl.u32 %v3460_v11, 16 }
 0x76f   : > { %v3480_v9 = vperm.slane %v3476_v38, %v13817_v26  ;;  %v3512_v38 = vshrl.u32 %v3464_v63, 16 }
 0x770   : > { %v3466_v33 = vsel %vm1466_vm0, 0, %v3465_v20 }
 0x771   : > { %v3481_v42 = vrot.slane %v3480_v9, 4  ;;  %v3484_v61 = vsel %vm1466_vm0, %v3480_v9, %v3483_v47  ;;  %v3468_v47 = vsel %vm1466_vm0, 0, %v3467_v22 }
 0x772   : > { %v3492_v60 = vperm.slane %v3484_v61, %v13819_v27  ;;  %v5141_v61 = vand.u32 %v5125_v49, %v14218_v31  ;;  %v3518_v62 = vshrl.u32 %v3468_v47, 16 }
 0x773   : > { %v14583_v2 = vpop.trf.xlu1  ;;  %v3482_v41 = vsel %vm1466_vm0, %v3481_v42, %v3474_v40  ;;  %v5130_v40 = vshrl.u32 %v5057_v19, 16 }
 0x774   : > { %v3488_v0 = vperm.slane %v3482_v41, %v13819_v27  ;;  %v3513_v52 = vshrl.u32 %v3492_v60, 16  ;;  %v3511_v8 = vpack.i.b16 %v3492_v60, %v3464_v63  ;;  %v3495_v9 = vrot.slane %v3492_v60, 4 }
 0x776   : > { %v3499_v43 = vpack.i.b16 %v3488_v0, %v3460_v11  ;;  %v3501_v53 = vshrl.u32 %v3488_v0, 16  ;;  %v3493_v37 = vrot.slane %v3488_v0, 4  ;;  %v3514_v24 = vpack.i.b16 %v3513_v52, %v3512_v38 }
 0x777   : > { %v3496_v42 = vsel %vm1466_vm0, 0, %v3495_v9  ;;  %v3671_v22 = vsel %vm3238_vm5, %v3511_v8, 0  ;;  %v5129_v11 = vpack.i.b16 0, %v5057_v19  ;;  %v3506_v52 = vshrl.u32 %v3466_v33, 16  ;;  %v14597_v9 = vpop.trf.xlu2 }
 0x778   : > { %v3531_v5 = vsel %vm3238_vm5, %v3499_v43, 0  ;;  %v3502_v41 = vpack.i.b16 %v3501_v53, %v3500_v1  ;;  %v3519_v63 = vshrl.u32 %v3496_v42, 16  ;;  %v3494_v49 = vsel %vm1466_vm0, 0, %v3493_v37 }
 0x779   : > { %3540 = vmatpush.bf16.msra.mxu0 %v3531_v5  ;;  %v3517_v60 = vpack.i.b16 %v3496_v42, %v3468_v47  ;;  %v3505_v0 = vpack.i.b16 %v3494_v49, %v3466_v33  ;;  %v3507_v38 = vshrl.u32 %v3494_v49, 16  ;;  %v3706_v1 = vsel %vm3238_vm5, %v3514_v24, 0  ;;  %v14605_v47 = vpop.trf.xlu0 }
 0x77a   : > { %v3566_v20 = vsel %vm3238_vm5, %v3502_v41, 0  ;;  %v3520_v53 = vpack.i.b16 %v3519_v63, %v3518_v62  ;;  %v5157_v5 = vand.u32 %v5127_v15, %v14218_v31  ;;  %v5131_v8 = vpack.i.b16 0, %v5130_v40 }
 0x77b   : > { %3575 = vmatpush.bf16.msrb.mxu1 %v3566_v20  ;;  %v12741_v43 = vpop.trf.xlu1  ;;  %v3601_v37 = vsel %vm3238_vm5, %v3505_v0, 0  ;;  %v3508_v19 = vpack.i.b16 %v3507_v38, %v3506_v52  ;;  %v3741_v33 = vsel %vm3238_vm5, %v3517_v60, 0  ;;  %v5173_v42 = vand.u32 %v5129_v11, %v14218_v31 }
 0x77c   : > { %12101 = vmatmul.msk.bf16.vlgmr.msra.gmra.mxu0 %vm3222_vm6, %v13959_v10  ;;  %3610 = vmatpush.bf16.msra.mxu2 %v3601_v37  ;;  %v4936_v62 = vrot.slane %v14530_v45, 4  ;;  %v3776_v15 = vsel %vm3238_vm5, %v3520_v53, 0  ;;  %v5189_v40 = vand.u32 %v5131_v8, %v14218_v31  ;;  %v4930_v41 = vrot.slane %v14536_v17, 4 }
 0x77d   : > { %3680 = vmatpush.bf16.msrb.mxu0 %v3671_v22  ;;  %v3636_v24 = vsel %vm3238_vm5, %v3508_v19, 0  ;;  %v4948_v63 = vrot.slane %v12741_v43, 4  ;;  %v4992_v22 = vrot.slane %v14532_v50, 4  ;;  %v4986_v49 = vrot.slane %v14583_v2, 4 }
 0x77e   : > { %12104 = vmatmul.msk.bf16.vlgmr.msrb.gmra.mxu1 %vm3222_vm6, %v13900_v29  ;;  %3645 = vmatpush.bf16.msra.mxu3 %v3636_v24  ;;  %v4937_v45 = vsel %vm1466_vm0, %v4936_v62, %v14540_v36  ;;  %v4931_v17 = vsel %vm1466_vm0, %v4930_v41, %v14556_v51  ;;  %v5004_v43 = vrot.slane %v14538_v12, 4  ;;  %v5046_v62 = vrot.slane %v14561_v32, 4 }
 0x77f   : > { %3715 = vmatpush.bf16.msra.mxu1 %v3706_v1  ;;  %12107 = vmatmul.msk.bf16.vlgmr.msra.gmra.mxu2 %vm3222_vm6, %v13902_v30  ;;  %v4949_v11 = vsel %vm1466_vm0, %v4948_v63, %v14553_v57  ;;  %v4941_v20 = vperm.slane %v4937_v45, %v13817_v26  ;;  %v4993_v36 = vsel %vm1466_vm0, %v4992_v22, %v14534_v16 }
 0x780   : > { %3750 = vmatpush.bf16.msrb.mxu2 %v3741_v33  ;;  %v4935_v50 = vperm.slane %v4931_v17, %v13817_v26  ;;  %v4987_v2 = vsel %vm1466_vm0, %v4986_v49, %v14549_v7  ;;  %v4953_v52 = vperm.slane %v4949_v11, %v13817_v26  ;;  %v4997_v57 = vperm.slane %v4993_v36, %v13817_v26 }
 0x781   : > { %5148 = vmatpush.bf16.msra.mxu0 %v5141_v61  ;;  %v4942_v61 = vrot.slane %v14585_v46, 4  ;;  %12110 = vmatmul.msk.bf16.vlgmr.msra.gmra.mxu3 %vm3222_vm6, %v13965_v14  ;;  %v12765_v46 = vpop.trf.xlu2  ;;  %v14638_v38 = vpop.trf.xlu0  ;;  %v4991_v1 = vperm.slane %v4987_v2, %v13817_v26  ;;  %v4954_v53 = vrot.slane %v4941_v20, 4  ;;  %v5005_v19 = vsel %vm1466_vm0, %v5004_v43, %v14567_v18 }
 0x782   : > { %3785 = vmatpush.bf16.msrb.mxu3 %v3776_v15  ;;  %v4966_v16 = vrot.slane %v4953_v52, 4  ;;  %v5010_v37 = vrot.slane %v4997_v57, 4  ;;  %v4998_v15 = vrot.slane %v14563_v39, 4  ;;  %v4892_v18 = vrot.slane %v14597_v9, 4 }
 0x783   : > { %5164 = vmatpush.bf16.msrb.mxu1 %v5157_v5  ;;  %v14624_v60 = vpop.trf.xlu1  ;;  %v4943_v0 = vsel %vm1466_vm0, %v4942_v61, %v12765_v46  ;;  %v4956_v5 = vrot.slane %v4935_v50, 4  ;;  %v5012_v33 = vrot.slane %v4991_v1, 4  ;;  %v4955_v12 = vsel %vm1466_vm0, %v4954_v53, %v4935_v50 }
 0x784   : > { %5180 = vmatpush.bf16.msra.mxu2 %v5173_v42  ;;  %v4947_v51 = vperm.slane %v4943_v0, %v13817_v26  ;;  %v5009_v41 = vperm.slane %v5005_v19, %v13817_v26  ;;  %v4961_v45 = vperm.slane %v4955_v12, %v13819_v27  ;;  %v4824_v49 = vrot.slane %v14543_v58, 4 }
 0x785   : > { %v4957_v42 = vsel %vm1466_vm0, %v4941_v20, %v4956_v5  ;;  %v5013_v39 = vsel %vm1466_vm0, %v4997_v57, %v5012_v33  ;;  %v5047_v11 = vsel %vm1466_vm0, 0, %v5046_v62  ;;  %v4880_v36 = vrot.slane %v14551_v3, 4 }
 0x786   : > { %5196 = vmatpush.bf16.msra.mxu3 %v5189_v40  ;;  %v4968_v7 = vrot.slane %v4947_v51, 4  ;;  %v4967_v24 = vsel %vm1466_vm0, %v4966_v16, %v4947_v51  ;;  %v5011_v40 = vsel %vm1466_vm0, %v5010_v37, %v4991_v1  ;;  %v4965_v22 = vperm.slane %v4957_v42, %v13819_v27 }
 0x787   : > { %v4973_v32 = vperm.slane %v4967_v24, %v13819_v27  ;;  %v5017_v17 = vperm.slane %v5011_v40, %v13819_v27  ;;  %v5022_v50 = vrot.slane %v5009_v41, 4  ;;  %v4980_v58 = vrot.slane %v4961_v45, 4 }
 0x788   : > { %v4969_v61 = vsel %vm1466_vm0, %v4953_v52, %v4968_v7  ;;  %v5021_v52 = vperm.slane %v5013_v39, %v13819_v27  ;;  %v4984_v43 = vrot.slane %v4965_v22, 4  ;;  %v4825_v1 = vsel %vm1466_vm0, %v4824_v49, %v14578_v55 }
 0x789   : > { %v14662_v63 = vpop.trf.xlu0  ;;  %v4977_v20 = vperm.slane %v4969_v61, %v13819_v27  ;;  %v12773_v0 = vpop.trf.xlu2  ;;  %v4978_v57 = vrot.slane %v4973_v32, 4  ;;  %v5036_v16 = vrot.slane %v5017_v17, 4  ;;  %v4981_v3 = vsel %vm1466_vm0, %v4973_v32, %v4980_v58 }
 0x78a   : > { %v4893_v51 = vsel %vm1466_vm0, %v4892_v18, %v12773_v0  ;;  %v4874_v33 = vrot.slane %v14605_v47, 4  ;;  %v4881_v12 = vsel %vm1466_vm0, %v4880_v36, %v14624_v60  ;;  %v5040_v24 = vrot.slane %v5021_v52, 4 }
 0x78b   : > { %v14644_v8 = vpop.trf.xlu1  ;;  %v14686_v37 = vsel %vm1466_vm0, %v4977_v20, %v4984_v43  ;;  %v4982_v19 = vrot.slane %v4977_v20, 4  ;;  %v5104_v39 = vshrl.u32 %v4981_v3, 16  ;;  %v4885_v58 = vperm.slane %v4881_v12, %v13817_v26 }
 0x78c   : > { %12102 = vmatmul.msk.bf16.gmra.mxu0 %vm3222_vm6, %v13984_v54  ;;  %v5120_v47 = vshrl.u32 %v14686_v37, 16  ;;  %v4829_v12 = vperm.slane %v4825_v1, %v13817_v26 }
 0x78e   : > { %12105 = vmatmul.msk.bf16.gmra.mxu1 %vm3222_vm6, %v13963_v13 }
 0x78f   : > { %12108 = vmatmul.msk.bf16.gmra.mxu2 %vm3222_vm6, %v13969_v21 }
 0x791   : > { %12111 = vmatmul.msk.bf16.gmra.mxu3 %vm3222_vm6, %v13986_v48  ;;  %v12771_v55 = vpop.trf.xlu0 }
 0x793   : > { %v12767_v9 = vpop.trf.xlu1 }
 0x794   : > { %v4999_v46 = vsel %vm1466_vm0, %v4998_v15, %v12767_v9  ;;  %v4979_v15 = vsel %vm1466_vm0, %v4978_v57, %v4961_v45  ;;  %v14703_v9 = vsel %vm1466_vm0, %v4982_v19, %v4965_v22 }
 0x795   : > { %v5003_v2 = vperm.slane %v4999_v46, %v13817_v26  ;;  %v5096_v0 = vshrl.u32 %v4979_v15, 16 }
 0x797   : > { %v5023_v53 = vsel %vm1466_vm0, %v5022_v50, %v5003_v2  ;;  %v5024_v5 = vrot.slane %v5003_v2, 4  ;;  %v4818_v50 = vrot.slane %v14644_v8, 4  ;;  %v4836_v8 = vrot.slane %v14638_v38, 4 }
 0x798   : > { %v5029_v7 = vperm.slane %v5023_v53, %v13819_v27 }
 0x799   : > { %v5025_v42 = vsel %vm1466_vm0, %v5009_v41, %v5024_v5 }
 0x79a   : > { %v5037_v62 = vsel %vm1466_vm0, %v5029_v7, %v5036_v16  ;;  %v5034_v40 = vrot.slane %v5029_v7, 4  ;;  %v5033_v18 = vperm.slane %v5025_v42, %v13819_v27  ;;  %v14725_v16 = vperm.slane %v5047_v11, %v13819_v27 }
 0x79b   : > { %v12768_v61 = vpop.trf.xlu1  ;;  %v5102_v32 = vpack.i.b16 %v5037_v62, %v4981_v3  ;;  %v5105_v49 = vshrl.u32 %v5037_v62, 16  ;;  %v4897_v7 = vperm.slane %v4893_v51, %v13817_v26  ;;  %v4875_v3 = vsel %vm1466_vm0, %v4874_v33, %v14662_v63  ;;  %v4442_v62 = vpop.trf.xlu0 }
 0x79c   : > { %12103 = vmatmul.msk.bf16.gmra.mxu0 %vm3222_vm6, %v14078_v44  ;;  %v5035_v60 = vsel %vm1466_vm0, %v5034_v40, %v5017_v17  ;;  %v14700_v41 = vsel %vm1466_vm0, %v5033_v18, %v5040_v24  ;;  %v5038_v45 = vrot.slane %v5033_v18, 4  ;;  %v4819_v38 = vsel %vm1466_vm0, %v4818_v50, %v12768_v61  ;;  %v12774_v61 = vpop.trf.xlu2 }
 0x79d   : > { %5181 = vmatpush.bf16.msra.mxu2 %v5102_v32  ;;  %v5094_v46 = vpack.i.b16 %v5035_v60, %v4979_v15  ;;  %v5106_v20 = vpack.i.b16 %v5105_v49, %v5104_v39  ;;  %v5097_v36 = vshrl.u32 %v5035_v60, 16  ;;  %v5118_v17 = vpack.i.b16 %v14700_v41, %v14686_v37 }
 0x79e   : > { %12106 = vmatmul.msk.bf16.gmra.mxu1 %vm3222_vm6, %v14006_v4  ;;  %v14711_v2 = vsel %vm1466_vm0, %v5038_v45, %v5021_v52  ;;  %v5121_v22 = vshrl.u32 %v14700_v41, 16  ;;  %v5112_v52 = vshrl.u32 %v14703_v9, 16  ;;  %v4898_v42 = vrot.slane %v4885_v58, 4 }
 0x79f   : > { %5149 = vmatpush.bf16.msra.mxu0 %v5094_v46  ;;  %5197 = vmatpush.bf16.msra.mxu3 %v5106_v20  ;;  %v5098_v57 = vpack.i.b16 %v5097_v36, %v5096_v0  ;;  %v5110_v43 = vpack.i.b16 %v14711_v2, %v14703_v9  ;;  %v5113_v5 = vshrl.u32 %v14711_v2, 16  ;;  %v4837_v11 = vsel %vm1466_vm0, %v4836_v8, %v12771_v55  ;;  %v16730_v9 = vld [vmem:[#allocation54_spill] sm:$0xff]  ;;  %v16731_v2 = vld [vmem:[#allocation52_spill] sm:$0xff] }
 0x7a0   : > { %12109 = vmatmul.msk.bf16.gmra.mxu2 %vm3222_vm6, %v14012_v6  ;;  %v14720_v53 = vpack.i.b16 %v5121_v22, %v5120_v47  ;;  %v5058_v51 = vrot.slane %v14725_v16, 4  ;;  %v4910_v40 = vrot.slane %v4897_v7, 4  ;;  %v4879_v63 = vperm.slane %v4875_v3, %v13817_v26 }
 0x7a1   : > { %5165 = vmatpush.bf16.msrb.mxu1 %v5098_v57  ;;  %12112 = vmatmul.msk.bf16.gmra.mxu3 %vm3222_vm6, %v14080_v28  ;;  %v14733_v19 = vpack.i.b16 %v5113_v5, %v5112_v52  ;;  %v4823_v33 = vperm.slane %v4819_v38, %v13817_v26  ;;  %v4842_v32 = vrot.slane %v4829_v12, 4  ;;  %v4841_v1 = vperm.slane %v4837_v11, %v13817_v26 }
 0x7a2   : > { %v4899_v39 = vsel %vm1466_vm0, %v4898_v42, %v4879_v63  ;;  %v4830_v47 = vrot.slane %v12774_v61, 4  ;;  %v5059_v46 = vsel %vm1466_vm0, 0, %v5058_v51  ;;  %v4900_v36 = vrot.slane %v4879_v63, 4 }
 0x7a3   : > { %v12776_v24 = vpop.trf.xlu1  ;;  %v4843_v55 = vsel %vm1466_vm0, %v4842_v32, %v4823_v33  ;;  %v4844_v60 = vrot.slane %v4823_v33, 4  ;;  %v4905_v20 = vperm.slane %v4899_v39, %v13819_v27  ;;  %v4854_v50 = vrot.slane %v4841_v1, 4 }
 0x7a4   : > { %v4886_v15 = vrot.slane %v12776_v24, 4  ;;  %v4849_v57 = vperm.slane %v4843_v55, %v13819_v27  ;;  %v5137_v52 = vpack.i.b16 0, %v5059_v46  ;;  %v5138_v42 = vshrl.u32 %v5059_v46, 16 }
 0x7a5   : > { %v4845_v5 = vsel %vm1466_vm0, %v4829_v12, %v4844_v60  ;;  %v4924_v24 = vrot.slane %v4905_v20, 4  ;;  %v5133_v11 = vpack.i.b16 0, %v14725_v16  ;;  %v5134_v63 = vshrl.u32 %v14725_v16, 16 }
 0x7a6   : > { %v4887_v18 = vsel %vm1466_vm0, %v4886_v15, %v4442_v62  ;;  %v4901_v15 = vsel %vm1466_vm0, %v4885_v58, %v4900_v36  ;;  %v4853_v12 = vperm.slane %v4845_v5, %v13819_v27  ;;  %v5237_v58 = vand.u32 %v5137_v52, %v14218_v31 }
 0x7a7   : > { %v4891_v49 = vperm.slane %v4887_v18, %v13817_v26  ;;  %v4868_v18 = vrot.slane %v4849_v57, 4  ;;  %v5135_v36 = vpack.i.b16 0, %v5134_v63 }
 0x7a9   : > { %v4911_v45 = vsel %vm1466_vm0, %v4910_v40, %v4891_v49  ;;  %v4912_v3 = vrot.slane %v4891_v49, 4  ;;  %v5139_v49 = vpack.i.b16 0, %v5138_v42 }
 0x7aa   : > { %v4917_v0 = vperm.slane %v4911_v45, %v13819_v27  ;;  %v4909_v45 = vperm.slane %v4901_v15, %v13819_v27  ;;  %v5221_v15 = vand.u32 %v5135_v36, %v14218_v31 }
 0x7ab   : > { %v12777_v22 = vpop.trf.xlu1  ;;  %v4913_v32 = vsel %vm1466_vm0, %v4897_v7, %v4912_v3 }
 0x7ac   : > { %v4831_v8 = vsel %vm1466_vm0, %v4830_v47, %v12777_v22  ;;  %12113 = vmatmul.msk.bf16.vlgmr.msrb.gmra.mxu0 %vm3222_vm6, %v14050_v34  ;;  %v4922_v62 = vrot.slane %v4917_v0, 4  ;;  %v4925_v61 = vsel %vm1466_vm0, %v4917_v0, %v4924_v24  ;;  %v4921_v22 = vperm.slane %v4913_v32, %v13819_v27 }
 0x7ad   : > { %v4835_v38 = vperm.slane %v4831_v8, %v13817_v26  ;;  %v5073_v7 = vshrl.u32 %v4925_v61, 16 }
 0x7ae   : > { %12116 = vmatmul.msk.bf16.vlgmr.msra.gmra.mxu1 %vm3222_vm6, %v13989_v56  ;;  %v4923_v55 = vsel %vm1466_vm0, %v4922_v62, %v4905_v20  ;;  %v5205_v20 = vand.u32 %v5133_v11, %v14218_v31  ;;  %v4928_v62 = vrot.slane %v4909_v45, 4 }
 0x7af   : > { %v4855_v51 = vsel %vm1466_vm0, %v4854_v50, %v4835_v38  ;;  %v4856_v40 = vrot.slane %v4835_v38, 4  ;;  %v4872_v50 = vrot.slane %v4853_v12, 4  ;;  %v5065_v3 = vshrl.u32 %v4923_v55, 16 }
 0x7b0   : > { %v4861_v33 = vperm.slane %v4855_v51, %v13819_v27  ;;  %12119 = vmatmul.msk.bf16.vlgmr.msrb.gmra.mxu2 %vm3222_vm6, %v13992_v59  ;;  %v5253_v38 = vand.u32 %v5139_v49, %v14218_v31  ;;  %v4926_v51 = vrot.slane %v4921_v22, 4 }
 0x7b1   : > { %v4857_v39 = vsel %vm1466_vm0, %v4841_v1, %v4856_v40  ;;  %12122 = vmatmul.msk.bf16.vlgmr.msrb.gmra.mxu3 %vm3222_vm6, %v14052_v35  ;;  %v4929_v40 = vsel %vm1466_vm0, %v4921_v22, %v4928_v62 }
 0x7b2   : > { %v4869_v16 = vsel %vm1466_vm0, %v4861_v33, %v4868_v18  ;;  %v4866_v47 = vrot.slane %v4861_v33, 4  ;;  %v4865_v60 = vperm.slane %v4857_v39, %v13819_v27  ;;  %v4927_v18 = vsel %vm1466_vm0, %v4926_v51, %v4909_v45  ;;  %v16729_v39 = vld [vmem:[#allocation47_spill] sm:$0xff]  ;;  %v16738_v45 = vld [vmem:[#allocation62_spill] sm:$0xff] }
 0x7b3   : > { %v5070_v46 = vpack.i.b16 %v4925_v61, %v4869_v16  ;;  %v5072_v0 = vshrl.u32 %v4869_v16, 16  ;;  %v5089_v61 = vshrl.u32 %v4929_v40, 16  ;;  %v16734_v16 = vld [vmem:[#allocation57_spill] sm:$0xff] }
 0x7b4   : > { %v4867_v1 = vsel %vm1466_vm0, %v4866_v47, %v4849_v57  ;;  %v4870_v42 = vrot.slane %v4865_v60, 4  ;;  %v4873_v57 = vsel %vm1466_vm0, %v4865_v60, %v4872_v50  ;;  %v16735_v47 = vld [vmem:[#allocation58_spill] sm:$0xff]  ;;  %v16737_v60 = vld [vmem:[#allocation60_spill] sm:$0xff] }
 0x7b5   : > { %5182 = vmatpush.bf16.msra.mxu2 %v5070_v46  ;;  %v5062_v8 = vpack.i.b16 %v4923_v55, %v4867_v1  ;;  %v5074_v52 = vpack.i.b16 %v5073_v7, %v5072_v0  ;;  %v5064_v5 = vshrl.u32 %v4867_v1, 16  ;;  %v5088_v63 = vshrl.u32 %v4873_v57, 16  ;;  %v16736_v55 = vld [vmem:[#allocation56_spill] sm:$0xff]  ;;  %v16739_v46 = vld [vmem:[#allocation61_spill] sm:$0xff]  ;;  %v16740_v0 = vld [vmem:[#allocation59_spill] sm:$0xff] }
 0x7b6   : > { %v4871_v11 = vsel %vm1466_vm0, %v4870_v42, %v4853_v12  ;;  %v5086_v33 = vpack.i.b16 %v4929_v40, %v4873_v57  ;;  %v16728_v12 = vld [vmem:[#allocation49_spill] sm:$0xff]  ;;  %v16741_v7 = vld [vmem:[#allocation63_spill] sm:$0xff] }
 0x7b7   : > { %5150 = vmatpush.bf16.msra.mxu0 %v5062_v8  ;;  %5198 = vmatpush.bf16.msra.mxu3 %v5074_v52  ;;  %v5066_v24 = vpack.i.b16 %v5065_v3, %v5064_v5  ;;  %v5080_v32 = vshrl.u32 %v4871_v11, 16  ;;  %v5090_v37 = vpack.i.b16 %v5089_v61, %v5088_v63  ;;  %v5078_v41 = vpack.i.b16 %v4927_v18, %v4871_v11 }
 0x7b9   : > { %5244 = vmatpush.bf16.msrb.mxu2 %v5237_v58  ;;  %5166 = vmatpush.bf16.msrb.mxu1 %v5066_v24  ;;  %v5571_v58 = vpop.permute.xlu2 %5570 }
 0x7ba   : > { %v5576_v49 = vsel %vm3200_vm4, %v5571_v58, 0 }
 0x7bb   : > { %5212 = vmatpush.bf16.msrb.mxu0 %v5205_v20  ;;  %5260 = vmatpush.bf16.msrb.mxu3 %v5253_v38 }
 0x7bc   : > { %12114 = vmatmul.msk.bf16.gmra.mxu0 %vm3222_vm6, %v14070_v23 }
 0x7bd   : > { %5228 = vmatpush.bf16.msra.mxu1 %v5221_v15  ;;  %5245 = vmatpush.bf16.msrb.mxu2 %v5118_v17  ;;  %v5081_v17 = vshrl.u32 %v4927_v18, 16 }
 0x7be   : > { %12117 = vmatmul.msk.bf16.gmra.mxu1 %vm3222_vm6, %v14074_v25 }
 0x7bf   : > { %5261 = vmatpush.bf16.msrb.mxu3 %v14720_v53  ;;  %5213 = vmatpush.bf16.msrb.mxu0 %v5110_v43  ;;  %v5082_v53 = vpack.i.b16 %v5081_v17, %v5080_v32  ;;  %v16732_v43 = vld [vmem:[#allocation53_spill] sm:$0xff] }
 0x7c0   : > { %12120 = vmatmul.msk.bf16.gmra.mxu2 %vm3222_vm6, %v16728_v12 }
 0x7c1   : > { %5246 = vmatpush.bf16.msrb.mxu2 %v5086_v33  ;;  %5229 = vmatpush.bf16.msra.mxu1 %v14733_v19  ;;  %v16733_v19 = vld [vmem:[#allocation55_spill] sm:$0xff] }
 0x7c2   : > { %12123 = vmatmul.msk.bf16.gmra.mxu3 %vm3222_vm6, %v16729_v39 }
 0x7c3   : > { %5262 = vmatpush.bf16.msrb.mxu3 %v5090_v37  ;;  %5214 = vmatpush.bf16.msrb.mxu0 %v5078_v41  ;;  %v5566_v36 = vpop.permute.xlu1 %5565 }
 0x7c5   : > { %5230 = vmatpush.bf16.msra.mxu1 %v5082_v53 }
 0x7cc   : > { %12115 = vmatmul.msk.bf16.gmra.mxu0 %vm3222_vm6, %v16730_v9 }
 0x7ce   : > { %12118 = vmatmul.msk.bf16.gmra.mxu1 %vm3222_vm6, %v16731_v2 }
 0x7d0   : > { %12121 = vmatmul.msk.bf16.gmra.mxu2 %vm3222_vm6, %v16732_v43 }
 0x7d2   : > { %12124 = vmatmul.msk.bf16.gmra.mxu3 %vm3222_vm6, %v16733_v19 }
 0x7dc   : > { %12125 = vmatmul.msk.bf16.vlgmr.msra.gmra.mxu0 %vm2525_vm3, %v16734_v16 }
 0x7dd   : > { %5585 = vmatpush.bf16.xpose.msra.mxu0 %v5576_v49 }
 0x7de   : > { %12126 = vmatmul.msk.bf16.vlgmr.msrb.gmra.mxu1 %vm2525_vm3, %v16735_v47 }
 0x7e0   : > { %12127 = vmatmul.msk.bf16.vlgmr.msra.gmra.mxu2 %vm2525_vm3, %v16736_v55 }
 0x7e2   : > { %12128 = vmatmul.msk.bf16.vlgmr.msra.gmra.mxu3 %vm2525_vm3, %v16737_v60 }
 0x7ec   : > { %12129 = vmatmul.msk.bf16.vlgmr.msrb.gmra.mxu0 %vm2525_vm3, %v16738_v45 }
 0x7ee   : > { %12130 = vmatmul.msk.bf16.vlgmr.msra.gmra.mxu1 %vm2525_vm3, %v16739_v46 }
 0x7f0   : > { %12131 = vmatmul.msk.bf16.vlgmr.msrb.gmra.mxu2 %vm2525_vm3, %v16740_v0 }
 0x7f2   : > { %12132 = vmatmul.msk.bf16.vlgmr.msrb.gmra.mxu3 %vm2525_vm3, %v16741_v7 }
 0x7f9   : > { %v14825_v1 = vpop.f32.mrf.mxu0 }
 0x7fa   : > { %16742 = vst [vmem:[#allocation68_spill] sm:$0xff] %v14825_v1 }
 0x7fb   : > { %v14827_v50 = vpop.f32.mrf.mxu1 }
 0x7fc   : > { %16743 = vst [vmem:[#allocation69_spill] sm:$0xff] %v14827_v50  ;;  %12133 = vmatmul.msk.bf16.vlgmr.msra.gmra.mxu0 %vm3200_vm4, %v5566_v36 }
 0x801   : > { %v14830_v22 = vpop.f32.mrf.mxu0 }
 0x802   : > { %16744 = vst [vmem:[#allocation70_spill] sm:$0xff] %v14830_v22  ;;  %v14832_v8 = vpop.f32.mrf.mxu2 }
 0x803   : > { %16745 = vst [vmem:[#allocation71_spill] sm:$0xff] %v14832_v8  ;;  %v14834_v52 = vpop.f32.mrf.mxu1 }
 0x804   : > { %16746 = vst [vmem:[#allocation72_spill] sm:$0xff] %v14834_v52  ;;  %v14838_v3 = vpop.f32.mrf.mxu3 }
 0x805   : > { %16747 = vst [vmem:[#allocation73_spill] sm:$0xff] %v14838_v3 }
 0x809   : > { %v14840_v20 = vpop.f32.mrf.mxu0 }
 0x80a   : > { %16748 = vst [vmem:[#allocation74_spill] sm:$0xff] %v14840_v20  ;;  %v14842_v38 = vpop.f32.mrf.mxu2 }
 0x80b   : > { %16749 = vst [vmem:[#allocation75_spill] sm:$0xff] %v14842_v38  ;;  %v14844_v42 = vpop.f32.mrf.mxu1 }
 0x80c   : > { %16750 = vst [vmem:[#allocation76_spill] sm:$0xff] %v14844_v42  ;;  %v14846_v24 = vpop.f32.mrf.mxu3 }
 0x80d   : > { %16751 = vst [vmem:[#allocation77_spill] sm:$0xff] %v14846_v24 }
 0x811   : > { %v14848_v57 = vpop.f32.mrf.mxu0 }
 0x812   : > { %16752 = vst [vmem:[#allocation78_spill] sm:$0xff] %v14848_v57  ;;  %v14850_v62 = vpop.f32.mrf.mxu2 }
 0x813   : > { %16753 = vst [vmem:[#allocation79_spill] sm:$0xff] %v14850_v62  ;;  %v14852_v15 = vpop.f32.mrf.mxu1 }
 0x814   : > { %16754 = vst [vmem:[#allocation80_spill] sm:$0xff] %v14852_v15  ;;  %v14856_v40 = vpop.f32.mrf.mxu3 }
 0x815   : > { %16755 = vst [vmem:[#allocation81_spill] sm:$0xff] %v14856_v40 }
 0x819   : > { %v14858_v11 = vpop.f32.mrf.mxu0 }
 0x81a   : > { %16756 = vst [vmem:[#allocation82_spill] sm:$0xff] %v14858_v11  ;;  %v14860_v63 = vpop.f32.mrf.mxu2 }
 0x81b   : > { %16757 = vst [vmem:[#allocation83_spill] sm:$0xff] %v14860_v63  ;;  %v14862_v33 = vpop.f32.mrf.mxu1 }
 0x81c   : > { %16758 = vst [vmem:[#allocation84_spill] sm:$0xff] %v14862_v33  ;;  %v14864_v18 = vpop.f32.mrf.mxu3 }
 0x81d   : > { %16759 = vst [vmem:[#allocation85_spill] sm:$0xff] %v14864_v18 }
 0x821   : > { %v3554_v61 = vpop.f32.mrf.mxu0 }
 0x823   : > { %v14866_v32 = vpop.f32.mrf.mxu2  ;;  %v3589_v37 = vpop.f32.mrf.mxu1 }
 0x824   : > { %16760 = vst [vmem:[#allocation86_spill] sm:$0xff] %v14866_v32  ;;  %v14870_v17 = vpop.f32.mrf.mxu3 }
 0x825   : > { %16761 = vst [vmem:[#allocation87_spill] sm:$0xff] %v14870_v17 }
 0x829   : > { %v14872_v53 = vpop.f32.mrf.mxu0 }
 0x82a   : > { %16762 = vst [vmem:[#allocation88_spill] sm:$0xff] %v14872_v53 }
 0x82b   : > { %v3624_v49 = vpop.f32.mrf.mxu2  ;;  %v14876_v36 = vpop.f32.mrf.mxu1 }
 0x82c   : > { %16763 = vst [vmem:[#allocation89_spill] sm:$0xff] %v14876_v36  ;;  %v3659_v51 = vpop.f32.mrf.mxu3 }
 0x831   : > { %v14878_v5 = vpop.f32.mrf.mxu0 }
 0x832   : > { %16764 = vst [vmem:[#allocation90_spill] sm:$0xff] %v14878_v5 }
 0x833   : > { %v14880_v61 = vpop.f32.mrf.mxu2  ;;  %v14882_v63 = vpop.f32.mrf.mxu1 }
 0x834   : > { %16765 = vst [vmem:[#allocation91_spill] sm:$0xff] %v14880_v61  ;;  %v14886_v41 = vpop.f32.mrf.mxu3 }
 0x835   : > { %16766 = vst [vmem:[#allocation92_spill] sm:$0xff] %v14882_v63 }
 0x836   : > { %16767 = vst [vmem:[#allocation93_spill] sm:$0xff] %v14886_v41 }
 0x839   : > { %v14890_v32 = vpop.f32.mrf.mxu0 }
 0x83a   : > { %16768 = vst [vmem:[#allocation94_spill] sm:$0xff] %v14890_v32 }
 0x83b   : > { %v14894_v51 = vpop.f32.mrf.mxu2  ;;  %v14896_v58 = vpop.f32.mrf.mxu1 }
 0x83c   : > { %16769 = vst [vmem:[#allocation95_spill] sm:$0xff] %v14894_v51  ;;  %v14898_v15 = vpop.f32.mrf.mxu3 }
 0x83d   : > { %16770 = vst [vmem:[#allocation96_spill] sm:$0xff] %v14896_v58 }
 0x83e   : > { %16771 = vst [vmem:[#allocation97_spill] sm:$0xff] %v14898_v15 }
 0x841   : > { %v14900_v42 = vpop.f32.mrf.mxu0 }
 0x842   : > { %16772 = vst [vmem:[#allocation98_spill] sm:$0xff] %v14900_v42 }
 0x843   : > { %v14902_v62 = vpop.f32.mrf.mxu2  ;;  %v14904_v37 = vpop.f32.mrf.mxu1 }
 0x844   : > { %16773 = vst [vmem:[#allocation99_spill] sm:$0xff] %v14902_v62 }
 0x845   : > { %16774 = vst [vmem:[#allocation100_spill] sm:$0xff] %v14904_v37  ;;  %v14908_v38 = vpop.f32.mrf.mxu3 }
 0x846   : > { %16775 = vst [vmem:[#allocation101_spill] sm:$0xff] %v14908_v38 }
 0x849   : > { %v14912_v52 = vpop.f32.mrf.mxu0 }
 0x84a   : > { %16776 = vst [vmem:[#allocation102_spill] sm:$0xff] %v14912_v52 }
 0x84b   : > { %v14916_v8 = vpop.f32.mrf.mxu2  ;;  %v14918_v57 = vpop.f32.mrf.mxu1 }
 0x84c   : > { %16777 = vst [vmem:[#allocation103_spill] sm:$0xff] %v14916_v8 }
 0x84d   : > { %16778 = vst [vmem:[#allocation104_spill] sm:$0xff] %v14918_v57  ;;  %v14920_v42 = vpop.f32.mrf.mxu3 }
 0x84e   : > { %16779 = vst [vmem:[#allocation105_spill] sm:$0xff] %v14920_v42 }
 0x851   : > { %v3694_v32 = vpop.f32.mrf.mxu0 }
 0x853   : > { %v14922_v20 = vpop.f32.mrf.mxu2  ;;  %v3729_v33 = vpop.f32.mrf.mxu1 }
 0x854   : > { %16780 = vst [vmem:[#allocation106_spill] sm:$0xff] %v14922_v20 }
 0x855   : > { %v14926_v5 = vpop.f32.mrf.mxu3 }
 0x856   : > { %16781 = vst [vmem:[#allocation107_spill] sm:$0xff] %v14926_v5 }
 0x859   : > { %v5152_v53 = vpop.f32.mrf.mxu0 }
 0x85a   : > { %5268 = vxpose.xlu0.b32.start.end [1/1] (short) (narrow) %v5152_v53, 8 }
 0x85b   : > { %v3764_v50 = vpop.f32.mrf.mxu2  ;;  %v5168_v52 = vpop.f32.mrf.mxu1 }
 0x85d   : > { %v3799_v11 = vpop.f32.mrf.mxu3 }
 0x861   : > { %v5154_v1 = vpop.f32.mrf.mxu0 }
 0x862   : > { %5300 = vxpose.xlu0.b32.start.end [1/1] (short) (narrow) %v5168_v52, 8 }
 0x863   : > { %v5184_v18 = vpop.f32.mrf.mxu2  ;;  %v5170_v32 = vpop.f32.mrf.mxu1 }
 0x865   : > { %v5200_v42 = vpop.f32.mrf.mxu3 }
 0x869   : > { %v5216_v38 = vpop.f32.mrf.mxu0 }
 0x86a   : > { %5332 = vxpose.xlu0.b32.start.end [1/1] (short) (narrow) %v5184_v18, 8 }
 0x86b   : > { %v5186_v33 = vpop.f32.mrf.mxu2  ;;  %v5232_v40 = vpop.f32.mrf.mxu1 }
 0x86d   : > { %v5202_v22 = vpop.f32.mrf.mxu3 }
 0x871   : > { %v5218_v57 = vpop.f32.mrf.mxu0 }
 0x872   : > { %5364 = vxpose.xlu0.b32.start.end [1/1] (short) (narrow) %v5200_v42, 8 }
 0x873   : > { %v5248_v20 = vpop.f32.mrf.mxu2  ;;  %v5234_v24 = vpop.f32.mrf.mxu1 }
 0x875   : > { %v5264_v49 = vpop.f32.mrf.mxu3 }
 0x879   : > { %v5587_v5 = vpop.f32.mrf.mxu0 }
 0x87a   : > { %5396 = vxpose.xlu0.b32.start.end [1/1] (short) (narrow) %v5216_v38, 8 }
 0x87b   : > { %v5250_v50 = vpop.f32.mrf.mxu2 }
 0x87d   : > { %v5266_v53 = vpop.f32.mrf.mxu3 }
 0x881   : > { %v5589_v11 = vpop.f32.mrf.mxu0 }
 0x882   : > { %5428 = vxpose.xlu0.b32.start.end [1/1] (short) (narrow) %v5232_v40, 8 }
 0x88a   : > { %5460 = vxpose.xlu0.b32.start.end [1/1] (short) (narrow) %v5248_v20, 8 }
 0x892   : > { %5492 = vxpose.xlu0.b32.start.end [1/1] (short) (narrow) %v5264_v49, 8 }
 0x8fe   : > { %v5284_v1 = vpop.trf.xlu0 }
 0x906   : > { %v5316_v52 = vpop.trf.xlu0 }
 0x90e   : > { %v5348_v32 = vpop.trf.xlu0 }
 0x90f   : > { %v5524_v24 = vrot.slane %v5348_v32, 4 }
 0x911   : > { %v5525_v40 = vsel %vm1466_vm0, %v5524_v24, %v5284_v1 }
 0x916   : > { %v5380_v18 = vpop.trf.xlu0 }
 0x917   : > { %v5530_v57 = vrot.slane %v5380_v18, 4  ;;  %v5529_v18 = vperm.slane %v5525_v40, %v13817_v26 }
 0x919   : > { %v5531_v42 = vsel %vm1466_vm0, %v5530_v57, %v5316_v52 }
 0x91a   : > { %v5535_v38 = vperm.slane %v5531_v42, %v13817_v26 }
 0x91c   : > { %v5548_v11 = vrot.slane %v5535_v38, 4  ;;  %v13182_v38 = vld [vmem:[%s13684_s16] ss:$0 sm:$0xff] }
 0x91e   : > { %v5412_v33 = vpop.trf.xlu0 }
 0x926   : > { %v5444_v17 = vpop.trf.xlu0 }
 0x92e   : > { %v5476_v22 = vpop.trf.xlu0 }
 0x92f   : > { %v5536_v15 = vrot.slane %v5476_v22, 4  ;;  %v5549_v22 = vsel %vm1466_vm0, %v5548_v11, %v5529_v18 }
 0x930   : > { %v5553_v1 = vperm.slane %v5549_v22, %v13819_v27 }
 0x931   : > { %v5537_v20 = vsel %vm1466_vm0, %v5536_v15, %v5412_v33 }
 0x932   : > { %v5541_v52 = vperm.slane %v5537_v20, %v13817_v26 }
 0x936   : > { %v5508_v50 = vpop.trf.xlu0 }
 0x937   : > { %v5542_v53 = vrot.slane %v5508_v50, 4 }
 0x939   : > { %v5543_v49 = vsel %vm1466_vm0, %v5542_v53, %v5444_v17 }
 0x93a   : > { %v5547_v8 = vperm.slane %v5543_v49, %v13817_v26 }
 0x93c   : > { %v5554_v32 = vrot.slane %v5547_v8, 4  ;;  %v6398_v8 = vpop.permute.xlu2 %6397 }
 0x93e   : > { %v5555_v57 = vsel %vm1466_vm0, %v5554_v32, %v5541_v52 }
 0x93f   : > { %v5559_v42 = vperm.slane %v5555_v57, %v13819_v27 }
 0x941   : > { %v5560_v24 = vrot.slane %v5559_v42, 4 }
 0x943   : > { %v5561_v15 = vsel %vm1466_vm0, %v5560_v24, %v5553_v1 }
 0x944   : > { %v5588_v17 = vadd.f32 %v5587_v5, %v5561_v15 }
 0x946   : > { %v5591_v33 = vmul.f32 0.17677669, %v5588_v17 }
 0x948   : > { %v14944_v50 = vadd.f32 %v13182_v38, %v5591_v33 }
 0x94a   : > { %v5593_v53 = vsel %vm3222_vm6, %v14944_v50, -inf }
 0x94b   : > { %5594 = vmax.xlane.f32.xlu0 %v5593_v53 }
 0x974   : > { %6400 = vxpose.xlu0.c.b16.start.end [1/1] (short) (narrow) %v6398_v8, 48 }
 0x9be   : > { %v14948_v40 = vpop.xlane.xlu0 %5594 }
 0xa20   : > { %v6408_v20 = vpop.trf.xlu0 }
 0xa30   : > { %v6409_v49 = vpop.trf.xlu0 }
 0xa31   : > { %v6454_v11 = vrot.slane %v6409_v49, 4  ;;  %v6459_v5 = vperm.slane %v6409_v49, %v13817_v26 }
 0xa33   : > { %v6455_v18 = vsel %vm1466_vm0, 0, %v6454_v11  ;;  %v6464_v24 = vrot.slane %v6459_v5, 4  ;;  %v14963_v11 = vperm.slane %v6459_v5, %v13819_v27 }
 0xa34   : > { %v6463_v52 = vperm.slane %v6455_v18, %v13817_v26 }
 0xa35   : > { %v6465_v49 = vsel %vm1466_vm0, 0, %v6464_v24  ;;  %v6416_v24 = vrot.slane %v6408_v20, 4 }
 0xa36   : > { %v6474_v32 = vrot.slane %v6463_v52, 4  ;;  %v14954_v22 = vperm.slane %v6463_v52, %v13819_v27 }
 0xa38   : > { %v6475_v57 = vsel %vm1466_vm0, 0, %v6474_v32  ;;  %v6488_v42 = vrot.slane %v14954_v22, 4  ;;  %v6565_v61 = vpack.i.b16 0, %v14954_v22 }
 0xa39   : > { %v6483_v1 = vperm.slane %v6475_v57, %v13819_v27  ;;  %v14966_v57 = vperm.slane %v6465_v49, %v13819_v27 }
 0xa3a   : > { %v6489_v15 = vsel %vm1466_vm0, 0, %v6488_v42  ;;  %v6484_v42 = vrot.slane %v14963_v11, 4 }
 0xa3b   : > { %v6573_v17 = vshrl.u32 %v6489_v15, 16  ;;  %v6490_v33 = vrot.slane %v6483_v1, 4  ;;  %v6571_v38 = vpack.i.b16 0, %v6489_v15  ;;  %v6421_v15 = vperm.slane %v6408_v20, %v13817_v26 }
 0xa3d   : > { %v6574_v53 = vpack.i.b16 0, %v6573_v17  ;;  %v6491_v8 = vsel %vm1466_vm0, 0, %v6490_v33  ;;  %v6486_v17 = vrot.slane %v14966_v57, 4  ;;  %v14972_v33 = vsel %vm1466_vm0, 0, %v6484_v42 }
 0xa3e   : > { %v6585_v18 = vshrl.u32 %v6491_v8, 16  ;;  %v6583_v52 = vpack.i.b16 0, %v6491_v8  ;;  %v6426_v5 = vrot.slane %v6421_v15, 4  ;;  %v6549_v37 = vshrl.u32 %v14972_v33, 16 }
 0xa3f   : > { %12784 = vxpose.binary.xlu0.c.b16.start.end [1/2] (short) (narrow) %v6574_v53, %v6571_v38, 16  ;;  %v6487_v38 = vsel %vm1466_vm0, 0, %v6486_v17  ;;  %v6417_v53 = vsel %vm1466_vm0, 0, %v6416_v24 }
 0xa40   : > { %v6586_v32 = vpack.i.b16 0, %v6585_v18  ;;  %v6427_v8 = vsel %vm1466_vm0, 0, %v6426_v5  ;;  %v6561_v49 = vshrl.u32 %v6487_v38, 16  ;;  %v6550_v18 = vpack.i.b16 0, %v6549_v37 }
 0xa41   : > { %v14981_v41 = vperm.slane %v6427_v8, %v13819_v27  ;;  %v6559_v20 = vpack.i.b16 0, %v6487_v38  ;;  %v6579_v8 = vshrl.u32 %v6483_v1, 16 }
 0xa42   : > { %12778 = vxpose.binary.xlu1.c.b16.start.end [1/2] (short) (narrow) %v6586_v32, %v6583_v52, 16  ;;  %v6553_v52 = vpack.i.b16 0, %v14966_v57  ;;  %v6425_v32 = vperm.slane %v6417_v53, %v13817_v26  ;;  %v6562_v42 = vpack.i.b16 0, %v6561_v49 }
 0xa43   : > { %v6448_v17 = vrot.slane %v14981_v41, 4 }
 0xa44   : > { %v14984_v3 = vperm.slane %v6425_v32, %v13819_v27  ;;  %v6436_v49 = vrot.slane %v6425_v32, 4  ;;  %v15005_v32 = vperm.slane %v6421_v15, %v13819_v27  ;;  %v16782_v15 = vld [vmem:[#allocation64_spill] sm:$0xff] }
 0xa45   : > { %v14988_v24 = vsel %vm1466_vm0, 0, %v6448_v17 }
 0xa46   : > { %v6450_v37 = vrot.slane %v14984_v3, 4  ;;  %v6513_v5 = vshrl.u32 %v14988_v24, 16 }
 0xa48   : > { %v14993_v53 = vsel %vm1466_vm0, 0, %v6450_v37  ;;  %v6410_v37 = vpop.trf.xlu0 }
 0xa49   : > { %v6523_v38 = vpack.i.b16 0, %v14993_v53 }
 0xa4f   : > { %12796 = vxpose.binary.xlu0.c.b16.start.end [1/2] (short) (narrow) %v6553_v52, %v6550_v18, 16  ;;  %v6514_v18 = vpack.i.b16 0, %v6513_v5  ;;  %v6577_v52 = vpack.i.b16 0, %v6483_v1  ;;  %v6541_v5 = vpack.i.b16 0, %v14963_v11  ;;  %v6589_v1 = vpack.i.b16 0, %v6410_v37 }
 0xa50   : > { %v5596_v37 = vsub.f32 %v14944_v50, %v14948_v40  ;;  %v6547_v40 = vpack.i.b16 0, %v14972_v33 }
 0xa52   : > { %12781 = vxpose.binary.xlu1.c.b16.start.end [1/2] (short) (narrow) %v6562_v42, %v6559_v20, 16  ;;  %v6580_v20 = vpack.i.b16 0, %v6579_v8  ;;  %v6437_v42 = vsel %vm1466_vm0, 0, %v6436_v49 }
 0xa53   : > { %v14998_v17 = vperm.slane %v6437_v42, %v13819_v27  ;;  %v5606_v42 = vunpack.c.l.b16 %v16782_v15 }
 0xa55   : > { %v6531_v58 = vshrl.u32 %v14998_v17, 16  ;;  %v6452_v62 = vrot.slane %v14998_v17, 4  ;;  %v6529_v55 = vpack.i.b16 0, %v14998_v17  ;;  %v6511_v17 = vpack.i.b16 0, %v14988_v24 }
 0xa57   : > { %v6532_v51 = vpack.i.b16 0, %v6531_v58  ;;  %v6453_v63 = vsel %vm1466_vm0, 0, %v6452_v62  ;;  %v6505_v58 = vpack.i.b16 0, %v14981_v41  ;;  %v6495_v62 = vshrl.u32 %v15005_v32, 16 }
 0xa58   : > { %v6535_v8 = vpack.i.b16 0, %v6453_v63  ;;  %v6537_v15 = vshrl.u32 %v6453_v63, 16 }
 0xa5f   : > { %12817 = vxpose.binary.xlu0.c.b16.start.end [1/2] (short) (narrow) %v6523_v38, %v6514_v18, 16  ;;  %v6446_v18 = vrot.slane %v15005_v32, 4 }
 0xa61   : > { %v15009_v38 = vsel %vm1466_vm0, 0, %v6446_v18 }
 0xa62   : > { %12787 = vxpose.binary.xlu1.c.b16.start.end [1/2] (short) (narrow) %v6580_v20, %v6577_v52, 16  ;;  %v6501_v49 = vshrl.u32 %v15009_v38, 16  ;;  %v6496_v20 = vpack.i.b16 0, %v6495_v62 }
 0xa64   : > { %v6502_v52 = vpack.i.b16 0, %v6501_v49 }
 0xa6f   : > { %12823 = vxpose.binary.xlu0.c.b16.start.end [1/2] (short) (narrow) %v6541_v5, %v6532_v51, 16  ;;  %v15015_v51 = vpack.c.b16 %v5606_v42, %v5606_v42  ;;  %v5597_v5 = vmul.f32 1.442695, %v5596_v37  ;;  %v6538_v42 = vpack.i.b16 0, %v6537_v15 }
 0xa71   : > { %16783 = vst [vmem:[#allocation64_spill] sm:$0xff] %v15015_v51  ;;  %13163 = vpow2.f32 %v5597_v5  ;;  %v6555_v5 = vshrl.u32 %v14966_v57, 16 }
 0xa72   : > { %12790 = vxpose.binary.xlu1.c.b16.start.end [1/2] (short) (narrow) %v6535_v8, %v6589_v1, 16 }
 0xa73   : > { %v6556_v36 = vpack.i.b16 0, %v6555_v5 }
 0xa77   : > { %v13164_v8 = vpop.eup %13163 }
 0xa78   : > { %v5599_v18 = vsel %vm3222_vm6, %v13164_v8, 0.0 }
 0xa7f   : > { %12829 = vxpose.binary.xlu0.c.b16.start.end [1/2] (short) (narrow) %v6505_v58, %v6502_v52, 16 }
 0xa8f   : > { %6607 = vxpose.xlu0.c.b16.start.end [1/1] (short) (narrow) %v6496_v20, 16 }
 0xacc   : > { %5608 = vrot.lane.b32.xlu1 %v15015_v51, %s13414_s18 }
 0xaee   : > { %v15021_v1 = vpop.trf.xlu1 }
 0xaf6   : > { %5600 = vadd.xlane.f32.xlu1 %v5599_v18  ;;  %v15024_v49 = vpop.trf.xlu1 }
 0xafe   : > { %v15026_v52 = vpop.trf.xlu1 }
 0xb06   : > { %v15028_v58 = vpop.trf.xlu1 }
 0xb0e   : > { %v15030_v62 = vpop.trf.xlu1 }
 0xb16   : > { %v15032_v20 = vpop.trf.xlu1 }
 0xb1e   : > { %v15034_v50 = vpop.trf.xlu1 }
 0xb26   : > { %v15037_v37 = vpop.trf.xlu1 }
 0xb30   : > { %12793 = vxpose.binary.xlu1.c.b16.start.end [1/2] (short) (narrow) %v6547_v40, %v6538_v42, 16 }
 0xb3e   : > { %v5609_v18 = vpop.permute.xlu1 %5608 }
 0xb3f   : > { %v5614_v7 = vsel %vm3238_vm5, %v5609_v18, 0 }
 0xb40   : > { %12799 = vxpose.binary.xlu1.c.b16.start.end [1/2] (short) (narrow) %v6565_v61, %v6556_v36, 16 }
 0xb41   : > { %5623 = vmatpush.bf16.msrb.mxu1 %v5614_v7 }
 0xb69   : > { %v5601_v0 = vpop.xlane.xlu1 %5600 }
 0xb6a   : > { %13165 = vrcp.f32 %v5601_v0 }
 0xb70   : > { %v13166_v63 = vpop.eup %13165 }
 0xb71   : > { %v5603_v46 = vmul.f32 %v13166_v63, %v13164_v8 }
 0xb73   : > { %v5604_v45 = vpack.c.bf16 %v5603_v46, %v5603_v46 }
 0xb75   : > { %5629 = vxpose.xlu2.c.b16.start.end [1/1] (short) (narrow) %v5604_v45, 16  ;;  %12134 = vmatmul.msk.bf16.vlgmr.msrb.gmra.mxu1 %vm3222_vm6, %v5604_v45 }
 0xbf2   : > { %v15043_v33 = vpop.f32.mrf.mxu1 }
 0xbf3   : > { %16784 = vst [vmem:[#allocation108_spill] sm:$0xff] %v15043_v33 }
 0xbfa   : > { %v5627_v15 = vpop.f32.mrf.mxu1 }
 0xc16   : > { %v5637_v57 = vpop.trf.xlu2 }
 0xc17   : > { %v5648_v40 = vperm.slane %v5637_v57, %v13817_v26  ;;  %v6525_v57 = vshrl.u32 %v14993_v53, 16  ;;  %v6567_v53 = vshrl.u32 %v14954_v22, 16  ;;  %v16785_v22 = vld [vmem:[#allocation67_spill] sm:$0xff] }
 0xc19   : > { %v5649_v42 = vrot.slane %v5648_v40, 4  ;;  %v5654_v5 = vperm.slane %v5648_v40, %v13819_v27 }
 0xc1b   : > { %v5650_v36 = vsel %vm1466_vm0, 0, %v5649_v42  ;;  %v5666_v7 = vshrl.u32 %v5654_v5, 16  ;;  %v5664_v61 = vpack.i.b16 0, %v5654_v5  ;;  %v5659_v63 = vrot.slane %v5654_v5, 4 }
 0xc1c   : > { %v5658_v0 = vperm.slane %v5650_v36, %v13819_v27  ;;  %v6526_v42 = vpack.i.b16 0, %v6525_v57  ;;  %v15061_v57 = vpop.trf.xlu1 }
 0xc1d   : > { %v5667_v8 = vpack.i.b16 0, %v5666_v7  ;;  %v5660_v15 = vsel %vm1466_vm0, 0, %v5659_v63 }
 0xc1e   : > { %v5678_v46 = vshrl.u32 %v5658_v0, 16  ;;  %v5676_v18 = vpack.i.b16 0, %v5658_v0  ;;  %v5672_v33 = vshrl.u32 %v5660_v15, 16  ;;  %v5670_v60 = vpack.i.b16 0, %v5660_v15 }
 0xc1f   : > { %12802 = vxpose.binary.xlu2.c.b16.start.end [1/2] (short) (narrow) %v5667_v8, %v5664_v61, 16  ;;  %v5661_v36 = vrot.slane %v5658_v0, 4  ;;  %v6543_v8 = vshrl.u32 %v14963_v11, 16  ;;  %v6507_v11 = vshrl.u32 %v14981_v41, 16  ;;  %v6517_v15 = vpack.i.b16 0, %v14984_v3 }
 0xc20   : > { %v5679_v45 = vpack.i.b16 0, %v5678_v46  ;;  %v5673_v40 = vpack.i.b16 0, %v5672_v33  ;;  %v6493_v33 = vpack.i.b16 0, %v15005_v32 }
 0xc21   : > { %v5662_v7 = vsel %vm1466_vm0, 0, %v5661_v36  ;;  %v6508_v63 = vpack.i.b16 0, %v6507_v11  ;;  %v7305_v11 = vrot.slane %v15024_v49, 4  ;;  %v7243_v49 = vrot.slane %v15030_v62, 4 }
 0xc22   : > { %12808 = vxpose.binary.xlu1.c.b16.start.end [1/2] (short) (narrow) %v5679_v45, %v5676_v18, 16  ;;  %v5684_v61 = vshrl.u32 %v5662_v7, 16  ;;  %v5682_v46 = vpack.i.b16 0, %v5662_v7  ;;  %v6499_v18 = vpack.i.b16 0, %v15009_v38  ;;  %v6544_v45 = vpack.i.b16 0, %v6543_v8  ;;  %v12785_v38 = vpop.trf.xlu0  ;;  %v16786_v8 = vld [vmem:[#allocation66_spill] sm:$0xff] }
 0xc24   : > { %v5685_v5 = vpack.i.b16 0, %v5684_v61 }
 0xc2a   : > { %v12786_v24 = vpop.trf.xlu0 }
 0xc2f   : > { %12805 = vxpose.binary.xlu2.c.b16.start.end [1/2] (short) (narrow) %v5673_v40, %v5670_v60, 16  ;;  %v6519_v60 = vshrl.u32 %v14984_v3, 16  ;;  %v12795_v40 = vpop.trf.xlu1 }
 0xc31   : > { %v6520_v0 = vpack.i.b16 0, %v6519_v60 }
 0xc32   : > { %12820 = vxpose.binary.xlu1.c.b16.start.end [1/2] (short) (narrow) %v6529_v55, %v6526_v42, 16  ;;  %v6568_v55 = vpack.i.b16 0, %v6567_v53  ;;  %v12797_v32 = vpop.trf.xlu0 }
 0xc37   : > { %v15067_v42 = vpop.trf.xlu1 }
 0xc3a   : > { %v12798_v41 = vpop.trf.xlu0 }
 0xc3f   : > { %12811 = vxpose.binary.xlu2.c.b16.start.end [1/2] (short) (narrow) %v5685_v5, %v5682_v46, 16  ;;  %v12801_v7 = vpop.trf.xlu1 }
 0xc42   : > { %12826 = vxpose.binary.xlu1.c.b16.start.end [1/2] (short) (narrow) %v6499_v18, %v6544_v45, 16  ;;  %v15069_v3 = vpop.trf.xlu0 }
 0xc4a   : > { %v15073_v18 = vpop.trf.xlu0 }
 0xc4f   : > { %12814 = vxpose.binary.xlu2.c.b16.start.end [1/2] (short) (narrow) %v6511_v17, %v6568_v55, 16  ;;  %v7249_v55 = vrot.slane %v15021_v1, 4 }
 0xc52   : > { %12835 = vxpose.binary.xlu1.c.b16.start.end [1/2] (short) (narrow) %v6493_v33, %v6520_v0, 16  ;;  %v15075_v60 = vpop.trf.xlu0  ;;  %v15080_v33 = vperm.slane %v15034_v50, %v13817_v26 }
 0xc5f   : > { %12832 = vxpose.binary.xlu2.c.b16.start.end [1/2] (short) (narrow) %v6517_v15, %v6508_v63, 16  ;;  %v7237_v63 = vrot.slane %v15026_v52, 4 }
 0xc61   : > { %v7238_v1 = vsel %vm1466_vm0, %v7237_v63, %v12795_v40 }
 0xc62   : > { %v15100_v19 = vperm.slane %v7238_v1, %v13817_v26 }
 0xcac   : > { %7863 = vrot.lane.b32.xlu1 %v16785_v22, %s13416_s1  ;;  %v7250_v22 = vsel %vm1466_vm0, %v7249_v55, %v12785_v38  ;;  %v12825_v55 = vpop.trf.xlu0 }
 0xcad   : > { %v15095_v52 = vperm.slane %v7250_v22, %v13817_v26 }
 0xcaf   : > { %v7267_v63 = vrot.slane %v15095_v52, 4 }
 0xcb4   : > { %7900 = vrot.lane.b32.xlu1 %v15015_v51, %s13416_s1  ;;  %v7293_v51 = vrot.slane %v15028_v58, 4  ;;  %v7231_v58 = vrot.slane %v12798_v41, 4 }
 0xcb6   : > { %v7294_v38 = vsel %vm1466_vm0, %v7293_v51, %v12797_v32  ;;  %v7232_v51 = vsel %vm1466_vm0, %v7231_v58, %v12825_v55 }
 0xcb7   : > { %v15110_v41 = vperm.slane %v7294_v38, %v13817_v26  ;;  %v15129_v38 = vperm.slane %v7232_v51, %v13817_v26 }
 0xcc0   : > { %v12803_v36 = vpop.trf.xlu2 }
 0xcc8   : > { %v12804_v61 = vpop.trf.xlu2  ;;  %7865 = vrot.lane.b32.xlu2 %v16786_v8, %s13416_s1 }
 0xcce   : > { %v12809_v46 = vpop.trf.xlu1 }
 0xccf   : > { %v5815_v17 = vrot.slane %v12809_v46, 4  ;;  %v7352_v46 = vperm.slane %v15080_v33, %v13819_v27 }
 0xcd0   : > { %v12806_v5 = vpop.trf.xlu2 }
 0xcd1   : > { %v5816_v0 = vsel %vm1466_vm0, %v5815_v17, %v12803_v36  ;;  %v7306_v17 = vsel %vm1466_vm0, %v7305_v11, %v12786_v24  ;;  %v7357_v16 = vrot.slane %v7352_v46, 4  ;;  %v7427_v22 = vshrl.u32 %v7352_v46, 16 }
 0xcd2   : > { %v5820_v50 = vperm.slane %v5816_v0, %v13817_v26  ;;  %v15105_v62 = vperm.slane %v7306_v17, %v13817_v26 }
 0xcd3   : > { %v15118_v1 = vsel %vm1466_vm0, 0, %v7357_v16  ;;  %v15126_v58 = vpack.i.b16 0, %v7427_v22 }
 0xcd4   : > { %v5829_v0 = vrot.slane %v5820_v50, 4 }
 0xcd6   : > { %v12810_v45 = vpop.trf.xlu1 }
 0xcd7   : > { %v5843_v47 = vrot.slane %v12810_v45, 4  ;;  %v7244_v45 = vsel %vm1466_vm0, %v7243_v49, %v12801_v7  ;;  %v7426_v7 = vpack.i.b16 0, %v7352_v46  ;;  %v7323_v46 = vrot.slane %v15105_v62, 4 }
 0xcd8   : > { %v12807_v53 = vpop.trf.xlu2 }
 0xcd9   : > { %v5844_v24 = vsel %vm1466_vm0, %v5843_v47, %v12804_v61  ;;  %v15122_v47 = vperm.slane %v7244_v45, %v13817_v26  ;;  %v7287_v45 = vrot.slane %v15067_v42, 4 }
 0xcda   : > { %v5848_v61 = vperm.slane %v5844_v24, %v13817_v26 }
 0xcdb   : > { %v7268_v51 = vsel %vm1466_vm0, %v7267_v63, %v15122_v47 }
 0xcde   : > { %v15085_v15 = vpop.trf.xlu1 }
 0xce0   : > { %v12812_v8 = vpop.trf.xlu2 }
 0xce1   : > { %v5821_v36 = vrot.slane %v12812_v8, 4 }
 0xce3   : > { %v5822_v40 = vsel %vm1466_vm0, %v5821_v36, %v12806_v5  ;;  %v7255_v36 = vrot.slane %v15100_v19, 4 }
 0xce4   : > { %v5826_v8 = vperm.slane %v5822_v40, %v13817_v26  ;;  %v7299_v40 = vrot.slane %v15032_v20, 4 }
 0xce6   : > { %v5827_v32 = vrot.slane %v5826_v8, 4  ;;  %v5830_v11 = vsel %vm1466_vm0, %v5826_v8, %v5829_v0  ;;  %v15114_v5 = vpop.trf.xlu1  ;;  %v7311_v0 = vrot.slane %v15110_v41, 4  ;;  %v7430_v8 = vpack.i.b16 0, %v15118_v1 }
 0xce7   : > { %v5838_v16 = vperm.slane %v5830_v11, %v13819_v27  ;;  %v15144_v11 = vpop.trf.xlu0 }
 0xce8   : > { %v12813_v49 = vpop.trf.xlu2  ;;  %v5828_v17 = vsel %vm1466_vm0, %v5827_v32, %v5820_v50  ;;  %v7256_v50 = vsel %vm1466_vm0, %v7255_v36, %v15129_v38  ;;  %v5857_v32 = vrot.slane %v5848_v61, 4  ;;  %v15155_v2 = vand.u32 %v7430_v8, %v14218_v31 }
 0xce9   : > { %v5849_v55 = vrot.slane %v12813_v49, 4  ;;  %v5834_v24 = vperm.slane %v5828_v17, %v13819_v27  ;;  %v15147_v49 = vand.u32 %v7426_v7, %v14218_v31  ;;  %v5841_v43 = vrot.slane %v5838_v16, 4 }
 0xcea   : > { %v15161_v7 = vperm.slane %v7268_v51, %v13819_v27  ;;  %v5886_v8 = vshrl.u32 %v5838_v16, 16 }
 0xceb   : > { %v5850_v22 = vsel %vm1466_vm0, %v5849_v55, %v12807_v53  ;;  %v7431_v53 = vshrl.u32 %v15118_v1, 16  ;;  %v5839_v36 = vrot.slane %v5834_v24, 4  ;;  %v5842_v51 = vsel %vm1466_vm0, 0, %v5841_v43 }
 0xcec   : > { %v5854_v20 = vperm.slane %v5850_v22, %v13817_v26  ;;  %v15158_v22 = vperm.slane %v7256_v50, %v13819_v27  ;;  %v7279_v43 = vrot.slane %v15161_v7, 4 }
 0xced   : > { %v5840_v35 = vsel %vm1466_vm0, 0, %v5839_v36 }
 0xcee   : > { %v5855_v17 = vrot.slane %v5854_v20, 4  ;;  %v5858_v55 = vsel %vm1466_vm0, %v5854_v20, %v5857_v32  ;;  %v12827_v63 = vpop.trf.xlu1  ;;  %v5874_v20 = vshrl.u32 %v5834_v24, 16 }
 0xcef   : > { %v7288_v42 = vsel %vm1466_vm0, %v7287_v45, %v12827_v63  ;;  %v5866_v9 = vperm.slane %v5858_v55, %v13819_v27  ;;  %v15187_v56 = vpop.trf.xlu0 }
 0xcf0   : > { %v15166_v1 = vperm.slane %v7288_v42, %v13817_v26  ;;  %v12815_v39 = vpop.trf.xlu2  ;;  %v5856_v32 = vsel %vm1466_vm0, %v5855_v17, %v5848_v61 }
 0xcf1   : > { %v7300_v12 = vsel %vm1466_vm0, %v7299_v40, %v12815_v39  ;;  %v5862_v50 = vperm.slane %v5856_v32, %v13819_v27  ;;  %v5887_v25 = vshrl.u32 %v5866_v9, 16  ;;  %v5885_v63 = vpack.i.b16 %v5866_v9, %v5838_v16 }
 0xcf2   : > { %v7312_v45 = vsel %vm1466_vm0, %v7311_v0, %v15166_v1  ;;  %v15175_v55 = vperm.slane %v7300_v12, %v13817_v26  ;;  %v5869_v42 = vrot.slane %v5866_v9, 4  ;;  %v5892_v32 = vshrl.u32 %v5842_v51, 16 }
 0xcf3   : > { %v7318_v23 = vperm.slane %v7312_v45, %v13819_v27  ;;  %v5873_v61 = vpack.i.b16 %v5862_v50, %v5834_v24  ;;  %v5875_v17 = vshrl.u32 %v5862_v50, 16  ;;  %v5867_v40 = vrot.slane %v5862_v50, 4 }
 0xcf4   : > { %v7324_v39 = vsel %vm1466_vm0, %v7323_v46, %v15175_v55  ;;  %v5888_v16 = vpack.i.b16 %v5887_v25, %v5886_v8  ;;  %v6000_v24 = vsel %vm3238_vm5, %v5885_v63, 0  ;;  %v5870_v36 = vsel %vm1466_vm0, 0, %v5869_v42 }
 0xcf5   : > { %v7330_v0 = vperm.slane %v7324_v39, %v13819_v27  ;;  %v5896_v12 = vsel %vm3238_vm5, %v5873_v61, 0  ;;  %v5876_v59 = vpack.i.b16 %v5875_v17, %v5874_v20  ;;  %v5868_v45 = vsel %vm1466_vm0, 0, %v5867_v40 }
 0xcf6   : > { %5905 = vmatpush.bf16.msra.mxu2 %v5896_v12  ;;  %v12828_v9 = vpop.trf.xlu1  ;;  %v5880_v46 = vshrl.u32 %v5840_v35, 16  ;;  %v5879_v34 = vpack.i.b16 %v5868_v45, %v5840_v35  ;;  %v6026_v39 = vsel %vm3238_vm5, %v5888_v16, 0  ;;  %v7337_v61 = vrot.slane %v7318_v23, 4 }
 0xcf7   : > { %v5922_v50 = vsel %vm3238_vm5, %v5876_v59, 0  ;;  %v5891_v25 = vpack.i.b16 %v5870_v36, %v5842_v51  ;;  %v5881_v8 = vshrl.u32 %v5868_v45, 16  ;;  %v5893_v17 = vshrl.u32 %v5870_v36, 16 }
 0xcf8   : > { %v12816_v20 = vpop.trf.xlu2  ;;  %5931 = vmatpush.bf16.msra.mxu3 %v5922_v50  ;;  %v7335_v63 = vrot.slane %v7330_v0, 4  ;;  %v7187_v40 = vrot.slane %v15075_v60, 4  ;;  %v5948_v42 = vsel %vm3238_vm5, %v5879_v34, 0  ;;  %v7280_v59 = vsel %vm1466_vm0, %v7279_v43, %v15158_v22 }
 0xcf9   : > { %12135 = vmatmul.msk.bf16.vlgmr.msra.gmra.mxu2 %vm3222_vm6, %v13959_v10  ;;  %v7432_v35 = vpack.i.b16 0, %v7431_v53  ;;  %5957 = vmatpush.bf16.msrb.mxu0 %v5948_v42  ;;  %v6052_v12 = vsel %vm3238_vm5, %v5891_v25, 0  ;;  %v5882_v51 = vpack.i.b16 %v5881_v8, %v5880_v46  ;;  %v5894_v16 = vpack.i.b16 %v5893_v17, %v5892_v32  ;;  %v6615_v17 = vpop.trf.xlu0 }
 0xcfa   : > { %6009 = vmatpush.bf16.msrb.mxu2 %v6000_v24  ;;  %v7336_v24 = vsel %vm1466_vm0, %v7335_v63, %v7318_v23  ;;  %v7193_v60 = vrot.slane %v15061_v57, 4  ;;  %v16787_v45 = vrot.slane %v15069_v3, 4  ;;  %v7125_v36 = vrot.slane %v12816_v20, 4 }
 0xcfb   : > { %12138 = vmatmul.msk.bf16.vlgmr.msra.gmra.mxu3 %vm3222_vm6, %v13900_v29  ;;  %v7398_v53 = vshrl.u32 %v7336_v24, 16  ;;  %v5974_v43 = vsel %vm3238_vm5, %v5882_v51, 0  ;;  %v7397_v23 = vshrl.u32 %v7280_v59, 16  ;;  %v7281_v57 = vrot.slane %v15158_v22, 4 }
 0xcfc   : > { %6035 = vmatpush.bf16.msrb.mxu3 %v6026_v39  ;;  %v7182_v34 = vsel %vm1466_vm0, %v16787_v45, %v15144_v11  ;;  %v7338_v32 = vsel %vm1466_vm0, %v7330_v0, %v7337_v61  ;;  %v7194_v3 = vsel %vm1466_vm0, %v7193_v60, %v15085_v15  ;;  %5983 = vmatpush.bf16.msra.mxu1 %v5974_v43  ;;  %v6078_v11 = vsel %vm3238_vm5, %v5894_v16, 0 }
 0xcfd   : > { %6061 = vmatpush.bf16.msra.mxu0 %v6052_v12  ;;  %v7395_v46 = vpack.i.b16 %v7336_v24, %v7280_v59  ;;  %v7137_v50 = vrot.slane %v15037_v37, 4  ;;  %v7399_v0 = vpack.i.b16 %v7398_v53, %v7397_v23  ;;  %v7282_v15 = vsel %vm1466_vm0, %v15161_v7, %v7281_v57 }
 0xcfe   : > { %7449 = vmatpush.bf16.msra.mxu2 %v15147_v49  ;;  %v16788_v49 = vand.u32 %v15126_v58, %v14218_v31  ;;  %12141 = vmatmul.msk.bf16.vlgmr.msrb.gmra.mxu0 %vm3222_vm6, %v13902_v30  ;;  %v15220_v58 = vperm.slane %v7182_v34, %v13817_v26  ;;  %v12836_v22 = vpop.trf.xlu1  ;;  %v7126_v39 = vsel %vm1466_vm0, %v7125_v36, %v12828_v9  ;;  %v7406_v25 = vshrl.u32 %v7338_v32, 16 }
 0xcff   : > { %v7188_v61 = vsel %vm1466_vm0, %v7187_v40, %v12836_v22  ;;  %v7490_v20 = vand.u32 %v7432_v35, %v14218_v31  ;;  %v15229_v37 = vperm.slane %v7194_v3, %v13817_v26  ;;  %12144 = vmatmul.msk.bf16.vlgmr.msra.gmra.mxu1 %vm3222_vm6, %v13965_v14  ;;  %v7403_v8 = vpack.i.b16 %v7338_v32, %v7282_v15 }
 0xd00   : > { %7465 = vmatpush.bf16.msra.mxu3 %v16788_v49  ;;  %6087 = vmatpush.bf16.msrb.mxu1 %v6078_v11  ;;  %v7405_v63 = vshrl.u32 %v7282_v15, 16  ;;  %v7199_v9 = vrot.slane %v15220_v58, 4  ;;  %v15235_v40 = vperm.slane %v7126_v39, %v13817_v26  ;;  %v15238_v42 = vperm.slane %v7188_v61, %v13817_v26 }
 0xd01   : > { %7481 = vmatpush.bf16.msrb.mxu0 %v15155_v2  ;;  %v12833_v2 = vpop.trf.xlu2  ;;  %v7138_v59 = vsel %vm1466_vm0, %v7137_v50, %v15073_v18  ;;  %v7119_v35 = vrot.slane %v15187_v56, 4  ;;  %v7211_v16 = vrot.slane %v15229_v37, 4  ;;  %v7131_v60 = vrot.slane %v15114_v5, 4 }
 0xd02   : > { %7450 = vmatpush.bf16.msra.mxu2 %v7395_v46  ;;  %v7175_v7 = vrot.slane %v12833_v2, 4  ;;  %v7407_v51 = vpack.i.b16 %v7406_v25, %v7405_v63  ;;  %v7142_v45 = vperm.slane %v7138_v59, %v13817_v26  ;;  %v7143_v34 = vrot.slane %v15235_v40, 4 }
 0xd03   : > { %v7212_v18 = vsel %vm1466_vm0, %v7211_v16, %v15238_v42 }
 0xd04   : > { %7466 = vmatpush.bf16.msra.mxu3 %v7399_v0  ;;  %7497 = vmatpush.bf16.msra.mxu1 %v7490_v20  ;;  %v7176_v12 = vsel %vm1466_vm0, %v7175_v7, %v6615_v17  ;;  %v7218_v23 = vperm.slane %v7212_v18, %v13819_v27  ;;  %v7155_v3 = vrot.slane %v7142_v45, 4  ;;  %v7269_v18 = vrot.slane %v15122_v47, 4 }
 0xd05   : > { %7482 = vmatpush.bf16.msrb.mxu0 %v7403_v8  ;;  %v15246_v24 = vperm.slane %v7176_v12, %v13817_v26 }
 0xd06   : > { %v12837_v36 = vpop.trf.xlu1  ;;  %v7223_v61 = vrot.slane %v7218_v23, 4 }
 0xd07   : > { %v7200_v56 = vsel %vm1466_vm0, %v7199_v9, %v15246_v24  ;;  %v7120_v43 = vsel %vm1466_vm0, %v7119_v35, %v12837_v36 }
 0xd08   : > { %7498 = vmatpush.bf16.msra.mxu1 %v7407_v51  ;;  %v7206_v53 = vperm.slane %v7200_v56, %v13819_v27  ;;  %v15258_v49 = vperm.slane %v7120_v43, %v13817_v26  ;;  %v7347_v51 = vrot.slane %v15080_v33, 4 }
 0xd09   : > { %v12834_v5 = vpop.trf.xlu2  ;;  %12136 = vmatmul.msk.bf16.gmra.mxu2 %vm3222_vm6, %v13984_v54 }
 0xd0a   : > { %v7132_v57 = vsel %vm1466_vm0, %v7131_v60, %v12834_v5  ;;  %v7225_v32 = vrot.slane %v7206_v53, 4  ;;  %v7144_v11 = vsel %vm1466_vm0, %v7143_v34, %v15258_v49  ;;  %v7224_v2 = vsel %vm1466_vm0, %v7223_v61, %v7206_v53 }
 0xd0b   : > { %v7136_v46 = vperm.slane %v7132_v57, %v13817_v26  ;;  %v7150_v50 = vperm.slane %v7144_v11, %v13819_v27  ;;  %12139 = vmatmul.msk.bf16.gmra.mxu3 %vm3222_vm6, %v13963_v13  ;;  %v7366_v12 = vshrl.u32 %v7224_v2, 16  ;;  %v7348_v60 = vsel %vm1466_vm0, 0, %v7347_v51 }
 0xd0c   : > { %v7226_v39 = vsel %vm1466_vm0, %v7218_v23, %v7225_v32  ;;  %v7325_v34 = vrot.slane %v15175_v55, 4  ;;  %v7356_v56 = vperm.slane %v7348_v60, %v13819_v27  ;;  %v7313_v53 = vrot.slane %v15166_v1, 4 }
 0xd0d   : > { %v7156_v22 = vsel %vm1466_vm0, %v7155_v3, %v7136_v46  ;;  %v7169_v15 = vrot.slane %v7150_v50, 4  ;;  %v7374_v7 = vshrl.u32 %v7226_v39, 16  ;;  %v7157_v36 = vrot.slane %v7136_v46, 4 }
 0xd0e   : > { %v7162_v0 = vperm.slane %v7156_v22, %v13819_v27  ;;  %12142 = vmatmul.msk.bf16.gmra.mxu0 %vm3222_vm6, %v13969_v21  ;;  %v7326_v33 = vsel %vm1466_vm0, %v15105_v62, %v7325_v34  ;;  %v7270_v55 = vsel %vm1466_vm0, %v15095_v52, %v7269_v18  ;;  %v7359_v43 = vrot.slane %v7356_v56, 4 }
 0xd0f   : > { %12145 = vmatmul.msk.bf16.gmra.mxu1 %vm3222_vm6, %v13986_v48  ;;  %v7334_v47 = vperm.slane %v7326_v33, %v13819_v27  ;;  %v7257_v5 = vrot.slane %v15129_v38, 4  ;;  %v7213_v23 = vrot.slane %v15238_v42, 4  ;;  %v7158_v57 = vsel %vm1466_vm0, %v7142_v45, %v7157_v36  ;;  %v16791_v33 = vld [vmem:[#allocation41_spill] sm:$0xff] }
 0xd10   : > { %v7170_v20 = vsel %vm1466_vm0, %v7162_v0, %v7169_v15  ;;  %v7167_v25 = vrot.slane %v7162_v0, 4  ;;  %v7278_v62 = vperm.slane %v7270_v55, %v13819_v27  ;;  %v7314_v1 = vsel %vm1466_vm0, %v15110_v41, %v7313_v53 }
 0xd11   : > { %v7371_v8 = vpack.i.b16 %v7226_v39, %v7170_v20  ;;  %v7373_v17 = vshrl.u32 %v7170_v20, 16  ;;  %v7145_v32 = vrot.slane %v15258_v49, 4  ;;  %v7201_v52 = vrot.slane %v15246_v24, 4 }
 0xd12   : > { %v7168_v63 = vsel %vm1466_vm0, %v7167_v25, %v7150_v50  ;;  %v7435_v3 = vshrl.u32 %v7356_v56, 16  ;;  %v7166_v11 = vperm.slane %v7158_v57, %v13819_v27  ;;  %v7360_v38 = vsel %vm1466_vm0, 0, %v7359_v43 }
 0xd13   : > { %7483 = vmatpush.bf16.msrb.mxu0 %v7371_v8  ;;  %v7363_v9 = vpack.i.b16 %v7224_v2, %v7168_v63  ;;  %v7375_v59 = vpack.i.b16 %v7374_v7, %v7373_v17  ;;  %v7365_v35 = vshrl.u32 %v7168_v63, 16  ;;  %v7339_v42 = vrot.slane %v7334_v47, 4 }
 0xd14   : > { %v7258_v45 = vsel %vm1466_vm0, %v15100_v19, %v7257_v5  ;;  %v7214_v46 = vsel %vm1466_vm0, %v15229_v37, %v7213_v23  ;;  %v7434_v50 = vpack.i.b16 0, %v7356_v56  ;;  %v7322_v22 = vperm.slane %v7314_v1, %v13819_v27  ;;  %v16792_v1 = vld [vmem:[#allocation45_spill] sm:$0xff] }
 0xd15   : > { %7451 = vmatpush.bf16.msra.mxu2 %v7363_v9  ;;  %7499 = vmatpush.bf16.msra.mxu1 %v7375_v59  ;;  %v7367_v16 = vpack.i.b16 %v7366_v12, %v7365_v35  ;;  %v7146_v41 = vsel %vm1466_vm0, %v15235_v40, %v7145_v32  ;;  %v7283_v49 = vrot.slane %v7278_v62, 4  ;;  %v7202_v24 = vsel %vm1466_vm0, %v15220_v58, %v7201_v52  ;;  %v16789_v40 = vld [vmem:[#allocation44_spill] sm:$0xff] }
 0xd16   : > { %v7436_v0 = vpack.i.b16 0, %v7435_v3  ;;  %v7438_v15 = vpack.i.b16 0, %v7360_v38  ;;  %v7439_v39 = vshrl.u32 %v7360_v38, 16  ;;  %v7266_v61 = vperm.slane %v7258_v45, %v13819_v27  ;;  %v16790_v59 = vld [vmem:[#allocation40_spill] sm:$0xff] }
 0xd17   : > { %7467 = vmatpush.bf16.msra.mxu3 %v7367_v16  ;;  %v7222_v19 = vperm.slane %v7214_v46, %v13819_v27  ;;  %v7340_v20 = vsel %vm1466_vm0, %v7339_v42, %v7322_v22  ;;  %v7171_v37 = vrot.slane %v7166_v11, 4  ;;  %v7506_v25 = vand.u32 %v7434_v50, %v14218_v31 }
 0xd18   : > { %v7341_v2 = vrot.slane %v7322_v22, 4  ;;  %v7154_v8 = vperm.slane %v7146_v41, %v13819_v27  ;;  %v7284_v58 = vsel %vm1466_vm0, %v7283_v49, %v7266_v61  ;;  %v7210_v17 = vperm.slane %v7202_v24, %v13819_v27  ;;  %v16793_v49 = vld [vmem:[#allocation46_spill] sm:$0xff]  ;;  %v16795_v24 = vld [vmem:[#allocation49_spill] sm:$0xff] }
 0xd19   : > { %12137 = vmatmul.msk.bf16.gmra.mxu2 %vm3222_vm6, %v14078_v44  ;;  %v7522_v7 = vand.u32 %v7436_v0, %v14218_v31  ;;  %v7538_v63 = vand.u32 %v7438_v15, %v14218_v31  ;;  %v7414_v9 = vshrl.u32 %v7340_v20, 16  ;;  %v7440_v35 = vpack.i.b16 0, %v7439_v39  ;;  %v16796_v0 = vld [vmem:[#allocation47_spill] sm:$0xff]  ;;  %v16797_v15 = vld [vmem:[#allocation54_spill] sm:$0xff]  ;;  %v16798_v39 = vld [vmem:[#allocation52_spill] sm:$0xff] }
 0xd1a   : > { %v7285_v12 = vrot.slane %v7266_v61, 4  ;;  %v7172_v51 = vsel %vm1466_vm0, %v7171_v37, %v7154_v8  ;;  %v7227_v16 = vrot.slane %v7222_v19, 4  ;;  %v7411_v60 = vpack.i.b16 %v7340_v20, %v7284_v58  ;;  %v16799_v61 = vld [vmem:[#allocation53_spill] sm:$0xff]  ;;  %v16800_v20 = vld [vmem:[#allocation55_spill] sm:$0xff] }
 0xd1b   : > { %12140 = vmatmul.msk.bf16.gmra.mxu3 %vm3222_vm6, %v14006_v4  ;;  %v7413_v34 = vshrl.u32 %v7284_v58, 16  ;;  %v7342_v18 = vsel %vm1466_vm0, %v7334_v47, %v7341_v2  ;;  %v7173_v56 = vrot.slane %v7154_v8, 4  ;;  %v7381_v43 = vshrl.u32 %v7172_v51, 16  ;;  %v16801_v8 = vld [vmem:[#allocation57_spill] sm:$0xff] }
 0xd1c   : > { %v7228_v36 = vsel %vm1466_vm0, %v7227_v16, %v7210_v17  ;;  %v7286_v55 = vsel %vm1466_vm0, %v7278_v62, %v7285_v12  ;;  %v7229_v5 = vrot.slane %v7210_v17, 4  ;;  %v7554_v23 = vand.u32 %v7440_v35, %v14218_v31  ;;  %v16802_v17 = vld [vmem:[#allocation58_spill] sm:$0xff]  ;;  %v16806_v35 = vld [vmem:[#allocation61_spill] sm:$0xff]  ;;  %v16807_v12 = vld [vmem:[#allocation59_spill] sm:$0xff] }
 0xd1d   : > { %v7415_v53 = vpack.i.b16 %v7414_v9, %v7413_v34  ;;  %v7422_v57 = vshrl.u32 %v7342_v18, 16  ;;  %v7419_v47 = vpack.i.b16 %v7342_v18, %v7286_v55  ;;  %v7379_v32 = vpack.i.b16 %v7228_v36, %v7172_v51  ;;  %v16805_v9 = vld [vmem:[#allocation62_spill] sm:$0xff]  ;;  %v16808_v51 = vld [vmem:[#allocation63_spill] sm:$0xff] }
 0xd1e   : > { %12143 = vmatmul.msk.bf16.gmra.mxu0 %vm3222_vm6, %v14012_v6  ;;  %v7382_v52 = vshrl.u32 %v7228_v36, 16  ;;  %v7174_v3 = vsel %vm1466_vm0, %v7166_v11, %v7173_v56  ;;  %v7421_v38 = vshrl.u32 %v7286_v55, 16  ;;  %v7230_v62 = vsel %vm1466_vm0, %v7222_v19, %v7229_v5  ;;  %v16794_v11 = vld [vmem:[#allocation48_spill] sm:$0xff]  ;;  %v7864_v19 = vpop.permute.xlu1 %7863 }
 0xd1f   : > { %12146 = vmatmul.msk.bf16.gmra.mxu1 %vm3222_vm6, %v14080_v28  ;;  %v7389_v46 = vshrl.u32 %v7174_v3, 16  ;;  %v7387_v50 = vpack.i.b16 %v7230_v62, %v7174_v3  ;;  %v7390_v22 = vshrl.u32 %v7230_v62, 16 }
 0xd20   : > { %v7383_v42 = vpack.i.b16 %v7382_v52, %v7381_v43  ;;  %v7423_v45 = vpack.i.b16 %v7422_v57, %v7421_v38 }
 0xd21   : > { %v7391_v41 = vpack.i.b16 %v7390_v22, %v7389_v46 }
 0xd22   : > { %v7866_v37 = vpop.permute.xlu2 %7865 }
 0xd23   : > { %v7871_v2 = vsel %vm3200_vm4, %v7866_v37, 0 }
 0xd29   : > { %12147 = vmatmul.msk.bf16.vlgmr.msrb.gmra.mxu2 %vm3222_vm6, %v16789_v40 }
 0xd2a   : > { %7513 = vmatpush.bf16.msrb.mxu2 %v7506_v25  ;;  %v7901_v25 = vpop.permute.xlu1 %7900 }
 0xd2b   : > { %12150 = vmatmul.msk.bf16.vlgmr.msrb.gmra.mxu3 %vm3222_vm6, %v16790_v59  ;;  %v7906_v58 = vsel %vm3238_vm5, %v7901_v25, 0 }
 0xd2c   : > { %7529 = vmatpush.bf16.msrb.mxu3 %v7522_v7  ;;  %v16803_v7 = vld [vmem:[#allocation56_spill] sm:$0xff] }
 0xd2e   : > { %12153 = vmatmul.msk.bf16.vlgmr.msra.gmra.mxu0 %vm3222_vm6, %v16791_v33  ;;  %7514 = vmatpush.bf16.msrb.mxu2 %v7411_v60 }
 0xd2f   : > { %7545 = vmatpush.bf16.msra.mxu0 %v7538_v63  ;;  %12156 = vmatmul.msk.bf16.vlgmr.msrb.gmra.mxu1 %vm3222_vm6, %v16792_v1  ;;  %v16804_v63 = vld [vmem:[#allocation60_spill] sm:$0xff] }
 0xd30   : > { %7530 = vmatpush.bf16.msrb.mxu3 %v7415_v53  ;;  %7561 = vmatpush.bf16.msrb.mxu1 %v7554_v23 }
 0xd32   : > { %7515 = vmatpush.bf16.msrb.mxu2 %v7379_v32 }
 0xd33   : > { %7546 = vmatpush.bf16.msra.mxu0 %v7419_v47 }
 0xd34   : > { %7531 = vmatpush.bf16.msrb.mxu3 %v7383_v42  ;;  %7562 = vmatpush.bf16.msrb.mxu1 %v7423_v45 }
 0xd37   : > { %7547 = vmatpush.bf16.msra.mxu0 %v7387_v50 }
 0xd38   : > { %7563 = vmatpush.bf16.msrb.mxu1 %v7391_v41 }
 0xd39   : > { %12148 = vmatmul.msk.bf16.gmra.mxu2 %vm3222_vm6, %v16793_v49 }
 0xd3b   : > { %12151 = vmatmul.msk.bf16.gmra.mxu3 %vm3222_vm6, %v16794_v11 }
 0xd3e   : > { %12154 = vmatmul.msk.bf16.gmra.mxu0 %vm3222_vm6, %v16795_v24 }
 0xd3f   : > { %12157 = vmatmul.msk.bf16.gmra.mxu1 %vm3222_vm6, %v16796_v0 }
 0xd49   : > { %12149 = vmatmul.msk.bf16.gmra.mxu2 %vm3222_vm6, %v16797_v15 }
 0xd4b   : > { %12152 = vmatmul.msk.bf16.gmra.mxu3 %vm3222_vm6, %v16798_v39 }
 0xd4e   : > { %12155 = vmatmul.msk.bf16.gmra.mxu0 %vm3222_vm6, %v16799_v61 }
 0xd4f   : > { %12158 = vmatmul.msk.bf16.gmra.mxu1 %vm3222_vm6, %v16800_v20 }
 0xd59   : > { %12159 = vmatmul.msk.bf16.vlgmr.msra.gmra.mxu2 %vm2525_vm3, %v16801_v8 }
 0xd5a   : > { %7880 = vmatpush.bf16.xpose.msra.mxu2 %v7871_v2 }
 0xd5b   : > { %12160 = vmatmul.msk.bf16.vlgmr.msra.gmra.mxu3 %vm2525_vm3, %v16802_v17 }
 0xd5c   : > { %7915 = vmatpush.bf16.msra.mxu3 %v7906_v58 }
 0xd5e   : > { %12161 = vmatmul.msk.bf16.vlgmr.msrb.gmra.mxu0 %vm2525_vm3, %v16803_v7 }
 0xd5f   : > { %12162 = vmatmul.msk.bf16.vlgmr.msra.gmra.mxu1 %vm2525_vm3, %v16804_v63 }
 0xd69   : > { %12163 = vmatmul.msk.bf16.vlgmr.msrb.gmra.mxu2 %vm2525_vm3, %v16805_v9 }
 0xd6b   : > { %12164 = vmatmul.msk.bf16.vlgmr.msrb.gmra.mxu3 %vm2525_vm3, %v16806_v35 }
 0xd6e   : > { %12165 = vmatmul.msk.bf16.vlgmr.msra.gmra.mxu0 %vm2525_vm3, %v16807_v12 }
 0xd6f   : > { %12166 = vmatmul.msk.bf16.vlgmr.msrb.gmra.mxu1 %vm2525_vm3, %v16808_v51 }
 0xd79   : > { %12167 = vmatmul.msk.bf16.vlgmr.msra.gmra.mxu2 %vm3200_vm4, %v7864_v19 }
 0xd7b   : > { %v15377_v16 = vpop.f32.mrf.mxu0 }
 0xd7c   : > { %16809 = vst [vmem:[#allocation57_spill] sm:$0xff] %v15377_v16  ;;  %v15379_v60 = vpop.f32.mrf.mxu2  ;;  %v15381_v34 = vpop.f32.mrf.mxu1 }
 0xd7d   : > { %16810 = vst [vmem:[#allocation56_spill] sm:$0xff] %v15379_v60 }
 0xd7e   : > { %v15383_v18 = vpop.f32.mrf.mxu3 }
 0xd7f   : > { %16811 = vst [vmem:[#allocation60_spill] sm:$0xff] %v15383_v18 }
 0xd83   : > { %v15385_v56 = vpop.f32.mrf.mxu0 }
 0xd84   : > { %16812 = vst [vmem:[#allocation109_spill] sm:$0xff] %v15385_v56  ;;  %v15387_v36 = vpop.f32.mrf.mxu2  ;;  %v15389_v53 = vpop.f32.mrf.mxu1 }
 0xd85   : > { %16813 = vst [vmem:[#allocation110_spill] sm:$0xff] %v15387_v36 }
 0xd86   : > { %v15391_v55 = vpop.f32.mrf.mxu3 }
 0xd87   : > { %16814 = vst [vmem:[#allocation111_spill] sm:$0xff] %v15391_v55 }
 0xd8b   : > { %v15393_v43 = vpop.f32.mrf.mxu0 }
 0xd8c   : > { %16815 = vst [vmem:[#allocation112_spill] sm:$0xff] %v15393_v43  ;;  %v15395_v5 = vpop.f32.mrf.mxu2  ;;  %v15397_v23 = vpop.f32.mrf.mxu1 }
 0xd8d   : > { %16816 = vst [vmem:[#allocation113_spill] sm:$0xff] %v15395_v5 }
 0xd8e   : > { %v15399_v57 = vpop.f32.mrf.mxu3 }
 0xd8f   : > { %16817 = vst [vmem:[#allocation114_spill] sm:$0xff] %v15399_v57 }
 0xd93   : > { %v15401_v47 = vpop.f32.mrf.mxu0 }
 0xd94   : > { %16818 = vst [vmem:[#allocation115_spill] sm:$0xff] %v15401_v47  ;;  %v15403_v32 = vpop.f32.mrf.mxu2  ;;  %v15405_v52 = vpop.f32.mrf.mxu1 }
 0xd95   : > { %16819 = vst [vmem:[#allocation116_spill] sm:$0xff] %v15403_v32 }
 0xd96   : > { %v15407_v3 = vpop.f32.mrf.mxu3 }
 0xd97   : > { %16820 = vst [vmem:[#allocation117_spill] sm:$0xff] %v15407_v3 }
 0xd9b   : > { %v15409_v38 = vpop.f32.mrf.mxu0 }
 0xd9c   : > { %16821 = vst [vmem:[#allocation118_spill] sm:$0xff] %v15409_v38  ;;  %v15411_v42 = vpop.f32.mrf.mxu2  ;;  %v15413_v62 = vpop.f32.mrf.mxu1 }
 0xd9d   : > { %16822 = vst [vmem:[#allocation119_spill] sm:$0xff] %v15411_v42 }
 0xd9e   : > { %v15415_v45 = vpop.f32.mrf.mxu3 }
 0xd9f   : > { %16823 = vst [vmem:[#allocation120_spill] sm:$0xff] %v15415_v45 }
 0xda3   : > { %v5971_v46 = vpop.f32.mrf.mxu0 }
 0xda4   : > { %v5919_v50 = vpop.f32.mrf.mxu2  ;;  %v5997_v22 = vpop.f32.mrf.mxu1 }
 0xda6   : > { %v5945_v41 = vpop.f32.mrf.mxu3 }
 0xdab   : > { %v15417_v19 = vpop.f32.mrf.mxu0 }
 0xdac   : > { %16824 = vst [vmem:[#allocation121_spill] sm:$0xff] %v15417_v19  ;;  %v15419_v37 = vpop.f32.mrf.mxu2  ;;  %v15421_v25 = vpop.f32.mrf.mxu1 }
 0xdad   : > { %16825 = vst [vmem:[#allocation122_spill] sm:$0xff] %v15419_v37 }
 0xdae   : > { %16826 = vst [vmem:[#allocation123_spill] sm:$0xff] %v15421_v25  ;;  %v15425_v58 = vpop.f32.mrf.mxu3 }
 0xdb3   : > { %v15429_v32 = vpop.f32.mrf.mxu0 }
 0xdb4   : > { %16827 = vst [vmem:[#allocation124_spill] sm:$0xff] %v15429_v32  ;;  %v15431_v46 = vpop.f32.mrf.mxu2  ;;  %v15433_v50 = vpop.f32.mrf.mxu1 }
 0xdb5   : > { %16828 = vst [vmem:[#allocation125_spill] sm:$0xff] %v15431_v46 }
 0xdb6   : > { %16829 = vst [vmem:[#allocation126_spill] sm:$0xff] %v15433_v50  ;;  %v15435_v22 = vpop.f32.mrf.mxu3 }
 0xdbb   : > { %v15437_v41 = vpop.f32.mrf.mxu0 }
 0xdbc   : > { %16830 = vst [vmem:[#allocation127_spill] sm:$0xff] %v15437_v41  ;;  %v15439_v19 = vpop.f32.mrf.mxu2  ;;  %v15441_v5 = vpop.f32.mrf.mxu1 }
 0xdbd   : > { %16831 = vst [vmem:[#allocation128_spill] sm:$0xff] %v15439_v19 }
 0xdbe   : > { %16832 = vst [vmem:[#allocation129_spill] sm:$0xff] %v15441_v5  ;;  %v15445_v36 = vpop.f32.mrf.mxu3 }
 0xdc3   : > { %v15449_v32 = vpop.f32.mrf.mxu0 }
 0xdc4   : > { %16833 = vst [vmem:[#allocation130_spill] sm:$0xff] %v15449_v32  ;;  %v15451_v60 = vpop.f32.mrf.mxu2  ;;  %v15453_v45 = vpop.f32.mrf.mxu1 }
 0xdc5   : > { %16834 = vst [vmem:[#allocation131_spill] sm:$0xff] %v15451_v60 }
 0xdc6   : > { %16835 = vst [vmem:[#allocation132_spill] sm:$0xff] %v15453_v45  ;;  %v15455_v3 = vpop.f32.mrf.mxu3 }
 0xdcb   : > { %v15457_v41 = vpop.f32.mrf.mxu0 }
 0xdcc   : > { %16836 = vst [vmem:[#allocation133_spill] sm:$0xff] %v15457_v41  ;;  %v15459_v57 = vpop.f32.mrf.mxu2  ;;  %v15461_v55 = vpop.f32.mrf.mxu1 }
 0xdcd   : > { %16837 = vst [vmem:[#allocation134_spill] sm:$0xff] %v15459_v57 }
 0xdce   : > { %16838 = vst [vmem:[#allocation135_spill] sm:$0xff] %v15461_v55  ;;  %v15465_v18 = vpop.f32.mrf.mxu3 }
 0xdd3   : > { %v6075_v32 = vpop.f32.mrf.mxu0 }
 0xdd4   : > { %v6023_v60 = vpop.f32.mrf.mxu2  ;;  %v6101_v47 = vpop.f32.mrf.mxu1 }
 0xdd6   : > { %v6049_v43 = vpop.f32.mrf.mxu3 }
 0xddb   : > { %v7485_v19 = vpop.f32.mrf.mxu0 }
 0xddc   : > { %7633 = vxpose.xlu0.b32.start.end [1/1] (short) (narrow) %v7485_v19, 8  ;;  %v7453_v46 = vpop.f32.mrf.mxu2  ;;  %v7501_v41 = vpop.f32.mrf.mxu1 }
 0xdde   : > { %v7469_v56 = vpop.f32.mrf.mxu3 }
 0xde3   : > { %v7487_v16 = vpop.f32.mrf.mxu0 }
 0xde4   : > { %7665 = vxpose.xlu0.b32.start.end [1/1] (short) (narrow) %v7501_v41, 8  ;;  %v7455_v37 = vpop.f32.mrf.mxu2  ;;  %v7503_v55 = vpop.f32.mrf.mxu1 }
 0xde6   : > { %v7471_v45 = vpop.f32.mrf.mxu3 }
 0xdeb   : > { %v7549_v2 = vpop.f32.mrf.mxu0 }
 0xdec   : > { %7569 = vxpose.xlu0.b32.start.end [1/1] (short) (narrow) %v7453_v46, 8  ;;  %v7517_v38 = vpop.f32.mrf.mxu2  ;;  %v7565_v57 = vpop.f32.mrf.mxu1 }
 0xdee   : > { %v7533_v5 = vpop.f32.mrf.mxu3 }
 0xdf3   : > { %v7551_v42 = vpop.f32.mrf.mxu0 }
 0xdf4   : > { %7601 = vxpose.xlu0.b32.start.end [1/1] (short) (narrow) %v7469_v56, 8  ;;  %v7519_v60 = vpop.f32.mrf.mxu2  ;;  %v7567_v47 = vpop.f32.mrf.mxu1 }
 0xdf6   : > { %v7535_v43 = vpop.f32.mrf.mxu3 }
 0xdfc   : > { %7761 = vxpose.xlu0.b32.start.end [1/1] (short) (narrow) %v7549_v2, 8  ;;  %v7882_v32 = vpop.f32.mrf.mxu2 }
 0xe04   : > { %7793 = vxpose.xlu0.b32.start.end [1/1] (short) (narrow) %v7565_v57, 8  ;;  %v7884_v19 = vpop.f32.mrf.mxu2 }
 0xe0c   : > { %7697 = vxpose.xlu0.b32.start.end [1/1] (short) (narrow) %v7517_v38, 8 }
 0xe14   : > { %7729 = vxpose.xlu0.b32.start.end [1/1] (short) (narrow) %v7533_v5, 8 }
 0xe80   : > { %v7649_v16 = vpop.trf.xlu0 }
 0xe81   : > { %v7825_v60 = vrot.slane %v7649_v16, 4 }
 0xe88   : > { %v7681_v37 = vpop.trf.xlu0 }
 0xe89   : > { %v7831_v25 = vrot.slane %v7681_v37, 4 }
 0xe90   : > { %v7585_v55 = vpop.trf.xlu0 }
 0xe91   : > { %v7826_v57 = vsel %vm1466_vm0, %v7825_v60, %v7585_v55 }
 0xe92   : > { %v7830_v37 = vperm.slane %v7826_v57, %v13817_v26  ;;  %v16839_v57 = vld [vmem:[#allocation30_spill] sm:$0xff] }
 0xe98   : > { %v7617_v45 = vpop.trf.xlu0 }
 0xe99   : > { %v7832_v42 = vsel %vm1466_vm0, %v7831_v25, %v7617_v45 }
 0xe9a   : > { %v7836_v56 = vperm.slane %v7832_v42, %v13817_v26 }
 0xe9c   : > { %v7849_v19 = vrot.slane %v7836_v56, 4 }
 0xe9e   : > { %v7850_v16 = vsel %vm1466_vm0, %v7849_v19, %v7830_v37 }
 0xe9f   : > { %v7854_v55 = vperm.slane %v7850_v16, %v13819_v27 }
 0xea0   : > { %v7777_v41 = vpop.trf.xlu0 }
 0xea1   : > { %v7837_v47 = vrot.slane %v7777_v41, 4 }
 0xea8   : > { %v7809_v46 = vpop.trf.xlu0 }
 0xea9   : > { %v7843_v2 = vrot.slane %v7809_v46, 4 }
 0xeb0   : > { %v7713_v50 = vpop.trf.xlu0 }
 0xeb1   : > { %v7838_v5 = vsel %vm1466_vm0, %v7837_v47, %v7713_v50  ;;  %v13183_v47 = vld [vmem:[%s13684_s16] ss:$0 sm:$0xff] }
 0xeb2   : > { %v7842_v25 = vperm.slane %v7838_v5, %v13817_v26 }
 0xeb8   : > { %v7745_v43 = vpop.trf.xlu0 }
 0xeb9   : > { %v7844_v38 = vsel %vm1466_vm0, %v7843_v2, %v7745_v43 }
 0xeba   : > { %v7848_v35 = vperm.slane %v7844_v38, %v13817_v26 }
 0xebc   : > { %v7855_v45 = vrot.slane %v7848_v35, 4  ;;  %v8689_v35 = vpack.c.bf16 %v16839_v57, %v16839_v57 }
 0xebe   : > { %v7856_v41 = vsel %vm1466_vm0, %v7855_v45, %v7842_v25 }
 0xebf   : > { %v7860_v46 = vperm.slane %v7856_v41, %v13819_v27 }
 0xec1   : > { %v7861_v42 = vrot.slane %v7860_v46, 4 }
 0xec3   : > { %v7862_v50 = vsel %vm1466_vm0, %v7861_v42, %v7854_v55 }
 0xec4   : > { %v7883_v60 = vadd.f32 %v7882_v32, %v7862_v50 }
 0xec6   : > { %v7886_v56 = vmul.f32 0.17677669, %v7883_v60 }
 0xec8   : > { %v7887_v2 = vadd.f32 %v13183_v47, %v7886_v56 }
 0xeca   : > { %v7888_v43 = vsel %vm3222_vm6, %v7887_v2, -inf }
 0xecb   : > { %7889 = vmax.xlane.f32.xlu0 %v7888_v43 }
 0xedf   : > { %8693 = vrot.lane.b32.xlu0 %v8689_v35, %s13417_s19 }
 0xf3e   : > { %v7890_v5 = vpop.xlane.xlu0 %7889 }
 0xf3f   : > { %v7891_v38 = vsub.f32 %v7887_v2, %v7890_v5 }
 0xf41   : > { %v7892_v19 = vmul.f32 1.442695, %v7891_v38 }
 0xf43   : > { %13167 = vpow2.f32 %v7892_v19 }
 0xf49   : > { %v13168_v37 = vpop.eup %13167 }
 0xf4a   : > { %v7894_v25 = vsel %vm3222_vm6, %v13168_v37, 0.0 }
 0xf4b   : > { %7895 = vadd.xlane.f32.xlu1 %v7894_v25 }
 0xfbe   : > { %v7896_v32 = vpop.xlane.xlu1 %7895 }
 0xfbf   : > { %13169 = vrcp.f32 %v7896_v32 }
 0xfc5   : > { %v13170_v45 = vpop.eup %13169 }
 0xfc6   : > { %v7898_v16 = vmul.f32 %v13170_v45, %v13168_v37 }
 0xfc8   : > { %v7899_v41 = vpack.c.bf16 %v7898_v16, %v7898_v16 }
 0xfca   : > { %7921 = vxpose.xlu2.c.b16.start.end [1/1] (short) (narrow) %v7899_v41, 16  ;;  %12168 = vmatmul.msk.bf16.vlgmr.msra.gmra.mxu3 %vm3222_vm6, %v7899_v41 }
0x104d   : > { %v15489_v46 = vpop.f32.mrf.mxu3 }
0x104e   : > { %16840 = vst [vmem:[#allocation30_spill] sm:$0xff] %v15489_v46 }
0x1055   : > { %v7919_v55 = vpop.f32.mrf.mxu3 }
0x106b   : > { %v7929_v42 = vpop.trf.xlu2 }
0x106c   : > { %v7940_v50 = vperm.slane %v7929_v42, %v13817_v26 }
0x106e   : > { %v7941_v60 = vrot.slane %v7940_v50, 4  ;;  %v7946_v56 = vperm.slane %v7940_v50, %v13819_v27 }
0x1070   : > { %v7942_v47 = vsel %vm1466_vm0, 0, %v7941_v60  ;;  %v7958_v2 = vshrl.u32 %v7946_v56, 16  ;;  %v7956_v57 = vpack.i.b16 0, %v7946_v56  ;;  %v7951_v37 = vrot.slane %v7946_v56, 4 }
0x1071   : > { %v7950_v43 = vperm.slane %v7942_v47, %v13819_v27  ;;  %v16841_v47 = vld [vmem:[#allocation31_spill] sm:$0xff] }
0x1072   : > { %v7959_v35 = vpack.i.b16 0, %v7958_v2  ;;  %v7952_v25 = vsel %vm1466_vm0, 0, %v7951_v37 }
0x1073   : > { %v7970_v5 = vshrl.u32 %v7950_v43, 16  ;;  %v7968_v38 = vpack.i.b16 0, %v7950_v43  ;;  %v7964_v32 = vshrl.u32 %v7952_v25, 16  ;;  %v7962_v45 = vpack.i.b16 0, %v7952_v25 }
0x1074   : > { %12838 = vxpose.binary.xlu2.c.b16.start.end [1/2] (short) (narrow) %v7959_v35, %v7956_v57, 16  ;;  %v7953_v41 = vrot.slane %v7950_v43, 4 }
0x1075   : > { %v7971_v19 = vpack.i.b16 0, %v7970_v5  ;;  %v7965_v16 = vpack.i.b16 0, %v7964_v32 }
0x1076   : > { %v7954_v55 = vsel %vm1466_vm0, 0, %v7953_v41 }
0x1077   : > { %12844 = vxpose.binary.xlu1.c.b16.start.end [1/2] (short) (narrow) %v7971_v19, %v7968_v38, 16  ;;  %v7976_v42 = vshrl.u32 %v7954_v55, 16  ;;  %v7974_v50 = vpack.i.b16 0, %v7954_v55 }
0x1079   : > { %v7977_v60 = vpack.i.b16 0, %v7976_v42 }
0x1084   : > { %12841 = vxpose.binary.xlu2.c.b16.start.end [1/2] (short) (narrow) %v7965_v16, %v7962_v45, 16 }
0x1094   : > { %12847 = vxpose.binary.xlu2.c.b16.start.end [1/2] (short) (narrow) %v7977_v60, %v7974_v50, 16 }
0x10fd   : > { %8691 = vrot.lane.b32.xlu2 %v16841_v47, %s13417_s19 }
0x1115   : > { %v12839_v2 = vpop.trf.xlu2 }
0x111d   : > { %v12840_v57 = vpop.trf.xlu2 }
0x1123   : > { %v12845_v56 = vpop.trf.xlu1 }
0x1124   : > { %v8107_v38 = vrot.slane %v12845_v56, 4 }
0x1125   : > { %v12842_v35 = vpop.trf.xlu2 }
0x1126   : > { %v8108_v19 = vsel %vm1466_vm0, %v8107_v38, %v12839_v2 }
0x1127   : > { %v8112_v43 = vperm.slane %v8108_v19, %v13817_v26 }
0x1129   : > { %v8121_v41 = vrot.slane %v8112_v43, 4 }
0x112b   : > { %v12846_v37 = vpop.trf.xlu1 }
0x112c   : > { %v8135_v32 = vrot.slane %v12846_v37, 4 }
0x112d   : > { %v12843_v5 = vpop.trf.xlu2 }
0x112e   : > { %v8136_v42 = vsel %vm1466_vm0, %v8135_v32, %v12840_v57 }
0x112f   : > { %v8140_v47 = vperm.slane %v8136_v42, %v13817_v26 }
0x1135   : > { %v12848_v25 = vpop.trf.xlu2 }
0x1136   : > { %v8113_v45 = vrot.slane %v12848_v25, 4  ;;  %v8149_v25 = vrot.slane %v8140_v47, 4 }
0x1138   : > { %v8114_v16 = vsel %vm1466_vm0, %v8113_v45, %v12842_v35 }
0x1139   : > { %v8118_v55 = vperm.slane %v8114_v16, %v13817_v26 }
0x113b   : > { %v8119_v50 = vrot.slane %v8118_v55, 4  ;;  %v8122_v60 = vsel %vm1466_vm0, %v8118_v55, %v8121_v41 }
0x113c   : > { %v8130_v38 = vperm.slane %v8122_v60, %v13819_v27 }
0x113d   : > { %v12849_v56 = vpop.trf.xlu2  ;;  %v8120_v2 = vsel %vm1466_vm0, %v8119_v50, %v8112_v43 }
0x113e   : > { %v8141_v19 = vrot.slane %v12849_v56, 4  ;;  %v8126_v37 = vperm.slane %v8120_v2, %v13819_v27  ;;  %v8133_v16 = vrot.slane %v8130_v38, 4 }
0x1140   : > { %v8142_v35 = vsel %vm1466_vm0, %v8141_v19, %v12843_v5  ;;  %v8131_v57 = vrot.slane %v8126_v37, 4  ;;  %v8134_v43 = vsel %vm1466_vm0, 0, %v8133_v16  ;;  %v8178_v19 = vshrl.u32 %v8130_v38, 16 }
0x1141   : > { %v8146_v45 = vperm.slane %v8142_v35, %v13817_v26  ;;  %v8166_v46 = vshrl.u32 %v8126_v37, 16 }
0x1142   : > { %v8132_v60 = vsel %vm1466_vm0, 0, %v8131_v57 }
0x1143   : > { %v8147_v32 = vrot.slane %v8146_v45, 4  ;;  %v8150_v41 = vsel %vm1466_vm0, %v8146_v45, %v8149_v25  ;;  %v8172_v45 = vshrl.u32 %v8132_v60, 16 }
0x1144   : > { %v8158_v55 = vperm.slane %v8150_v41, %v13819_v27  ;;  %v8184_v41 = vshrl.u32 %v8134_v43, 16 }
0x1145   : > { %v8148_v42 = vsel %vm1466_vm0, %v8147_v32, %v8140_v47 }
0x1146   : > { %v8154_v50 = vperm.slane %v8148_v42, %v13819_v27  ;;  %v8179_v56 = vshrl.u32 %v8158_v55, 16  ;;  %v8161_v5 = vrot.slane %v8158_v55, 4  ;;  %v8177_v2 = vpack.i.b16 %v8158_v55, %v8130_v38 }
0x1148   : > { %v8165_v35 = vpack.i.b16 %v8154_v50, %v8126_v37  ;;  %v8167_v51 = vshrl.u32 %v8154_v50, 16  ;;  %v8159_v9 = vrot.slane %v8154_v50, 4  ;;  %v8180_v12 = vpack.i.b16 %v8179_v56, %v8178_v19 }
0x1149   : > { %v8162_v25 = vsel %vm1466_vm0, 0, %v8161_v5  ;;  %v8292_v57 = vsel %vm3238_vm5, %v8177_v2, 0 }
0x114a   : > { %v8188_v47 = vsel %vm3238_vm5, %v8165_v35, 0  ;;  %v8168_v16 = vpack.i.b16 %v8167_v51, %v8166_v46  ;;  %v8160_v32 = vsel %vm1466_vm0, 0, %v8159_v9  ;;  %v8183_v42 = vpack.i.b16 %v8162_v25, %v8134_v43 }
0x114b   : > { %8197 = vmatpush.bf16.msrb.mxu0 %v8188_v47  ;;  %v8171_v55 = vpack.i.b16 %v8160_v32, %v8132_v60  ;;  %v8173_v38 = vshrl.u32 %v8160_v32, 16  ;;  %v8185_v17 = vshrl.u32 %v8162_v25, 16  ;;  %v8318_v56 = vsel %vm3238_vm5, %v8180_v12, 0 }
0x114c   : > { %v8214_v37 = vsel %vm3238_vm5, %v8168_v16, 0  ;;  %v8344_v9 = vsel %vm3238_vm5, %v8183_v42, 0 }
0x114d   : > { %8223 = vmatpush.bf16.msra.mxu1 %v8214_v37  ;;  %v8240_v50 = vsel %vm3238_vm5, %v8171_v55, 0  ;;  %v8174_v5 = vpack.i.b16 %v8173_v38, %v8172_v45  ;;  %v8186_v19 = vpack.i.b16 %v8185_v17, %v8184_v41  ;;  %v8694_v17 = vpop.permute.xlu0 %8693 }
0x114e   : > { %8249 = vmatpush.bf16.msrb.mxu2 %v8240_v50  ;;  %12169 = vmatmul.msk.bf16.vlgmr.msrb.gmra.mxu0 %vm3222_vm6, %v13959_v10 }
0x114f   : > { %8301 = vmatpush.bf16.msra.mxu0 %v8292_v57  ;;  %v8266_v51 = vsel %vm3238_vm5, %v8174_v5, 0  ;;  %v8370_v46 = vsel %vm3238_vm5, %v8186_v19, 0 }
0x1150   : > { %8275 = vmatpush.bf16.msrb.mxu3 %v8266_v51  ;;  %12172 = vmatmul.msk.bf16.vlgmr.msra.gmra.mxu1 %vm3222_vm6, %v13900_v29 }
0x1151   : > { %8327 = vmatpush.bf16.msrb.mxu1 %v8318_v56  ;;  %12175 = vmatmul.msk.bf16.vlgmr.msrb.gmra.mxu2 %vm3222_vm6, %v13902_v30 }
0x1152   : > { %8353 = vmatpush.bf16.msra.mxu2 %v8344_v9 }
0x1153   : > { %12178 = vmatmul.msk.bf16.vlgmr.msrb.gmra.mxu3 %vm3222_vm6, %v13965_v14 }
0x1154   : > { %8379 = vmatpush.bf16.msra.mxu3 %v8370_v46 }
0x1157   : > { %v8692_v12 = vpop.permute.xlu2 %8691 }
0x1158   : > { %v8696_v43 = vsel %vm8695_vm7, %v8692_v12, %v8694_v17 }
0x1159   : > { %8698 = vxpose.xlu0.c.b16.start.end [1/1] (short) (narrow) %v8696_v43, 48 }
0x115e   : > { %12170 = vmatmul.msk.bf16.gmra.mxu0 %vm3222_vm6, %v13984_v54 }
0x1160   : > { %12173 = vmatmul.msk.bf16.gmra.mxu1 %vm3222_vm6, %v13963_v13 }
0x1161   : > { %12176 = vmatmul.msk.bf16.gmra.mxu2 %vm3222_vm6, %v13969_v21 }
0x1163   : > { %12179 = vmatmul.msk.bf16.gmra.mxu3 %vm3222_vm6, %v13986_v48 }
0x116e   : > { %12171 = vmatmul.msk.bf16.gmra.mxu0 %vm3222_vm6, %v14078_v44 }
0x1170   : > { %12174 = vmatmul.msk.bf16.gmra.mxu1 %vm3222_vm6, %v14006_v4 }
0x1171   : > { %12177 = vmatmul.msk.bf16.gmra.mxu2 %vm3222_vm6, %v14012_v6 }
0x1173   : > { %12180 = vmatmul.msk.bf16.gmra.mxu3 %vm3222_vm6, %v14080_v28 }
0x117e   : > { %12181 = vmatmul.msk.bf16.vlgmr.msra.gmra.mxu0 %vm3222_vm6, %v16789_v40 }
0x1180   : > { %12184 = vmatmul.msk.bf16.vlgmr.msrb.gmra.mxu1 %vm3222_vm6, %v16790_v59 }
0x1181   : > { %12187 = vmatmul.msk.bf16.vlgmr.msra.gmra.mxu2 %vm3222_vm6, %v16791_v33 }
0x1183   : > { %12190 = vmatmul.msk.bf16.vlgmr.msra.gmra.mxu3 %vm3222_vm6, %v16792_v1 }
0x118e   : > { %12182 = vmatmul.msk.bf16.gmra.mxu0 %vm3222_vm6, %v16793_v49 }
0x1190   : > { %12185 = vmatmul.msk.bf16.gmra.mxu1 %vm3222_vm6, %v16794_v11 }
0x1191   : > { %12188 = vmatmul.msk.bf16.gmra.mxu2 %vm3222_vm6, %v16795_v24 }
0x1193   : > { %12191 = vmatmul.msk.bf16.gmra.mxu3 %vm3222_vm6, %v16796_v0 }
0x119e   : > { %12183 = vmatmul.msk.bf16.gmra.mxu0 %vm3222_vm6, %v16797_v15 }
0x11a0   : > { %12186 = vmatmul.msk.bf16.gmra.mxu1 %vm3222_vm6, %v16798_v39 }
0x11a1   : > { %12189 = vmatmul.msk.bf16.gmra.mxu2 %vm3222_vm6, %v16799_v61 }
0x11a3   : > { %12192 = vmatmul.msk.bf16.gmra.mxu3 %vm3222_vm6, %v16800_v20 }
0x11d4   : > { %v15575_v60 = vpop.f32.mrf.mxu2 }
0x11d6   : > { %v15577_v2 = vpop.f32.mrf.mxu3 }
0x11dc   : > { %v15579_v35 = vpop.f32.mrf.mxu2 }
0x11de   : > { %v15581_v25 = vpop.f32.mrf.mxu3 }
0x11e4   : > { %v15583_v45 = vpop.f32.mrf.mxu2 }
0x11e6   : > { %v15585_v41 = vpop.f32.mrf.mxu3 }
0x11ec   : > { %v15587_v47 = vpop.f32.mrf.mxu2 }
0x11ee   : > { %v15589_v16 = vpop.f32.mrf.mxu3 }
0x11f4   : > { %v15591_v32 = vpop.f32.mrf.mxu2 }
0x11f6   : > { %v15593_v42 = vpop.f32.mrf.mxu3 }
0x11fc   : > { %v8263_v57 = vpop.f32.mrf.mxu2 }
0x11fe   : > { %v8289_v55 = vpop.f32.mrf.mxu3 }
0x1204   : > { %v15595_v38 = vpop.f32.mrf.mxu2 }
0x1205   : > { %v8706_v50 = vpop.trf.xlu0 }
0x1206   : > { %v15597_v37 = vpop.f32.mrf.mxu3  ;;  %v8714_v20 = vrot.slane %v8706_v50, 4  ;;  %v8719_v44 = vperm.slane %v8706_v50, %v13817_v26 }
0x1208   : > { %v8715_v11 = vsel %vm1466_vm0, 0, %v8714_v20  ;;  %v8724_v14 = vrot.slane %v8719_v44, 4 }
0x120c   : > { %v15599_v56 = vpop.f32.mrf.mxu2 }
0x120e   : > { %v15601_v5 = vpop.f32.mrf.mxu3 }
0x1214   : > { %v15603_v19 = vpop.f32.mrf.mxu2 }
0x1215   : > { %v8707_v9 = vpop.trf.xlu0 }
0x1216   : > { %v8752_v51 = vrot.slane %v8707_v9, 4  ;;  %v8757_v46 = vperm.slane %v8707_v9, %v13817_v26  ;;  %v15606_v17 = vpop.f32.mrf.mxu3 }
0x1218   : > { %v8753_v12 = vsel %vm1466_vm0, 0, %v8752_v51  ;;  %v8762_v43 = vrot.slane %v8757_v46, 4  ;;  %v15610_v57 = vperm.slane %v8757_v46, %v13819_v27 }
0x1219   : > { %v8761_v55 = vperm.slane %v8753_v12, %v13817_v26 }
0x121a   : > { %v8763_v61 = vsel %vm1466_vm0, 0, %v8762_v43  ;;  %v8782_v39 = vrot.slane %v15610_v57, 4  ;;  %v8841_v0 = vshrl.u32 %v15610_v57, 16 }
0x121b   : > { %v15616_v15 = vperm.slane %v8763_v61, %v13819_v27  ;;  %v15619_v9 = vperm.slane %v8761_v55, %v13819_v27  ;;  %v8772_v48 = vrot.slane %v8761_v55, 4 }
0x121c   : > { %v15622_v51 = vpop.f32.mrf.mxu2  ;;  %v8783_v46 = vsel %vm1466_vm0, 0, %v8782_v39  ;;  %v8842_v59 = vpack.i.b16 0, %v8841_v0  ;;  %v8723_v39 = vperm.slane %v8715_v11, %v13817_v26 }
0x121d   : > { %v8786_v24 = vrot.slane %v15619_v9, 4  ;;  %v8847_v12 = vshrl.u32 %v8783_v46, 16  ;;  %v8784_v49 = vrot.slane %v15616_v15, 4  ;;  %v8851_v1 = vpack.i.b16 0, %v15616_v15 }
0x121e   : > { %v15627_v43 = vpop.f32.mrf.mxu3 }
0x121f   : > { %v8848_v61 = vpack.i.b16 0, %v8847_v12  ;;  %v8787_v33 = vsel %vm1466_vm0, 0, %v8786_v24  ;;  %v8785_v28 = vsel %vm1466_vm0, 0, %v8784_v49  ;;  %v15638_v12 = vperm.slane %v8723_v39, %v13819_v27 }
0x1220   : > { %v8869_v40 = vpack.i.b16 0, %v8787_v33  ;;  %v8859_v6 = vshrl.u32 %v8785_v28, 16  ;;  %v8857_v4 = vpack.i.b16 0, %v8785_v28  ;;  %v15643_v49 = vperm.slane %v8719_v44, %v13819_v27 }
0x1221   : > { %12856 = vxpose.binary.xlu0.c.b16.start.end [1/2] (short) (narrow) %v8851_v1, %v8848_v61, 16  ;;  %v8773_v1 = vsel %vm1466_vm0, 0, %v8772_v48  ;;  %v8871_v28 = vshrl.u32 %v8787_v33, 16  ;;  %v8845_v48 = vpack.i.b16 0, %v8783_v46  ;;  %v8725_v33 = vsel %vm1466_vm0, 0, %v8724_v14 }
0x1222   : > { %12868 = vxpose.binary.xlu2.c.b16.start.end [1/2] (short) (narrow) %v8869_v40, %v8842_v59, 16  ;;  %v8860_v20 = vpack.i.b16 0, %v8859_v6  ;;  %v8748_v40 = vrot.slane %v15638_v12, 4  ;;  %v8781_v6 = vperm.slane %v8773_v1, %v13819_v27  ;;  %v8793_v59 = vshrl.u32 %v15643_v49, 16 }
0x1223   : > { %v8744_v30 = vrot.slane %v15643_v49, 4  ;;  %v8853_v44 = vshrl.u32 %v15616_v15, 16 }
0x1224   : > { %v15635_v21 = vpop.f32.mrf.mxu2  ;;  %12850 = vxpose.binary.xlu1.c.b16.start.end [1/2] (short) (narrow) %v8860_v20, %v8857_v4, 16  ;;  %v8749_v0 = vsel %vm1466_vm0, 0, %v8748_v40  ;;  %v8872_v4 = vpack.i.b16 0, %v8871_v28  ;;  %v8875_v61 = vpack.i.b16 0, %v8781_v6  ;;  %v8794_v20 = vpack.i.b16 0, %v8793_v59 }
0x1225   : > { %v8708_v50 = vpop.trf.xlu0  ;;  %v8821_v13 = vpack.i.b16 0, %v8749_v0  ;;  %v8745_v1 = vsel %vm1466_vm0, 0, %v8744_v30  ;;  %v8733_v40 = vperm.slane %v8725_v33, %v13819_v27  ;;  %v8817_v28 = vshrl.u32 %v15638_v12, 16 }
0x1226   : > { %v15640_v24 = vpop.f32.mrf.mxu3  ;;  %v8887_v54 = vpack.i.b16 0, %v8708_v50  ;;  %v8788_v59 = vrot.slane %v8781_v6, 4  ;;  %v8854_v30 = vpack.i.b16 0, %v8853_v44 }
0x1227   : > { %v8746_v33 = vrot.slane %v8733_v40, 4 }
0x1228   : > { %v8789_v14 = vsel %vm1466_vm0, 0, %v8788_v59  ;;  %v8823_v59 = vshrl.u32 %v8749_v0, 16  ;;  %v8791_v0 = vpack.i.b16 0, %v15643_v49 }
0x1229   : > { %v8883_v29 = vshrl.u32 %v8789_v14, 16  ;;  %v8747_v15 = vsel %vm1466_vm0, 0, %v8746_v33 }
0x122a   : > { %v8811_v44 = vshrl.u32 %v8747_v15, 16 }
0x122c   : > { %v8367_v11 = vpop.f32.mrf.mxu2 }
0x122d   : > { %v8734_v11 = vrot.slane %v8723_v39, 4  ;;  %v8881_v39 = vpack.i.b16 0, %v8789_v14  ;;  %v8805_v14 = vshrl.u32 %v8733_v40, 16 }
0x122e   : > { %v8393_v55 = vpop.f32.mrf.mxu3 }
0x122f   : > { %v8799_v55 = vshrl.u32 %v8745_v1, 16  ;;  %v8806_v10 = vpack.i.b16 0, %v8805_v14 }
0x1231   : > { %12871 = vxpose.binary.xlu0.c.b16.start.end [1/2] (short) (narrow) %v8875_v61, %v8872_v4, 16  ;;  %v8735_v4 = vsel %vm1466_vm0, 0, %v8734_v11  ;;  %v8800_v50 = vpack.i.b16 0, %v8799_v55  ;;  %v8863_v55 = vpack.i.b16 0, %v15619_v9 }
0x1232   : > { %12889 = vxpose.binary.xlu2.c.b16.start.end [1/2] (short) (narrow) %v8821_v13, %v8794_v20, 16  ;;  %v8803_v13 = vpack.i.b16 0, %v8733_v40  ;;  %v8743_v46 = vperm.slane %v8735_v4, %v13819_v27  ;;  %v8884_v4 = vpack.i.b16 0, %v8883_v29  ;;  %v8865_v29 = vshrl.u32 %v15619_v9, 16 }
0x1234   : > { %12853 = vxpose.binary.xlu1.c.b16.start.end [1/2] (short) (narrow) %v8845_v48, %v8887_v54, 16  ;;  %v8818_v54 = vpack.i.b16 0, %v8817_v28  ;;  %v8750_v61 = vrot.slane %v8743_v46, 4  ;;  %v8809_v28 = vpack.i.b16 0, %v8747_v15  ;;  %v8815_v15 = vpack.i.b16 0, %v15638_v12 }
0x1236   : > { %v8751_v20 = vsel %vm1466_vm0, 0, %v8750_v61  ;;  %v8797_v61 = vpack.i.b16 0, %v8745_v1 }
0x1237   : > { %v8835_v48 = vshrl.u32 %v8751_v20, 16  ;;  %v8833_v33 = vpack.i.b16 0, %v8751_v20 }
0x1239   : > { %v8836_v11 = vpack.i.b16 0, %v8835_v48 }
0x1241   : > { %12877 = vxpose.binary.xlu0.c.b16.start.end [1/2] (short) (narrow) %v8803_v13, %v8800_v50, 16  ;;  %v8824_v50 = vpack.i.b16 0, %v8823_v59  ;;  %v8827_v13 = vpack.i.b16 0, %v8743_v46 }
0x1242   : > { %9033 = vxpose.xlu2.c.b16.start.end [1/1] (short) (narrow) %v8818_v54, 16  ;;  %v8812_v54 = vpack.i.b16 0, %v8811_v44 }
0x1244   : > { %12859 = vxpose.binary.xlu1.c.b16.start.end [1/2] (short) (narrow) %v8881_v39, %v8854_v30, 16  ;;  %v8839_v30 = vpack.i.b16 0, %v15610_v57  ;;  %v8877_v39 = vshrl.u32 %v8781_v6, 16  ;;  %v16842_v6 = vld [vmem:[#allocation66_spill] sm:$0xff] }
0x1246   : > { %v8878_v48 = vpack.i.b16 0, %v8877_v39 }
0x1251   : > { %12883 = vxpose.binary.xlu0.c.b16.start.end [1/2] (short) (narrow) %v8863_v55, %v8836_v11, 16  ;;  %v8866_v11 = vpack.i.b16 0, %v8865_v29  ;;  %v8829_v55 = vshrl.u32 %v8743_v46, 16 }
0x1254   : > { %12862 = vxpose.binary.xlu1.c.b16.start.end [1/2] (short) (narrow) %v8809_v28, %v8884_v4, 16  ;;  %v8830_v28 = vpack.i.b16 0, %v8829_v55 }
0x1261   : > { %12892 = vxpose.binary.xlu0.c.b16.start.end [1/2] (short) (narrow) %v8827_v13, %v8824_v50, 16 }
0x1264   : > { %12865 = vxpose.binary.xlu1.c.b16.start.end [1/2] (short) (narrow) %v8839_v30, %v8812_v54, 16 }
0x1274   : > { %12874 = vxpose.binary.xlu1.c.b16.start.end [1/2] (short) (narrow) %v8797_v61, %v8878_v48, 16 }
0x1284   : > { %12880 = vxpose.binary.xlu1.c.b16.start.end [1/2] (short) (narrow) %v8833_v33, %v8806_v10, 16 }
0x1294   : > { %12886 = vxpose.binary.xlu1.c.b16.start.end [1/2] (short) (narrow) %v8791_v0, %v8866_v11, 16 }
0x12a4   : > { %12895 = vxpose.binary.xlu1.c.b16.start.end [1/2] (short) (narrow) %v8815_v15, %v8830_v28, 16 }
0x12cd   : > { %v12857_v57 = vpop.trf.xlu0 }
0x12cf   : > { %10163 = vrot.lane.b32.xlu0 %v16842_v6, %s13418_s14 }
0x12d0   : > { %v12851_v1 = vpop.trf.xlu1 }
0x12d1   : > { %v9535_v13 = vrot.slane %v12851_v1, 4 }
0x12d5   : > { %v15668_v40 = vpop.trf.xlu0 }
0x12d8   : > { %v12852_v10 = vpop.trf.xlu1 }
0x12d9   : > { %v9591_v14 = vrot.slane %v12852_v10, 4  ;;  %v16843_v10 = vpack.i.bf16 %v15425_v58, %v15381_v34  ;;  %v16844_v58 = vld [vmem:[#allocation67_spill] sm:$0xff] }
0x12db   : > { %v9592_v28 = vsel %vm1466_vm0, %v9591_v14, %v12857_v57 }
0x12dc   : > { %v9596_v6 = vperm.slane %v9592_v28, %v13817_v26 }
0x12dd   : > { %v15670_v20 = vpop.trf.xlu0 }
0x12e0   : > { %v12854_v9 = vpop.trf.xlu1 }
0x12e1   : > { %v15673_v49 = vperm.slane %v12854_v9, %v13817_v26  ;;  %v12869_v9 = vpop.trf.xlu2 }
0x12e3   : > { %v9650_v12 = vperm.slane %v15673_v49, %v13819_v27 }
0x12e5   : > { %v12873_v46 = vpop.trf.xlu0  ;;  %v9655_v4 = vrot.slane %v9650_v12, 4  ;;  %v9724_v59 = vpack.i.b16 0, %v9650_v12  ;;  %v9725_v50 = vshrl.u32 %v9650_v12, 16 }
0x12e7   : > { %v9656_v44 = vsel %vm1466_vm0, 0, %v9655_v4  ;;  %v9726_v54 = vpack.i.b16 0, %v9725_v50  ;;  %v9740_v30 = vand.u32 %v9724_v59, %v14218_v31  ;;  %v9609_v59 = vrot.slane %v9596_v6, 4 }
0x12e8   : > { %v12855_v39 = vpop.trf.xlu1  ;;  %v9728_v61 = vpack.i.b16 0, %v9656_v44  ;;  %v9729_v48 = vshrl.u32 %v9656_v44, 16 }
0x12e9   : > { %v9536_v33 = vsel %vm1466_vm0, %v9535_v13, %v12855_v39  ;;  %9747 = vmatpush.bf16.msrb.mxu0 %v9740_v30  ;;  %v9756_v29 = vand.u32 %v9726_v54, %v14218_v31  ;;  %v12915_v13 = vpack.i.bf16 %v15435_v22, %v15389_v53  ;;  %v12919_v53 = vpack.i.bf16 %v15455_v3, %v15405_v52  ;;  %v16846_v22 = vld [vmem:[#allocation64_spill] sm:$0xff] }
0x12ea   : > { %v9772_v0 = vand.u32 %v9728_v61, %v14218_v31  ;;  %v9730_v11 = vpack.i.b16 0, %v9729_v48  ;;  %v16845_v48 = vpack.i.bf16 %v15445_v36, %v15397_v23  ;;  %v16847_v52 = vpack.i.bf16 %v15465_v18, %v15413_v62 }
0x12eb   : > { %9763 = vmatpush.bf16.msra.mxu1 %v9756_v29  ;;  %v9541_v29 = vrot.slane %v12873_v46, 4  ;;  %v9529_v46 = vrot.slane %v15668_v40, 4 }
0x12ec   : > { %9779 = vmatpush.bf16.msrb.mxu2 %v9772_v0  ;;  %v9788_v15 = vand.u32 %v9730_v11, %v14218_v31  ;;  %v12870_v11 = vpop.trf.xlu2 }
0x12ed   : > { %v15682_v55 = vpop.trf.xlu0 }
0x12ee   : > { %9795 = vmatpush.bf16.msrb.mxu3 %v9788_v15 }
0x12f0   : > { %v12860_v1 = vpop.trf.xlu1 }
0x12f1   : > { %12914 = vxpose.xlu0.b32.start [1/5] (short) (narrow) %v16843_v10, 8  ;;  %v9585_v12 = vrot.slane %v12860_v1, 4 }
0x12f3   : > { %v9586_v4 = vsel %vm1466_vm0, %v9585_v12, %v12869_v9  ;;  %v9540_v9 = vperm.slane %v9536_v33, %v13817_v26 }
0x12f4   : > { %v9590_v50 = vperm.slane %v9586_v4, %v13817_v26 }
0x12f5   : > { %v15695_v54 = vpop.trf.xlu0 }
0x12f6   : > { %v9610_v57 = vsel %vm1466_vm0, %v9609_v59, %v9590_v50  ;;  %v9611_v44 = vrot.slane %v9590_v50, 4 }
0x12f8   : > { %v15698_v30 = vsel %vm1466_vm0, %v9596_v6, %v9611_v44  ;;  %v12861_v34 = vpop.trf.xlu1  ;;  %v9553_v44 = vrot.slane %v9540_v9, 4 }
0x12f9   : > { %12916 = vxpose.xlu0.b32.cont [2/5] (short) (narrow) %v12915_v13, 8  ;;  %v9547_v0 = vrot.slane %v12861_v34, 4 }
0x12fb   : > { %v9548_v28 = vsel %vm1466_vm0, %v9547_v0, %v12870_v11 }
0x12fc   : > { %v9552_v36 = vperm.slane %v9548_v28, %v13817_v26 }
0x12fd   : > { %v15702_v39 = vpop.trf.xlu0 }
0x12fe   : > { %10161 = vrot.lane.b32.xlu1 %v16844_v58, %s13418_s14  ;;  %v9565_v3 = vrot.slane %v9552_v36, 4 }
0x1300   : > { %v12863_v61 = vpop.trf.xlu1 }
0x1301   : > { %12918 = vxpose.xlu0.b32.cont [3/5] (short) (narrow) %v16845_v48, 8 }
0x1305   : > { %v12885_v15 = vpop.trf.xlu0 }
0x1306   : > { %10198 = vrot.lane.b32.xlu1 %v16846_v22, %s13418_s14  ;;  %v9542_v6 = vsel %vm1466_vm0, %v9541_v29, %v12885_v15 }
0x1307   : > { %v9546_v23 = vperm.slane %v9542_v6, %v13817_v26 }
0x1308   : > { %v15711_v14 = vpop.trf.xlu1 }
0x1309   : > { %12920 = vxpose.xlu0.b32.cont [4/5] (short) (narrow) %v12919_v53, 8  ;;  %v9567_v10 = vrot.slane %v9546_v23, 4  ;;  %v9566_v12 = vsel %vm1466_vm0, %v9565_v3, %v9546_v23  ;;  %v9603_v3 = vrot.slane %v12863_v61, 4 }
0x130a   : > { %v9572_v50 = vperm.slane %v9566_v12, %v13819_v27 }
0x130b   : > { %v9568_v4 = vsel %vm1466_vm0, %v9552_v36, %v9567_v10 }
0x130c   : > { %v9576_v18 = vperm.slane %v9568_v4, %v13819_v27  ;;  %v9577_v33 = vrot.slane %v9572_v50, 4  ;;  %v12890_v4 = vpop.trf.xlu2 }
0x130e   : > { %v9581_v0 = vrot.slane %v9576_v18, 4 }
0x1310   : > { %v12866_v1 = vpop.trf.xlu1 }
0x1311   : > { %12922 = vxpose.xlu0.b32.end [5/5] (short) (narrow) %v16847_v52, 8 }
0x1318   : > { %v12867_v59 = vpop.trf.xlu1 }
0x1319   : > { %v9530_v13 = vsel %vm1466_vm0, %v9529_v46, %v12867_v59  ;;  %v9604_v46 = vsel %vm1466_vm0, %v9603_v3, %v15670_v20  ;;  %v15750_v59 = vpop.f32.mrf.mxu0 }
0x131a   : > { %v9534_v34 = vperm.slane %v9530_v13, %v13817_v26  ;;  %v9608_v12 = vperm.slane %v9604_v46, %v13817_v26 }
0x131c   : > { %v9554_v62 = vsel %vm1466_vm0, %v9553_v44, %v9534_v34  ;;  %v9555_v58 = vrot.slane %v9534_v34, 4  ;;  %v9616_v34 = vperm.slane %v9610_v57, %v13819_v27  ;;  %v9621_v20 = vrot.slane %v9608_v12, 4 }
0x131d   : > { %v9560_v40 = vperm.slane %v9554_v62, %v13819_v27  ;;  %v9620_v62 = vperm.slane %v15698_v30, %v13819_v27  ;;  %v9417_v57 = vrot.slane %v15695_v54, 4 }
0x131e   : > { %v9556_v48 = vsel %vm1466_vm0, %v9540_v9, %v9555_v58  ;;  %v9645_v9 = vrot.slane %v15673_v49, 4  ;;  %v9491_v58 = vrot.slane %v15702_v39, 4  ;;  %v12893_v39 = vpop.trf.xlu0 }
0x131f   : > { %v9564_v53 = vperm.slane %v9556_v48, %v13819_v27  ;;  %v9579_v22 = vrot.slane %v9560_v40, 4  ;;  %v15733_v29 = vsel %vm1466_vm0, %v9577_v33, %v9560_v40  ;;  %v15759_v40 = vpop.f32.mrf.mxu1  ;;  %v9639_v46 = vrot.slane %v9620_v62, 4 }
0x1320   : > { %v12875_v11 = vpop.trf.xlu1  ;;  %v9646_v44 = vsel %vm1466_vm0, 0, %v9645_v9  ;;  %16848 = vst [vmem:[#allocation31_spill] sm:$0xff] %v15759_v40  ;;  %v9492_v9 = vsel %vm1466_vm0, %v9491_v58, %v12893_v39 }
0x1321   : > { %v9580_v15 = vsel %vm1466_vm0, %v9572_v50, %v9579_v22  ;;  %v9583_v28 = vrot.slane %v9564_v53, 4  ;;  %v15737_v6 = vsel %vm1466_vm0, %v9581_v0, %v9564_v53  ;;  %v9597_v50 = vrot.slane %v12875_v11, 4  ;;  %v15771_v3 = vpop.f32.mrf.mxu0 }
0x1322   : > { %v15762_v33 = vperm.slane %v9646_v44, %v13819_v27  ;;  %v9635_v22 = vrot.slane %v9616_v34, 4  ;;  %v9423_v0 = vrot.slane %v15711_v14, 4  ;;  %16849 = vst [vmem:[#allocation66_spill] sm:$0xff] %v15771_v3  ;;  %v12891_v44 = vpop.trf.xlu2  ;;  %v9703_v14 = vshrl.u32 %v9580_v15, 16 }
0x1323   : > { %v15740_v36 = vsel %vm1466_vm0, %v9576_v18, %v9583_v28  ;;  %v9479_v18 = vrot.slane %v12866_v1, 4 }
0x1325   : > { %v9480_v1 = vsel %vm1466_vm0, %v9479_v18, %v15682_v55 }
0x1326   : > { %v9484_v55 = vperm.slane %v9480_v1, %v13817_v26 }
0x1328   : > { %v15742_v23 = vpop.trf.xlu1 }
0x1330   : > { %v12881_v52 = vpop.trf.xlu1 }
0x1331   : > { %v9473_v11 = vrot.slane %v12881_v52, 4 }
0x1338   : > { %v15744_v10 = vpop.trf.xlu1 }
0x1340   : > { %v12887_v13 = vpop.trf.xlu1 }
0x1341   : > { %v9598_v61 = vsel %vm1466_vm0, %v9597_v50, %v12887_v13 }
0x1342   : > { %v9602_v49 = vperm.slane %v9598_v61, %v13817_v26 }
0x1344   : > { %v9622_v48 = vsel %vm1466_vm0, %v9621_v20, %v9602_v49  ;;  %v9623_v53 = vrot.slane %v9602_v49, 4 }
0x1345   : > { %v9628_v30 = vperm.slane %v9622_v48, %v13819_v27  ;;  %v9474_v48 = vsel %vm1466_vm0, %v9473_v11, %v12890_v4  ;;  %v9711_v11 = vshrl.u32 %v15737_v6, 16 }
0x1346   : > { %v9624_v28 = vsel %vm1466_vm0, %v9608_v12, %v9623_v53  ;;  %v9695_v12 = vshrl.u32 %v15733_v29, 16 }
0x1347   : > { %v9636_v50 = vsel %vm1466_vm0, %v9628_v30, %v9635_v22  ;;  %v9633_v54 = vrot.slane %v9628_v30, 4  ;;  %v9632_v13 = vperm.slane %v9624_v28, %v13819_v27 }
0x1348   : > { %v12888_v18 = vpop.trf.xlu1  ;;  %v9701_v61 = vpack.i.b16 %v9636_v50, %v9580_v15  ;;  %v9704_v52 = vshrl.u32 %v9636_v50, 16  ;;  %v9478_v50 = vperm.slane %v9474_v48, %v13817_v26 }
0x1349   : > { %v9634_v20 = vsel %vm1466_vm0, %v9633_v54, %v9616_v34  ;;  %v15780_v49 = vsel %vm1466_vm0, %v9632_v13, %v9639_v46  ;;  %v9637_v58 = vrot.slane %v9632_v13, 4  ;;  %v9719_v34 = vshrl.u32 %v15740_v36, 16  ;;  %v15795_v46 = vpop.f32.mrf.mxu1 }
0x134a   : > { %9780 = vmatpush.bf16.msrb.mxu2 %v9701_v61  ;;  %v9693_v53 = vpack.i.b16 %v9634_v20, %v15733_v29  ;;  %v9705_v30 = vpack.i.b16 %v9704_v52, %v9703_v14  ;;  %v9696_v1 = vshrl.u32 %v9634_v20, 16  ;;  %v9720_v39 = vshrl.u32 %v15780_v49, 16  ;;  %16850 = vst [vmem:[#allocation67_spill] sm:$0xff] %v15795_v46 }
0x134b   : > { %v15787_v15 = vsel %vm1466_vm0, %v9637_v58, %v9620_v62  ;;  %v9418_v28 = vsel %vm1466_vm0, %v9417_v57, %v12888_v18  ;;  %v9424_v62 = vsel %vm1466_vm0, %v9423_v0, %v15742_v23  ;;  %v15803_v57 = vpop.f32.mrf.mxu0  ;;  %v9435_v18 = vrot.slane %v15744_v10, 4 }
0x134c   : > { %9748 = vmatpush.bf16.msrb.mxu0 %v9693_v53  ;;  %9796 = vmatpush.bf16.msrb.mxu3 %v9705_v30  ;;  %v9697_v4 = vpack.i.b16 %v9696_v1, %v9695_v12  ;;  %v15800_v54 = vpack.i.b16 %v9720_v39, %v9719_v34  ;;  %v9712_v13 = vshrl.u32 %v15787_v15, 16  ;;  %16851 = vst [vmem:[#allocation64_spill] sm:$0xff] %v15803_v57  ;;  %v9497_v52 = vrot.slane %v9484_v55, 4  ;;  %v9041_v12 = vpop.trf.xlu2 }
0x134d   : > { %v9422_v61 = vperm.slane %v9418_v28, %v13817_v26  ;;  %v9428_v20 = vperm.slane %v9424_v62, %v13817_v26  ;;  %v9496_v23 = vperm.slane %v9492_v9, %v13817_v26  ;;  %v9657_v58 = vrot.slane %v15762_v33, 4 }
0x134e   : > { %9764 = vmatpush.bf16.msra.mxu1 %v9697_v4  ;;  %v15807_v14 = vpack.i.b16 %v9712_v13, %v9711_v11  ;;  %v9499_v48 = vrot.slane %v9478_v50, 4  ;;  %v9498_v30 = vsel %vm1466_vm0, %v9497_v52, %v9478_v50  ;;  %v9436_v1 = vsel %vm1466_vm0, %v9435_v18, %v12891_v44  ;;  %v12894_v4 = vpop.trf.xlu0 }
0x134f   : > { %v9443_v10 = vrot.slane %v9422_v61, 4  ;;  %v9441_v39 = vrot.slane %v9428_v20, 4  ;;  %v9509_v28 = vrot.slane %v9496_v23, 4  ;;  %v9504_v13 = vperm.slane %v9498_v30, %v13819_v27 }
0x1350   : > { %v12896_v0 = vpop.trf.xlu1  ;;  %v9500_v9 = vsel %vm1466_vm0, %v9484_v55, %v9499_v48  ;;  %v9429_v29 = vrot.slane %v12894_v4, 4  ;;  %v9440_v50 = vperm.slane %v9436_v1, %v13817_v26  ;;  %v9732_v55 = vpack.i.b16 0, %v15762_v33 }
0x1351   : > { %v9485_v53 = vrot.slane %v12896_v0, 4  ;;  %v15816_v62 = vpop.f32.mrf.mxu1  ;;  %v9658_v0 = vsel %vm1466_vm0, 0, %v9657_v58  ;;  %v9442_v44 = vsel %vm1466_vm0, %v9441_v39, %v9422_v61  ;;  %v9733_v48 = vshrl.u32 %v15762_v33, 16 }
0x1352   : > { %16852 = vst [vmem:[#allocation136_spill] sm:$0xff] %v15816_v62  ;;  %v9508_v30 = vperm.slane %v9500_v9, %v13819_v27  ;;  %v9736_v4 = vpack.i.b16 0, %v9658_v0  ;;  %v9737_v61 = vshrl.u32 %v9658_v0, 16  ;;  %v9448_v39 = vperm.slane %v9442_v44, %v13819_v27 }
0x1353   : > { %v9486_v34 = vsel %vm1466_vm0, %v9485_v53, %v9041_v12  ;;  %v15824_v12 = vpop.f32.mrf.mxu0  ;;  %v9444_v53 = vsel %vm1466_vm0, %v9428_v20, %v9443_v10  ;;  %v9453_v10 = vrot.slane %v9440_v50, 4  ;;  %v9523_v33 = vrot.slane %v9504_v13, 4 }
0x1354   : > { %v9490_v11 = vperm.slane %v9486_v34, %v13817_v26  ;;  %16853 = vst [vmem:[#allocation137_spill] sm:$0xff] %v15824_v12  ;;  %v9804_v9 = vand.u32 %v9732_v55, %v14218_v31  ;;  %v9734_v62 = vpack.i.b16 0, %v9733_v48  ;;  %v9836_v44 = vand.u32 %v9736_v4, %v14218_v31 }
0x1355   : > { %v9738_v40 = vpack.i.b16 0, %v9737_v61  ;;  %v9527_v48 = vrot.slane %v9508_v30, 4 }
0x1356   : > { %v9510_v18 = vsel %vm1466_vm0, %v9509_v28, %v9490_v11  ;;  %v9511_v52 = vrot.slane %v9490_v11, 4 }
0x1357   : > { %v9516_v34 = vperm.slane %v9510_v18, %v13819_v27  ;;  %v9452_v18 = vperm.slane %v9444_v53, %v13819_v27 }
0x1358   : > { %v9512_v58 = vsel %vm1466_vm0, %v9496_v23, %v9511_v52  ;;  %v12897_v1 = vpop.trf.xlu1 }
0x1359   : > { %v9430_v28 = vsel %vm1466_vm0, %v9429_v29, %v12897_v1  ;;  %v9521_v11 = vrot.slane %v9516_v34, 4  ;;  %v9520_v20 = vperm.slane %v9512_v58, %v13819_v27  ;;  %v9524_v0 = vsel %vm1466_vm0, %v9516_v34, %v9523_v33  ;;  %v15841_v29 = vpop.f32.mrf.mxu1 }
0x135a   : > { %v9434_v22 = vperm.slane %v9430_v28, %v13817_v26  ;;  %16854 = vst [vmem:[#allocation138_spill] sm:$0xff] %v15841_v29  ;;  %v9467_v1 = vrot.slane %v9448_v39, 4  ;;  %v9471_v55 = vrot.slane %v9452_v18, 4 }
0x135b   : > { %v9522_v53 = vsel %vm1466_vm0, %v9521_v11, %v9504_v13  ;;  %v9525_v46 = vrot.slane %v9520_v20, 4  ;;  %v15846_v12 = vpop.f32.mrf.mxu0  ;;  %v9528_v57 = vsel %vm1466_vm0, %v9520_v20, %v9527_v48 }
0x135c   : > { %v9454_v23 = vsel %vm1466_vm0, %v9453_v10, %v9434_v22  ;;  %v9455_v52 = vrot.slane %v9434_v22, 4  ;;  %16855 = vst [vmem:[#allocation139_spill] sm:$0xff] %v15846_v12  ;;  %v9672_v10 = vshrl.u32 %v9524_v0, 16  ;;  %v9688_v3 = vshrl.u32 %v9528_v57, 16 }
0x135d   : > { %v9460_v58 = vperm.slane %v9454_v23, %v13819_v27  ;;  %v9664_v23 = vshrl.u32 %v9522_v53, 16  ;;  %v9526_v11 = vsel %vm1466_vm0, %v9525_v46, %v9508_v30 }
0x135e   : > { %v9456_v28 = vsel %vm1466_vm0, %v9440_v50, %v9455_v52  ;;  %v9680_v48 = vshrl.u32 %v9526_v11, 16 }
0x135f   : > { %v9468_v22 = vsel %vm1466_vm0, %v9460_v58, %v9467_v1  ;;  %v9465_v34 = vrot.slane %v9460_v58, 4  ;;  %v9464_v4 = vperm.slane %v9456_v28, %v13819_v27  ;;  %v9852_v28 = vand.u32 %v9738_v40, %v14218_v31 }
0x1360   : > { %v9669_v33 = vpack.i.b16 %v9524_v0, %v9468_v22  ;;  %v9671_v29 = vshrl.u32 %v9468_v22, 16  ;;  %v9820_v40 = vand.u32 %v9734_v62, %v14218_v31  ;;  %v10164_v31 = vpop.permute.xlu0 %10163 }
0x1361   : > { %v9466_v13 = vsel %vm1466_vm0, %v9465_v34, %v9448_v39  ;;  %v9472_v50 = vsel %vm1466_vm0, %v9464_v4, %v9471_v55  ;;  %v9469_v61 = vrot.slane %v9464_v4, 4  ;;  %v15856_v34 = vpop.f32.mrf.mxu1 }
0x1362   : > { %9781 = vmatpush.bf16.msrb.mxu2 %v9669_v33  ;;  %v9661_v52 = vpack.i.b16 %v9522_v53, %v9466_v13  ;;  %v9673_v12 = vpack.i.b16 %v9672_v10, %v9671_v29  ;;  %v9663_v1 = vshrl.u32 %v9466_v13, 16  ;;  %v9685_v58 = vpack.i.b16 %v9528_v57, %v9472_v50  ;;  %v16862_v29 = vld [vmem:[#allocation61_spill] sm:$0xff] }
0x1363   : > { %v9470_v0 = vsel %vm1466_vm0, %v9469_v61, %v9452_v18  ;;  %v9687_v22 = vshrl.u32 %v9472_v50, 16  ;;  %v8211_v18 = vpop.f32.mrf.mxu0  ;;  %v16856_v57 = vpack.i.b16 %v15780_v49, %v15740_v36 }
0x1364   : > { %9749 = vmatpush.bf16.msrb.mxu0 %v9661_v52  ;;  %9797 = vmatpush.bf16.msrb.mxu3 %v9673_v12  ;;  %v9665_v39 = vpack.i.b16 %v9664_v23, %v9663_v1  ;;  %v9677_v20 = vpack.i.b16 %v9526_v11, %v9470_v0  ;;  %v9679_v55 = vshrl.u32 %v9470_v0, 16  ;;  %v16859_v12 = vld [vmem:[#allocation59_spill] sm:$0xff] }
0x1365   : > { %12195 = vmatmul.msk.bf16.vlgmr.msrb.gmra.mxu2 %vm2525_vm3, %v16803_v7  ;;  %v9689_v46 = vpack.i.b16 %v9688_v3, %v9687_v22  ;;  %v16857_v7 = vld [vmem:[#allocation58_spill] sm:$0xff]  ;;  %v16858_v3 = vpack.i.b16 %v15787_v15, %v15737_v6 }
0x1366   : > { %9843 = vmatpush.bf16.msra.mxu2 %v9836_v44  ;;  %9765 = vmatpush.bf16.msra.mxu1 %v9665_v39  ;;  %v9681_v30 = vpack.i.b16 %v9680_v48, %v9679_v55 }
0x1367   : > { %12193 = vmatmul.msk.bf16.vlgmr.msrb.gmra.mxu0 %vm2525_vm3, %v16801_v8  ;;  %12196 = vmatmul.msk.bf16.vlgmr.msrb.gmra.mxu3 %vm2525_vm3, %v16804_v63  ;;  %v10169_v63 = vsel %vm3200_vm4, %v10164_v31, 0 }
0x1368   : > { %9811 = vmatpush.bf16.msra.mxu0 %v9804_v9  ;;  %9859 = vmatpush.bf16.msra.mxu3 %v9852_v28 }
0x1369   : > { %12194 = vmatmul.msk.bf16.vlgmr.msra.gmra.mxu1 %vm2525_vm3, %v16857_v7  ;;  %v8237_v8 = vpop.f32.mrf.mxu1 }
0x136a   : > { %9827 = vmatpush.bf16.msrb.mxu1 %v9820_v40  ;;  %9844 = vmatpush.bf16.msra.mxu2 %v16856_v57 }
0x136b   : > { %v15876_v36 = vpop.f32.mrf.mxu0 }
0x136c   : > { %9812 = vmatpush.bf16.msra.mxu0 %v16858_v3  ;;  %9860 = vmatpush.bf16.msra.mxu3 %v15800_v54  ;;  %v16860_v54 = vld [vmem:[#allocation62_spill] sm:$0xff] }
0x136e   : > { %9828 = vmatpush.bf16.msrb.mxu1 %v15807_v14  ;;  %9845 = vmatpush.bf16.msra.mxu2 %v9685_v58  ;;  %v16861_v14 = vld [vmem:[#allocation63_spill] sm:$0xff] }
0x1370   : > { %9813 = vmatpush.bf16.msra.mxu0 %v9677_v20  ;;  %9861 = vmatpush.bf16.msra.mxu3 %v9689_v46  ;;  %v10162_v49 = vpop.permute.xlu1 %10161 }
0x1371   : > { %v8329_v62 = vpop.f32.mrf.mxu1 }
0x1372   : > { %9829 = vmatpush.bf16.msrb.mxu1 %v9681_v30  ;;  %v12928_v6 = vpack.i.bf16 %v8329_v62, %v15577_v2 }
0x1373   : > { %v15881_v15 = vpop.f32.mrf.mxu0 }
0x1374   : > { %10178 = vmatpush.bf16.xpose.msrb.mxu0 %v10169_v63  ;;  %12929 = vxpose.xlu0.b32.start [1/5] (short) (narrow) %v12928_v6, 8 }
0x1375   : > { %12199 = vmatmul.msk.bf16.vlgmr.msra.gmra.mxu2 %vm2525_vm3, %v16859_v12 }
0x1377   : > { %12197 = vmatmul.msk.bf16.vlgmr.msra.gmra.mxu0 %vm2525_vm3, %v16860_v54  ;;  %12200 = vmatmul.msk.bf16.vlgmr.msra.gmra.mxu3 %vm2525_vm3, %v16861_v14 }
0x1378   : > { %v10199_v9 = vpop.permute.xlu1 %10198 }
0x1379   : > { %v10204_v44 = vsel %vm3238_vm5, %v10199_v9, 0  ;;  %12198 = vmatmul.msk.bf16.vlgmr.msrb.gmra.mxu1 %vm2525_vm3, %v16862_v29  ;;  %v8331_v53 = vpop.f32.mrf.mxu1 }
0x137a   : > { %10213 = vmatpush.bf16.msra.mxu1 %v10204_v44  ;;  %v12930_v10 = vpack.i.bf16 %v8331_v53, %v15581_v25 }
0x137b   : > { %v15891_v2 = vpop.f32.mrf.mxu0 }
0x137c   : > { %12931 = vxpose.xlu0.b32.cont [2/5] (short) (narrow) %v12930_v10, 8 }
0x1381   : > { %v8334_v4 = vpop.f32.mrf.mxu1 }
0x1382   : > { %v12932_v33 = vpack.i.bf16 %v8334_v4, %v15585_v41 }
0x1383   : > { %v15894_v23 = vpop.f32.mrf.mxu0 }
0x1384   : > { %12933 = vxpose.xlu0.b32.cont [3/5] (short) (narrow) %v12932_v33, 8 }
0x1387   : > { %12201 = vmatmul.msk.bf16.vlgmr.msrb.gmra.mxu0 %vm3200_vm4, %v10162_v49 }
0x1389   : > { %v8336_v13 = vpop.f32.mrf.mxu1 }
0x138a   : > { %v12934_v50 = vpack.i.bf16 %v8336_v13, %v15589_v16 }
0x138b   : > { %v15898_v61 = vpop.f32.mrf.mxu0 }
0x138c   : > { %12935 = vxpose.xlu0.b32.cont [4/5] (short) (narrow) %v12934_v50, 8 }
0x1391   : > { %v8339_v11 = vpop.f32.mrf.mxu1 }
0x1392   : > { %v12936_v25 = vpack.i.bf16 %v8339_v11, %v15593_v42 }
0x1393   : > { %v8315_v52 = vpop.f32.mrf.mxu0 }
0x1394   : > { %12937 = vxpose.xlu0.b32.end [5/5] (short) (narrow) %v12936_v25, 8 }
0x1399   : > { %v8341_v1 = vpop.f32.mrf.mxu1 }
0x13e4   : > { %v9751_v58 = vpop.f32.mrf.mxu0 }
0x13e5   : > { %9867 = vxpose.xlu2.b32.start.end [1/1] (short) (narrow) %v9751_v58, 8 }
0x13e6   : > { %v9767_v41 = vpop.f32.mrf.mxu1 }
0x13e8   : > { %v9783_v28 = vpop.f32.mrf.mxu2 }
0x13ea   : > { %v9799_v0 = vpop.f32.mrf.mxu3 }
0x13ec   : > { %v9753_v22 = vpop.f32.mrf.mxu0 }
0x13ed   : > { %9899 = vxpose.xlu2.b32.start.end [1/1] (short) (narrow) %v9767_v41, 8 }
0x13ee   : > { %v9769_v39 = vpop.f32.mrf.mxu1 }
0x13f0   : > { %v9785_v20 = vpop.f32.mrf.mxu2 }
0x13f2   : > { %v9801_v55 = vpop.f32.mrf.mxu3 }
0x13f4   : > { %v9815_v16 = vpop.f32.mrf.mxu0 }
0x13f5   : > { %9931 = vxpose.xlu2.b32.start.end [1/1] (short) (narrow) %v9783_v28, 8 }
0x13f6   : > { %v9831_v48 = vpop.f32.mrf.mxu1 }
0x13f8   : > { %v9847_v46 = vpop.f32.mrf.mxu2 }
0x13fa   : > { %v9863_v40 = vpop.f32.mrf.mxu3 }
0x13fc   : > { %v9817_v30 = vpop.f32.mrf.mxu0 }
0x13fd   : > { %9963 = vxpose.xlu2.b32.start.end [1/1] (short) (narrow) %v9799_v0, 8 }
0x13fe   : > { %v9833_v42 = vpop.f32.mrf.mxu1 }
0x13ff   : > { %v16864_v42 = vld [vmem:[#allocation126_spill] sm:$0xff] }
0x1400   : > { %v9849_v18 = vpop.f32.mrf.mxu2 }
0x1401   : > { %v12900_v18 = vpack.i.bf16 %v15601_v5, %v16864_v42 }
0x1402   : > { %v9865_v57 = vpop.f32.mrf.mxu3 }
0x1403   : > { %v16865_v57 = vld [vmem:[#allocation129_spill] sm:$0xff] }
0x1404   : > { %v10180_v7 = vpop.f32.mrf.mxu0 }
0x1405   : > { %9995 = vxpose.xlu2.b32.start.end [1/1] (short) (narrow) %v9815_v16, 8  ;;  %v13184_v16 = vld [vmem:[%s13684_s16] ss:$0 sm:$0xff]  ;;  %s13419_s16 = smov 66  }
0x140c   : > { %v10182_v3 = vpop.f32.mrf.mxu0 }
0x140d   : > { %10027 = vxpose.xlu2.b32.start.end [1/1] (short) (narrow) %v9831_v48, 8  ;;  %v12902_v3 = vpack.i.bf16 %v15606_v17, %v16865_v57 }
0x1415   : > { %10059 = vxpose.xlu2.b32.start.end [1/1] (short) (narrow) %v9847_v46, 8 }
0x141d   : > { %10091 = vxpose.xlu2.b32.start.end [1/1] (short) (narrow) %v9863_v40, 8  ;;  %v16863_v40 = vld [vmem:[#allocation123_spill] sm:$0xff] }
0x141e   : > { %v12898_v30 = vpack.i.bf16 %v15597_v37, %v16863_v40 }
0x147e   : > { %v9883_v31 = vpop.trf.xlu2 }
0x1486   : > { %v9915_v8 = vpop.trf.xlu2 }
0x148e   : > { %v9947_v63 = vpop.trf.xlu2 }
0x148f   : > { %v10123_v9 = vrot.slane %v9947_v63, 4 }
0x1491   : > { %v10124_v4 = vsel %vm1466_vm0, %v10123_v9, %v9883_v31  ;;  %v16866_v31 = vld [vmem:[#allocation132_spill] sm:$0xff]  ;;  %v16876_v9 = vld [vmem:[#allocation115_spill] sm:$0xff] }
0x1492   : > { %v10128_v25 = vperm.slane %v10124_v4, %v13817_v26 }
0x1496   : > { %v9979_v49 = vpop.trf.xlu2 }
0x1497   : > { %v10129_v54 = vrot.slane %v9979_v49, 4  ;;  %v16868_v49 = vld [vmem:[#allocation122_spill] sm:$0xff] }
0x1499   : > { %v10130_v14 = vsel %vm1466_vm0, %v10129_v54, %v9915_v8  ;;  %v16867_v8 = vld [vmem:[#allocation135_spill] sm:$0xff]  ;;  %v16873_v54 = vld [vmem:[#allocation128_spill] sm:$0xff] }
0x149a   : > { %v10134_v29 = vperm.slane %v10130_v14, %v13817_v26  ;;  %v12906_v63 = vpack.i.bf16 %v15640_v24, %v16867_v8  ;;  %v16874_v14 = vld [vmem:[#allocation112_spill] sm:$0xff] }
0x149b   : > { %v16875_v17 = vpack.i.bf16 %v16873_v54, %v16874_v14 }
0x149c   : > { %v10147_v50 = vrot.slane %v10134_v29, 4  ;;  %v16878_v29 = vld [vmem:[#allocation134_spill] sm:$0xff] }
0x149e   : > { %v10011_v62 = vpop.trf.xlu2  ;;  %v10148_v58 = vsel %vm1466_vm0, %v10147_v50, %v10128_v25 }
0x149f   : > { %v10152_v0 = vperm.slane %v10148_v58, %v13819_v27 }
0x14a6   : > { %v10043_v12 = vpop.trf.xlu2 }
0x14ae   : > { %v10075_v6 = vpop.trf.xlu2 }
0x14af   : > { %v10135_v44 = vrot.slane %v10075_v6, 4  ;;  %v16872_v6 = vld [vmem:[#allocation125_spill] sm:$0xff] }
0x14b1   : > { %v10136_v33 = vsel %vm1466_vm0, %v10135_v44, %v10011_v62  ;;  %v16869_v62 = vld [vmem:[#allocation57_spill] sm:$0xff]  ;;  %v16877_v44 = vld [vmem:[#allocation131_spill] sm:$0xff] }
0x14b2   : > { %v10140_v52 = vperm.slane %v10136_v33, %v13817_v26  ;;  %v16870_v37 = vpack.i.bf16 %v16868_v49, %v16869_v62 }
0x14b6   : > { %v10107_v53 = vpop.trf.xlu2 }
0x14b7   : > { %v10141_v10 = vrot.slane %v10107_v53, 4  ;;  %v16879_v53 = vld [vmem:[#allocation118_spill] sm:$0xff] }
0x14b8   : > { %v16880_v24 = vpack.i.bf16 %v16878_v29, %v16879_v53 }
0x14b9   : > { %v10142_v13 = vsel %vm1466_vm0, %v10141_v10, %v10043_v12  ;;  %v16871_v12 = vld [vmem:[#allocation109_spill] sm:$0xff] }
0x14ba   : > { %v10146_v11 = vperm.slane %v10142_v13, %v13817_v26  ;;  %v12960_v5 = vpack.i.bf16 %v16872_v6, %v16871_v12  ;;  %v12973_v13 = vpack.i.bf16 %v15876_v36, %v15575_v60  ;;  %v12981_v60 = vpack.i.bf16 %v15898_v61, %v15591_v32  ;;  %v16881_v36 = vld [vmem:[#allocation60_spill] sm:$0xff] }
0x14bb   : > { %v12943_v58 = vpack.i.bf16 %v16881_v36, %v15595_v38 }
0x14bc   : > { %v10153_v1 = vrot.slane %v10146_v11, 4  ;;  %v12975_v11 = vpack.i.bf16 %v15881_v15, %v15579_v35  ;;  %v16882_v35 = vld [vmem:[#allocation111_spill] sm:$0xff] }
0x14bd   : > { %v12945_v15 = vpack.i.bf16 %v16882_v35, %v15599_v56 }
0x14be   : > { %v10154_v41 = vsel %vm1466_vm0, %v10153_v1, %v10140_v52  ;;  %v12977_v52 = vpack.i.bf16 %v15891_v2, %v15583_v45  ;;  %v12979_v1 = vpack.i.bf16 %v15894_v23, %v15587_v47  ;;  %v16884_v2 = vld [vmem:[#allocation117_spill] sm:$0xff]  ;;  %v16885_v23 = vld [vmem:[#allocation120_spill] sm:$0xff] }
0x14bf   : > { %v10158_v28 = vperm.slane %v10154_v41, %v13819_v27  ;;  %v16883_v41 = vld [vmem:[#allocation114_spill] sm:$0xff]  ;;  %v12949_v47 = vpack.i.bf16 %v16884_v2, %v15622_v51  ;;  %v12951_v32 = vpack.i.bf16 %v16885_v23, %v15635_v21 }
0x14c0   : > { %v12947_v45 = vpack.i.bf16 %v16883_v41, %v15603_v19 }
0x14c1   : > { %v10159_v22 = vrot.slane %v10158_v28, 4 }
0x14c3   : > { %v10160_v39 = vsel %vm1466_vm0, %v10159_v22, %v10152_v0  ;;  %v15961_v22 = vpop.trf.xlu0 }
0x14c4   : > { %v10181_v20 = vadd.f32 %v10180_v7, %v10160_v39  ;;  %v12904_v7 = vpack.i.bf16 %v15627_v43, %v16866_v31  ;;  %v12964_v43 = vpack.i.bf16 %v16877_v44, %v16876_v9  ;;  %v12927_v39 = vunpack.i.h.bf16 %v15961_v22 }
0x14c6   : > { %v10184_v55 = vmul.f32 0.17677669, %v10181_v20 }
0x14c8   : > { %v10185_v48 = vadd.f32 %v13184_v16, %v10184_v55 }
0x14ca   : > { %v10186_v46 = vsel %vm3222_vm6, %v10185_v48, -inf }
0x14cb   : > { %10187 = vmax.xlane.f32.xlu2 %v10186_v46  ;;  %v15971_v46 = vpop.trf.xlu0 }
0x14cc   : > { %v12942_v40 = vunpack.i.h.bf16 %v15971_v46 }
0x14f4   : > { %12899 = vxpose.xlu2.b32.start [1/5] (short) (narrow) %v12898_v30, 8 }
0x14fc   : > { %12901 = vxpose.xlu2.b32.cont [2/5] (short) (narrow) %v12900_v18, 8 }
0x1504   : > { %12903 = vxpose.xlu2.b32.cont [3/5] (short) (narrow) %v12902_v3, 8 }
0x150c   : > { %12905 = vxpose.xlu2.b32.cont [4/5] (short) (narrow) %v12904_v7, 8 }
0x1514   : > { %12907 = vxpose.xlu2.b32.end [5/5] (short) (narrow) %v12906_v63, 8 }
0x151c   : > { %12959 = vxpose.xlu2.b32.start [1/5] (short) (narrow) %v16870_v37, 8 }
0x1524   : > { %12961 = vxpose.xlu2.b32.cont [2/5] (short) (narrow) %v12960_v5, 8 }
0x152c   : > { %12963 = vxpose.xlu2.b32.cont [3/5] (short) (narrow) %v16875_v17, 8 }
0x1534   : > { %12965 = vxpose.xlu2.b32.cont [4/5] (short) (narrow) %v12964_v43, 8 }
0x153c   : > { %12967 = vxpose.xlu2.b32.end [5/5] (short) (narrow) %v16880_v24, 8 }
0x153e   : > { %v10188_v10 = vpop.xlane.xlu2 %10187 }
0x153f   : > { %v10189_v4 = vsub.f32 %v10185_v48, %v10188_v10 }
0x1541   : > { %v10190_v33 = vmul.f32 1.442695, %v10189_v4 }
0x1543   : > { %13171 = vpow2.f32 %v10190_v33 }
0x1544   : > { %12974 = vxpose.xlu2.b32.start [1/5] (short) (narrow) %v12973_v13, 8 }
0x1549   : > { %v13172_v50 = vpop.eup %13171 }
0x154a   : > { %v10192_v25 = vsel %vm3222_vm6, %v13172_v50, 0.0 }
0x154b   : > { %10193 = vadd.xlane.f32.xlu1 %v10192_v25 }
0x154c   : > { %12976 = vxpose.xlu2.b32.cont [2/5] (short) (narrow) %v12975_v11, 8 }
0x1554   : > { %12978 = vxpose.xlu2.b32.cont [3/5] (short) (narrow) %v12977_v52, 8 }
0x155c   : > { %12980 = vxpose.xlu2.b32.cont [4/5] (short) (narrow) %v12979_v1, 8 }
0x1564   : > { %12982 = vxpose.xlu2.b32.end [5/5] (short) (narrow) %v12981_v60, 8 }
0x1585   : > { %12944 = vxpose.xlu1.b32.start [1/5] (short) (narrow) %v12943_v58, 8 }
0x158d   : > { %12946 = vxpose.xlu1.b32.cont [2/5] (short) (narrow) %v12945_v15, 8  ;;  %v12908_v56 = vpop.trf.xlu2 }
0x158e   : > { %v12909_v19 = vunpack.i.l.bf16 %v12908_v56  ;;  %v12912_v55 = vunpack.i.h.bf16 %v12908_v56 }
0x1590   : > { %v6377_v20 = vrot.slane %v12909_v19, 4  ;;  %v8669_v16 = vrot.slane %v12912_v55, 4 }
0x1592   : > { %v15967_v21 = vsel %vm1466_vm0, %v6377_v20, %v12927_v39  ;;  %v15975_v30 = vsel %vm1466_vm0, %v8669_v16, %v12942_v40 }
0x1595   : > { %12948 = vxpose.xlu1.b32.cont [3/5] (short) (narrow) %v12947_v45, 8 }
0x159d   : > { %12950 = vxpose.xlu1.b32.cont [4/5] (short) (narrow) %v12949_v47, 8 }
0x15a5   : > { %12952 = vxpose.xlu1.b32.end [5/5] (short) (narrow) %v12951_v32, 8 }
0x15b5   : > { %v15969_v48 = vpop.trf.xlu2 }
0x15be   : > { %v10194_v61 = vpop.xlane.xlu1 %10193 }
0x15bf   : > { %13173 = vrcp.f32 %v10194_v61 }
0x15c5   : > { %v13174_v38 = vpop.eup %13173 }
0x15c6   : > { %v10196_v28 = vmul.f32 %v13174_v38, %v13172_v50 }
0x15c8   : > { %v10197_v0 = vpack.c.bf16 %v10196_v28, %v10196_v28 }
0x15ca   : > { %10219 = vxpose.xlu0.c.b16.start.end [1/1] (short) (narrow) %v10197_v0, 16  ;;  %12202 = vmatmul.msk.bf16.vlgmr.msra.gmra.mxu1 %vm3222_vm6, %v10197_v0 }
0x15dd   : > { %v15977_v42 = vpop.trf.xlu2 }
0x1629   : > { %v15964_v51 = vpop.trf.xlu1 }
0x1647   : > { %v15979_v18 = vpop.f32.mrf.mxu1 }
0x164f   : > { %v10217_v57 = vpop.f32.mrf.mxu1 }
0x1676   : > { %v10227_v3 = vpop.trf.xlu0 }
0x1677   : > { %v10238_v31 = vperm.slane %v10227_v3, %v13817_v26 }
0x1679   : > { %v10244_v7 = vperm.slane %v10238_v31, %v13819_v27  ;;  %v10239_v12 = vrot.slane %v10238_v31, 4 }
0x167b   : > { %v10249_v8 = vrot.slane %v10244_v7, 4  ;;  %v10256_v63 = vshrl.u32 %v10244_v7, 16  ;;  %v10254_v49 = vpack.i.b16 0, %v10244_v7  ;;  %v10240_v14 = vsel %vm1466_vm0, 0, %v10239_v12 }
0x167c   : > { %v10248_v17 = vperm.slane %v10240_v14, %v13819_v27 }
0x167d   : > { %v10257_v62 = vpack.i.b16 0, %v10256_v63  ;;  %v10250_v37 = vsel %vm1466_vm0, 0, %v10249_v8 }
0x167e   : > { %v10262_v6 = vshrl.u32 %v10250_v37, 16  ;;  %v10260_v5 = vpack.i.b16 0, %v10250_v37  ;;  %v10268_v9 = vshrl.u32 %v10248_v17, 16  ;;  %v10266_v44 = vpack.i.b16 0, %v10248_v17 }
0x167f   : > { %12988 = vxpose.binary.xlu0.c.b16.start.end [1/2] (short) (narrow) %v10257_v62, %v10254_v49, 16  ;;  %v10251_v29 = vrot.slane %v10248_v17, 4 }
0x1680   : > { %v10263_v54 = vpack.i.b16 0, %v10262_v6  ;;  %v10269_v43 = vpack.i.b16 0, %v10268_v9 }
0x1681   : > { %v10252_v53 = vsel %vm1466_vm0, 0, %v10251_v29 }
0x1682   : > { %12991 = vxpose.binary.xlu1.c.b16.start.end [1/2] (short) (narrow) %v10263_v54, %v10260_v5, 16  ;;  %v10274_v24 = vshrl.u32 %v10252_v53, 16  ;;  %v10272_v10 = vpack.i.b16 0, %v10252_v53 }
0x1684   : > { %v10275_v4 = vpack.i.b16 0, %v10274_v24 }
0x168f   : > { %12994 = vxpose.binary.xlu0.c.b16.start.end [1/2] (short) (narrow) %v10269_v43, %v10266_v44, 16 }
0x169f   : > { %12997 = vxpose.binary.xlu0.c.b16.start.end [1/2] (short) (narrow) %v10275_v4, %v10272_v10, 16 }
0x172b   : > { %v12989_v33 = vpop.trf.xlu0 }
0x172e   : > { %v12992_v1 = vpop.trf.xlu1 }
0x1733   : > { %v12990_v13 = vpop.trf.xlu0 }
0x1736   : > { %v12993_v0 = vpop.trf.xlu1 }
0x173b   : > { %v12995_v50 = vpop.trf.xlu0 }
0x173c   : > { %v10405_v25 = vrot.slane %v12995_v50, 4 }
0x173e   : > { %v10406_v52 = vsel %vm1466_vm0, %v10405_v25, %v12989_v33 }
0x173f   : > { %v10410_v60 = vperm.slane %v10406_v52, %v13817_v26 }
0x1741   : > { %v10419_v41 = vrot.slane %v10410_v60, 4 }
0x1743   : > { %v12996_v11 = vpop.trf.xlu0 }
0x1744   : > { %v10433_v58 = vrot.slane %v12996_v11, 4 }
0x1746   : > { %v10434_v2 = vsel %vm1466_vm0, %v10433_v58, %v12990_v13 }
0x1747   : > { %v10438_v32 = vperm.slane %v10434_v2, %v13817_v26  ;;  %v16888_v2 = vld [vmem:[#allocation33_spill] sm:$0xff] }
0x1749   : > { %v10447_v20 = vrot.slane %v10438_v32, 4 }
0x174b   : > { %v12998_v36 = vpop.trf.xlu0 }
0x174c   : > { %v10411_v35 = vrot.slane %v12998_v36, 4  ;;  %v16886_v36 = vld [vmem:[#allocation34_spill] sm:$0xff] }
0x174e   : > { %v10412_v15 = vsel %vm1466_vm0, %v10411_v35, %v12992_v1 }
0x174f   : > { %v10416_v45 = vperm.slane %v10412_v15, %v13817_v26 }
0x1751   : > { %v10417_v47 = vrot.slane %v10416_v45, 4  ;;  %v10420_v23 = vsel %vm1466_vm0, %v10416_v45, %v10419_v41  ;;  %v16887_v41 = vld [vmem:[#allocation32_spill] sm:$0xff] }
0x1752   : > { %v10428_v38 = vperm.slane %v10420_v23, %v13819_v27  ;;  %v16890_v23 = vld [vmem:[#allocation38_spill] sm:$0xff] }
0x1753   : > { %v10418_v61 = vsel %vm1466_vm0, %v10417_v47, %v10410_v60  ;;  %v12999_v28 = vpop.trf.xlu0  ;;  %v16889_v47 = vld [vmem:[#allocation36_spill] sm:$0xff] }
0x1754   : > { %v10439_v56 = vrot.slane %v12999_v28, 4  ;;  %v10424_v19 = vperm.slane %v10418_v61, %v13819_v27  ;;  %v10431_v16 = vrot.slane %v10428_v38, 4  ;;  %v10476_v6 = vshrl.u32 %v10428_v38, 16  ;;  %v16892_v61 = vld [vmem:[#allocation37_spill] sm:$0xff]  ;;  %v16894_v28 = vld [vmem:[#allocation50_spill] sm:$0xff] }
0x1756   : > { %v10440_v39 = vsel %vm1466_vm0, %v10439_v56, %v12993_v0  ;;  %v10429_v40 = vrot.slane %v10424_v19, 4  ;;  %v10432_v8 = vsel %vm1466_vm0, 0, %v10431_v16  ;;  %v10464_v54 = vshrl.u32 %v10424_v19, 16  ;;  %v16895_v0 = vld [vmem:[#allocation42_spill] sm:$0xff]  ;;  %v16896_v56 = vld [vmem:[#allocation43_spill] sm:$0xff]  ;;  %v16901_v16 = vld [vmem:[#allocation45_spill] sm:$0xff] }
0x1757   : > { %v10444_v55 = vperm.slane %v10440_v39, %v13817_v26  ;;  %v10482_v29 = vshrl.u32 %v10432_v8, 16  ;;  %v16898_v39 = vld [vmem:[#allocation44_spill] sm:$0xff] }
0x1758   : > { %v10430_v49 = vsel %vm1466_vm0, 0, %v10429_v40  ;;  %v16902_v40 = vld [vmem:[#allocation46_spill] sm:$0xff] }
0x1759   : > { %v10445_v57 = vrot.slane %v10444_v55, 4  ;;  %v10448_v3 = vsel %vm1466_vm0, %v10444_v55, %v10447_v20  ;;  %v10470_v43 = vshrl.u32 %v10430_v49, 16  ;;  %v16899_v20 = vld [vmem:[#allocation40_spill] sm:$0xff]  ;;  %v16900_v55 = vld [vmem:[#allocation41_spill] sm:$0xff] }
0x175a   : > { %v10456_v31 = vperm.slane %v10448_v3, %v13819_v27  ;;  %v16904_v3 = vld [vmem:[#allocation49_spill] sm:$0xff] }
0x175b   : > { %v10446_v7 = vsel %vm1466_vm0, %v10445_v57, %v10438_v32  ;;  %v16891_v32 = vld [vmem:[#allocation35_spill] sm:$0xff]  ;;  %v16903_v57 = vld [vmem:[#allocation48_spill] sm:$0xff] }
0x175c   : > { %v10452_v63 = vperm.slane %v10446_v7, %v13819_v27  ;;  %v10477_v62 = vshrl.u32 %v10456_v31, 16  ;;  %v10459_v37 = vrot.slane %v10456_v31, 4  ;;  %v10475_v12 = vpack.i.b16 %v10456_v31, %v10428_v38  ;;  %v16893_v38 = vld [vmem:[#allocation39_spill] sm:$0xff]  ;;  %v16906_v7 = vld [vmem:[#allocation54_spill] sm:$0xff] }
0x175d   : > { %v16905_v31 = vld [vmem:[#allocation47_spill] sm:$0xff] }
0x175e   : > { %v10463_v5 = vpack.i.b16 %v10452_v63, %v10424_v19  ;;  %v10465_v14 = vshrl.u32 %v10452_v63, 16  ;;  %v10457_v17 = vrot.slane %v10452_v63, 4  ;;  %v10478_v9 = vpack.i.b16 %v10477_v62, %v10476_v6  ;;  %v16897_v19 = vld [vmem:[#allocation51_spill] sm:$0xff]  ;;  %v16908_v63 = vld [vmem:[#allocation53_spill] sm:$0xff] }
0x175f   : > { %v10460_v44 = vsel %vm1466_vm0, 0, %v10459_v37  ;;  %v10590_v33 = vsel %vm3238_vm5, %v10475_v12, 0 }
0x1760   : > { %v10486_v53 = vsel %vm3238_vm5, %v10463_v5, 0  ;;  %v10466_v24 = vpack.i.b16 %v10465_v14, %v10464_v54  ;;  %v10458_v10 = vsel %vm1466_vm0, 0, %v10457_v17  ;;  %v10481_v4 = vpack.i.b16 %v10460_v44, %v10432_v8  ;;  %v16907_v8 = vld [vmem:[#allocation52_spill] sm:$0xff] }
0x1761   : > { %10495 = vmatpush.bf16.msrb.mxu2 %v10486_v53  ;;  %v10469_v13 = vpack.i.b16 %v10458_v10, %v10430_v49  ;;  %v10471_v50 = vshrl.u32 %v10458_v10, 16  ;;  %v10483_v11 = vshrl.u32 %v10460_v44, 16  ;;  %v10616_v58 = vsel %vm3238_vm5, %v10478_v9, 0  ;;  %v16909_v49 = vld [vmem:[#allocation55_spill] sm:$0xff]  ;;  %v16910_v54 = vld [vmem:[#allocation56_spill] sm:$0xff] }
0x1762   : > { %v10512_v25 = vsel %vm3238_vm5, %v10466_v24, 0  ;;  %v10642_v35 = vsel %vm3238_vm5, %v10481_v4, 0  ;;  %v16912_v24 = vld [vmem:[#allocation110_spill] sm:$0xff] }
0x1763   : > { %10521 = vmatpush.bf16.msrb.mxu3 %v10512_v25  ;;  %v10538_v52 = vsel %vm3238_vm5, %v10469_v13, 0  ;;  %v10472_v1 = vpack.i.b16 %v10471_v50, %v10470_v43  ;;  %v10484_v60 = vpack.i.b16 %v10483_v11, %v10482_v29  ;;  %v16911_v43 = vld [vmem:[#allocation66_spill] sm:$0xff]  ;;  %v16913_v13 = vld [vmem:[#allocation64_spill] sm:$0xff]  ;;  %v16914_v25 = vld [vmem:[#allocation113_spill] sm:$0xff] }
0x1764   : > { %12203 = vmatmul.msk.bf16.vlgmr.msrb.gmra.mxu2 %vm3222_vm6, %v16886_v36  ;;  %10547 = vmatpush.bf16.msra.mxu0 %v10538_v52 }
0x1765   : > { %10599 = vmatpush.bf16.msra.mxu2 %v10590_v33  ;;  %v10564_v15 = vsel %vm3238_vm5, %v10472_v1, 0  ;;  %v10668_v45 = vsel %vm3238_vm5, %v10484_v60, 0 }
0x1766   : > { %12206 = vmatmul.msk.bf16.vlgmr.msrb.gmra.mxu3 %vm3222_vm6, %v16887_v41  ;;  %10573 = vmatpush.bf16.msrb.mxu1 %v10564_v15  ;;  %v16916_v41 = vld [vmem:[#allocation116_spill] sm:$0xff] }
0x1767   : > { %10625 = vmatpush.bf16.msra.mxu3 %v10616_v58  ;;  %12209 = vmatmul.msk.bf16.vlgmr.msra.gmra.mxu0 %vm3222_vm6, %v16888_v2  ;;  %v16915_v58 = vld [vmem:[#allocation137_spill] sm:$0xff] }
0x1768   : > { %10651 = vmatpush.bf16.msrb.mxu0 %v10642_v35 }
0x1769   : > { %12212 = vmatmul.msk.bf16.vlgmr.msrb.gmra.mxu1 %vm3222_vm6, %v16889_v47 }
0x176a   : > { %10677 = vmatpush.bf16.msra.mxu1 %v10668_v45 }
0x1774   : > { %12204 = vmatmul.msk.bf16.gmra.mxu2 %vm3222_vm6, %v16890_v23 }
0x1776   : > { %12207 = vmatmul.msk.bf16.gmra.mxu3 %vm3222_vm6, %v16891_v32  ;;  %v16917_v32 = vld [vmem:[#allocation139_spill] sm:$0xff] }
0x1777   : > { %12210 = vmatmul.msk.bf16.gmra.mxu0 %vm3222_vm6, %v16892_v61 }
0x1779   : > { %12213 = vmatmul.msk.bf16.gmra.mxu1 %vm3222_vm6, %v16893_v38 }
0x1784   : > { %12205 = vmatmul.msk.bf16.gmra.mxu2 %vm3222_vm6, %v16894_v28  ;;  %v16918_v28 = vld [vmem:[#allocation119_spill] sm:$0xff] }
0x1786   : > { %12208 = vmatmul.msk.bf16.gmra.mxu3 %vm3222_vm6, %v16895_v0 }
0x1787   : > { %12211 = vmatmul.msk.bf16.gmra.mxu0 %vm3222_vm6, %v16896_v56 }
0x1789   : > { %12214 = vmatmul.msk.bf16.gmra.mxu1 %vm3222_vm6, %v16897_v19 }
0x1794   : > { %12215 = vmatmul.msk.bf16.vlgmr.msra.gmra.mxu2 %vm3222_vm6, %v16898_v39 }
0x1796   : > { %12218 = vmatmul.msk.bf16.vlgmr.msra.gmra.mxu3 %vm3222_vm6, %v16899_v20 }
0x1797   : > { %12221 = vmatmul.msk.bf16.vlgmr.msrb.gmra.mxu0 %vm3222_vm6, %v16900_v55 }
0x1799   : > { %12224 = vmatmul.msk.bf16.vlgmr.msra.gmra.mxu1 %vm3222_vm6, %v16901_v16  ;;  %v16919_v16 = vld [vmem:[#allocation31_spill] sm:$0xff] }
0x17a4   : > { %12216 = vmatmul.msk.bf16.gmra.mxu2 %vm3222_vm6, %v16902_v40 }
0x17a6   : > { %12219 = vmatmul.msk.bf16.gmra.mxu3 %vm3222_vm6, %v16903_v57 }
0x17a7   : > { %12222 = vmatmul.msk.bf16.gmra.mxu0 %vm3222_vm6, %v16904_v3 }
0x17a9   : > { %12225 = vmatmul.msk.bf16.gmra.mxu1 %vm3222_vm6, %v16905_v31 }
0x17b4   : > { %12217 = vmatmul.msk.bf16.gmra.mxu2 %vm3222_vm6, %v16906_v7 }
0x17b6   : > { %12220 = vmatmul.msk.bf16.gmra.mxu3 %vm3222_vm6, %v16907_v8 }
0x17b7   : > { %12223 = vmatmul.msk.bf16.gmra.mxu0 %vm3222_vm6, %v16908_v63 }
0x17b9   : > { %12226 = vmatmul.msk.bf16.gmra.mxu1 %vm3222_vm6, %v16909_v49  ;;  %v16920_v49 = vld [vmem:[#allocation67_spill] sm:$0xff] }
0x17e4   : > { %v16063_v62 = vpop.f32.mrf.mxu0 }
0x17e6   : > { %v16065_v37 = vpop.f32.mrf.mxu1 }
0x17e7   : > { %v10497_v12 = vpop.f32.mrf.mxu2 }
0x17e8   : > { %v13000_v6 = vpack.i.bf16 %v10497_v12, %v15750_v59 }
0x17e9   : > { %v10523_v5 = vpop.f32.mrf.mxu3 }
0x17ea   : > { %v13015_v14 = vpack.i.bf16 %v10523_v5, %v16910_v54  ;;  %13001 = vxpose.xlu2.b32.start [1/5] (short) (narrow) %v13000_v6, 8 }
0x17ec   : > { %v16069_v17 = vpop.f32.mrf.mxu0  ;;  %13016 = vxpose.xlu0.b32.start [1/5] (short) (narrow) %v13015_v14, 8 }
0x17ee   : > { %v16071_v9 = vpop.f32.mrf.mxu1 }
0x17ef   : > { %v10499_v44 = vpop.f32.mrf.mxu2 }
0x17f0   : > { %v13002_v29 = vpack.i.bf16 %v10499_v44, %v16911_v43 }
0x17f1   : > { %v10525_v53 = vpop.f32.mrf.mxu3 }
0x17f2   : > { %v13017_v10 = vpack.i.bf16 %v10525_v53, %v16912_v24  ;;  %13003 = vxpose.xlu2.b32.cont [2/5] (short) (narrow) %v13002_v29, 8  ;;  %v16921_v29 = vld [vmem:[#allocation136_spill] sm:$0xff] }
0x17f4   : > { %v16075_v4 = vpop.f32.mrf.mxu0  ;;  %13018 = vxpose.xlu0.b32.cont [2/5] (short) (narrow) %v13017_v10, 8 }
0x17f6   : > { %v16077_v59 = vpop.f32.mrf.mxu1 }
0x17f7   : > { %v10502_v33 = vpop.f32.mrf.mxu2 }
0x17f8   : > { %v13004_v50 = vpack.i.bf16 %v10502_v33, %v16913_v13 }
0x17f9   : > { %v10528_v11 = vpop.f32.mrf.mxu3 }
0x17fa   : > { %v13019_v52 = vpack.i.bf16 %v10528_v11, %v16914_v25  ;;  %13005 = vxpose.xlu2.b32.cont [3/5] (short) (narrow) %v13004_v50, 8  ;;  %v16922_v25 = vld [vmem:[#allocation138_spill] sm:$0xff] }
0x17fc   : > { %v16081_v1 = vpop.f32.mrf.mxu0  ;;  %13020 = vxpose.xlu0.b32.cont [3/5] (short) (narrow) %v13019_v52, 8 }
0x17fe   : > { %v16083_v60 = vpop.f32.mrf.mxu1 }
0x17ff   : > { %v10504_v36 = vpop.f32.mrf.mxu2 }
0x1800   : > { %v13006_v35 = vpack.i.bf16 %v10504_v36, %v16915_v58 }
0x1801   : > { %v10530_v15 = vpop.f32.mrf.mxu3 }
0x1802   : > { %v13021_v45 = vpack.i.bf16 %v10530_v15, %v16916_v41  ;;  %13007 = vxpose.xlu2.b32.cont [4/5] (short) (narrow) %v13006_v35, 8 }
0x1804   : > { %v16087_v2 = vpop.f32.mrf.mxu0  ;;  %13022 = vxpose.xlu0.b32.cont [4/5] (short) (narrow) %v13021_v45, 8 }
0x1806   : > { %v16089_v47 = vpop.f32.mrf.mxu1 }
0x1807   : > { %v10507_v23 = vpop.f32.mrf.mxu2 }
0x1808   : > { %v13008_v61 = vpack.i.bf16 %v10507_v23, %v16917_v32 }
0x1809   : > { %v10533_v38 = vpop.f32.mrf.mxu3 }
0x180a   : > { %v13023_v0 = vpack.i.bf16 %v10533_v38, %v16918_v28  ;;  %13009 = vxpose.xlu2.b32.end [5/5] (short) (narrow) %v13008_v61, 8 }
0x180c   : > { %v10561_v56 = vpop.f32.mrf.mxu0  ;;  %13024 = vxpose.xlu0.b32.end [5/5] (short) (narrow) %v13023_v0, 8 }
0x180e   : > { %v10587_v19 = vpop.f32.mrf.mxu1 }
0x180f   : > { %v10509_v39 = vpop.f32.mrf.mxu2  ;;  %v16923_v19 = vld [vmem:[#allocation121_spill] sm:$0xff] }
0x1811   : > { %v10535_v20 = vpop.f32.mrf.mxu3 }
0x1814   : > { %v10653_v55 = vpop.f32.mrf.mxu0 }
0x1815   : > { %v13030_v40 = vpack.i.bf16 %v16919_v16, %v10653_v55 }
0x1816   : > { %v10679_v57 = vpop.f32.mrf.mxu1 }
0x1817   : > { %v16094_v3 = vpop.f32.mrf.mxu2  ;;  %13031 = vxpose.xlu1.b32.start [1/5] (short) (narrow) %v13030_v40, 8  ;;  %v13045_v39 = vpack.i.bf16 %v10679_v57, %v16923_v19  ;;  %v12957_v57 = vunpack.i.h.bf16 %v15964_v51 }
0x1818   : > { %v13060_v31 = vpack.i.bf16 %v16094_v3, %v16063_v62  ;;  %v16934_v3 = vld [vmem:[#allocation96_spill] sm:$0xff] }
0x1819   : > { %v16098_v7 = vpop.f32.mrf.mxu3 }
0x181a   : > { %v13105_v8 = vpack.i.bf16 %v16098_v7, %v16065_v37  ;;  %v16954_v37 = vld [vmem:[#allocation68_spill] sm:$0xff] }
0x181b   : > { %v16955_v7 = vld [vmem:[#allocation88_spill] sm:$0xff] }
0x181c   : > { %v10655_v63 = vpop.f32.mrf.mxu0 }
0x181d   : > { %v13032_v12 = vpack.i.bf16 %v16920_v49, %v10655_v63  ;;  %v16925_v63 = vld [vmem:[#allocation127_spill] sm:$0xff] }
0x181e   : > { %v10681_v6 = vpop.f32.mrf.mxu1 }
0x181f   : > { %v16103_v5 = vpop.f32.mrf.mxu2  ;;  %13033 = vxpose.xlu1.b32.cont [2/5] (short) (narrow) %v13032_v12, 8  ;;  %v16926_v12 = vld [vmem:[#allocation130_spill] sm:$0xff] }
0x1820   : > { %v13062_v54 = vpack.i.bf16 %v16103_v5, %v16069_v17  ;;  %v16933_v17 = vld [vmem:[#allocation99_spill] sm:$0xff]  ;;  %v16937_v5 = vld [vmem:[#allocation93_spill] sm:$0xff] }
0x1821   : > { %v16107_v14 = vpop.f32.mrf.mxu3 }
0x1822   : > { %v13107_v44 = vpack.i.bf16 %v16107_v14, %v16071_v9  ;;  %v16956_v9 = vpack.i.bf16 %v16954_v37, %v16955_v7  ;;  %v16958_v14 = vld [vmem:[#allocation70_spill] sm:$0xff]  ;;  %v16974_v7 = vld [vmem:[#allocation79_spill] sm:$0xff] }
0x1824   : > { %v10658_v43 = vpop.f32.mrf.mxu0 }
0x1825   : > { %v13034_v53 = vpack.i.bf16 %v16921_v29, %v10658_v43  ;;  %v16927_v29 = vld [vmem:[#allocation133_spill] sm:$0xff] }
0x1826   : > { %v10684_v24 = vpop.f32.mrf.mxu1 }
0x1827   : > { %v16112_v10 = vpop.f32.mrf.mxu2  ;;  %13035 = vxpose.xlu1.b32.cont [3/5] (short) (narrow) %v13034_v53, 8  ;;  %v13049_v49 = vpack.i.bf16 %v10684_v24, %v16925_v63 }
0x1828   : > { %v13064_v33 = vpack.i.bf16 %v16112_v10, %v16075_v4  ;;  %v16935_v4 = vpack.i.bf16 %v16933_v17, %v16934_v3  ;;  %v16939_v10 = vld [vmem:[#allocation100_spill] sm:$0xff] }
0x1829   : > { %v16116_v13 = vpop.f32.mrf.mxu3 }
0x182a   : > { %v13109_v50 = vpack.i.bf16 %v16116_v13, %v16077_v59  ;;  %v16962_v13 = vld [vmem:[#allocation98_spill] sm:$0xff] }
0x182c   : > { %v10660_v11 = vpop.f32.mrf.mxu0 }
0x182d   : > { %v13036_v52 = vpack.i.bf16 %v16922_v25, %v10660_v11  ;;  %v12924_v11 = vunpack.i.l.bf16 %v15961_v22 }
0x182e   : > { %v10686_v36 = vpop.f32.mrf.mxu1 }
0x182f   : > { %v16121_v58 = vpop.f32.mrf.mxu2  ;;  %13037 = vxpose.xlu1.b32.cont [4/5] (short) (narrow) %v13036_v52, 8  ;;  %v13051_v43 = vpack.i.bf16 %v10686_v36, %v16926_v12  ;;  %v6365_v25 = vrot.slane %v12924_v11, 4  ;;  %v12969_v52 = vunpack.i.l.bf16 %v15969_v48 }
0x1830   : > { %v13066_v35 = vpack.i.bf16 %v16121_v58, %v16081_v1  ;;  %v16941_v58 = vld [vmem:[#allocation97_spill] sm:$0xff] }
0x1831   : > { %v16125_v15 = vpop.f32.mrf.mxu3 }
0x1832   : > { %v13111_v41 = vpack.i.bf16 %v16125_v15, %v16083_v60  ;;  %v16964_v15 = vld [vmem:[#allocation82_spill] sm:$0xff] }
0x1834   : > { %v10663_v45 = vpop.f32.mrf.mxu0 }
0x1835   : > { %v13038_v23 = vpack.i.bf16 %v15856_v34, %v10663_v45  ;;  %v16924_v34 = vld [vmem:[#allocation124_spill] sm:$0xff]  ;;  %v6366_v45 = vsel %vm1466_vm0, %v6365_v25, %v12957_v57 }
0x1836   : > { %v10689_v32 = vpop.f32.mrf.mxu1  ;;  %v13047_v40 = vpack.i.bf16 %v10681_v6, %v16924_v34  ;;  %v6359_v6 = vrot.slane %v12969_v52, 4  ;;  %v12984_v34 = vunpack.i.l.bf16 %v15977_v42 }
0x1837   : > { %v16130_v61 = vpop.f32.mrf.mxu2  ;;  %13039 = vxpose.xlu1.b32.end [5/5] (short) (narrow) %v13038_v23, 8  ;;  %v13053_v53 = vpack.i.bf16 %v10689_v32, %v16927_v29  ;;  %v6370_v23 = vperm.slane %v6366_v45, %v13817_v26 }
0x1838   : > { %v13068_v38 = vpack.i.bf16 %v16130_v61, %v16087_v2  ;;  %v8651_v12 = vrot.slane %v12984_v34, 4  ;;  %v16946_v61 = vld [vmem:[#allocation81_spill] sm:$0xff] }
0x1839   : > { %v16134_v28 = vpop.f32.mrf.mxu3  ;;  %v6383_v32 = vrot.slane %v6370_v23, 4 }
0x183a   : > { %v13113_v0 = vpack.i.bf16 %v16134_v28, %v16089_v47  ;;  %v16967_v28 = vmov 0  }
0x183c   : > { %v10665_v56 = vpop.f32.mrf.mxu0 }
0x183e   : > { %v10691_v20 = vpop.f32.mrf.mxu1 }
0x183f   : > { %13046 = vxpose.xlu1.b32.start [1/5] (short) (narrow) %v13045_v39, 8  ;;  %v10613_v55 = vpop.f32.mrf.mxu2  ;;  %v12954_v20 = vunpack.i.l.bf16 %v15964_v51 }
0x1841   : > { %v10639_v16 = vpop.f32.mrf.mxu3  ;;  %v8663_v55 = vrot.slane %v12954_v20, 4  ;;  %v12972_v20 = vunpack.i.h.bf16 %v15969_v48  ;;  %v16929_v48 = vld [vmem:[#allocation89_spill] sm:$0xff] }
0x1842   : > { %v12987_v16 = vunpack.i.h.bf16 %v15977_v42 }
0x1844   : > { %v8664_v63 = vsel %vm1466_vm0, %v8663_v55, %v12987_v16  ;;  %v6382_v16 = vperm.slane %v15967_v21, %v13817_v26  ;;  %v16928_v21 = vld [vmem:[#allocation91_spill] sm:$0xff] }
0x1847   : > { %13048 = vxpose.xlu1.b32.cont [2/5] (short) (narrow) %v13047_v40, 8  ;;  %v8674_v40 = vperm.slane %v15975_v30, %v13817_v26 }
0x1849   : > { %v8681_v29 = vrot.slane %v8674_v40, 4 }
0x184f   : > { %13050 = vxpose.xlu1.b32.cont [3/5] (short) (narrow) %v13049_v49, 8  ;;  %v12939_v49 = vunpack.i.l.bf16 %v15971_v46 }
0x1851   : > { %v8657_v11 = vrot.slane %v12939_v49, 4 }
0x1857   : > { %13052 = vxpose.xlu1.b32.cont [4/5] (short) (narrow) %v13051_v43, 8 }
0x185f   : > { %13054 = vxpose.xlu1.b32.end [5/5] (short) (narrow) %v13053_v53, 8  ;;  %v8668_v53 = vperm.slane %v8664_v63, %v13817_v26  ;;  %v6389_v63 = vrot.slane %v6382_v16, 4 }
0x1861   : > { %v8682_v57 = vsel %vm1466_vm0, %v8681_v29, %v8668_v53 }
0x1862   : > { %v8686_v45 = vperm.slane %v8682_v57, %v13819_v27 }
0x1883   : > { %v16154_v39 = vpop.trf.xlu2 }
0x1884   : > { %v13011_v43 = vunpack.i.l.bf16 %v16154_v39  ;;  %v13014_v17 = vunpack.i.h.bf16 %v16154_v39 }
0x1886   : > { %v8652_v42 = vsel %vm1466_vm0, %v8651_v12, %v13011_v43 }
0x1887   : > { %v8656_v46 = vperm.slane %v8652_v42, %v13817_v26  ;;  %v16932_v42 = vld [vmem:[#allocation95_spill] sm:$0xff] }
0x1890   : > { %v16148_v24 = vpop.trf.xlu0 }
0x1891   : > { %v13026_v36 = vunpack.i.l.bf16 %v16148_v24 }
0x1893   : > { %v6360_v56 = vsel %vm1466_vm0, %v6359_v6, %v13026_v36 }
0x1894   : > { %v6364_v19 = vperm.slane %v6360_v56, %v13817_v26  ;;  %v8687_v56 = vrot.slane %v8686_v45, 4  ;;  %v16949_v45 = vld [vmem:[#allocation105_spill] sm:$0xff] }
0x1896   : > { %v6384_v22 = vsel %vm1466_vm0, %v6383_v32, %v6364_v19 }
0x1897   : > { %v6388_v29 = vperm.slane %v6384_v22, %v13819_v27  ;;  %v16930_v22 = vpack.i.bf16 %v16928_v21, %v16929_v48 }
0x18bb   : > { %v16165_v51 = vpop.trf.xlu1 }
0x18bc   : > { %v13044_v25 = vunpack.i.h.bf16 %v16165_v51  ;;  %v13041_v16 = vunpack.i.l.bf16 %v16165_v51 }
0x18be   : > { %v8658_v30 = vsel %vm1466_vm0, %v8657_v11, %v13044_v25  ;;  %v16931_v25 = vld [vmem:[#allocation92_spill] sm:$0xff] }
0x18bf   : > { %v8662_v52 = vperm.slane %v8658_v30, %v13817_v26  ;;  %v13092_v62 = vpack.i.bf16 %v16932_v42, %v16931_v25  ;;  %v16943_v30 = vld [vmem:[#allocation106_spill] sm:$0xff] }
0x18c1   : > { %v8675_v6 = vrot.slane %v8662_v52, 4  ;;  %v16944_v52 = vld [vmem:[#allocation104_spill] sm:$0xff] }
0x18c2   : > { %v16945_v2 = vpack.i.bf16 %v16943_v30, %v16944_v52 }
0x18c3   : > { %v8676_v23 = vsel %vm1466_vm0, %v8675_v6, %v8656_v46  ;;  %v16950_v6 = vld [vmem:[#allocation85_spill] sm:$0xff] }
0x18c4   : > { %v8680_v36 = vperm.slane %v8676_v23, %v13819_v27  ;;  %v13081_v23 = vpack.i.bf16 %v16950_v6, %v16949_v45  ;;  %v11039_v45 = vld [vmem:[%s13734_s15 + $0x40] sm:$0x3] }
0x18c5   : > { %v11073_v6 = vunpack.c.l.b16 %v11039_v45 }
0x18c6   : > { %v8688_v32 = vsel %vm1466_vm0, %v8687_v56, %v8680_v36  ;;  %v16951_v36 = vld [vmem:[#allocation87_spill] sm:$0xff] }
0x18c7   : > { %11009 = vrot.lane.b32.xlu1 %v8688_v32, %s13419_s16  ;;  %v16952_v56 = vld [vmem:[#allocation107_spill] sm:$0xff] }
0x18c8   : > { %v16953_v32 = vpack.i.bf16 %v16951_v36, %v16952_v56  ;;  %v16972_v56 = vld [vmem:[#allocation72_spill] sm:$0xff] }
0x18e3   : > { %v13055_v19 = vpop.trf.xlu1 }
0x18e4   : > { %v13056_v55 = vunpack.i.l.bf16 %v13055_v19 }
0x18e6   : > { %v6371_v34 = vrot.slane %v13056_v55, 4  ;;  %v16960_v55 = vld [vmem:[#allocation94_spill] sm:$0xff] }
0x18e8   : > { %v6372_v40 = vsel %vm1466_vm0, %v6371_v34, %v12972_v20  ;;  %v16959_v20 = vld [vmem:[#allocation74_spill] sm:$0xff]  ;;  %v16968_v34 = vld [vmem:[#allocation108_spill] sm:$0xff] }
0x18e9   : > { %v6376_v49 = vperm.slane %v6372_v40, %v13817_v26  ;;  %v16961_v59 = vpack.i.bf16 %v16959_v20, %v16960_v55  ;;  %v16979_v20 = vld [vmem:[#allocation86_spill] sm:$0xff]  ;;  %v16980_v55 = vld [vmem:[#allocation84_spill] sm:$0xff] }
0x18eb   : > { %v6390_v12 = vsel %vm1466_vm0, %v6389_v63, %v6376_v49  ;;  %v10961_v63 = vrot.slane %v13041_v16, 4  ;;  %v12470_v16 = vld [vmem:[%s13734_s15 + $0x10] sm:$0xff] }
0x18ec   : > { %v6394_v43 = vperm.slane %v6390_v12, %v13819_v27 }
0x18ee   : > { %v6395_v53 = vrot.slane %v6394_v43, 4 }
0x18f0   : > { %v6396_v11 = vsel %vm1466_vm0, %v6395_v53, %v6388_v29 }
0x18f1   : > { %11005 = vrot.lane.b32.xlu0 %v6396_v11, %s13420_s21  ;;  %v13059_v11 = vunpack.i.h.bf16 %v13055_v19 }
0x18f3   : > { %v10967_v48 = vrot.slane %v13059_v11, 4 }
0x18fc   : > { %13061 = vxpose.xlu1.b32.start [1/5] (short) (narrow) %v13060_v31, 8  ;;  %v16936_v31 = vld [vmem:[#allocation73_spill] sm:$0xff] }
0x1904   : > { %13063 = vxpose.xlu1.b32.cont [2/5] (short) (narrow) %v13062_v54, 8  ;;  %v16938_v54 = vpack.i.bf16 %v16936_v31, %v16937_v5 }
0x190c   : > { %13065 = vxpose.xlu1.b32.cont [3/5] (short) (narrow) %v13064_v33, 8  ;;  %v16940_v33 = vld [vmem:[#allocation103_spill] sm:$0xff] }
0x190d   : > { %v13096_v1 = vpack.i.bf16 %v16940_v33, %v16939_v10 }
0x1913   : > { %13091 = vxpose.xlu0.b32.start [1/5] (short) (narrow) %v16930_v22, 8 }
0x1914   : > { %13067 = vxpose.xlu1.b32.cont [4/5] (short) (narrow) %v13066_v35, 8  ;;  %v16942_v35 = vld [vmem:[#allocation77_spill] sm:$0xff] }
0x1915   : > { %v13077_v57 = vpack.i.bf16 %v16942_v35, %v16941_v58 }
0x191b   : > { %13093 = vxpose.xlu0.b32.cont [2/5] (short) (narrow) %v13092_v62, 8  ;;  %v13029_v62 = vunpack.i.h.bf16 %v16148_v24 }
0x191c   : > { %13069 = vxpose.xlu1.b32.end [5/5] (short) (narrow) %v13068_v38, 8  ;;  %v16947_v38 = vld [vmem:[#allocation101_spill] sm:$0xff] }
0x191d   : > { %v16948_v46 = vpack.i.bf16 %v16946_v61, %v16947_v38  ;;  %v16969_v61 = vld [vmem:[#allocation71_spill] sm:$0xff]  ;;  %v16970_v38 = vld [vmem:[#allocation69_spill] sm:$0xff] }
0x1923   : > { %13095 = vxpose.xlu0.b32.cont [3/5] (short) (narrow) %v16935_v4, 8 }
0x1924   : > { %13076 = vxpose.xlu1.b32.start [1/5] (short) (narrow) %v16938_v54, 8 }
0x192b   : > { %13097 = vxpose.xlu0.b32.cont [4/5] (short) (narrow) %v13096_v1, 8 }
0x192c   : > { %13078 = vxpose.xlu1.b32.cont [2/5] (short) (narrow) %v13077_v57, 8 }
0x1933   : > { %13099 = vxpose.xlu0.b32.end [5/5] (short) (narrow) %v16945_v2, 8 }
0x1934   : > { %13080 = vxpose.xlu1.b32.cont [3/5] (short) (narrow) %v16948_v46, 8  ;;  %v16971_v46 = vpack.i.bf16 %v16969_v61, %v16970_v38 }
0x193b   : > { %13106 = vxpose.xlu0.b32.start [1/5] (short) (narrow) %v13105_v8, 8  ;;  %v16957_v8 = vld [vmem:[#allocation90_spill] sm:$0xff] }
0x193c   : > { %13082 = vxpose.xlu1.b32.cont [4/5] (short) (narrow) %v13081_v23, 8  ;;  %v11082_v23 = vpack.c.b16 %v11073_v6, %v11073_v6  ;;  %v12482_v6 = vld [vmem:[%s13700_s10 + $0x30] sm:$0xff] }
0x193e   : > { %v11097_v36 = vsel %vm11095_vm8, %v11082_v23, 0  ;;  %v12481_v23 = vld [vmem:[%s13700_s10 + $0x28] sm:$0xff] }
0x193f   : > { %11119 = vmatpush.bf16.msrb.mxu3 %v11097_v36  ;;  %v12480_v36 = vld [vmem:[%s13700_s10 + $0x20] sm:$0xff] }
0x1943   : > { %13108 = vxpose.xlu0.b32.cont [2/5] (short) (narrow) %v13107_v44, 8  ;;  %v13137_v44 = vpack.i.bf16 %v16958_v14, %v16957_v8  ;;  %v16977_v8 = vld [vmem:[#allocation80_spill] sm:$0xff]  ;;  %v16978_v14 = vld [vmem:[#allocation83_spill] sm:$0xff] }
0x1944   : > { %13084 = vxpose.xlu1.b32.end [5/5] (short) (narrow) %v16953_v32, 8  ;;  %v16973_v32 = vld [vmem:[#allocation75_spill] sm:$0xff] }
0x1945   : > { %v13122_v37 = vpack.i.bf16 %v16973_v32, %v16972_v56  ;;  %v12477_v56 = vld [vmem:[%s13700_s10 + $0x8] sm:$0xff]  ;;  %v12476_v32 = vld [vmem:[%s13700_s10] sm:$0xff] }
0x194b   : > { %13110 = vxpose.xlu0.b32.cont [3/5] (short) (narrow) %v13109_v50, 8  ;;  %v16963_v50 = vld [vmem:[#allocation78_spill] sm:$0xff] }
0x194c   : > { %v13141_v60 = vpack.i.bf16 %v16963_v50, %v16962_v13  ;;  %v12475_v13 = vld [vmem:[%s13734_s15 + $0x38] sm:$0xff] }
0x194d   : > { %11099 = vmatpush.bf16.msrb.mxu2 %v12475_v13 }
0x1953   : > { %13112 = vxpose.xlu0.b32.cont [4/5] (short) (narrow) %v13111_v41, 8  ;;  %v16965_v41 = vld [vmem:[#allocation102_spill] sm:$0xff] }
0x1954   : > { %v16966_v47 = vpack.i.bf16 %v16964_v15, %v16965_v41  ;;  %v12474_v15 = vld [vmem:[%s13734_s15 + $0x30] sm:$0xff]  ;;  %v12473_v41 = vld [vmem:[%s13734_s15 + $0x28] sm:$0xff] }
0x1955   : > { %11100 = vmatpush.bf16.msrb.mxu2 %v12474_v15  ;;  %v13153_v15 = vld [vmem:[%s16987_s11] ss:$0 sm:$0xff] }
0x1959   : > { %11101 = vmatpush.bf16.msrb.mxu2 %v12473_v41 }
0x195b   : > { %13114 = vxpose.xlu0.b32.end [5/5] (short) (narrow) %v13113_v0, 8  ;;  %v16256_v0 = vpop.permute.xlu1 %11009 }
0x1963   : > { %13136 = vxpose.xlu0.b32.start [1/5] (short) (narrow) %v16956_v9, 8  ;;  %v16262_v43 = vpop.permute.xlu0 %11005 }
0x196b   : > { %13138 = vxpose.xlu0.b32.cont [2/5] (short) (narrow) %v13137_v44, 8  ;;  %v13126_v44 = vpack.i.bf16 %v16978_v14, %v16977_v8 }
0x1973   : > { %13140 = vxpose.xlu0.b32.cont [3/5] (short) (narrow) %v16961_v59, 8  ;;  %v16981_v59 = vpack.i.bf16 %v16979_v20, %v16980_v55 }
0x197b   : > { %13142 = vxpose.xlu0.b32.cont [4/5] (short) (narrow) %v13141_v60, 8 }
0x1983   : > { %13144 = vxpose.xlu0.b32.end [5/5] (short) (narrow) %v16966_v47, 8  ;;  %v12472_v47 = vld [vmem:[%s13734_s15 + $0x20] sm:$0xff] }
0x1984   : > { %11102 = vmatpush.bf16.msrb.mxu2 %v12472_v47 }
0x1997   : > { %13150 = vset.pattern.permute.xlu1 %v16967_v28 }
0x199e   : > { %10988 = vrot.lane.b32.xlu1 %v16968_v34, %s13418_s14  ;;  %v12469_v34 = vld [vmem:[%s13734_s15 + $0x8] sm:$0xff]  ;;  %s16995_s14 = sld [smem:[#allocation157_spill]] }
0x19a0   : > { %v13070_v40 = vpop.trf.xlu1 }
0x19a1   : > { %v13074_v49 = vunpack.i.h.bf16 %v13070_v40  ;;  %v13071_v21 = vunpack.i.l.bf16 %v13070_v40  ;;  %v12468_v40 = vld [vmem:[%s13734_s15] sm:$0xff] }
0x19a3   : > { %v10962_v12 = vsel %vm1466_vm0, %v10961_v63, %v13074_v49  ;;  %v10949_v22 = vrot.slane %v13071_v21, 4  ;;  %v16982_v63 = vld [vmem:[#allocation30_spill] sm:$0xff] }
0x19a4   : > { %v10966_v19 = vperm.slane %v10962_v12, %v13817_v26  ;;  %s13296_s17 = scalar_lea.hbm %s16995_s14, 16 }
0x19a5   : > { %v10950_v5 = vsel %vm1466_vm0, %v10949_v22, %v13014_v17 }
0x19a6   : > { %v10954_v1 = vperm.slane %v10950_v5, %v13817_v26 }
0x19b7   : > { %v16264_v29 = vpop.trf.xlu0 }
0x19b8   : > { %v13104_v12 = vunpack.i.h.bf16 %v16264_v29  ;;  %v13101_v11 = vunpack.i.l.bf16 %v16264_v29 }
0x19ba   : > { %v4069_v22 = vrot.slane %v13104_v12, 4  ;;  %v12350_v12 = vld [vmem:[%s16985_s8 + $0x70] sm:$0xf] }
0x19c8   : > { %v16266_v53 = vpop.trf.xlu1 }
0x19c9   : > { %v13086_v49 = vunpack.i.l.bf16 %v16266_v53 }
0x19cb   : > { %v4075_v21 = vrot.slane %v13086_v49, 4  ;;  %v13422_v49 = vmov 128.0  }
0x19cc   : > { %13175 = vrcp.f32 %v13422_v49 }
0x19df   : > { %v13115_v25 = vpop.trf.xlu0 }
0x19e0   : > { %v13119_v51 = vunpack.i.h.bf16 %v13115_v25  ;;  %v13116_v42 = vunpack.i.l.bf16 %v13115_v25  ;;  %v4076_v25 = vsel %vm1466_vm0, %v4075_v21, %v13101_v11  ;;  %v12499_v11 = vld [vmem:[%s16985_s8 + $0x74] sm:$0xf0]  ;;  %v12498_v21 = vld [vmem:[%s16985_s8 + $0x74] sm:$0xf] }
0x19e2   : > { %v10968_v3 = vsel %vm1466_vm0, %v10967_v48, %v13119_v51  ;;  %v10955_v4 = vrot.slane %v13116_v42, 4  ;;  %v13089_v42 = vunpack.i.h.bf16 %v16266_v53 }
0x19e3   : > { %v10972_v31 = vperm.slane %v10968_v3, %v13817_v26 }
0x19e4   : > { %v10956_v54 = vsel %vm1466_vm0, %v10955_v4, %v13029_v62  ;;  %v4080_v62 = vperm.slane %v4076_v25, %v13817_v26  ;;  %v4063_v3 = vrot.slane %v13089_v42, 4 }
0x19e5   : > { %v10979_v10 = vrot.slane %v10972_v31, 4  ;;  %v10960_v33 = vperm.slane %v10956_v54, %v13817_v26 }
0x19e6   : > { %v4087_v4 = vrot.slane %v4080_v62, 4 }
0x19e7   : > { %v10973_v24 = vrot.slane %v10960_v33, 4  ;;  %v10980_v39 = vsel %vm1466_vm0, %v10979_v10, %v10966_v19 }
0x19e8   : > { %v10984_v58 = vperm.slane %v10980_v39, %v13819_v27 }
0x19e9   : > { %v10974_v35 = vsel %vm1466_vm0, %v10973_v24, %v10954_v1 }
0x19ea   : > { %v10978_v57 = vperm.slane %v10974_v35, %v13819_v27  ;;  %v10985_v30 = vrot.slane %v10984_v58, 4  ;;  %13151 = vset.pattern.permute.xlu0 %v16967_v28  ;;  %v12471_v28 = vld [vmem:[%s13734_s15 + $0x18] sm:$0xff]  ;;  %s16988_s15 = sld [smem:[#allocation28_spill]] }
0x19eb   : > { %11103 = vmatpush.bf16.msrb.mxu2 %v12471_v28 }
0x19ec   : > { %v10986_v52 = vsel %vm1466_vm0, %v10985_v30, %v10978_v57 }
0x19ed   : > { %11013 = vrot.lane.b32.xlu2 %v10986_v52, %s13421_s24 }
0x19ef   : > { %11104 = vmatpush.bf16.msrb.mxu2 %v12470_v16 }
0x19f0   : > { %v12506_v49 = vld [vmem:[%s16988_s15 + $0x30] sm:$0xff] }
0x19f1   : > { %10996 = vrot.lane.b32.xlu0 %v15979_v18, %s13414_s18  ;;  %v16975_v18 = vld [vmem:[#allocation76_spill] sm:$0xff] }
0x19f2   : > { %v16976_v9 = vpack.i.bf16 %v16974_v7, %v16975_v18 }
0x19f3   : > { %11105 = vmatpush.bf16.msrb.mxu2 %v12469_v34  ;;  %v13185_v34 = vld [vmem:[%s13751_s2] sm:$0xff] }
0x19f7   : > { %11106 = vmatpush.bf16.msrb.mxu2 %v12468_v40 }
0x1a07   : > { %v13145_v2 = vpop.trf.xlu0 }
0x1a08   : > { %v13146_v48 = vunpack.i.l.bf16 %v13145_v2  ;;  %v13149_v19 = vunpack.i.h.bf16 %v13145_v2 }
0x1a0a   : > { %v4070_v51 = vsel %vm1466_vm0, %v4069_v22, %v13146_v48  ;;  %v12351_v48 = vor.u32 %v12499_v11, %v12350_v12  ;;  %v12352_v22 = vld [vmem:[%s16985_s8 + $0x78] sm:$0xf0]  ;;  %v12514_v12 = vld [vmem:[%s16988_s15 + $0x70] sm:$0xff] }
0x1a0b   : > { %v4074_v17 = vperm.slane %v4070_v51, %v13817_v26  ;;  %v12355_v25 = vor.u32 %v12498_v21, %v12352_v22  ;;  %v13176_v51 = vpop.eup %13175  ;;  %v12505_v21 = vld [vmem:[%s16988_s15 + $0x28] sm:$0xff]  ;;  %v12504_v22 = vld [vmem:[%s16988_s15 + $0x20] sm:$0xff] }
0x1a0c   : > { %11355 = vmatpush.bf16.msrb.mxu1 %v12351_v48  ;;  %v11220_v42 = vmul.f32 128.0, %v13176_v51  ;;  %vm11224_vm13 = vweird.f32 %v13176_v51  ;;  %v12513_v48 = vld [vmem:[%s16988_s15 + $0x68] sm:$0xff] }
0x1a0d   : > { %v4088_v29 = vsel %vm1466_vm0, %v4087_v4, %v4074_v17  ;;  %11368 = vmatpush.bf16.msra.mxu2 %v12355_v25  ;;  %v12512_v25 = vld [vmem:[%s16988_s15 + $0x60] sm:$0xff] }
0x1a0e   : > { %v4092_v24 = vperm.slane %v4088_v29, %v13819_v27  ;;  %v11221_v62 = vsub.f32 1.0, %v11220_v42 }
0x1a10   : > { %v4093_v57 = vrot.slane %v4092_v24, 4  ;;  %v10989_v7 = vpop.permute.xlu1 %10988  ;;  %v11222_v17 = vmul.f32 %v13176_v51, %v11221_v62  ;;  %v12344_v24 = vld [vmem:[%s16985_s8 + $0x68] sm:$0xf0]  ;;  %v12503_v62 = vld [vmem:[%s16988_s15 + $0x18] sm:$0xff] }
0x1a13   : > { %13121 = vxpose.xlu2.b32.start [1/5] (short) (narrow) %v16971_v46, 8 }
0x1a1b   : > { %13123 = vxpose.xlu2.b32.cont [2/5] (short) (narrow) %v13122_v37, 8  ;;  %v895_v37 = vld [vmem:[%s16983_s4] sm:$0xff] }
0x1a1c   : > { %11210 = vperm.xlu1 %13150, %v895_v37   ;;  %v12488_v37 = vld [vmem:[%s16985_s8 + $0x24] sm:$0xf] }
0x1a23   : > { %13125 = vxpose.xlu2.b32.cont [3/5] (short) (narrow) %v16976_v9, 8  ;;  %v16984_v9 = vld [vmem:[#allocation65_spill] sm:$0xff] }
0x1a24   : > { %v10999_v8 = vsel %vm3200_vm4, %v16984_v9, %v10989_v7 }
0x1a2b   : > { %13127 = vxpose.xlu2.b32.cont [4/5] (short) (narrow) %v13126_v44, 8 }
0x1a33   : > { %13129 = vxpose.xlu2.b32.end [5/5] (short) (narrow) %v16981_v59, 8 }
0x1a47   : > { %v11014_v50 = vpop.permute.xlu2 %11013 }
0x1a48   : > { %v11022_v60 = vpack.c.bf16 %v11014_v50, %v11014_v50 }
0x1a4a   : > { %12259 = vmatmul.msk.bf16.vlgmr.msrb.gmra.mxu3 %vm11091_vm9, %v11022_v60 }
0x1a63   : > { %v10997_v20 = vpop.permute.xlu0 %10996 }
0x1a8e   : > { %v16345_v47 = vpop.permute.xlu1 %11210 }
0x1a9c   : > { %10992 = vrot.lane.b32.xlu2 %v16982_v63, %s13416_s1 }
0x1aac   : > { %v13130_v31 = vpop.trf.xlu2 }
0x1aad   : > { %v13134_v5 = vunpack.i.h.bf16 %v13130_v31  ;;  %v13131_v54 = vunpack.i.l.bf16 %v13130_v31 }
0x1aaf   : > { %v4057_v10 = vrot.slane %v13134_v5, 4  ;;  %v4064_v33 = vsel %vm1466_vm0, %v4063_v3, %v13131_v54  ;;  %v11223_v3 = vadd.f32 %v13176_v51, %v11222_v17 }
0x1ab0   : > { %v4068_v1 = vperm.slane %v4064_v33, %v13817_v26  ;;  %v12496_v33 = vld [vmem:[%s16985_s8 + $0x64] sm:$0xf] }
0x1ab1   : > { %v4058_v53 = vsel %vm1466_vm0, %v4057_v10, %v13149_v19  ;;  %v16353_v4 = vsel %vm11224_vm13, %v13176_v51, %v11223_v3  ;;  %v12342_v19 = vld [vmem:[%s16985_s8 + $0x60] sm:$0xf]  ;;  %v12497_v10 = vld [vmem:[%s16985_s8 + $0x64] sm:$0xf0]  ;;  %v12511_v3 = vld [vmem:[%s16988_s15 + $0x58] sm:$0xff] }
0x1ab2   : > { %v4062_v39 = vperm.slane %v4058_v53, %v13817_v26  ;;  %v4081_v58 = vrot.slane %v4068_v1, 4  ;;  %v12343_v1 = vor.u32 %v12497_v10, %v12342_v19  ;;  %v12347_v53 = vor.u32 %v12496_v33, %v12344_v24  ;;  %v13154_v10 = vld [vmem:[%s16990_s30] ss:$0 sm:$0xff] }
0x1ab4   : > { %v4082_v35 = vsel %vm1466_vm0, %v4081_v58, %v4062_v39  ;;  %11356 = vmatpush.bf16.msrb.mxu1 %v12343_v1  ;;  %11369 = vmatpush.bf16.msra.mxu2 %v12347_v53  ;;  %v12334_v39 = vld [vmem:[%s16985_s8 + $0x50] sm:$0xf]  ;;  %v12495_v58 = vld [vmem:[%s16985_s8 + $0x54] sm:$0xf0]  ;;  %v13155_v1 = vld [vmem:[%s876_s9] ss:$0 sm:$0xff] }
0x1ab5   : > { %v4086_v30 = vperm.slane %v4082_v35, %v13819_v27  ;;  %v12483_v27 = vld [vmem:[%s13700_s10 + $0x38] sm:$0xff]  ;;  %v12494_v35 = vld [vmem:[%s16985_s8 + $0x54] sm:$0xf] }
0x1ab6   : > { %11195 = vmatpush.bf16.msra.mxu0 %v12483_v27  ;;  %v12318_v27 = vld [vmem:[%s16985_s8 + $0x30] sm:$0xf] }
0x1ab7   : > { %v4094_v52 = vsel %vm1466_vm0, %v4093_v57, %v4086_v30  ;;  %vm11000_vm0 = vcmask 523264   ;;  %v12335_v57 = vor.u32 %v12495_v58, %v12334_v39  ;;  %v12336_v30 = vld [vmem:[%s16985_s8 + $0x58] sm:$0xf0] }
0x1ab8   : > { %v11016_v2 = vsel %vm2525_vm3, %v4094_v52, %v16262_v43  ;;  %v12479_v43 = vld [vmem:[%s13700_s10 + $0x18] sm:$0xff]  ;;  %v12339_v52 = vor.u32 %v12494_v35, %v12336_v30  ;;  %v12501_v35 = vld [vmem:[%s16988_s15 + $0x8] sm:$0xff]  ;;  %v12500_v30 = vld [vmem:[%s16988_s15] sm:$0xff] }
0x1ab9   : > { %v11018_v61 = vsel %vm11017_vm10, %v11016_v2, %v16256_v0  ;;  %v12478_v0 = vld [vmem:[%s13700_s10 + $0x10] sm:$0xff]  ;;  %11357 = vmatpush.bf16.msrb.mxu1 %v12335_v57  ;;  %v12326_v2 = vld [vmem:[%s16985_s8 + $0x40] sm:$0xf]  ;;  %s11589_s10 = sshll.u32 %s13751_s2, 4  ;;  %s11590_s10 = int_to_ptr.vmem [resolvable:$true] %s11589_s10 }
0x1aba   : > { %v11020_v26 = vsel %vm11019_vm11, %v11018_v61, %v11014_v50  ;;  %11196 = vmatpush.bf16.msra.mxu0 %v12482_v6  ;;  %11370 = vmatpush.bf16.msra.mxu2 %v12339_v52  ;;  %v12493_v61 = vld [vmem:[%s16985_s8 + $0x44] sm:$0xf0]  ;;  %v12491_v6 = vld [vmem:[%s16985_s8 + $0x34] sm:$0xf0]  ;;  %v12510_v57 = vld [vmem:[%s16988_s15 + $0x50] sm:$0xff] }
0x1abb   : > { %v11021_v38 = vpack.c.bf16 %v11020_v26, %v11020_v26  ;;  %v12492_v26 = vld [vmem:[%s16985_s8 + $0x44] sm:$0xf]  ;;  %v12509_v52 = vld [vmem:[%s16988_s15 + $0x48] sm:$0xff] }
0x1abd   : > { %11107 = vmatmul.bf16.vlgmr.msrb.gmra.mxu2 %v11021_v38  ;;  %v12327_v38 = vor.u32 %v12493_v61, %v12326_v2  ;;  %v12508_v2 = vld [vmem:[%s16988_s15 + $0x40] sm:$0xff] }
0x1abe   : > { %11197 = vmatpush.bf16.msra.mxu0 %v12481_v23  ;;  %v12490_v23 = vld [vmem:[%s16985_s8 + $0x34] sm:$0xf]  ;;  %v11269_v61 = vld [vmem:[%s13740_s28] sm:$0x3]  ;;  %s16993_s28 = sld [smem:[#allocation17_spill]] }
0x1abf   : > { %11358 = vmatpush.bf16.msrb.mxu1 %v12327_v38 }
0x1ac2   : > { %11198 = vmatpush.bf16.msra.mxu0 %v12480_v36  ;;  %v12319_v36 = vor.u32 %v12491_v6, %v12318_v27 }
0x1ac4   : > { %11359 = vmatpush.bf16.msrb.mxu1 %v12319_v36 }
0x1ac6   : > { %11199 = vmatpush.bf16.msra.mxu0 %v12479_v43  ;;  %v12320_v43 = vld [vmem:[%s16985_s8 + $0x38] sm:$0xf0] }
0x1aca   : > { %11200 = vmatpush.bf16.msra.mxu0 %v12478_v0  ;;  %v12323_v0 = vor.u32 %v12490_v23, %v12320_v43 }
0x1acd   : > { %v11121_v46 = vpop.f32.mrf.mxu3 }
0x1ace   : > { %11201 = vmatpush.bf16.msra.mxu0 %v12477_v56  ;;  %v12310_v56 = vld [vmem:[%s16985_s8 + $0x20] sm:$0xf] }
0x1ad2   : > { %11202 = vmatpush.bf16.msra.mxu0 %v12476_v32  ;;  %v12489_v32 = vld [vmem:[%s16985_s8 + $0x24] sm:$0xf0] }
0x1ad3   : > { %v12311_v7 = vor.u32 %v12489_v32, %v12310_v56  ;;  %v13156_v32 = vld [vmem:[%s883_s20] ss:$0 sm:$0xff]  ;;  %s12421_s20 = sshll.u32 %s16993_s28, 3 }
0x1ad4   : > { %s11587_s16 = scalar_lea.hbm %s16995_s14, %s12421_s20 }
0x1ad5   : > { %v11123_v45 = vpop.f32.mrf.mxu3  ;;  %11360 = vmatpush.bf16.msrb.mxu1 %v12311_v7  ;;  %s11591_s26 = sshll.u32 %s11587_s16, 4  ;;  %s11592_s26 = int_to_ptr.hbm [resolvable:$true] %s11591_s26 }
0x1ad6   : > { %s13290_s22 = sshra.s32 %s11592_s26, 4  ;;  %s13291_s22 = int_to_ptr.hbm [resolvable:$true] %s13290_s22 }
0x1ad7   : > { %s13292_s11 = scalar_lea.hbm %s13291_s22, 8  ;;  %p13297_p0 = scmp.lt.s32.totalorder %s13291_s22, %s16995_s14 }
0x1ad8   : > { %p13293_p10 = scmp.ne.s32.totalorder %s13291_s22, %s13292_s11  ;;  %p13298_p1 = scmp.lt.s32.totalorder %s13296_s17, %s13292_s11 }
0x1ada   : > { %p13294_p11 = pnand %p13293_p10, %p13605_p12  ;;  %p13299_p4 = por %p13298_p1, %p13297_p0 }
0x1adc   : > { %p13295_p13 = pneg %p13294_p11 }
0x1ade   : > { %p13300_p5 = pnand %p13299_p4, %p13295_p13 }
0x1af6   : > { %v10993_v18 = vpop.permute.xlu2 %10992 }
0x1af7   : > { %v11001_v14 = vsel %vm11000_vm0, %v10999_v8, %v10993_v18  ;;  %v12312_v18 = vld [vmem:[%s16985_s8 + $0x28] sm:$0xf0]  ;;  %v12302_v8 = vld [vmem:[%s16985_s8 + $0x10] sm:$0xf] }
0x1af8   : > { %v11003_v59 = vsel %vm11002_vm12, %v11001_v14, %v10997_v20  ;;  %v12315_v9 = vor.u32 %v12488_v37, %v12312_v18  ;;  %v12487_v14 = vld [vmem:[%s16985_s8 + $0x14] sm:$0xf0] }
0x1af9   : > { %v12303_v20 = vor.u32 %v12487_v14, %v12302_v8 }
0x1afb   : > { %11361 = vmatpush.bf16.msrb.mxu1 %v12303_v20 }
0x1b40   : > { %v11108_v44 = vpop.f32.mrf.mxu2 }
0x1b41   : > { %v11122_v55 = vadd.f32 %v11121_v46, %v11108_v44  ;;  %v12328_v46 = vld [vmem:[%s16985_s8 + $0x48] sm:$0xf0]  ;;  %v12486_v44 = vld [vmem:[%s16985_s8 + $0x14] sm:$0xf] }
0x1b42   : > { %v12331_v45 = vor.u32 %v12492_v26, %v12328_v46  ;;  %v11271_v26 = vperm.slane %v11269_v61, 0 }
0x1b43   : > { %v11125_v13 = vadd.f32 %v11122_v55, %v11003_v59  ;;  %v12304_v55 = vld [vmem:[%s16985_s8 + $0x18] sm:$0xf0]  ;;  %v12294_v59 = vld [vmem:[%s16985_s8] sm:$0xf] }
0x1b44   : > { %11371 = vmatpush.bf16.msra.mxu2 %v12331_v45  ;;  %v11272_v45 = vperm.slane %v11269_v61, 1 }
0x1b45   : > { %v11126_v50 = vpack.c.bf16 %v11125_v13, %v11125_v13  ;;  %v12485_v13 = vld [vmem:[%s16985_s8 + $0x4] sm:$0xf0] }
0x1b47   : > { %11203 = vmatmul.bf16.vlgmr.msra.gmra.mxu0 %v11126_v50  ;;  %v12307_v50 = vor.u32 %v12486_v44, %v12304_v55 }
0x1b48   : > { %v11110_v60 = vpop.f32.mrf.mxu2  ;;  %11372 = vmatpush.bf16.msra.mxu2 %v12323_v0 }
0x1b49   : > { %v12484_v60 = vld [vmem:[%s16985_s8 + $0x4] sm:$0xf] }
0x1b4c   : > { %11373 = vmatpush.bf16.msra.mxu2 %v12315_v9 }
0x1b50   : > { %11374 = vmatpush.bf16.msra.mxu2 %v12307_v50 }
0x1bc4   : > { %v11204_v41 = vpop.f32.mrf.mxu0 }
0x1bc5   : > { %v11205_v28 = vadd.f32 %v13153_v15, %v11204_v41  ;;  %v12296_v15 = vld [vmem:[%s16985_s8 + $0x8] sm:$0xf0]  ;;  %v12295_v41 = vor.u32 %v12485_v13, %v12294_v59 }
0x1bc7   : > { %v11213_v16 = vmul.f32 %v16345_v47, %v11205_v28  ;;  %v12299_v28 = vor.u32 %v12484_v60, %v12296_v15  ;;  %11362 = vmatpush.bf16.msrb.mxu1 %v12295_v41 }
0x1bc9   : > { %v11214_v40 = vadd.f32 %v13185_v34, %v11213_v16  ;;  %v12507_v16 = vld [vmem:[%s16988_s15 + $0x38] sm:$0xff]  ;;  %11375 = vmatpush.bf16.msra.mxu2 %v12299_v28 }
0x1bca   : > { %v12515_v34 = vld [vmem:[%s16988_s15 + $0x78] sm:$0xff]  ;;  %11517 = vmatpush.bf16.msra.mxu3 %v12507_v16 }
0x1bcb   : > { %11217 = vadd.xlane.f32.xlu1 %v11214_v40  ;;  %11530 = vmatpush.bf16.msrb.mxu0 %v12515_v34 }
0x1bcc   : > { %v11206_v63 = vpop.f32.mrf.mxu0 }
0x1bce   : > { %11518 = vmatpush.bf16.msra.mxu3 %v12506_v49  ;;  %v13157_v49 = vld [vmem:[%s718_s29] ss:$0 sm:$0xff]  ;;  %s11577_s29 = scalar_lea.sflag [#allocation4], %s16998_s23 }
0x1bcf   : > { %11531 = vmatpush.bf16.msrb.mxu0 %v12514_v12 }
0x1bd2   : > { %11519 = vmatpush.bf16.msra.mxu3 %v12505_v21 }
0x1bd3   : > { %11532 = vmatpush.bf16.msrb.mxu0 %v12513_v48 }
0x1bd6   : > { %11520 = vmatpush.bf16.msra.mxu3 %v12504_v22 }
0x1bd7   : > { %11533 = vmatpush.bf16.msrb.mxu0 %v12512_v25 }
0x1bda   : > { %11521 = vmatpush.bf16.msra.mxu3 %v12503_v62 }
0x1bdb   : > { %11534 = vmatpush.bf16.msrb.mxu0 %v12511_v3 }
0x1bdf   : > { %11535 = vmatpush.bf16.msrb.mxu0 %v12510_v57 }
0x1be3   : > { %11536 = vmatpush.bf16.msrb.mxu0 %v12509_v52 }
0x1be7   : > { %11537 = vmatpush.bf16.msrb.mxu0 %v12508_v2 }
0x1c3e   : > { %v11218_v31 = vpop.xlane.xlu1 %11217 }
0x1c3f   : > { %v11226_v5 = vmul.f32 %v16353_v4, %v11218_v31 }
0x1c41   : > { %v16356_v54 = vsub.f32 %v11214_v40, %v11226_v5  ;;  %v12502_v5 = vld [vmem:[%s16988_s15 + $0x10] sm:$0xff] }
0x1c42   : > { %11522 = vmatpush.bf16.msra.mxu3 %v12502_v5 }
0x1c43   : > { %v11228_v29 = vmul.f32 %v16356_v54, %v16356_v54 }
0x1c45   : > { %11229 = vadd.xlane.f32.xlu2 %v11228_v29 }
0x1c46   : > { %11523 = vmatpush.bf16.msra.mxu3 %v12501_v35 }
0x1c4a   : > { %11524 = vmatpush.bf16.msra.mxu3 %v12500_v30 }
0x1cb8   : > { %v11230_v40 = vpop.xlane.xlu2 %11229 }
0x1cb9   : > { %v11231_v63 = vmul.f32 %v11230_v40, %v16353_v4 }
0x1cbb   : > { %v11232_v11 = vadd.f32 1e-06, %v11231_v63 }
0x1cbd   : > { %13177 = vrsqrt.f32 %v11232_v11  ;;  %vm11239_vm15 = vweird.f32 %v11232_v11 }
0x1cc3   : > { %v13178_v51 = vpop.eup %13177 }
0x1cc4   : > { %v11234_v42 = vmul.f32 %v13178_v51, %v11232_v11  ;;  %vm11240_vm14 = vweird.f32 %v13178_v51  ;;  %v13158_v11 = vld [vmem:[%s886_s12] ss:$0 sm:$0xff] }
0x1cc5   : > { %vm11241_vm1 = vmor %vm11239_vm15, %vm11240_vm14 }
0x1cc6   : > { %v11235_v17 = vmul.f32 %v13178_v51, %v11234_v42 }
0x1cc8   : > { %v11236_v31 = vmul.f32 0.5, %v11235_v17 }
0x1cca   : > { %v11237_v29 = vsub.f32 1.5, %v11236_v31 }
0x1ccc   : > { %v11238_v19 = vmul.f32 %v13178_v51, %v11237_v29 }
0x1cce   : > { %v11242_v33 = vsel %vm11241_vm1, %v13178_v51, %v11238_v19 }
0x1ccf   : > { %v11243_v24 = vmul.f32 %v11242_v33, %v16356_v54 }
0x1cd1   : > { %v11247_v53 = vmul.f32 %v13154_v10, %v11243_v24 }
0x1cd3   : > { %v11251_v39 = vadd.f32 %v13155_v1, %v11247_v53 }
0x1cd5   : > { %v11252_v58 = vpack.c.bf16 %v11251_v39, %v11251_v39 }
0x1cd7   : > { %11363 = vmatmul.bf16.vlgmr.msrb.gmra.mxu1 %v11252_v58  ;;  %11376 = vmatmul.bf16.vlgmr.msra.gmra.mxu2 %v11252_v58 }
0x1d54   : > { %v11364_v54 = vpop.f32.mrf.mxu1 }
0x1d55   : > { %v11365_v38 = vadd.f32 %v11364_v54, %v11271_v26 }
0x1d57   : > { %v11381_v46 = vmax.f32 %v11365_v38, 0.0 }
0x1d59   : > { %v11383_v27 = vpack.c.bf16 %v11381_v46, %v11381_v46 }
0x1d5a   : > { %v11377_v6 = vpop.f32.mrf.mxu2 }
0x1d5b   : > { %v11378_v23 = vadd.f32 %v11377_v6, %v11272_v45  ;;  %11525 = vmatmul.bf16.vlgmr.msra.gmra.mxu3 %v11383_v27 }
0x1d5c   : > { %v11366_v36 = vpop.f32.mrf.mxu1 }
0x1d5d   : > { %v11382_v43 = vmax.f32 %v11378_v23, 0.0 }
0x1d5f   : > { %v11384_v0 = vpack.c.bf16 %v11382_v43, %v11382_v43 }
0x1d61   : > { %11538 = vmatmul.bf16.vlgmr.msrb.gmra.mxu0 %v11384_v0 }
0x1d62   : > { %v11379_v56 = vpop.f32.mrf.mxu2 }
0x1dde   : > { %v11526_v37 = vpop.f32.mrf.mxu3  ;;  %v11539_v7 = vpop.f32.mrf.mxu0 }
0x1ddf   : > { %v11527_v18 = vadd.f32 %v13156_v32, %v11526_v37 }
0x1de1   : > { %v11540_v9 = vadd.f32 %v11539_v7, %v11527_v18 }
0x1de3   : > { %v11543_v8 = vmul.f32 %v11540_v9, %v16345_v47 }
0x1de5   : > { %v11544_v14 = vadd.f32 %v11543_v8, %v11251_v39 }
0x1de6   : > { %v11528_v44 = vpop.f32.mrf.mxu3  ;;  %v11541_v20 = vpop.f32.mrf.mxu0 }
0x1de7   : > { %11547 = vadd.xlane.f32.xlu0 %v11544_v14 }
0x1e5a   : > { %v11548_v55 = vpop.xlane.xlu0 %11547 }
0x1e5b   : > { %v11549_v59 = vmul.f32 %v11548_v55, %v16353_v4 }
0x1e5d   : > { %v11550_v13 = vsub.f32 %v11544_v14, %v11549_v59 }
0x1e5f   : > { %v11551_v50 = vmul.f32 %v11550_v13, %v11550_v13 }
0x1e61   : > { %11552 = vadd.xlane.f32.xlu1 %v11551_v50 }
0x1ed4   : > { %v11553_v60 = vpop.xlane.xlu1 %11552 }
0x1ed5   : > { %v11554_v15 = vmul.f32 %v11553_v60, %v16353_v4 }
0x1ed7   : > { %v11555_v41 = vadd.f32 1e-06, %v11554_v15 }
0x1ed9   : > { %13179 = vrsqrt.f32 %v11555_v41  ;;  %vm11562_vm3 = vweird.f32 %v11555_v41 }
0x1edf   : > { %v13180_v47 = vpop.eup %13179 }
0x1ee0   : > { %v11557_v28 = vmul.f32 %v13180_v47, %v11555_v41  ;;  %vm11563_vm2 = vweird.f32 %v13180_v47 }
0x1ee1   : > { %vm11564_vm4 = vmor %vm11562_vm3, %vm11563_vm2 }
0x1ee2   : > { %v11558_v16 = vmul.f32 %v13180_v47, %v11557_v28 }
0x1ee4   : > { %v11559_v34 = vmul.f32 0.5, %v11558_v16 }
0x1ee6   : > { %v11560_v40 = vsub.f32 1.5, %v11559_v34 }
0x1ee8   : > { %v11561_v63 = vmul.f32 %v13180_v47, %v11560_v40 }
0x1eea   : > { %v11565_v4 = vsel %vm11564_vm4, %v13180_v47, %v11561_v63 }
0x1eeb   : > { %v11566_v12 = vmul.f32 %v11565_v4, %v11550_v13 }
0x1eed   : > { %v11570_v21 = vmul.f32 %v13157_v49, %v11566_v12 }
0x1eef   : > { %v11574_v48 = vadd.f32 %v13158_v11, %v11570_v21 }
0x1ef1   : > { %11575 = vst [vmem:[%s13751_s2] sm:$0xff] %v11574_v48 }
0x1ef2   : > { %13303 = shalt.err (!%p13300_p5)
}
0x1ef3   : > { %12525 = dma.vmem_to_hbm [thread:$0]  (%p13605_p12), %s11590_s10, 128, %s11592_s26, %s11577_s29  }
0x1ef4 PF: > { %s16999_s2 = sld [smem:[#allocation20_spill]] }
0x1ef5   : > { %s17000_s25 = sld [smem:[#allocation12_spill]] }
0x1efa   : > { %p12542_p3 = scmp.ge.s32.totalorder %s16999_s2, 2 }
0x1efb   : > { %s11603_s7 = sand.u32 1, %s17000_s25  }
0x1efc   : > { %p12538_p6 = pnand %p12542_p3, %p13615_p2  ;;  %s11604_s13 = scalar_lea.sflag [#allocation4], %s11603_s7 }
0x1efe   : > { %p12539_p7 = pneg %p12538_p6 }
0x1f00   : > { %13357 = dma.done.wait (%p12539_p7), %s11604_s13, 128  }
0x1f01   : > { %13359 = vsyncadd (%p12539_p7), %s11604_s13, 4294967168  ;;  %s36_s1 = sadd.s32 1, %s16999_s2   ;;  %s17002_s24 = sld [smem:[#allocation13_spill]] }
0x1f02   : > { %p33_p9 = scmp.ge.s32.totalorder %s36_s1, 6   ;;  %s17003_s25 = sld [smem:[#allocation14_spill]] }
0x1f03   : > { %s17004_s26 = sld [smem:[#allocation24_spill]] }
0x1f04   : > { %s17005_s27 = sld [smem:[#allocation15_spill]] }
0x1f05   : > { %s17006_s28 = sld [smem:[#allocation16_spill]] }
0x1f06   : > { %s17007_s29 = sld [smem:[#allocation23_spill]]  ;;  %35 = sbr.rel (!%p33_p9) target bundleno = 30 (0x1e), region = 203 }
0x1f07   : > { %s17008_s0 = sld [smem:[#allocation18_spill]] }
0x1f08   : > { %s17009_s30 = sld [smem:[#allocation19_spill]] }
0x1f09   : > { %s17010_s18 = sld [smem:[#allocation21_spill]] }
0x1f0a   : > { %s17011_s19 = sld [smem:[#allocation22_spill]] }
0x1f0b   :  { %11610 = vsyncpa [#allocation3], 1 }
0x1f0c   :  { %11612 = vsyncpa [#allocation3 + $0x1], 1 }
0x1f0d   :  { %11613 = vsyncpa [#allocation6], 1 }
0x1f0e   :  { %11615 = vsyncpa [#allocation6 + $0x1], 1 }
0x1f0f   :  { %11616 = vsyncpa [#allocation4], 1 }
0x1f10   :  { %11618 = vsyncpa [#allocation4 + $0x1], 1 }

</bundles_post_ra>
